<compile_context>
chip_gen: v7x
topology: tpu7x:2x2x1
jax: 0.10.0
libtpu: 0.0.40
codegen_flags: <defaults>
</compile_context>

<pallas_src>
import jax
import jax.numpy as jnp
from jax import lax
from jax.experimental import pallas as pl
from jax.experimental.pallas import tpu as pltpu


# ----------------------------------------------------------------------------
# Static tap / combo patterns
# ----------------------------------------------------------------------------
SHIFTS9 = tuple((dh, dw) for dh in (-1, 0, 1) for dw in (-1, 0, 1))
# (parity, coarse shift) combos per spatial dim for the polyphase 3x3 conv that
# consumes the 4 up2 parity groups directly (fine position 2m+r+d maps to
# parity (r+d)%2 at coarse index m + (r+d)//2).
COMBO1D = ((0, 0), (1, -1), (1, 0), (0, 1))
_COMBO_IDX = {c: i for i, c in enumerate(COMBO1D)}


def _round_up(x, m):
    return -(-x // m) * m


def _mask_table(H, W, dtype):
    """(9, H*W) per-shift validity mask for one image on an HxW grid."""
    p = jnp.arange(H * W, dtype=jnp.int32)
    h, w = p // W, p % W
    rows = []
    for dh, dw in SHIFTS9:
        ok = (h + dh >= 0) & (h + dh < H) & (w + dw >= 0) & (w + dw < W)
        rows.append(ok)
    return jnp.stack(rows).astype(dtype)


def _act(y, act):
    if act == "relu":
        return jnp.maximum(y, 0.0)
    if act == "tanh":
        return jnp.tanh(y)
    return y


# ----------------------------------------------------------------------------
# BN folding + stacked (implicit-GEMM) weight packing — done ONCE at prep time
# ----------------------------------------------------------------------------
def _fold_bn(layer, eps=1e-5):
    cb = layer["b"]
    if layer["use_bn"]:
        s = layer["gamma"] / jnp.sqrt(layer["var"] + eps)
        b = layer["beta"] + (cb - layer["mean"]) * s
    else:
        s = jnp.ones_like(cb)
        b = cb
    return s, b


def _pack_tconv_full(w, scale):
    """ConvTranspose2d k=3,s=1,p=0 as a 'same' 3x3 conv on the 1-pre-padded
    grid: tap (dh,dw) uses W[:, :, 1-dh, 1-dw].  w: (Ci, Co, 3, 3)."""
    taps = [jnp.transpose(w[:, :, 1 - dh, 1 - dw]) for dh, dw in SHIFTS9]
    return jnp.concatenate(taps, axis=1) * scale[:, None]          # (Co, 9*Ci)


def _pack_conv3(w, scale):
    """Conv2d k=3,s=1,p=1 (torch layout (Co, Ci, 3, 3))."""
    taps = [w[:, :, dh + 1, dw + 1] for dh, dw in SHIFTS9]
    return jnp.concatenate(taps, axis=1) * scale[:, None]          # (Co, 9*Ci)


def _pack_tconv_up2(w, scale):
    """ConvTranspose2d k=4,s=2,p=1 polyphase: rows = 4 parity groups x Co,
    cols = 9 coarse shifts x Ci (zeros for taps a group doesn't use).
    Group (rh,rw), tap (dh,dw in allowed set) uses W[:, :, 1+rh-2dh, 1+rw-2dw].
    w: (Ci, Co, 4, 4)."""
    Ci, Co = w.shape[0], w.shape[1]
    groups = []
    for rh in (0, 1):
        for rw in (0, 1):
            taps = []
            for dh, dw in SHIFTS9:
                use_h = dh in ((0, -1) if rh == 0 else (0, 1))
                use_w = dw in ((0, -1) if rw == 0 else (0, 1))
                if use_h and use_w:
                    taps.append(
                        jnp.transpose(w[:, :, 1 + rh - 2 * dh, 1 + rw - 2 * dw]))
                else:
                    taps.append(jnp.zeros((Co, Ci), w.dtype))
            groups.append(jnp.concatenate(taps, axis=1))            # (Co, 9*Ci)
    W = jnp.concatenate(groups, axis=0)                             # (4*Co, 9*Ci)
    return W * jnp.tile(scale, 4)[:, None]


def _pack_conv3_poly(w, scale):
    """Conv2d k=3,s=1,p=1 at the FINE resolution, expressed over the 4 coarse
    parity groups: rows = 4 output parity groups x Co, cols = 16 (input parity,
    coarse shift) combos x Cm (zeros for combos a group doesn't use).
    w: (Co, Cm, 3, 3)."""
    Co, Cm = w.shape[0], w.shape[1]
    rows = []
    for rh in (0, 1):
        for rw in (0, 1):
            cols = [jnp.zeros((Co, Cm), w.dtype) for _ in range(16)]
            for dh in (-1, 0, 1):
                ch = _COMBO_IDX[((rh + dh) % 2, (rh + dh) // 2)]
                for dw in (-1, 0, 1):
                    cw = _COMBO_IDX[((rw + dw) % 2, (rw + dw) // 2)]
                    cols[ch * 4 + cw] = w[:, :, dh + 1, dw + 1]
            rows.append(jnp.concatenate(cols, axis=1))               # (Co, 16*Cm)
    W = jnp.concatenate(rows, axis=0)                                # (4*Co, 16*Cm)
    return W * jnp.tile(scale, 4)[:, None]


def _poly_combos(Cm):
    """Stage-2 combo list for up2 blocks: (row_start_in_mid, shift_h, shift_w)."""
    combos = []
    for ch in range(4):
        ph, sh = COMBO1D[ch]
        for cw in range(4):
            pw, sw = COMBO1D[cw]
            combos.append(((ph * 2 + pw) * Cm, sh, sw))
    return tuple(combos)


def _same3_combos():
    return tuple((0, dh, dw) for dh, dw in SHIFTS9)


# ----------------------------------------------------------------------------
# Plan building (weights, biases, masks, shapes) — once per configuration
# ----------------------------------------------------------------------------
def prepare_generator(raw_layers, in_hw, dtype=jnp.bfloat16, eps=1e-5):
    H, W = in_hw
    H, W = H + 2, W + 2            # block 0's k3/s1/p0 tconv runs on pre-padded grid
    n = len(raw_layers)
    blocks = []
    for i, blk in enumerate(raw_layers):
        t = blk["tconv"]
        s1, b1 = _fold_bn(t, eps)
        Ci, Cm = t["w"].shape[0], t["w"].shape[1]
        if i == 0:
            G, W1 = 1, _pack_tconv_full(t["w"], s1)
        else:
            G, W1 = 4, _pack_tconv_up2(t["w"], s1)
        K1 = 9 * Ci
        K1pad = _round_up(K1, 128)
        W1 = jnp.pad(W1, ((0, 0), (0, K1pad - K1))).astype(dtype)
        B1 = jnp.tile(b1, G).astype(jnp.float32)[:, None]            # (G*Cm, 1)
        cfg = dict(H=H, W=W, P=H * W, halo=W + 1, Ci=Ci, Cm=Cm, G=G,
                   K1=K1, K1pad=K1pad, w1=W1, b1=B1, act1=t["act"],
                   mask=_mask_table(H, W, dtype), dtype=dtype)
        c = blk["conv"]
        if c is not None:
            s2, b2 = _fold_bn(c, eps)
            Co = c["w"].shape[0]
            if i == 0:
                W2, combos = _pack_conv3(c["w"], s2), _same3_combos()
            else:
                W2, combos = _pack_conv3_poly(c["w"], s2), _poly_combos(Cm)
            K2 = len(combos) * Cm
            K2pad = _round_up(K2, 128)
            W2 = jnp.pad(W2, ((0, 0), (0, K2pad - K2))).astype(dtype)
            B2 = jnp.tile(b2, G).astype(jnp.float32)[:, None]
            cfg.update(Co=Co, K2=K2, K2pad=K2pad, w2=W2, b2=B2,
                       act2=c["act"], combos=combos, has_stage2=True)
        else:
            cfg.update(Co=Cm, has_stage2=False)
        cfg["out_dtype"] = jnp.float32 if i == n - 1 else dtype
        blocks.append(cfg)
        if i > 0:                      # up2 blocks emit the fine (2H, 2W) grid
            H, W = 2 * H, 2 * W
    return dict(blocks=blocks, dtype=dtype, in_hw=in_hw)


# ----------------------------------------------------------------------------
# Fused per-block Pallas kernel
# ----------------------------------------------------------------------------
def _make_block_kernel(cfg):
    Ci, Cm, G, Co = cfg["Ci"], cfg["Cm"], cfg["G"], cfg["Co"]
    W, P, halo = cfg["W"], cfg["P"], cfg["halo"]
    K1, K1pad = cfg["K1"], cfg["K1pad"]
    act1, has2 = cfg["act1"], cfg["has_stage2"]
    dtype, out_dt = cfg["dtype"], cfg["out_dtype"]
    R1 = G * Cm
    if has2:
        K2, K2pad, combos, act2 = cfg["K2"], cfg["K2pad"], cfg["combos"], cfg["act2"]

    def stage(w_ref, b_ref, stack_ref, act):
        y = jnp.dot(w_ref[...], stack_ref[...],
                    preferred_element_type=jnp.float32)
        return _act(y + b_ref[...], act)

    def build_stage1(x_ref, m_ref, x1s_ref):
        # masked, tap-stacked bf16 slab: rows [t*Ci:(t+1)*Ci] = shift t of x
        for t, (dh, dw) in enumerate(SHIFTS9):
            off = halo + dh * W + dw
            x1s_ref[t * Ci:(t + 1) * Ci, :] = (
                x_ref[0, :, off:off + P] * m_ref[t:t + 1, :])
        if K1pad > K1:   # zero the alignment pad (never feed junk to the MXU)
            x1s_ref[K1:, :] = jnp.zeros((K1pad - K1, P), dtype)

    if not has2:
        def kernel(x_ref, m_ref, w1_ref, b1_ref, o_ref, x1s_ref):
            build_stage1(x_ref, m_ref, x1s_ref)
            y = stage(w1_ref, b1_ref, x1s_ref, act1)        # (G*Co, P) f32
            o_ref[0, :, :] = y.astype(out_dt)
        return kernel

    def kernel(x_ref, m_ref, w1_ref, b1_ref, w2_ref, b2_ref, o_ref,
               x1s_ref, mid_ref, x2s_ref):
        # ---- stage 1: (T)Conv as one MXU matmul over 9 masked shifts -------
        build_stage1(x_ref, m_ref, x1s_ref)
        mid = stage(w1_ref, b1_ref, x1s_ref, act1)           # (R1, P) f32
        # keep the intermediate activation VMEM-resident, halo-padded
        mid_ref[:, :halo] = jnp.zeros((R1, halo), dtype)
        mid_ref[:, halo + P:] = jnp.zeros((R1, halo), dtype)
        mid_ref[:, halo:halo + P] = mid.astype(dtype)
        # ---- stage 2: 3x3 Conv (same-grid or polyphase over parity groups) -
        for c, (row0, sh, sw) in enumerate(combos):
            off = halo + sh * W + sw
            tm = (sh + 1) * 3 + (sw + 1)
            x2s_ref[c * Cm:(c + 1) * Cm, :] = (
                mid_ref[row0:row0 + Cm, off:off + P] * m_ref[tm:tm + 1, :])
        if K2pad > K2:
            x2s_ref[K2:, :] = jnp.zeros((K2pad - K2, P), dtype)
        y = stage(w2_ref, b2_ref, x2s_ref, act2)             # (G*Co, P) f32
        o_ref[0, :, :] = y.astype(out_dt)

    return kernel


def _run_block(x, cfg, N):
    P, halo, dtype = cfg["P"], cfg["halo"], cfg["dtype"]
    Rout = cfg["G"] * cfg["Co"]
    kernel = _make_block_kernel(cfg)

    in_specs = [
        pl.BlockSpec((1, cfg["Ci"], P + 2 * halo), lambda n: (n, 0, 0)),
        pl.BlockSpec((9, P), lambda n: (0, 0)),
        pl.BlockSpec(cfg["w1"].shape, lambda n: (0, 0)),
        pl.BlockSpec(cfg["b1"].shape, lambda n: (0, 0)),
    ]
    args = [x, cfg["mask"], cfg["w1"], cfg["b1"]]
    scratch = [pltpu.VMEM((cfg["K1pad"], P), dtype)]
    if cfg["has_stage2"]:
        in_specs += [pl.BlockSpec(cfg["w2"].shape, lambda n: (0, 0)),
                     pl.BlockSpec(cfg["b2"].shape, lambda n: (0, 0))]
        args += [cfg["w2"], cfg["b2"]]
        scratch += [pltpu.VMEM((cfg["G"] * cfg["Cm"], P + 2 * halo), dtype),
                    pltpu.VMEM((cfg["K2pad"], P), dtype)]

    return pl.pallas_call(
        kernel,
        out_shape=jax.ShapeDtypeStruct((N, Rout, P), cfg["out_dtype"]),
        grid_spec=pltpu.PrefetchScalarGridSpec(
            num_scalar_prefetch=0,
            grid=(N,),                       # one image per step; independent
            in_specs=in_specs,
            out_specs=pl.BlockSpec((1, Rout, P), lambda n: (n, 0, 0)),
            scratch_shapes=scratch),
        compiler_params=pltpu.CompilerParams(
            dimension_semantics=("parallel",)),   # v7x: both TensorCores
    )(*args)


# ----------------------------------------------------------------------------
# Forward pass (NCHW in / NCHW out; (N, C, H*W) lane-dense per image inside)
# ----------------------------------------------------------------------------
def generator_vpc_forward(x_nchw, plan):
    blocks = plan["blocks"]
    dtype = plan["dtype"]
    N, C, H, W = x_nchw.shape
    assert C == blocks[0]["Ci"], (C, blocks[0]["Ci"])
    assert (H, W) == plan["in_hw"], ((H, W), plan["in_hw"])
    # block 0's ConvTranspose2d(k=3,s=1,p=0) == 3x3 "same" conv (flipped kernel)
    # on the 1-pixel spatially pre-padded grid
    x = jnp.pad(x_nchw.astype(dtype), ((0, 0), (0, 0), (1, 1), (1, 1)))
    x = x.reshape(N, C, (H + 2) * (W + 2))
    for cfg in blocks:
        halo = cfg["halo"]
        x = jnp.pad(x, ((0, 0), (0, 0), (halo, halo)))       # flat halo, per image
        y = _run_block(x, cfg, N)                            # (N, G*Co, P)
        if cfg["G"] == 4:
            # parity interleave: out[:, co, 2h+rh, 2w+rw] = y[:, (2rh+rw)*Co+co, h, w]
            Co, Hc, Wc = cfg["Co"], cfg["H"], cfg["W"]
            y = y.reshape(N, 2, 2, Co, Hc, Wc)
            y = jnp.transpose(y, (0, 3, 4, 1, 5, 2))         # (N, Co, Hc, 2, Wc, 2)
            x = y.reshape(N, Co, 4 * Hc * Wc)
        else:
            x = y
    last = blocks[-1]
    Hf, Wf = 2 * last["H"], 2 * last["W"]
    return x.reshape(N, last["Co"], Hf, Wf).astype(jnp.float32)


# ----------------------------------------------------------------------------
# Deterministic parameter construction (torch-layout raw params)
# ----------------------------------------------------------------------------
def build_generator_vpc(key, ic=24, oc=3, cc=24, j=8):
    assert j * 2 % ic != 0, "j times 2 should not be equal or less than ic"
    assert cc % j == 0, "Assert Failed"
    c = [f for f in range(ic, cc + j, j)][::-1] + [ic - j, ic - j * 2, j]
    layers = []
    for i, cl in enumerate(c):
        c1 = ic if i == 0 else c[i - 1]
        k = 3 if i == 0 else 4
        s = 1 if i == 0 else 2
        p = 0 if i == 0 else 1
        last = i == len(c) - 1
        c2 = oc if last else cl
        key, k1, k2, k3, k4 = jax.random.split(key, 5)
        tconv = dict(
            w=jax.random.normal(k1, (c1, c2, k, k), jnp.float32) * 0.05,
            b=jax.random.normal(k2, (c2,), jnp.float32) * 0.01,
            k=k, s=s, p=p,
            use_bn=not last,
            act="tanh" if last else "relu",   # last block: Identity then Tanh
            gamma=jnp.ones((c2,), jnp.float32),
            beta=jnp.zeros((c2,), jnp.float32),
            mean=jnp.zeros((c2,), jnp.float32),
            var=jnp.ones((c2,), jnp.float32),
        )
        conv = None
        if not last:
            conv = dict(
                w=jax.random.normal(k3, (cl, cl, 3, 3), jnp.float32) * 0.05,
                b=jax.random.normal(k4, (cl,), jnp.float32) * 0.01,
                k=3, s=1, p=1,
                use_bn=True,
                act="identity",
                gamma=jnp.ones((cl,), jnp.float32),
                beta=jnp.zeros((cl,), jnp.float32),
                mean=jnp.zeros((cl,), jnp.float32),
                var=jnp.ones((cl,), jnp.float32),
            )
        layers.append(dict(tconv=tconv, conv=conv))
    return layers, c


# ----------------------------------------------------------------------------
# Pure-XLA f32 reference (independent of the kernel path) for the self-check
# ----------------------------------------------------------------------------
def _bn_eval(x, g, b, m, v, eps=1e-5):
    inv = g / jnp.sqrt(v + eps)
    return (x - m[None, :, None, None]) * inv[None, :, None, None] \
        + b[None, :, None, None]


def _ref_tconv(x, layer):
    w, K, s, p = layer["w"], layer["k"], layer["s"], layer["p"]
    w_conv = jnp.transpose(jnp.flip(w, (2, 3)), (1, 0, 2, 3))   # (Co, Ci, K, K)
    y = lax.conv_general_dilated(
        x, w_conv, window_strides=(1, 1),
        padding=[(K - 1 - p, K - 1 - p)] * 2, lhs_dilation=(s, s),
        dimension_numbers=("NCHW", "OIHW", "NCHW"),
        precision=lax.Precision.HIGHEST)
    y = y + layer["b"][None, :, None, None]
    if layer["use_bn"]:
        y = _bn_eval(y, layer["gamma"], layer["beta"], layer["mean"], layer["var"])
    return _act(y, layer["act"])


def _ref_conv(x, layer):
    p = layer["p"]
    y = lax.conv_general_dilated(
        x, layer["w"], (1, 1), [(p, p), (p, p)],
        dimension_numbers=("NCHW", "OIHW", "NCHW"),
        precision=lax.Precision.HIGHEST)
    y = y + layer["b"][None, :, None, None]
    if layer["use_bn"]:
        y = _bn_eval(y, layer["gamma"], layer["beta"], layer["mean"], layer["var"])
    return _act(y, layer["act"])


def reference_forward(x, raw_layers):
    for blk in raw_layers:
        x = _ref_tconv(x, blk["tconv"])
        if blk["conv"] is not None:
            x = _ref_conv(x, blk["conv"])
    return x


if __name__ == "__main__":
    key = jax.random.PRNGKey(0)
    pkey, xkey = jax.random.split(key)

    # small config consistent with the module's asserts:
    #   j*2 % ic != 0 (16 % 24 == 16), cc % j == 0 (24 % 8 == 0)
    ic, oc, cc, j = 24, 3, 24, 8
    raw_layers, _channels = build_generator_vpc(pkey, ic=ic, oc=oc, cc=cc, j=j)

    N, Hin, Win = 2, 4, 4
    x = jax.random.normal(xkey, (N, ic, Hin, Win), jnp.float32)

    # production path: bf16 activations/weights, f32 MXU accumulation
    plan_bf16 = prepare_generator(raw_layers, (Hin, Win), dtype=jnp.bfloat16)
    fwd = jax.jit(lambda inp: generator_vpc_forward(inp, plan_bf16))
    y = jax.block_until_ready(fwd(x))

    # spatial: 4 -(k3,s1,p0)-> 6 -(x2)-> 12 -(x2)-> 24 -(x2)-> 48
    assert y.shape == (N, oc, 48, 48), y.shape
    assert bool(jnp.all(jnp.isfinite(y)))
    assert bool(jnp.all(jnp.abs(y) <= 1.0 + 1e-6))   # final Tanh

    # independent XLA reference (f32, HIGHEST precision)
    y_ref = jax.block_until_ready(
        jax.jit(lambda inp: reference_forward(inp, raw_layers))(x))

    # structural check: the SAME kernel path run in f32 must match tightly
    # (catches mis-derived taps / parity packing — review: bf16 check too loose)
    plan_f32 = prepare_generator(raw_layers, (Hin, Win), dtype=jnp.float32)
    y32 = jax.block_until_ready(
        jax.jit(lambda inp: generator_vpc_forward(inp, plan_f32))(x))
    err32 = float(jnp.max(jnp.abs(y32 - y_ref)))
    assert err32 <= 5e-3, ("f32 kernel path mismatch", err32)

    # production bf16 path: quantization-level tolerance
    err16 = float(jnp.max(jnp.abs(y - y_ref)))
    assert err16 <= 6e-2, ("bf16 kernel path mismatch", err16)

    print("KERNEL_OK")
</pallas_src>

<mosaic_0001>
module attributes {stable_mosaic.version = 11 : i64} {
  func.func @kernel(%arg0: i32, %arg1: memref<1x24x50xbf16, #tpu.memory_space<vmem>>, %arg2: memref<9x36xbf16, #tpu.memory_space<vmem>>, %arg3: memref<24x256xbf16, #tpu.memory_space<vmem>>, %arg4: memref<24x1xf32, #tpu.memory_space<vmem>>, %arg5: memref<24x256xbf16, #tpu.memory_space<vmem>>, %arg6: memref<24x1xf32, #tpu.memory_space<vmem>>, %arg7: memref<1x24x36xbf16, #tpu.memory_space<vmem>>, %arg8: memref<256x36xbf16, #tpu.memory_space<vmem>>, %arg9: memref<24x50xbf16, #tpu.memory_space<vmem>>, %arg10: memref<256x36xbf16, #tpu.memory_space<vmem>>) attributes {dimension_semantics = [#tpu.dimension_semantics<parallel>], iteration_bounds = array<i64: 2>, scalar_prefetch = 0 : i64, scratch_operands = 3 : i64, tpu.core_type = #tpu.core_type<tc>, window_params = [{transform_indices = @transform_0, window_bounds = array<i64: 1, 24, 50>}, {pipeline_mode = #tpu.pipeline_mode<synchronous>, transform_indices = @transform_1, window_bounds = array<i64: 9, 36>}, {pipeline_mode = #tpu.pipeline_mode<synchronous>, transform_indices = @transform_2, window_bounds = array<i64: 24, 256>}, {pipeline_mode = #tpu.pipeline_mode<synchronous>, transform_indices = @transform_3, window_bounds = array<i64: 24, 1>}, {pipeline_mode = #tpu.pipeline_mode<synchronous>, transform_indices = @transform_4, window_bounds = array<i64: 24, 256>}, {pipeline_mode = #tpu.pipeline_mode<synchronous>, transform_indices = @transform_5, window_bounds = array<i64: 24, 1>}, {transform_indices = @transform_6, window_bounds = array<i64: 1, 24, 36>}]} {
    %c0 = arith.constant 0 : index
    %c0_0 = arith.constant 0 : index
    %c0_1 = arith.constant 0 : index
    %0 = vector.load %arg1[%c0, %c0_0, %c0_1] : memref<1x24x50xbf16, #tpu.memory_space<vmem>>, vector<1x24x36xbf16>
    %1 = vector.shape_cast %0 : vector<1x24x36xbf16> to vector<24x36xbf16>
    %c0_2 = arith.constant 0 : index
    %c0_3 = arith.constant 0 : index
    %2 = vector.load %arg2[%c0_2, %c0_3] : memref<9x36xbf16, #tpu.memory_space<vmem>>, vector<1x36xbf16>
    %3 = vector.broadcast %2 : vector<1x36xbf16> to vector<24x36xbf16>
    %4 = arith.mulf %1, %3 : vector<24x36xbf16>
    %c0_4 = arith.constant 0 : index
    %c0_5 = arith.constant 0 : index
    %5 = vector.load %arg8[%c0_4, %c0_5] : memref<256x36xbf16, #tpu.memory_space<vmem>>, vector<24x36xbf16>
    tpu.vector_store %arg8[%c0_4, %c0_5], %4 {strides = array<i32>} : memref<256x36xbf16, #tpu.memory_space<vmem>>, vector<24x36xbf16>,
    %c0_6 = arith.constant 0 : index
    %c0_7 = arith.constant 0 : index
    %c1 = arith.constant 1 : index
    %6 = vector.load %arg1[%c0_6, %c0_7, %c1] : memref<1x24x50xbf16, #tpu.memory_space<vmem>>, vector<1x24x36xbf16>
    %7 = vector.shape_cast %6 : vector<1x24x36xbf16> to vector<24x36xbf16>
    %c1_8 = arith.constant 1 : index
    %c0_9 = arith.constant 0 : index
    %8 = vector.load %arg2[%c1_8, %c0_9] : memref<9x36xbf16, #tpu.memory_space<vmem>>, vector<1x36xbf16>
    %9 = vector.broadcast %8 : vector<1x36xbf16> to vector<24x36xbf16>
    %10 = arith.mulf %7, %9 : vector<24x36xbf16>
    %c24 = arith.constant 24 : index
    %c0_10 = arith.constant 0 : index
    %11 = vector.load %arg8[%c24, %c0_10] : memref<256x36xbf16, #tpu.memory_space<vmem>>, vector<24x36xbf16>
    tpu.vector_store %arg8[%c24, %c0_10], %10 {strides = array<i32>} : memref<256x36xbf16, #tpu.memory_space<vmem>>, vector<24x36xbf16>,
    %c0_11 = arith.constant 0 : index
    %c0_12 = arith.constant 0 : index
    %c2 = arith.constant 2 : index
    %12 = vector.load %arg1[%c0_11, %c0_12, %c2] : memref<1x24x50xbf16, #tpu.memory_space<vmem>>, vector<1x24x36xbf16>
    %13 = vector.shape_cast %12 : vector<1x24x36xbf16> to vector<24x36xbf16>
    %c2_13 = arith.constant 2 : index
    %c0_14 = arith.constant 0 : index
    %14 = vector.load %arg2[%c2_13, %c0_14] : memref<9x36xbf16, #tpu.memory_space<vmem>>, vector<1x36xbf16>
    %15 = vector.broadcast %14 : vector<1x36xbf16> to vector<24x36xbf16>
    %16 = arith.mulf %13, %15 : vector<24x36xbf16>
    %c48 = arith.constant 48 : index
    %c0_15 = arith.constant 0 : index
    %17 = vector.load %arg8[%c48, %c0_15] : memref<256x36xbf16, #tpu.memory_space<vmem>>, vector<24x36xbf16>
    tpu.vector_store %arg8[%c48, %c0_15], %16 {strides = array<i32>} : memref<256x36xbf16, #tpu.memory_space<vmem>>, vector<24x36xbf16>,
    %c0_16 = arith.constant 0 : index
    %c0_17 = arith.constant 0 : index
    %c6 = arith.constant 6 : index
    %18 = vector.load %arg1[%c0_16, %c0_17, %c6] : memref<1x24x50xbf16, #tpu.memory_space<vmem>>, vector<1x24x36xbf16>
    %19 = vector.shape_cast %18 : vector<1x24x36xbf16> to vector<24x36xbf16>
    %c3 = arith.constant 3 : index
    %c0_18 = arith.constant 0 : index
    %20 = vector.load %arg2[%c3, %c0_18] : memref<9x36xbf16, #tpu.memory_space<vmem>>, vector<1x36xbf16>
    %21 = vector.broadcast %20 : vector<1x36xbf16> to vector<24x36xbf16>
    %22 = arith.mulf %19, %21 : vector<24x36xbf16>
    %c72 = arith.constant 72 : index
    %c0_19 = arith.constant 0 : index
    %23 = vector.load %arg8[%c72, %c0_19] : memref<256x36xbf16, #tpu.memory_space<vmem>>, vector<24x36xbf16>
    tpu.vector_store %arg8[%c72, %c0_19], %22 {strides = array<i32>} : memref<256x36xbf16, #tpu.memory_space<vmem>>, vector<24x36xbf16>,
    %c0_20 = arith.constant 0 : index
    %c0_21 = arith.constant 0 : index
    %c7 = arith.constant 7 : index
    %24 = vector.load %arg1[%c0_20, %c0_21, %c7] : memref<1x24x50xbf16, #tpu.memory_space<vmem>>, vector<1x24x36xbf16>
    %25 = vector.shape_cast %24 : vector<1x24x36xbf16> to vector<24x36xbf16>
    %c4 = arith.constant 4 : index
    %c0_22 = arith.constant 0 : index
    %26 = vector.load %arg2[%c4, %c0_22] : memref<9x36xbf16, #tpu.memory_space<vmem>>, vector<1x36xbf16>
    %27 = vector.broadcast %26 : vector<1x36xbf16> to vector<24x36xbf16>
    %28 = arith.mulf %25, %27 : vector<24x36xbf16>
    %c96 = arith.constant 96 : index
    %c0_23 = arith.constant 0 : index
    %29 = vector.load %arg8[%c96, %c0_23] : memref<256x36xbf16, #tpu.memory_space<vmem>>, vector<24x36xbf16>
    tpu.vector_store %arg8[%c96, %c0_23], %28 {strides = array<i32>} : memref<256x36xbf16, #tpu.memory_space<vmem>>, vector<24x36xbf16>,
    %c0_24 = arith.constant 0 : index
    %c0_25 = arith.constant 0 : index
    %c8 = arith.constant 8 : index
    %30 = vector.load %arg1[%c0_24, %c0_25, %c8] : memref<1x24x50xbf16, #tpu.memory_space<vmem>>, vector<1x24x36xbf16>
    %31 = vector.shape_cast %30 : vector<1x24x36xbf16> to vector<24x36xbf16>
    %c5 = arith.constant 5 : index
    %c0_26 = arith.constant 0 : index
    %32 = vector.load %arg2[%c5, %c0_26] : memref<9x36xbf16, #tpu.memory_space<vmem>>, vector<1x36xbf16>
    %33 = vector.broadcast %32 : vector<1x36xbf16> to vector<24x36xbf16>
    %34 = arith.mulf %31, %33 : vector<24x36xbf16>
    %c120 = arith.constant 120 : index
    %c0_27 = arith.constant 0 : index
    %35 = vector.load %arg8[%c120, %c0_27] : memref<256x36xbf16, #tpu.memory_space<vmem>>, vector<24x36xbf16>
    tpu.vector_store %arg8[%c120, %c0_27], %34 {strides = array<i32>} : memref<256x36xbf16, #tpu.memory_space<vmem>>, vector<24x36xbf16>,
    %c0_28 = arith.constant 0 : index
    %c0_29 = arith.constant 0 : index
    %c12 = arith.constant 12 : index
    %36 = vector.load %arg1[%c0_28, %c0_29, %c12] : memref<1x24x50xbf16, #tpu.memory_space<vmem>>, vector<1x24x36xbf16>
    %37 = vector.shape_cast %36 : vector<1x24x36xbf16> to vector<24x36xbf16>
    %c6_30 = arith.constant 6 : index
    %c0_31 = arith.constant 0 : index
    %38 = vector.load %arg2[%c6_30, %c0_31] : memref<9x36xbf16, #tpu.memory_space<vmem>>, vector<1x36xbf16>
    %39 = vector.broadcast %38 : vector<1x36xbf16> to vector<24x36xbf16>
    %40 = arith.mulf %37, %39 : vector<24x36xbf16>
    %c144 = arith.constant 144 : index
    %c0_32 = arith.constant 0 : index
    %41 = vector.load %arg8[%c144, %c0_32] : memref<256x36xbf16, #tpu.memory_space<vmem>>, vector<24x36xbf16>
    tpu.vector_store %arg8[%c144, %c0_32], %40 {strides = array<i32>} : memref<256x36xbf16, #tpu.memory_space<vmem>>, vector<24x36xbf16>,
    %c0_33 = arith.constant 0 : index
    %c0_34 = arith.constant 0 : index
    %c13 = arith.constant 13 : index
    %42 = vector.load %arg1[%c0_33, %c0_34, %c13] : memref<1x24x50xbf16, #tpu.memory_space<vmem>>, vector<1x24x36xbf16>
    %43 = vector.shape_cast %42 : vector<1x24x36xbf16> to vector<24x36xbf16>
    %c7_35 = arith.constant 7 : index
    %c0_36 = arith.constant 0 : index
    %44 = vector.load %arg2[%c7_35, %c0_36] : memref<9x36xbf16, #tpu.memory_space<vmem>>, vector<1x36xbf16>
    %45 = vector.broadcast %44 : vector<1x36xbf16> to vector<24x36xbf16>
    %46 = arith.mulf %43, %45 : vector<24x36xbf16>
    %c168 = arith.constant 168 : index
    %c0_37 = arith.constant 0 : index
    %47 = vector.load %arg8[%c168, %c0_37] : memref<256x36xbf16, #tpu.memory_space<vmem>>, vector<24x36xbf16>
    tpu.vector_store %arg8[%c168, %c0_37], %46 {strides = array<i32>} : memref<256x36xbf16, #tpu.memory_space<vmem>>, vector<24x36xbf16>,
    %c0_38 = arith.constant 0 : index
    %c0_39 = arith.constant 0 : index
    %c14 = arith.constant 14 : index
    %48 = vector.load %arg1[%c0_38, %c0_39, %c14] : memref<1x24x50xbf16, #tpu.memory_space<vmem>>, vector<1x24x36xbf16>
    %49 = vector.shape_cast %48 : vector<1x24x36xbf16> to vector<24x36xbf16>
    %c8_40 = arith.constant 8 : index
    %c0_41 = arith.constant 0 : index
    %50 = vector.load %arg2[%c8_40, %c0_41] : memref<9x36xbf16, #tpu.memory_space<vmem>>, vector<1x36xbf16>
    %51 = vector.broadcast %50 : vector<1x36xbf16> to vector<24x36xbf16>
    %52 = arith.mulf %49, %51 : vector<24x36xbf16>
    %c192 = arith.constant 192 : index
    %c0_42 = arith.constant 0 : index
    %53 = vector.load %arg8[%c192, %c0_42] : memref<256x36xbf16, #tpu.memory_space<vmem>>, vector<24x36xbf16>
    tpu.vector_store %arg8[%c192, %c0_42], %52 {strides = array<i32>} : memref<256x36xbf16, #tpu.memory_space<vmem>>, vector<24x36xbf16>,
    %cst = arith.constant 0.000000e+00 : bf16
    %54 = vector.broadcast %cst : bf16 to vector<40x36xbf16>
    %c216 = arith.constant 216 : index
    %c0_43 = arith.constant 0 : index
    %55 = vector.load %arg8[%c216, %c0_43] : memref<256x36xbf16, #tpu.memory_space<vmem>>, vector<40x36xbf16>
    tpu.vector_store %arg8[%c216, %c0_43], %54 {strides = array<i32>} : memref<256x36xbf16, #tpu.memory_space<vmem>>, vector<40x36xbf16>,
    %c0_44 = arith.constant 0 : index
    %c0_45 = arith.constant 0 : index
    %56 = vector.load %arg3[%c0_44, %c0_45] : memref<24x256xbf16, #tpu.memory_space<vmem>>, vector<24x256xbf16>
    %c0_46 = arith.constant 0 : index
    %c0_47 = arith.constant 0 : index
    %57 = vector.load %arg8[%c0_46, %c0_47] : memref<256x36xbf16, #tpu.memory_space<vmem>>, vector<256x36xbf16>
    %cst_48 = arith.constant dense<0.000000e+00> : vector<24x36xf32>
    %58 = tpu.matmul %56, %57, %cst_48 {dimension_numbers = #tpu.dot_dimension_numbers<[1], [0], [0], [1], [0, 0, 1, 1], [], []>} : vector<24x256xbf16>, vector<256x36xbf16>, vector<24x36xf32> -> vector<24x36xf32>
    %c0_49 = arith.constant 0 : index
    %c0_50 = arith.constant 0 : index
    %59 = vector.load %arg4[%c0_49, %c0_50] : memref<24x1xf32, #tpu.memory_space<vmem>>, vector<24x1xf32>
    %60 = vector.broadcast %59 : vector<24x1xf32> to vector<24x36xf32>
    %61 = arith.addf %58, %60 : vector<24x36xf32>
    %cst_51 = arith.constant 0.000000e+00 : f32
    %62 = vector.broadcast %cst_51 : f32 to vector<24x36xf32>
    %63 = arith.maximumf %61, %62 : vector<24x36xf32>
    %cst_52 = arith.constant 0.000000e+00 : bf16
    %64 = vector.broadcast %cst_52 : bf16 to vector<24x7xbf16>
    %c0_53 = arith.constant 0 : index
    %c0_54 = arith.constant 0 : index
    %65 = vector.load %arg9[%c0_53, %c0_54] : memref<24x50xbf16, #tpu.memory_space<vmem>>, vector<24x7xbf16>
    tpu.vector_store %arg9[%c0_53, %c0_54], %64 {strides = array<i32>} : memref<24x50xbf16, #tpu.memory_space<vmem>>, vector<24x7xbf16>,
    %cst_55 = arith.constant 0.000000e+00 : bf16
    %66 = vector.broadcast %cst_55 : bf16 to vector<24x7xbf16>
    %c0_56 = arith.constant 0 : index
    %c43 = arith.constant 43 : index
    %67 = vector.load %arg9[%c0_56, %c43] : memref<24x50xbf16, #tpu.memory_space<vmem>>, vector<24x7xbf16>
    tpu.vector_store %arg9[%c0_56, %c43], %66 {strides = array<i32>} : memref<24x50xbf16, #tpu.memory_space<vmem>>, vector<24x7xbf16>,
    %68 = arith.truncf %63 : vector<24x36xf32> to vector<24x36xbf16>
    %c0_57 = arith.constant 0 : index
    %c7_58 = arith.constant 7 : index
    %69 = vector.load %arg9[%c0_57, %c7_58] : memref<24x50xbf16, #tpu.memory_space<vmem>>, vector<24x36xbf16>
    tpu.vector_store %arg9[%c0_57, %c7_58], %68 {strides = array<i32>} : memref<24x50xbf16, #tpu.memory_space<vmem>>, vector<24x36xbf16>,
    %c0_59 = arith.constant 0 : index
    %c0_60 = arith.constant 0 : index
    %70 = vector.load %arg9[%c0_59, %c0_60] : memref<24x50xbf16, #tpu.memory_space<vmem>>, vector<24x36xbf16>
    %c0_61 = arith.constant 0 : index
    %c0_62 = arith.constant 0 : index
    %71 = vector.load %arg2[%c0_61, %c0_62] : memref<9x36xbf16, #tpu.memory_space<vmem>>, vector<1x36xbf16>
    %72 = vector.broadcast %71 : vector<1x36xbf16> to vector<24x36xbf16>
    %73 = arith.mulf %70, %72 : vector<24x36xbf16>
    %c0_63 = arith.constant 0 : index
    %c0_64 = arith.constant 0 : index
    %74 = vector.load %arg10[%c0_63, %c0_64] : memref<256x36xbf16, #tpu.memory_space<vmem>>, vector<24x36xbf16>
    tpu.vector_store %arg10[%c0_63, %c0_64], %73 {strides = array<i32>} : memref<256x36xbf16, #tpu.memory_space<vmem>>, vector<24x36xbf16>,
    %c0_65 = arith.constant 0 : index
    %c1_66 = arith.constant 1 : index
    %75 = vector.load %arg9[%c0_65, %c1_66] : memref<24x50xbf16, #tpu.memory_space<vmem>>, vector<24x36xbf16>
    %c1_67 = arith.constant 1 : index
    %c0_68 = arith.constant 0 : index
    %76 = vector.load %arg2[%c1_67, %c0_68] : memref<9x36xbf16, #tpu.memory_space<vmem>>, vector<1x36xbf16>
    %77 = vector.broadcast %76 : vector<1x36xbf16> to vector<24x36xbf16>
    %78 = arith.mulf %75, %77 : vector<24x36xbf16>
    %c24_69 = arith.constant 24 : index
    %c0_70 = arith.constant 0 : index
    %79 = vector.load %arg10[%c24_69, %c0_70] : memref<256x36xbf16, #tpu.memory_space<vmem>>, vector<24x36xbf16>
    tpu.vector_store %arg10[%c24_69, %c0_70], %78 {strides = array<i32>} : memref<256x36xbf16, #tpu.memory_space<vmem>>, vector<24x36xbf16>,
    %c0_71 = arith.constant 0 : index
    %c2_72 = arith.constant 2 : index
    %80 = vector.load %arg9[%c0_71, %c2_72] : memref<24x50xbf16, #tpu.memory_space<vmem>>, vector<24x36xbf16>
    %c2_73 = arith.constant 2 : index
    %c0_74 = arith.constant 0 : index
    %81 = vector.load %arg2[%c2_73, %c0_74] : memref<9x36xbf16, #tpu.memory_space<vmem>>, vector<1x36xbf16>
    %82 = vector.broadcast %81 : vector<1x36xbf16> to vector<24x36xbf16>
    %83 = arith.mulf %80, %82 : vector<24x36xbf16>
    %c48_75 = arith.constant 48 : index
    %c0_76 = arith.constant 0 : index
    %84 = vector.load %arg10[%c48_75, %c0_76] : memref<256x36xbf16, #tpu.memory_space<vmem>>, vector<24x36xbf16>
    tpu.vector_store %arg10[%c48_75, %c0_76], %83 {strides = array<i32>} : memref<256x36xbf16, #tpu.memory_space<vmem>>, vector<24x36xbf16>,
    %c0_77 = arith.constant 0 : index
    %c6_78 = arith.constant 6 : index
    %85 = vector.load %arg9[%c0_77, %c6_78] : memref<24x50xbf16, #tpu.memory_space<vmem>>, vector<24x36xbf16>
    %c3_79 = arith.constant 3 : index
    %c0_80 = arith.constant 0 : index
    %86 = vector.load %arg2[%c3_79, %c0_80] : memref<9x36xbf16, #tpu.memory_space<vmem>>, vector<1x36xbf16>
    %87 = vector.broadcast %86 : vector<1x36xbf16> to vector<24x36xbf16>
    %88 = arith.mulf %85, %87 : vector<24x36xbf16>
    %c72_81 = arith.constant 72 : index
    %c0_82 = arith.constant 0 : index
    %89 = vector.load %arg10[%c72_81, %c0_82] : memref<256x36xbf16, #tpu.memory_space<vmem>>, vector<24x36xbf16>
    tpu.vector_store %arg10[%c72_81, %c0_82], %88 {strides = array<i32>} : memref<256x36xbf16, #tpu.memory_space<vmem>>, vector<24x36xbf16>,
    %c0_83 = arith.constant 0 : index
    %c7_84 = arith.constant 7 : index
    %90 = vector.load %arg9[%c0_83, %c7_84] : memref<24x50xbf16, #tpu.memory_space<vmem>>, vector<24x36xbf16>
    %c4_85 = arith.constant 4 : index
    %c0_86 = arith.constant 0 : index
    %91 = vector.load %arg2[%c4_85, %c0_86] : memref<9x36xbf16, #tpu.memory_space<vmem>>, vector<1x36xbf16>
    %92 = vector.broadcast %91 : vector<1x36xbf16> to vector<24x36xbf16>
    %93 = arith.mulf %90, %92 : vector<24x36xbf16>
    %c96_87 = arith.constant 96 : index
    %c0_88 = arith.constant 0 : index
    %94 = vector.load %arg10[%c96_87, %c0_88] : memref<256x36xbf16, #tpu.memory_space<vmem>>, vector<24x36xbf16>
    tpu.vector_store %arg10[%c96_87, %c0_88], %93 {strides = array<i32>} : memref<256x36xbf16, #tpu.memory_space<vmem>>, vector<24x36xbf16>,
    %c0_89 = arith.constant 0 : index
    %c8_90 = arith.constant 8 : index
    %95 = vector.load %arg9[%c0_89, %c8_90] : memref<24x50xbf16, #tpu.memory_space<vmem>>, vector<24x36xbf16>
    %c5_91 = arith.constant 5 : index
    %c0_92 = arith.constant 0 : index
    %96 = vector.load %arg2[%c5_91, %c0_92] : memref<9x36xbf16, #tpu.memory_space<vmem>>, vector<1x36xbf16>
    %97 = vector.broadcast %96 : vector<1x36xbf16> to vector<24x36xbf16>
    %98 = arith.mulf %95, %97 : vector<24x36xbf16>
    %c120_93 = arith.constant 120 : index
    %c0_94 = arith.constant 0 : index
    %99 = vector.load %arg10[%c120_93, %c0_94] : memref<256x36xbf16, #tpu.memory_space<vmem>>, vector<24x36xbf16>
    tpu.vector_store %arg10[%c120_93, %c0_94], %98 {strides = array<i32>} : memref<256x36xbf16, #tpu.memory_space<vmem>>, vector<24x36xbf16>,
    %c0_95 = arith.constant 0 : index
    %c12_96 = arith.constant 12 : index
    %100 = vector.load %arg9[%c0_95, %c12_96] : memref<24x50xbf16, #tpu.memory_space<vmem>>, vector<24x36xbf16>
    %c6_97 = arith.constant 6 : index
    %c0_98 = arith.constant 0 : index
    %101 = vector.load %arg2[%c6_97, %c0_98] : memref<9x36xbf16, #tpu.memory_space<vmem>>, vector<1x36xbf16>
    %102 = vector.broadcast %101 : vector<1x36xbf16> to vector<24x36xbf16>
    %103 = arith.mulf %100, %102 : vector<24x36xbf16>
    %c144_99 = arith.constant 144 : index
    %c0_100 = arith.constant 0 : index
    %104 = vector.load %arg10[%c144_99, %c0_100] : memref<256x36xbf16, #tpu.memory_space<vmem>>, vector<24x36xbf16>
    tpu.vector_store %arg10[%c144_99, %c0_100], %103 {strides = array<i32>} : memref<256x36xbf16, #tpu.memory_space<vmem>>, vector<24x36xbf16>,
    %c0_101 = arith.constant 0 : index
    %c13_102 = arith.constant 13 : index
    %105 = vector.load %arg9[%c0_101, %c13_102] : memref<24x50xbf16, #tpu.memory_space<vmem>>, vector<24x36xbf16>
    %c7_103 = arith.constant 7 : index
    %c0_104 = arith.constant 0 : index
    %106 = vector.load %arg2[%c7_103, %c0_104] : memref<9x36xbf16, #tpu.memory_space<vmem>>, vector<1x36xbf16>
    %107 = vector.broadcast %106 : vector<1x36xbf16> to vector<24x36xbf16>
    %108 = arith.mulf %105, %107 : vector<24x36xbf16>
    %c168_105 = arith.constant 168 : index
    %c0_106 = arith.constant 0 : index
    %109 = vector.load %arg10[%c168_105, %c0_106] : memref<256x36xbf16, #tpu.memory_space<vmem>>, vector<24x36xbf16>
    tpu.vector_store %arg10[%c168_105, %c0_106], %108 {strides = array<i32>} : memref<256x36xbf16, #tpu.memory_space<vmem>>, vector<24x36xbf16>,
    %c0_107 = arith.constant 0 : index
    %c14_108 = arith.constant 14 : index
    %110 = vector.load %arg9[%c0_107, %c14_108] : memref<24x50xbf16, #tpu.memory_space<vmem>>, vector<24x36xbf16>
    %c8_109 = arith.constant 8 : index
    %c0_110 = arith.constant 0 : index
    %111 = vector.load %arg2[%c8_109, %c0_110] : memref<9x36xbf16, #tpu.memory_space<vmem>>, vector<1x36xbf16>
    %112 = vector.broadcast %111 : vector<1x36xbf16> to vector<24x36xbf16>
    %113 = arith.mulf %110, %112 : vector<24x36xbf16>
    %c192_111 = arith.constant 192 : index
    %c0_112 = arith.constant 0 : index
    %114 = vector.load %arg10[%c192_111, %c0_112] : memref<256x36xbf16, #tpu.memory_space<vmem>>, vector<24x36xbf16>
    tpu.vector_store %arg10[%c192_111, %c0_112], %113 {strides = array<i32>} : memref<256x36xbf16, #tpu.memory_space<vmem>>, vector<24x36xbf16>,
    %cst_113 = arith.constant 0.000000e+00 : bf16
    %115 = vector.broadcast %cst_113 : bf16 to vector<40x36xbf16>
    %c216_114 = arith.constant 216 : index
    %c0_115 = arith.constant 0 : index
    %116 = vector.load %arg10[%c216_114, %c0_115] : memref<256x36xbf16, #tpu.memory_space<vmem>>, vector<40x36xbf16>
    tpu.vector_store %arg10[%c216_114, %c0_115], %115 {strides = array<i32>} : memref<256x36xbf16, #tpu.memory_space<vmem>>, vector<40x36xbf16>,
    %c0_116 = arith.constant 0 : index
    %c0_117 = arith.constant 0 : index
    %117 = vector.load %arg5[%c0_116, %c0_117] : memref<24x256xbf16, #tpu.memory_space<vmem>>, vector<24x256xbf16>
    %c0_118 = arith.constant 0 : index
    %c0_119 = arith.constant 0 : index
    %118 = vector.load %arg10[%c0_118, %c0_119] : memref<256x36xbf16, #tpu.memory_space<vmem>>, vector<256x36xbf16>
    %cst_120 = arith.constant dense<0.000000e+00> : vector<24x36xf32>
    %119 = tpu.matmul %117, %118, %cst_120 {dimension_numbers = #tpu.dot_dimension_numbers<[1], [0], [0], [1], [0, 0, 1, 1], [], []>} : vector<24x256xbf16>, vector<256x36xbf16>, vector<24x36xf32> -> vector<24x36xf32>
    %c0_121 = arith.constant 0 : index
    %c0_122 = arith.constant 0 : index
    %120 = vector.load %arg6[%c0_121, %c0_122] : memref<24x1xf32, #tpu.memory_space<vmem>>, vector<24x1xf32>
    %121 = vector.broadcast %120 : vector<24x1xf32> to vector<24x36xf32>
    %122 = arith.addf %119, %121 : vector<24x36xf32>
    %123 = arith.truncf %122 : vector<24x36xf32> to vector<24x36xbf16>
    %c0_123 = arith.constant 0 : index
    %c0_124 = arith.constant 0 : index
    %c0_125 = arith.constant 0 : index
    %124 = vector.load %arg7[%c0_123, %c0_124, %c0_125] : memref<1x24x36xbf16, #tpu.memory_space<vmem>>, vector<1x24x36xbf16>
    %125 = vector.shape_cast %124 : vector<1x24x36xbf16> to vector<24x36xbf16>
    %126 = vector.shape_cast %123 : vector<24x36xbf16> to vector<1x24x36xbf16>
    tpu.vector_store %arg7[%c0_123, %c0_124, %c0_125], %126 {strides = array<i32>} : memref<1x24x36xbf16, #tpu.memory_space<vmem>>, vector<1x24x36xbf16>,
    return
  }
  func.func @transform_0(%arg0: i32) -> (i32, i32, i32) {
    %c0_i32 = arith.constant 0 : i32
    %c0_i32_0 = arith.constant 0 : i32
    %c0_i32_1 = arith.constant 0 : i32
    return %arg0, %c0_i32, %c0_i32_0 : i32, i32, i32
  }
  func.func @transform_1(%arg0: i32) -> (i32, i32) {
    %c0_i32 = arith.constant 0 : i32
    %c0_i32_0 = arith.constant 0 : i32
    %c0_i32_1 = arith.constant 0 : i32
    return %c0_i32, %c0_i32_0 : i32, i32
  }
  func.func @transform_2(%arg0: i32) -> (i32, i32) {
    %c0_i32 = arith.constant 0 : i32
    %c0_i32_0 = arith.constant 0 : i32
    %c0_i32_1 = arith.constant 0 : i32
    return %c0_i32, %c0_i32_0 : i32, i32
  }
  func.func @transform_3(%arg0: i32) -> (i32, i32) {
    %c0_i32 = arith.constant 0 : i32
    %c0_i32_0 = arith.constant 0 : i32
    %c0_i32_1 = arith.constant 0 : i32
    return %c0_i32, %c0_i32_0 : i32, i32
  }
  func.func @transform_4(%arg0: i32) -> (i32, i32) {
    %c0_i32 = arith.constant 0 : i32
    %c0_i32_0 = arith.constant 0 : i32
    %c0_i32_1 = arith.constant 0 : i32
    return %c0_i32, %c0_i32_0 : i32, i32
  }
  func.func @transform_5(%arg0: i32) -> (i32, i32) {
    %c0_i32 = arith.constant 0 : i32
    %c0_i32_0 = arith.constant 0 : i32
    %c0_i32_1 = arith.constant 0 : i32
    return %c0_i32, %c0_i32_0 : i32, i32
  }
  func.func @transform_6(%arg0: i32) -> (i32, i32, i32) {
    %c0_i32 = arith.constant 0 : i32
    %c0_i32_0 = arith.constant 0 : i32
    %c0_i32_1 = arith.constant 0 : i32
    return %arg0, %c0_i32, %c0_i32_0 : i32, i32, i32
  }
}

module attributes {stable_mosaic.version = 11 : i64} {
  func.func @kernel(%arg0: i32, %arg1: memref<1x24x50xbf16, #tpu.memory_space<vmem>>, %arg2: memref<9x36xbf16, #tpu.memory_space<vmem>>, %arg3: memref<64x256xbf16, #tpu.memory_space<vmem>>, %arg4: memref<64x1xf32, #tpu.memory_space<vmem>>, %arg5: memref<64x256xbf16, #tpu.memory_space<vmem>>, %arg6: memref<64x1xf32, #tpu.memory_space<vmem>>, %arg7: memref<1x64x36xbf16, #tpu.memory_space<vmem>>, %arg8: memref<256x36xbf16, #tpu.memory_space<vmem>>, %arg9: memref<64x50xbf16, #tpu.memory_space<vmem>>, %arg10: memref<256x36xbf16, #tpu.memory_space<vmem>>) attributes {dimension_semantics = [#tpu.dimension_semantics<parallel>], iteration_bounds = array<i64: 2>, scalar_prefetch = 0 : i64, scratch_operands = 3 : i64, tpu.core_type = #tpu.core_type<tc>, window_params = [{transform_indices = @transform_0, window_bounds = array<i64: 1, 24, 50>}, {pipeline_mode = #tpu.pipeline_mode<synchronous>, transform_indices = @transform_1, window_bounds = array<i64: 9, 36>}, {pipeline_mode = #tpu.pipeline_mode<synchronous>, transform_indices = @transform_2, window_bounds = array<i64: 64, 256>}, {pipeline_mode = #tpu.pipeline_mode<synchronous>, transform_indices = @transform_3, window_bounds = array<i64: 64, 1>}, {pipeline_mode = #tpu.pipeline_mode<synchronous>, transform_indices = @transform_4, window_bounds = array<i64: 64, 256>}, {pipeline_mode = #tpu.pipeline_mode<synchronous>, transform_indices = @transform_5, window_bounds = array<i64: 64, 1>}, {transform_indices = @transform_6, window_bounds = array<i64: 1, 64, 36>}]} {
    %c0 = arith.constant 0 : index
    %c0_0 = arith.constant 0 : index
    %c0_1 = arith.constant 0 : index
    %0 = vector.load %arg1[%c0, %c0_0, %c0_1] : memref<1x24x50xbf16, #tpu.memory_space<vmem>>, vector<1x24x36xbf16>
    %1 = vector.shape_cast %0 : vector<1x24x36xbf16> to vector<24x36xbf16>
    %c0_2 = arith.constant 0 : index
    %c0_3 = arith.constant 0 : index
    %2 = vector.load %arg2[%c0_2, %c0_3] : memref<9x36xbf16, #tpu.memory_space<vmem>>, vector<1x36xbf16>
    %3 = vector.broadcast %2 : vector<1x36xbf16> to vector<24x36xbf16>
    %4 = arith.mulf %1, %3 : vector<24x36xbf16>
    %c0_4 = arith.constant 0 : index
    %c0_5 = arith.constant 0 : index
    %5 = vector.load %arg8[%c0_4, %c0_5] : memref<256x36xbf16, #tpu.memory_space<vmem>>, vector<24x36xbf16>
    tpu.vector_store %arg8[%c0_4, %c0_5], %4 {strides = array<i32>} : memref<256x36xbf16, #tpu.memory_space<vmem>>, vector<24x36xbf16>,
    %c0_6 = arith.constant 0 : index
    %c0_7 = arith.constant 0 : index
    %c1 = arith.constant 1 : index
    %6 = vector.load %arg1[%c0_6, %c0_7, %c1] : memref<1x24x50xbf16, #tpu.memory_space<vmem>>, vector<1x24x36xbf16>
    %7 = vector.shape_cast %6 : vector<1x24x36xbf16> to vector<24x36xbf16>
    %c1_8 = arith.constant 1 : index
    %c0_9 = arith.constant 0 : index
    %8 = vector.load %arg2[%c1_8, %c0_9] : memref<9x36xbf16, #tpu.memory_space<vmem>>, vector<1x36xbf16>
    %9 = vector.broadcast %8 : vector<1x36xbf16> to vector<24x36xbf16>
    %10 = arith.mulf %7, %9 : vector<24x36xbf16>
    %c24 = arith.constant 24 : index
    %c0_10 = arith.constant 0 : index
    %11 = vector.load %arg8[%c24, %c0_10] : memref<256x36xbf16, #tpu.memory_space<vmem>>, vector<24x36xbf16>
    tpu.vector_store %arg8[%c24, %c0_10], %10 {strides = array<i32>} : memref<256x36xbf16, #tpu.memory_space<vmem>>, vector<24x36xbf16>,
    %c0_11 = arith.constant 0 : index
    %c0_12 = arith.constant 0 : index
    %c2 = arith.constant 2 : index
    %12 = vector.load %arg1[%c0_11, %c0_12, %c2] : memref<1x24x50xbf16, #tpu.memory_space<vmem>>, vector<1x24x36xbf16>
    %13 = vector.shape_cast %12 : vector<1x24x36xbf16> to vector<24x36xbf16>
    %c2_13 = arith.constant 2 : index
    %c0_14 = arith.constant 0 : index
    %14 = vector.load %arg2[%c2_13, %c0_14] : memref<9x36xbf16, #tpu.memory_space<vmem>>, vector<1x36xbf16>
    %15 = vector.broadcast %14 : vector<1x36xbf16> to vector<24x36xbf16>
    %16 = arith.mulf %13, %15 : vector<24x36xbf16>
    %c48 = arith.constant 48 : index
    %c0_15 = arith.constant 0 : index
    %17 = vector.load %arg8[%c48, %c0_15] : memref<256x36xbf16, #tpu.memory_space<vmem>>, vector<24x36xbf16>
    tpu.vector_store %arg8[%c48, %c0_15], %16 {strides = array<i32>} : memref<256x36xbf16, #tpu.memory_space<vmem>>, vector<24x36xbf16>,
    %c0_16 = arith.constant 0 : index
    %c0_17 = arith.constant 0 : index
    %c6 = arith.constant 6 : index
    %18 = vector.load %arg1[%c0_16, %c0_17, %c6] : memref<1x24x50xbf16, #tpu.memory_space<vmem>>, vector<1x24x36xbf16>
    %19 = vector.shape_cast %18 : vector<1x24x36xbf16> to vector<24x36xbf16>
    %c3 = arith.constant 3 : index
    %c0_18 = arith.constant 0 : index
    %20 = vector.load %arg2[%c3, %c0_18] : memref<9x36xbf16, #tpu.memory_space<vmem>>, vector<1x36xbf16>
    %21 = vector.broadcast %20 : vector<1x36xbf16> to vector<24x36xbf16>
    %22 = arith.mulf %19, %21 : vector<24x36xbf16>
    %c72 = arith.constant 72 : index
    %c0_19 = arith.constant 0 : index
    %23 = vector.load %arg8[%c72, %c0_19] : memref<256x36xbf16, #tpu.memory_space<vmem>>, vector<24x36xbf16>
    tpu.vector_store %arg8[%c72, %c0_19], %22 {strides = array<i32>} : memref<256x36xbf16, #tpu.memory_space<vmem>>, vector<24x36xbf16>,
    %c0_20 = arith.constant 0 : index
    %c0_21 = arith.constant 0 : index
    %c7 = arith.constant 7 : index
    %24 = vector.load %arg1[%c0_20, %c0_21, %c7] : memref<1x24x50xbf16, #tpu.memory_space<vmem>>, vector<1x24x36xbf16>
    %25 = vector.shape_cast %24 : vector<1x24x36xbf16> to vector<24x36xbf16>
    %c4 = arith.constant 4 : index
    %c0_22 = arith.constant 0 : index
    %26 = vector.load %arg2[%c4, %c0_22] : memref<9x36xbf16, #tpu.memory_space<vmem>>, vector<1x36xbf16>
    %27 = vector.broadcast %26 : vector<1x36xbf16> to vector<24x36xbf16>
    %28 = arith.mulf %25, %27 : vector<24x36xbf16>
    %c96 = arith.constant 96 : index
    %c0_23 = arith.constant 0 : index
    %29 = vector.load %arg8[%c96, %c0_23] : memref<256x36xbf16, #tpu.memory_space<vmem>>, vector<24x36xbf16>
    tpu.vector_store %arg8[%c96, %c0_23], %28 {strides = array<i32>} : memref<256x36xbf16, #tpu.memory_space<vmem>>, vector<24x36xbf16>,
    %c0_24 = arith.constant 0 : index
    %c0_25 = arith.constant 0 : index
    %c8 = arith.constant 8 : index
    %30 = vector.load %arg1[%c0_24, %c0_25, %c8] : memref<1x24x50xbf16, #tpu.memory_space<vmem>>, vector<1x24x36xbf16>
    %31 = vector.shape_cast %30 : vector<1x24x36xbf16> to vector<24x36xbf16>
    %c5 = arith.constant 5 : index
    %c0_26 = arith.constant 0 : index
    %32 = vector.load %arg2[%c5, %c0_26] : memref<9x36xbf16, #tpu.memory_space<vmem>>, vector<1x36xbf16>
    %33 = vector.broadcast %32 : vector<1x36xbf16> to vector<24x36xbf16>
    %34 = arith.mulf %31, %33 : vector<24x36xbf16>
    %c120 = arith.constant 120 : index
    %c0_27 = arith.constant 0 : index
    %35 = vector.load %arg8[%c120, %c0_27] : memref<256x36xbf16, #tpu.memory_space<vmem>>, vector<24x36xbf16>
    tpu.vector_store %arg8[%c120, %c0_27], %34 {strides = array<i32>} : memref<256x36xbf16, #tpu.memory_space<vmem>>, vector<24x36xbf16>,
    %c0_28 = arith.constant 0 : index
    %c0_29 = arith.constant 0 : index
    %c12 = arith.constant 12 : index
    %36 = vector.load %arg1[%c0_28, %c0_29, %c12] : memref<1x24x50xbf16, #tpu.memory_space<vmem>>, vector<1x24x36xbf16>
    %37 = vector.shape_cast %36 : vector<1x24x36xbf16> to vector<24x36xbf16>
    %c6_30 = arith.constant 6 : index
    %c0_31 = arith.constant 0 : index
    %38 = vector.load %arg2[%c6_30, %c0_31] : memref<9x36xbf16, #tpu.memory_space<vmem>>, vector<1x36xbf16>
    %39 = vector.broadcast %38 : vector<1x36xbf16> to vector<24x36xbf16>
    %40 = arith.mulf %37, %39 : vector<24x36xbf16>
    %c144 = arith.constant 144 : index
    %c0_32 = arith.constant 0 : index
    %41 = vector.load %arg8[%c144, %c0_32] : memref<256x36xbf16, #tpu.memory_space<vmem>>, vector<24x36xbf16>
    tpu.vector_store %arg8[%c144, %c0_32], %40 {strides = array<i32>} : memref<256x36xbf16, #tpu.memory_space<vmem>>, vector<24x36xbf16>,
    %c0_33 = arith.constant 0 : index
    %c0_34 = arith.constant 0 : index
    %c13 = arith.constant 13 : index
    %42 = vector.load %arg1[%c0_33, %c0_34, %c13] : memref<1x24x50xbf16, #tpu.memory_space<vmem>>, vector<1x24x36xbf16>
    %43 = vector.shape_cast %42 : vector<1x24x36xbf16> to vector<24x36xbf16>
    %c7_35 = arith.constant 7 : index
    %c0_36 = arith.constant 0 : index
    %44 = vector.load %arg2[%c7_35, %c0_36] : memref<9x36xbf16, #tpu.memory_space<vmem>>, vector<1x36xbf16>
    %45 = vector.broadcast %44 : vector<1x36xbf16> to vector<24x36xbf16>
    %46 = arith.mulf %43, %45 : vector<24x36xbf16>
    %c168 = arith.constant 168 : index
    %c0_37 = arith.constant 0 : index
    %47 = vector.load %arg8[%c168, %c0_37] : memref<256x36xbf16, #tpu.memory_space<vmem>>, vector<24x36xbf16>
    tpu.vector_store %arg8[%c168, %c0_37], %46 {strides = array<i32>} : memref<256x36xbf16, #tpu.memory_space<vmem>>, vector<24x36xbf16>,
    %c0_38 = arith.constant 0 : index
    %c0_39 = arith.constant 0 : index
    %c14 = arith.constant 14 : index
    %48 = vector.load %arg1[%c0_38, %c0_39, %c14] : memref<1x24x50xbf16, #tpu.memory_space<vmem>>, vector<1x24x36xbf16>
    %49 = vector.shape_cast %48 : vector<1x24x36xbf16> to vector<24x36xbf16>
    %c8_40 = arith.constant 8 : index
    %c0_41 = arith.constant 0 : index
    %50 = vector.load %arg2[%c8_40, %c0_41] : memref<9x36xbf16, #tpu.memory_space<vmem>>, vector<1x36xbf16>
    %51 = vector.broadcast %50 : vector<1x36xbf16> to vector<24x36xbf16>
    %52 = arith.mulf %49, %51 : vector<24x36xbf16>
    %c192 = arith.constant 192 : index
    %c0_42 = arith.constant 0 : index
    %53 = vector.load %arg8[%c192, %c0_42] : memref<256x36xbf16, #tpu.memory_space<vmem>>, vector<24x36xbf16>
    tpu.vector_store %arg8[%c192, %c0_42], %52 {strides = array<i32>} : memref<256x36xbf16, #tpu.memory_space<vmem>>, vector<24x36xbf16>,
    %cst = arith.constant 0.000000e+00 : bf16
    %54 = vector.broadcast %cst : bf16 to vector<40x36xbf16>
    %c216 = arith.constant 216 : index
    %c0_43 = arith.constant 0 : index
    %55 = vector.load %arg8[%c216, %c0_43] : memref<256x36xbf16, #tpu.memory_space<vmem>>, vector<40x36xbf16>
    tpu.vector_store %arg8[%c216, %c0_43], %54 {strides = array<i32>} : memref<256x36xbf16, #tpu.memory_space<vmem>>, vector<40x36xbf16>,
    %c0_44 = arith.constant 0 : index
    %c0_45 = arith.constant 0 : index
    %56 = vector.load %arg3[%c0_44, %c0_45] : memref<64x256xbf16, #tpu.memory_space<vmem>>, vector<64x256xbf16>
    %c0_46 = arith.constant 0 : index
    %c0_47 = arith.constant 0 : index
    %57 = vector.load %arg8[%c0_46, %c0_47] : memref<256x36xbf16, #tpu.memory_space<vmem>>, vector<256x36xbf16>
    %cst_48 = arith.constant dense<0.000000e+00> : vector<64x36xf32>
    %58 = tpu.matmul %56, %57, %cst_48 {dimension_numbers = #tpu.dot_dimension_numbers<[1], [0], [0], [1], [0, 0, 1, 1], [], []>} : vector<64x256xbf16>, vector<256x36xbf16>, vector<64x36xf32> -> vector<64x36xf32>
    %c0_49 = arith.constant 0 : index
    %c0_50 = arith.constant 0 : index
    %59 = vector.load %arg4[%c0_49, %c0_50] : memref<64x1xf32, #tpu.memory_space<vmem>>, vector<64x1xf32>
    %60 = vector.broadcast %59 : vector<64x1xf32> to vector<64x36xf32>
    %61 = arith.addf %58, %60 : vector<64x36xf32>
    %cst_51 = arith.constant 0.000000e+00 : f32
    %62 = vector.broadcast %cst_51 : f32 to vector<64x36xf32>
    %63 = arith.maximumf %61, %62 : vector<64x36xf32>
    %cst_52 = arith.constant 0.000000e+00 : bf16
    %64 = vector.broadcast %cst_52 : bf16 to vector<64x7xbf16>
    %c0_53 = arith.constant 0 : index
    %c0_54 = arith.constant 0 : index
    %65 = vector.load %arg9[%c0_53, %c0_54] : memref<64x50xbf16, #tpu.memory_space<vmem>>, vector<64x7xbf16>
    tpu.vector_store %arg9[%c0_53, %c0_54], %64 {strides = array<i32>} : memref<64x50xbf16, #tpu.memory_space<vmem>>, vector<64x7xbf16>,
    %cst_55 = arith.constant 0.000000e+00 : bf16
    %66 = vector.broadcast %cst_55 : bf16 to vector<64x7xbf16>
    %c0_56 = arith.constant 0 : index
    %c43 = arith.constant 43 : index
    %67 = vector.load %arg9[%c0_56, %c43] : memref<64x50xbf16, #tpu.memory_space<vmem>>, vector<64x7xbf16>
    tpu.vector_store %arg9[%c0_56, %c43], %66 {strides = array<i32>} : memref<64x50xbf16, #tpu.memory_space<vmem>>, vector<64x7xbf16>,
    %68 = arith.truncf %63 : vector<64x36xf32> to vector<64x36xbf16>
    %c0_57 = arith.constant 0 : index
    %c7_58 = arith.constant 7 : index
    %69 = vector.load %arg9[%c0_57, %c7_58] : memref<64x50xbf16, #tpu.memory_space<vmem>>, vector<64x36xbf16>
    tpu.vector_store %arg9[%c0_57, %c7_58], %68 {strides = array<i32>} : memref<64x50xbf16, #tpu.memory_space<vmem>>, vector<64x36xbf16>,
    %c0_59 = arith.constant 0 : index
    %c7_60 = arith.constant 7 : index
    %70 = vector.load %arg9[%c0_59, %c7_60] : memref<64x50xbf16, #tpu.memory_space<vmem>>, vector<16x36xbf16>
    %c4_61 = arith.constant 4 : index
    %c0_62 = arith.constant 0 : index
    %71 = vector.load %arg2[%c4_61, %c0_62] : memref<9x36xbf16, #tpu.memory_space<vmem>>, vector<1x36xbf16>
    %72 = vector.broadcast %71 : vector<1x36xbf16> to vector<16x36xbf16>
    %73 = arith.mulf %70, %72 : vector<16x36xbf16>
    %c0_63 = arith.constant 0 : index
    %c0_64 = arith.constant 0 : index
    %74 = vector.load %arg10[%c0_63, %c0_64] : memref<256x36xbf16, #tpu.memory_space<vmem>>, vector<16x36xbf16>
    tpu.vector_store %arg10[%c0_63, %c0_64], %73 {strides = array<i32>} : memref<256x36xbf16, #tpu.memory_space<vmem>>, vector<16x36xbf16>,
    %c16 = arith.constant 16 : index
    %c6_65 = arith.constant 6 : index
    %75 = vector.load %arg9[%c16, %c6_65] : memref<64x50xbf16, #tpu.memory_space<vmem>>, vector<16x36xbf16>
    %c3_66 = arith.constant 3 : index
    %c0_67 = arith.constant 0 : index
    %76 = vector.load %arg2[%c3_66, %c0_67] : memref<9x36xbf16, #tpu.memory_space<vmem>>, vector<1x36xbf16>
    %77 = vector.broadcast %76 : vector<1x36xbf16> to vector<16x36xbf16>
    %78 = arith.mulf %75, %77 : vector<16x36xbf16>
    %c16_68 = arith.constant 16 : index
    %c0_69 = arith.constant 0 : index
    %79 = vector.load %arg10[%c16_68, %c0_69] : memref<256x36xbf16, #tpu.memory_space<vmem>>, vector<16x36xbf16>
    tpu.vector_store %arg10[%c16_68, %c0_69], %78 {strides = array<i32>} : memref<256x36xbf16, #tpu.memory_space<vmem>>, vector<16x36xbf16>,
    %c16_70 = arith.constant 16 : index
    %c7_71 = arith.constant 7 : index
    %80 = vector.load %arg9[%c16_70, %c7_71] : memref<64x50xbf16, #tpu.memory_space<vmem>>, vector<16x36xbf16>
    %c4_72 = arith.constant 4 : index
    %c0_73 = arith.constant 0 : index
    %81 = vector.load %arg2[%c4_72, %c0_73] : memref<9x36xbf16, #tpu.memory_space<vmem>>, vector<1x36xbf16>
    %82 = vector.broadcast %81 : vector<1x36xbf16> to vector<16x36xbf16>
    %83 = arith.mulf %80, %82 : vector<16x36xbf16>
    %c32 = arith.constant 32 : index
    %c0_74 = arith.constant 0 : index
    %84 = vector.load %arg10[%c32, %c0_74] : memref<256x36xbf16, #tpu.memory_space<vmem>>, vector<16x36xbf16>
    tpu.vector_store %arg10[%c32, %c0_74], %83 {strides = array<i32>} : memref<256x36xbf16, #tpu.memory_space<vmem>>, vector<16x36xbf16>,
    %c0_75 = arith.constant 0 : index
    %c8_76 = arith.constant 8 : index
    %85 = vector.load %arg9[%c0_75, %c8_76] : memref<64x50xbf16, #tpu.memory_space<vmem>>, vector<16x36xbf16>
    %c5_77 = arith.constant 5 : index
    %c0_78 = arith.constant 0 : index
    %86 = vector.load %arg2[%c5_77, %c0_78] : memref<9x36xbf16, #tpu.memory_space<vmem>>, vector<1x36xbf16>
    %87 = vector.broadcast %86 : vector<1x36xbf16> to vector<16x36xbf16>
    %88 = arith.mulf %85, %87 : vector<16x36xbf16>
    %c48_79 = arith.constant 48 : index
    %c0_80 = arith.constant 0 : index
    %89 = vector.load %arg10[%c48_79, %c0_80] : memref<256x36xbf16, #tpu.memory_space<vmem>>, vector<16x36xbf16>
    tpu.vector_store %arg10[%c48_79, %c0_80], %88 {strides = array<i32>} : memref<256x36xbf16, #tpu.memory_space<vmem>>, vector<16x36xbf16>,
    %c32_81 = arith.constant 32 : index
    %c1_82 = arith.constant 1 : index
    %90 = vector.load %arg9[%c32_81, %c1_82] : memref<64x50xbf16, #tpu.memory_space<vmem>>, vector<16x36xbf16>
    %c1_83 = arith.constant 1 : index
    %c0_84 = arith.constant 0 : index
    %91 = vector.load %arg2[%c1_83, %c0_84] : memref<9x36xbf16, #tpu.memory_space<vmem>>, vector<1x36xbf16>
    %92 = vector.broadcast %91 : vector<1x36xbf16> to vector<16x36xbf16>
    %93 = arith.mulf %90, %92 : vector<16x36xbf16>
    %c64 = arith.constant 64 : index
    %c0_85 = arith.constant 0 : index
    %94 = vector.load %arg10[%c64, %c0_85] : memref<256x36xbf16, #tpu.memory_space<vmem>>, vector<16x36xbf16>
    tpu.vector_store %arg10[%c64, %c0_85], %93 {strides = array<i32>} : memref<256x36xbf16, #tpu.memory_space<vmem>>, vector<16x36xbf16>,
    %c48_86 = arith.constant 48 : index
    %c0_87 = arith.constant 0 : index
    %95 = vector.load %arg9[%c48_86, %c0_87] : memref<64x50xbf16, #tpu.memory_space<vmem>>, vector<16x36xbf16>
    %c0_88 = arith.constant 0 : index
    %c0_89 = arith.constant 0 : index
    %96 = vector.load %arg2[%c0_88, %c0_89] : memref<9x36xbf16, #tpu.memory_space<vmem>>, vector<1x36xbf16>
    %97 = vector.broadcast %96 : vector<1x36xbf16> to vector<16x36xbf16>
    %98 = arith.mulf %95, %97 : vector<16x36xbf16>
    %c80 = arith.constant 80 : index
    %c0_90 = arith.constant 0 : index
    %99 = vector.load %arg10[%c80, %c0_90] : memref<256x36xbf16, #tpu.memory_space<vmem>>, vector<16x36xbf16>
    tpu.vector_store %arg10[%c80, %c0_90], %98 {strides = array<i32>} : memref<256x36xbf16, #tpu.memory_space<vmem>>, vector<16x36xbf16>,
    %c48_91 = arith.constant 48 : index
    %c1_92 = arith.constant 1 : index
    %100 = vector.load %arg9[%c48_91, %c1_92] : memref<64x50xbf16, #tpu.memory_space<vmem>>, vector<16x36xbf16>
    %c1_93 = arith.constant 1 : index
    %c0_94 = arith.constant 0 : index
    %101 = vector.load %arg2[%c1_93, %c0_94] : memref<9x36xbf16, #tpu.memory_space<vmem>>, vector<1x36xbf16>
    %102 = vector.broadcast %101 : vector<1x36xbf16> to vector<16x36xbf16>
    %103 = arith.mulf %100, %102 : vector<16x36xbf16>
    %c96_95 = arith.constant 96 : index
    %c0_96 = arith.constant 0 : index
    %104 = vector.load %arg10[%c96_95, %c0_96] : memref<256x36xbf16, #tpu.memory_space<vmem>>, vector<16x36xbf16>
    tpu.vector_store %arg10[%c96_95, %c0_96], %103 {strides = array<i32>} : memref<256x36xbf16, #tpu.memory_space<vmem>>, vector<16x36xbf16>,
    %c32_97 = arith.constant 32 : index
    %c2_98 = arith.constant 2 : index
    %105 = vector.load %arg9[%c32_97, %c2_98] : memref<64x50xbf16, #tpu.memory_space<vmem>>, vector<16x36xbf16>
    %c2_99 = arith.constant 2 : index
    %c0_100 = arith.constant 0 : index
    %106 = vector.load %arg2[%c2_99, %c0_100] : memref<9x36xbf16, #tpu.memory_space<vmem>>, vector<1x36xbf16>
    %107 = vector.broadcast %106 : vector<1x36xbf16> to vector<16x36xbf16>
    %108 = arith.mulf %105, %107 : vector<16x36xbf16>
    %c112 = arith.constant 112 : index
    %c0_101 = arith.constant 0 : index
    %109 = vector.load %arg10[%c112, %c0_101] : memref<256x36xbf16, #tpu.memory_space<vmem>>, vector<16x36xbf16>
    tpu.vector_store %arg10[%c112, %c0_101], %108 {strides = array<i32>} : memref<256x36xbf16, #tpu.memory_space<vmem>>, vector<16x36xbf16>,
    %c32_102 = arith.constant 32 : index
    %c7_103 = arith.constant 7 : index
    %110 = vector.load %arg9[%c32_102, %c7_103] : memref<64x50xbf16, #tpu.memory_space<vmem>>, vector<16x36xbf16>
    %c4_104 = arith.constant 4 : index
    %c0_105 = arith.constant 0 : index
    %111 = vector.load %arg2[%c4_104, %c0_105] : memref<9x36xbf16, #tpu.memory_space<vmem>>, vector<1x36xbf16>
    %112 = vector.broadcast %111 : vector<1x36xbf16> to vector<16x36xbf16>
    %113 = arith.mulf %110, %112 : vector<16x36xbf16>
    %c128 = arith.constant 128 : index
    %c0_106 = arith.constant 0 : index
    %114 = vector.load %arg10[%c128, %c0_106] : memref<256x36xbf16, #tpu.memory_space<vmem>>, vector<16x36xbf16>
    tpu.vector_store %arg10[%c128, %c0_106], %113 {strides = array<i32>} : memref<256x36xbf16, #tpu.memory_space<vmem>>, vector<16x36xbf16>,
    %c48_107 = arith.constant 48 : index
    %c6_108 = arith.constant 6 : index
    %115 = vector.load %arg9[%c48_107, %c6_108] : memref<64x50xbf16, #tpu.memory_space<vmem>>, vector<16x36xbf16>
    %c3_109 = arith.constant 3 : index
    %c0_110 = arith.constant 0 : index
    %116 = vector.load %arg2[%c3_109, %c0_110] : memref<9x36xbf16, #tpu.memory_space<vmem>>, vector<1x36xbf16>
    %117 = vector.broadcast %116 : vector<1x36xbf16> to vector<16x36xbf16>
    %118 = arith.mulf %115, %117 : vector<16x36xbf16>
    %c144_111 = arith.constant 144 : index
    %c0_112 = arith.constant 0 : index
    %119 = vector.load %arg10[%c144_111, %c0_112] : memref<256x36xbf16, #tpu.memory_space<vmem>>, vector<16x36xbf16>
    tpu.vector_store %arg10[%c144_111, %c0_112], %118 {strides = array<i32>} : memref<256x36xbf16, #tpu.memory_space<vmem>>, vector<16x36xbf16>,
    %c48_113 = arith.constant 48 : index
    %c7_114 = arith.constant 7 : index
    %120 = vector.load %arg9[%c48_113, %c7_114] : memref<64x50xbf16, #tpu.memory_space<vmem>>, vector<16x36xbf16>
    %c4_115 = arith.constant 4 : index
    %c0_116 = arith.constant 0 : index
    %121 = vector.load %arg2[%c4_115, %c0_116] : memref<9x36xbf16, #tpu.memory_space<vmem>>, vector<1x36xbf16>
    %122 = vector.broadcast %121 : vector<1x36xbf16> to vector<16x36xbf16>
    %123 = arith.mulf %120, %122 : vector<16x36xbf16>
    %c160 = arith.constant 160 : index
    %c0_117 = arith.constant 0 : index
    %124 = vector.load %arg10[%c160, %c0_117] : memref<256x36xbf16, #tpu.memory_space<vmem>>, vector<16x36xbf16>
    tpu.vector_store %arg10[%c160, %c0_117], %123 {strides = array<i32>} : memref<256x36xbf16, #tpu.memory_space<vmem>>, vector<16x36xbf16>,
    %c32_118 = arith.constant 32 : index
    %c8_119 = arith.constant 8 : index
    %125 = vector.load %arg9[%c32_118, %c8_119] : memref<64x50xbf16, #tpu.memory_space<vmem>>, vector<16x36xbf16>
    %c5_120 = arith.constant 5 : index
    %c0_121 = arith.constant 0 : index
    %126 = vector.load %arg2[%c5_120, %c0_121] : memref<9x36xbf16, #tpu.memory_space<vmem>>, vector<1x36xbf16>
    %127 = vector.broadcast %126 : vector<1x36xbf16> to vector<16x36xbf16>
    %128 = arith.mulf %125, %127 : vector<16x36xbf16>
    %c176 = arith.constant 176 : index
    %c0_122 = arith.constant 0 : index
    %129 = vector.load %arg10[%c176, %c0_122] : memref<256x36xbf16, #tpu.memory_space<vmem>>, vector<16x36xbf16>
    tpu.vector_store %arg10[%c176, %c0_122], %128 {strides = array<i32>} : memref<256x36xbf16, #tpu.memory_space<vmem>>, vector<16x36xbf16>,
    %c0_123 = arith.constant 0 : index
    %c13_124 = arith.constant 13 : index
    %130 = vector.load %arg9[%c0_123, %c13_124] : memref<64x50xbf16, #tpu.memory_space<vmem>>, vector<16x36xbf16>
    %c7_125 = arith.constant 7 : index
    %c0_126 = arith.constant 0 : index
    %131 = vector.load %arg2[%c7_125, %c0_126] : memref<9x36xbf16, #tpu.memory_space<vmem>>, vector<1x36xbf16>
    %132 = vector.broadcast %131 : vector<1x36xbf16> to vector<16x36xbf16>
    %133 = arith.mulf %130, %132 : vector<16x36xbf16>
    %c192_127 = arith.constant 192 : index
    %c0_128 = arith.constant 0 : index
    %134 = vector.load %arg10[%c192_127, %c0_128] : memref<256x36xbf16, #tpu.memory_space<vmem>>, vector<16x36xbf16>
    tpu.vector_store %arg10[%c192_127, %c0_128], %133 {strides = array<i32>} : memref<256x36xbf16, #tpu.memory_space<vmem>>, vector<16x36xbf16>,
    %c16_129 = arith.constant 16 : index
    %c12_130 = arith.constant 12 : index
    %135 = vector.load %arg9[%c16_129, %c12_130] : memref<64x50xbf16, #tpu.memory_space<vmem>>, vector<16x36xbf16>
    %c6_131 = arith.constant 6 : index
    %c0_132 = arith.constant 0 : index
    %136 = vector.load %arg2[%c6_131, %c0_132] : memref<9x36xbf16, #tpu.memory_space<vmem>>, vector<1x36xbf16>
    %137 = vector.broadcast %136 : vector<1x36xbf16> to vector<16x36xbf16>
    %138 = arith.mulf %135, %137 : vector<16x36xbf16>
    %c208 = arith.constant 208 : index
    %c0_133 = arith.constant 0 : index
    %139 = vector.load %arg10[%c208, %c0_133] : memref<256x36xbf16, #tpu.memory_space<vmem>>, vector<16x36xbf16>
    tpu.vector_store %arg10[%c208, %c0_133], %138 {strides = array<i32>} : memref<256x36xbf16, #tpu.memory_space<vmem>>, vector<16x36xbf16>,
    %c16_134 = arith.constant 16 : index
    %c13_135 = arith.constant 13 : index
    %140 = vector.load %arg9[%c16_134, %c13_135] : memref<64x50xbf16, #tpu.memory_space<vmem>>, vector<16x36xbf16>
    %c7_136 = arith.constant 7 : index
    %c0_137 = arith.constant 0 : index
    %141 = vector.load %arg2[%c7_136, %c0_137] : memref<9x36xbf16, #tpu.memory_space<vmem>>, vector<1x36xbf16>
    %142 = vector.broadcast %141 : vector<1x36xbf16> to vector<16x36xbf16>
    %143 = arith.mulf %140, %142 : vector<16x36xbf16>
    %c224 = arith.constant 224 : index
    %c0_138 = arith.constant 0 : index
    %144 = vector.load %arg10[%c224, %c0_138] : memref<256x36xbf16, #tpu.memory_space<vmem>>, vector<16x36xbf16>
    tpu.vector_store %arg10[%c224, %c0_138], %143 {strides = array<i32>} : memref<256x36xbf16, #tpu.memory_space<vmem>>, vector<16x36xbf16>,
    %c0_139 = arith.constant 0 : index
    %c14_140 = arith.constant 14 : index
    %145 = vector.load %arg9[%c0_139, %c14_140] : memref<64x50xbf16, #tpu.memory_space<vmem>>, vector<16x36xbf16>
    %c8_141 = arith.constant 8 : index
    %c0_142 = arith.constant 0 : index
    %146 = vector.load %arg2[%c8_141, %c0_142] : memref<9x36xbf16, #tpu.memory_space<vmem>>, vector<1x36xbf16>
    %147 = vector.broadcast %146 : vector<1x36xbf16> to vector<16x36xbf16>
    %148 = arith.mulf %145, %147 : vector<16x36xbf16>
    %c240 = arith.constant 240 : index
    %c0_143 = arith.constant 0 : index
    %149 = vector.load %arg10[%c240, %c0_143] : memref<256x36xbf16, #tpu.memory_space<vmem>>, vector<16x36xbf16>
    tpu.vector_store %arg10[%c240, %c0_143], %148 {strides = array<i32>} : memref<256x36xbf16, #tpu.memory_space<vmem>>, vector<16x36xbf16>,
    %c0_144 = arith.constant 0 : index
    %c0_145 = arith.constant 0 : index
    %150 = vector.load %arg5[%c0_144, %c0_145] : memref<64x256xbf16, #tpu.memory_space<vmem>>, vector<64x256xbf16>
    %c0_146 = arith.constant 0 : index
    %c0_147 = arith.constant 0 : index
    %151 = vector.load %arg10[%c0_146, %c0_147] : memref<256x36xbf16, #tpu.memory_space<vmem>>, vector<256x36xbf16>
    %cst_148 = arith.constant dense<0.000000e+00> : vector<64x36xf32>
    %152 = tpu.matmul %150, %151, %cst_148 {dimension_numbers = #tpu.dot_dimension_numbers<[1], [0], [0], [1], [0, 0, 1, 1], [], []>} : vector<64x256xbf16>, vector<256x36xbf16>, vector<64x36xf32> -> vector<64x36xf32>
    %c0_149 = arith.constant 0 : index
    %c0_150 = arith.constant 0 : index
    %153 = vector.load %arg6[%c0_149, %c0_150] : memref<64x1xf32, #tpu.memory_space<vmem>>, vector<64x1xf32>
    %154 = vector.broadcast %153 : vector<64x1xf32> to vector<64x36xf32>
    %155 = arith.addf %152, %154 : vector<64x36xf32>
    %156 = arith.truncf %155 : vector<64x36xf32> to vector<64x36xbf16>
    %c0_151 = arith.constant 0 : index
    %c0_152 = arith.constant 0 : index
    %c0_153 = arith.constant 0 : index
    %157 = vector.load %arg7[%c0_151, %c0_152, %c0_153] : memref<1x64x36xbf16, #tpu.memory_space<vmem>>, vector<1x64x36xbf16>
    %158 = vector.shape_cast %157 : vector<1x64x36xbf16> to vector<64x36xbf16>
    %159 = vector.shape_cast %156 : vector<64x36xbf16> to vector<1x64x36xbf16>
    tpu.vector_store %arg7[%c0_151, %c0_152, %c0_153], %159 {strides = array<i32>} : memref<1x64x36xbf16, #tpu.memory_space<vmem>>, vector<1x64x36xbf16>,
    return
  }
  func.func @transform_0(%arg0: i32) -> (i32, i32, i32) {
    %c0_i32 = arith.constant 0 : i32
    %c0_i32_0 = arith.constant 0 : i32
    %c0_i32_1 = arith.constant 0 : i32
    return %arg0, %c0_i32, %c0_i32_0 : i32, i32, i32
  }
  func.func @transform_1(%arg0: i32) -> (i32, i32) {
    %c0_i32 = arith.constant 0 : i32
    %c0_i32_0 = arith.constant 0 : i32
    %c0_i32_1 = arith.constant 0 : i32
    return %c0_i32, %c0_i32_0 : i32, i32
  }
  func.func @transform_2(%arg0: i32) -> (i32, i32) {
    %c0_i32 = arith.constant 0 : i32
    %c0_i32_0 = arith.constant 0 : i32
    %c0_i32_1 = arith.constant 0 : i32
    return %c0_i32, %c0_i32_0 : i32, i32
  }
  func.func @transform_3(%arg0: i32) -> (i32, i32) {
    %c0_i32 = arith.constant 0 : i32
    %c0_i32_0 = arith.constant 0 : i32
    %c0_i32_1 = arith.constant 0 : i32
    return %c0_i32, %c0_i32_0 : i32, i32
  }
  func.func @transform_4(%arg0: i32) -> (i32, i32) {
    %c0_i32 = arith.constant 0 : i32
    %c0_i32_0 = arith.constant 0 : i32
    %c0_i32_1 = arith.constant 0 : i32
    return %c0_i32, %c0_i32_0 : i32, i32
  }
  func.func @transform_5(%arg0: i32) -> (i32, i32) {
    %c0_i32 = arith.constant 0 : i32
    %c0_i32_0 = arith.constant 0 : i32
    %c0_i32_1 = arith.constant 0 : i32
    return %c0_i32, %c0_i32_0 : i32, i32
  }
  func.func @transform_6(%arg0: i32) -> (i32, i32, i32) {
    %c0_i32 = arith.constant 0 : i32
    %c0_i32_0 = arith.constant 0 : i32
    %c0_i32_1 = arith.constant 0 : i32
    return %arg0, %c0_i32, %c0_i32_0 : i32, i32, i32
  }
}

module attributes {stable_mosaic.version = 11 : i64} {
  func.func @kernel(%arg0: i32, %arg1: memref<1x16x170xbf16, #tpu.memory_space<vmem>>, %arg2: memref<9x144xbf16, #tpu.memory_space<vmem>>, %arg3: memref<32x256xbf16, #tpu.memory_space<vmem>>, %arg4: memref<32x1xf32, #tpu.memory_space<vmem>>, %arg5: memref<32x128xbf16, #tpu.memory_space<vmem>>, %arg6: memref<32x1xf32, #tpu.memory_space<vmem>>, %arg7: memref<1x32x144xbf16, #tpu.memory_space<vmem>>, %arg8: memref<256x144xbf16, #tpu.memory_space<vmem>>, %arg9: memref<32x170xbf16, #tpu.memory_space<vmem>>, %arg10: memref<128x144xbf16, #tpu.memory_space<vmem>>) attributes {dimension_semantics = [#tpu.dimension_semantics<parallel>], iteration_bounds = array<i64: 2>, scalar_prefetch = 0 : i64, scratch_operands = 3 : i64, tpu.core_type = #tpu.core_type<tc>, window_params = [{transform_indices = @transform_0, window_bounds = array<i64: 1, 16, 170>}, {pipeline_mode = #tpu.pipeline_mode<synchronous>, transform_indices = @transform_1, window_bounds = array<i64: 9, 144>}, {pipeline_mode = #tpu.pipeline_mode<synchronous>, transform_indices = @transform_2, window_bounds = array<i64: 32, 256>}, {pipeline_mode = #tpu.pipeline_mode<synchronous>, transform_indices = @transform_3, window_bounds = array<i64: 32, 1>}, {pipeline_mode = #tpu.pipeline_mode<synchronous>, transform_indices = @transform_4, window_bounds = array<i64: 32, 128>}, {pipeline_mode = #tpu.pipeline_mode<synchronous>, transform_indices = @transform_5, window_bounds = array<i64: 32, 1>}, {transform_indices = @transform_6, window_bounds = array<i64: 1, 32, 144>}]} {
    %c0 = arith.constant 0 : index
    %c0_0 = arith.constant 0 : index
    %c0_1 = arith.constant 0 : index
    %0 = vector.load %arg1[%c0, %c0_0, %c0_1] : memref<1x16x170xbf16, #tpu.memory_space<vmem>>, vector<1x16x144xbf16>
    %1 = vector.shape_cast %0 : vector<1x16x144xbf16> to vector<16x144xbf16>
    %c0_2 = arith.constant 0 : index
    %c0_3 = arith.constant 0 : index
    %2 = vector.load %arg2[%c0_2, %c0_3] : memref<9x144xbf16, #tpu.memory_space<vmem>>, vector<1x144xbf16>
    %3 = vector.broadcast %2 : vector<1x144xbf16> to vector<16x144xbf16>
    %4 = arith.mulf %1, %3 : vector<16x144xbf16>
    %c0_4 = arith.constant 0 : index
    %c0_5 = arith.constant 0 : index
    %5 = vector.load %arg8[%c0_4, %c0_5] : memref<256x144xbf16, #tpu.memory_space<vmem>>, vector<16x144xbf16>
    tpu.vector_store %arg8[%c0_4, %c0_5], %4 {strides = array<i32>} : memref<256x144xbf16, #tpu.memory_space<vmem>>, vector<16x144xbf16>,
    %c0_6 = arith.constant 0 : index
    %c0_7 = arith.constant 0 : index
    %c1 = arith.constant 1 : index
    %6 = vector.load %arg1[%c0_6, %c0_7, %c1] : memref<1x16x170xbf16, #tpu.memory_space<vmem>>, vector<1x16x144xbf16>
    %7 = vector.shape_cast %6 : vector<1x16x144xbf16> to vector<16x144xbf16>
    %c1_8 = arith.constant 1 : index
    %c0_9 = arith.constant 0 : index
    %8 = vector.load %arg2[%c1_8, %c0_9] : memref<9x144xbf16, #tpu.memory_space<vmem>>, vector<1x144xbf16>
    %9 = vector.broadcast %8 : vector<1x144xbf16> to vector<16x144xbf16>
    %10 = arith.mulf %7, %9 : vector<16x144xbf16>
    %c16 = arith.constant 16 : index
    %c0_10 = arith.constant 0 : index
    %11 = vector.load %arg8[%c16, %c0_10] : memref<256x144xbf16, #tpu.memory_space<vmem>>, vector<16x144xbf16>
    tpu.vector_store %arg8[%c16, %c0_10], %10 {strides = array<i32>} : memref<256x144xbf16, #tpu.memory_space<vmem>>, vector<16x144xbf16>,
    %c0_11 = arith.constant 0 : index
    %c0_12 = arith.constant 0 : index
    %c2 = arith.constant 2 : index
    %12 = vector.load %arg1[%c0_11, %c0_12, %c2] : memref<1x16x170xbf16, #tpu.memory_space<vmem>>, vector<1x16x144xbf16>
    %13 = vector.shape_cast %12 : vector<1x16x144xbf16> to vector<16x144xbf16>
    %c2_13 = arith.constant 2 : index
    %c0_14 = arith.constant 0 : index
    %14 = vector.load %arg2[%c2_13, %c0_14] : memref<9x144xbf16, #tpu.memory_space<vmem>>, vector<1x144xbf16>
    %15 = vector.broadcast %14 : vector<1x144xbf16> to vector<16x144xbf16>
    %16 = arith.mulf %13, %15 : vector<16x144xbf16>
    %c32 = arith.constant 32 : index
    %c0_15 = arith.constant 0 : index
    %17 = vector.load %arg8[%c32, %c0_15] : memref<256x144xbf16, #tpu.memory_space<vmem>>, vector<16x144xbf16>
    tpu.vector_store %arg8[%c32, %c0_15], %16 {strides = array<i32>} : memref<256x144xbf16, #tpu.memory_space<vmem>>, vector<16x144xbf16>,
    %c0_16 = arith.constant 0 : index
    %c0_17 = arith.constant 0 : index
    %c12 = arith.constant 12 : index
    %18 = vector.load %arg1[%c0_16, %c0_17, %c12] : memref<1x16x170xbf16, #tpu.memory_space<vmem>>, vector<1x16x144xbf16>
    %19 = vector.shape_cast %18 : vector<1x16x144xbf16> to vector<16x144xbf16>
    %c3 = arith.constant 3 : index
    %c0_18 = arith.constant 0 : index
    %20 = vector.load %arg2[%c3, %c0_18] : memref<9x144xbf16, #tpu.memory_space<vmem>>, vector<1x144xbf16>
    %21 = vector.broadcast %20 : vector<1x144xbf16> to vector<16x144xbf16>
    %22 = arith.mulf %19, %21 : vector<16x144xbf16>
    %c48 = arith.constant 48 : index
    %c0_19 = arith.constant 0 : index
    %23 = vector.load %arg8[%c48, %c0_19] : memref<256x144xbf16, #tpu.memory_space<vmem>>, vector<16x144xbf16>
    tpu.vector_store %arg8[%c48, %c0_19], %22 {strides = array<i32>} : memref<256x144xbf16, #tpu.memory_space<vmem>>, vector<16x144xbf16>,
    %c0_20 = arith.constant 0 : index
    %c0_21 = arith.constant 0 : index
    %c13 = arith.constant 13 : index
    %24 = vector.load %arg1[%c0_20, %c0_21, %c13] : memref<1x16x170xbf16, #tpu.memory_space<vmem>>, vector<1x16x144xbf16>
    %25 = vector.shape_cast %24 : vector<1x16x144xbf16> to vector<16x144xbf16>
    %c4 = arith.constant 4 : index
    %c0_22 = arith.constant 0 : index
    %26 = vector.load %arg2[%c4, %c0_22] : memref<9x144xbf16, #tpu.memory_space<vmem>>, vector<1x144xbf16>
    %27 = vector.broadcast %26 : vector<1x144xbf16> to vector<16x144xbf16>
    %28 = arith.mulf %25, %27 : vector<16x144xbf16>
    %c64 = arith.constant 64 : index
    %c0_23 = arith.constant 0 : index
    %29 = vector.load %arg8[%c64, %c0_23] : memref<256x144xbf16, #tpu.memory_space<vmem>>, vector<16x144xbf16>
    tpu.vector_store %arg8[%c64, %c0_23], %28 {strides = array<i32>} : memref<256x144xbf16, #tpu.memory_space<vmem>>, vector<16x144xbf16>,
    %c0_24 = arith.constant 0 : index
    %c0_25 = arith.constant 0 : index
    %c14 = arith.constant 14 : index
    %30 = vector.load %arg1[%c0_24, %c0_25, %c14] : memref<1x16x170xbf16, #tpu.memory_space<vmem>>, vector<1x16x144xbf16>
    %31 = vector.shape_cast %30 : vector<1x16x144xbf16> to vector<16x144xbf16>
    %c5 = arith.constant 5 : index
    %c0_26 = arith.constant 0 : index
    %32 = vector.load %arg2[%c5, %c0_26] : memref<9x144xbf16, #tpu.memory_space<vmem>>, vector<1x144xbf16>
    %33 = vector.broadcast %32 : vector<1x144xbf16> to vector<16x144xbf16>
    %34 = arith.mulf %31, %33 : vector<16x144xbf16>
    %c80 = arith.constant 80 : index
    %c0_27 = arith.constant 0 : index
    %35 = vector.load %arg8[%c80, %c0_27] : memref<256x144xbf16, #tpu.memory_space<vmem>>, vector<16x144xbf16>
    tpu.vector_store %arg8[%c80, %c0_27], %34 {strides = array<i32>} : memref<256x144xbf16, #tpu.memory_space<vmem>>, vector<16x144xbf16>,
    %c0_28 = arith.constant 0 : index
    %c0_29 = arith.constant 0 : index
    %c24 = arith.constant 24 : index
    %36 = vector.load %arg1[%c0_28, %c0_29, %c24] : memref<1x16x170xbf16, #tpu.memory_space<vmem>>, vector<1x16x144xbf16>
    %37 = vector.shape_cast %36 : vector<1x16x144xbf16> to vector<16x144xbf16>
    %c6 = arith.constant 6 : index
    %c0_30 = arith.constant 0 : index
    %38 = vector.load %arg2[%c6, %c0_30] : memref<9x144xbf16, #tpu.memory_space<vmem>>, vector<1x144xbf16>
    %39 = vector.broadcast %38 : vector<1x144xbf16> to vector<16x144xbf16>
    %40 = arith.mulf %37, %39 : vector<16x144xbf16>
    %c96 = arith.constant 96 : index
    %c0_31 = arith.constant 0 : index
    %41 = vector.load %arg8[%c96, %c0_31] : memref<256x144xbf16, #tpu.memory_space<vmem>>, vector<16x144xbf16>
    tpu.vector_store %arg8[%c96, %c0_31], %40 {strides = array<i32>} : memref<256x144xbf16, #tpu.memory_space<vmem>>, vector<16x144xbf16>,
    %c0_32 = arith.constant 0 : index
    %c0_33 = arith.constant 0 : index
    %c25 = arith.constant 25 : index
    %42 = vector.load %arg1[%c0_32, %c0_33, %c25] : memref<1x16x170xbf16, #tpu.memory_space<vmem>>, vector<1x16x144xbf16>
    %43 = vector.shape_cast %42 : vector<1x16x144xbf16> to vector<16x144xbf16>
    %c7 = arith.constant 7 : index
    %c0_34 = arith.constant 0 : index
    %44 = vector.load %arg2[%c7, %c0_34] : memref<9x144xbf16, #tpu.memory_space<vmem>>, vector<1x144xbf16>
    %45 = vector.broadcast %44 : vector<1x144xbf16> to vector<16x144xbf16>
    %46 = arith.mulf %43, %45 : vector<16x144xbf16>
    %c112 = arith.constant 112 : index
    %c0_35 = arith.constant 0 : index
    %47 = vector.load %arg8[%c112, %c0_35] : memref<256x144xbf16, #tpu.memory_space<vmem>>, vector<16x144xbf16>
    tpu.vector_store %arg8[%c112, %c0_35], %46 {strides = array<i32>} : memref<256x144xbf16, #tpu.memory_space<vmem>>, vector<16x144xbf16>,
    %c0_36 = arith.constant 0 : index
    %c0_37 = arith.constant 0 : index
    %c26 = arith.constant 26 : index
    %48 = vector.load %arg1[%c0_36, %c0_37, %c26] : memref<1x16x170xbf16, #tpu.memory_space<vmem>>, vector<1x16x144xbf16>
    %49 = vector.shape_cast %48 : vector<1x16x144xbf16> to vector<16x144xbf16>
    %c8 = arith.constant 8 : index
    %c0_38 = arith.constant 0 : index
    %50 = vector.load %arg2[%c8, %c0_38] : memref<9x144xbf16, #tpu.memory_space<vmem>>, vector<1x144xbf16>
    %51 = vector.broadcast %50 : vector<1x144xbf16> to vector<16x144xbf16>
    %52 = arith.mulf %49, %51 : vector<16x144xbf16>
    %c128 = arith.constant 128 : index
    %c0_39 = arith.constant 0 : index
    %53 = vector.load %arg8[%c128, %c0_39] : memref<256x144xbf16, #tpu.memory_space<vmem>>, vector<16x144xbf16>
    tpu.vector_store %arg8[%c128, %c0_39], %52 {strides = array<i32>} : memref<256x144xbf16, #tpu.memory_space<vmem>>, vector<16x144xbf16>,
    %cst = arith.constant 0.000000e+00 : bf16
    %54 = vector.broadcast %cst : bf16 to vector<112x144xbf16>
    %c144 = arith.constant 144 : index
    %c0_40 = arith.constant 0 : index
    %55 = vector.load %arg8[%c144, %c0_40] : memref<256x144xbf16, #tpu.memory_space<vmem>>, vector<112x144xbf16>
    tpu.vector_store %arg8[%c144, %c0_40], %54 {strides = array<i32>} : memref<256x144xbf16, #tpu.memory_space<vmem>>, vector<112x144xbf16>,
    %c0_41 = arith.constant 0 : index
    %c0_42 = arith.constant 0 : index
    %56 = vector.load %arg3[%c0_41, %c0_42] : memref<32x256xbf16, #tpu.memory_space<vmem>>, vector<32x256xbf16>
    %c0_43 = arith.constant 0 : index
    %c0_44 = arith.constant 0 : index
    %57 = vector.load %arg8[%c0_43, %c0_44] : memref<256x144xbf16, #tpu.memory_space<vmem>>, vector<256x144xbf16>
    %cst_45 = arith.constant dense<0.000000e+00> : vector<32x144xf32>
    %58 = tpu.matmul %56, %57, %cst_45 {dimension_numbers = #tpu.dot_dimension_numbers<[1], [0], [0], [1], [0, 0, 1, 1], [], []>} : vector<32x256xbf16>, vector<256x144xbf16>, vector<32x144xf32> -> vector<32x144xf32>
    %c0_46 = arith.constant 0 : index
    %c0_47 = arith.constant 0 : index
    %59 = vector.load %arg4[%c0_46, %c0_47] : memref<32x1xf32, #tpu.memory_space<vmem>>, vector<32x1xf32>
    %60 = vector.broadcast %59 : vector<32x1xf32> to vector<32x144xf32>
    %61 = arith.addf %58, %60 : vector<32x144xf32>
    %cst_48 = arith.constant 0.000000e+00 : f32
    %62 = vector.broadcast %cst_48 : f32 to vector<32x144xf32>
    %63 = arith.maximumf %61, %62 : vector<32x144xf32>
    %cst_49 = arith.constant 0.000000e+00 : bf16
    %64 = vector.broadcast %cst_49 : bf16 to vector<32x13xbf16>
    %c0_50 = arith.constant 0 : index
    %c0_51 = arith.constant 0 : index
    %65 = vector.load %arg9[%c0_50, %c0_51] : memref<32x170xbf16, #tpu.memory_space<vmem>>, vector<32x13xbf16>
    tpu.vector_store %arg9[%c0_50, %c0_51], %64 {strides = array<i32>} : memref<32x170xbf16, #tpu.memory_space<vmem>>, vector<32x13xbf16>,
    %cst_52 = arith.constant 0.000000e+00 : bf16
    %66 = vector.broadcast %cst_52 : bf16 to vector<32x13xbf16>
    %c0_53 = arith.constant 0 : index
    %c157 = arith.constant 157 : index
    %67 = vector.load %arg9[%c0_53, %c157] : memref<32x170xbf16, #tpu.memory_space<vmem>>, vector<32x13xbf16>
    tpu.vector_store %arg9[%c0_53, %c157], %66 {strides = array<i32>} : memref<32x170xbf16, #tpu.memory_space<vmem>>, vector<32x13xbf16>,
    %68 = arith.truncf %63 : vector<32x144xf32> to vector<32x144xbf16>
    %c0_54 = arith.constant 0 : index
    %c13_55 = arith.constant 13 : index
    %69 = vector.load %arg9[%c0_54, %c13_55] : memref<32x170xbf16, #tpu.memory_space<vmem>>, vector<32x144xbf16>
    tpu.vector_store %arg9[%c0_54, %c13_55], %68 {strides = array<i32>} : memref<32x170xbf16, #tpu.memory_space<vmem>>, vector<32x144xbf16>,
    %c0_56 = arith.constant 0 : index
    %c13_57 = arith.constant 13 : index
    %70 = vector.load %arg9[%c0_56, %c13_57] : memref<32x170xbf16, #tpu.memory_space<vmem>>, vector<8x144xbf16>
    %c4_58 = arith.constant 4 : index
    %c0_59 = arith.constant 0 : index
    %71 = vector.load %arg2[%c4_58, %c0_59] : memref<9x144xbf16, #tpu.memory_space<vmem>>, vector<1x144xbf16>
    %72 = vector.broadcast %71 : vector<1x144xbf16> to vector<8x144xbf16>
    %73 = arith.mulf %70, %72 : vector<8x144xbf16>
    %c0_60 = arith.constant 0 : index
    %c0_61 = arith.constant 0 : index
    %74 = vector.load %arg10[%c0_60, %c0_61] : memref<128x144xbf16, #tpu.memory_space<vmem>>, vector<8x144xbf16>
    tpu.vector_store %arg10[%c0_60, %c0_61], %73 {strides = array<i32>} : memref<128x144xbf16, #tpu.memory_space<vmem>>, vector<8x144xbf16>,
    %c8_62 = arith.constant 8 : index
    %c12_63 = arith.constant 12 : index
    %75 = vector.load %arg9[%c8_62, %c12_63] : memref<32x170xbf16, #tpu.memory_space<vmem>>, vector<8x144xbf16>
    %c3_64 = arith.constant 3 : index
    %c0_65 = arith.constant 0 : index
    %76 = vector.load %arg2[%c3_64, %c0_65] : memref<9x144xbf16, #tpu.memory_space<vmem>>, vector<1x144xbf16>
    %77 = vector.broadcast %76 : vector<1x144xbf16> to vector<8x144xbf16>
    %78 = arith.mulf %75, %77 : vector<8x144xbf16>
    %c8_66 = arith.constant 8 : index
    %c0_67 = arith.constant 0 : index
    %79 = vector.load %arg10[%c8_66, %c0_67] : memref<128x144xbf16, #tpu.memory_space<vmem>>, vector<8x144xbf16>
    tpu.vector_store %arg10[%c8_66, %c0_67], %78 {strides = array<i32>} : memref<128x144xbf16, #tpu.memory_space<vmem>>, vector<8x144xbf16>,
    %c8_68 = arith.constant 8 : index
    %c13_69 = arith.constant 13 : index
    %80 = vector.load %arg9[%c8_68, %c13_69] : memref<32x170xbf16, #tpu.memory_space<vmem>>, vector<8x144xbf16>
    %c4_70 = arith.constant 4 : index
    %c0_71 = arith.constant 0 : index
    %81 = vector.load %arg2[%c4_70, %c0_71] : memref<9x144xbf16, #tpu.memory_space<vmem>>, vector<1x144xbf16>
    %82 = vector.broadcast %81 : vector<1x144xbf16> to vector<8x144xbf16>
    %83 = arith.mulf %80, %82 : vector<8x144xbf16>
    %c16_72 = arith.constant 16 : index
    %c0_73 = arith.constant 0 : index
    %84 = vector.load %arg10[%c16_72, %c0_73] : memref<128x144xbf16, #tpu.memory_space<vmem>>, vector<8x144xbf16>
    tpu.vector_store %arg10[%c16_72, %c0_73], %83 {strides = array<i32>} : memref<128x144xbf16, #tpu.memory_space<vmem>>, vector<8x144xbf16>,
    %c0_74 = arith.constant 0 : index
    %c14_75 = arith.constant 14 : index
    %85 = vector.load %arg9[%c0_74, %c14_75] : memref<32x170xbf16, #tpu.memory_space<vmem>>, vector<8x144xbf16>
    %c5_76 = arith.constant 5 : index
    %c0_77 = arith.constant 0 : index
    %86 = vector.load %arg2[%c5_76, %c0_77] : memref<9x144xbf16, #tpu.memory_space<vmem>>, vector<1x144xbf16>
    %87 = vector.broadcast %86 : vector<1x144xbf16> to vector<8x144xbf16>
    %88 = arith.mulf %85, %87 : vector<8x144xbf16>
    %c24_78 = arith.constant 24 : index
    %c0_79 = arith.constant 0 : index
    %89 = vector.load %arg10[%c24_78, %c0_79] : memref<128x144xbf16, #tpu.memory_space<vmem>>, vector<8x144xbf16>
    tpu.vector_store %arg10[%c24_78, %c0_79], %88 {strides = array<i32>} : memref<128x144xbf16, #tpu.memory_space<vmem>>, vector<8x144xbf16>,
    %c16_80 = arith.constant 16 : index
    %c1_81 = arith.constant 1 : index
    %90 = vector.load %arg9[%c16_80, %c1_81] : memref<32x170xbf16, #tpu.memory_space<vmem>>, vector<8x144xbf16>
    %c1_82 = arith.constant 1 : index
    %c0_83 = arith.constant 0 : index
    %91 = vector.load %arg2[%c1_82, %c0_83] : memref<9x144xbf16, #tpu.memory_space<vmem>>, vector<1x144xbf16>
    %92 = vector.broadcast %91 : vector<1x144xbf16> to vector<8x144xbf16>
    %93 = arith.mulf %90, %92 : vector<8x144xbf16>
    %c32_84 = arith.constant 32 : index
    %c0_85 = arith.constant 0 : index
    %94 = vector.load %arg10[%c32_84, %c0_85] : memref<128x144xbf16, #tpu.memory_space<vmem>>, vector<8x144xbf16>
    tpu.vector_store %arg10[%c32_84, %c0_85], %93 {strides = array<i32>} : memref<128x144xbf16, #tpu.memory_space<vmem>>, vector<8x144xbf16>,
    %c24_86 = arith.constant 24 : index
    %c0_87 = arith.constant 0 : index
    %95 = vector.load %arg9[%c24_86, %c0_87] : memref<32x170xbf16, #tpu.memory_space<vmem>>, vector<8x144xbf16>
    %c0_88 = arith.constant 0 : index
    %c0_89 = arith.constant 0 : index
    %96 = vector.load %arg2[%c0_88, %c0_89] : memref<9x144xbf16, #tpu.memory_space<vmem>>, vector<1x144xbf16>
    %97 = vector.broadcast %96 : vector<1x144xbf16> to vector<8x144xbf16>
    %98 = arith.mulf %95, %97 : vector<8x144xbf16>
    %c40 = arith.constant 40 : index
    %c0_90 = arith.constant 0 : index
    %99 = vector.load %arg10[%c40, %c0_90] : memref<128x144xbf16, #tpu.memory_space<vmem>>, vector<8x144xbf16>
    tpu.vector_store %arg10[%c40, %c0_90], %98 {strides = array<i32>} : memref<128x144xbf16, #tpu.memory_space<vmem>>, vector<8x144xbf16>,
    %c24_91 = arith.constant 24 : index
    %c1_92 = arith.constant 1 : index
    %100 = vector.load %arg9[%c24_91, %c1_92] : memref<32x170xbf16, #tpu.memory_space<vmem>>, vector<8x144xbf16>
    %c1_93 = arith.constant 1 : index
    %c0_94 = arith.constant 0 : index
    %101 = vector.load %arg2[%c1_93, %c0_94] : memref<9x144xbf16, #tpu.memory_space<vmem>>, vector<1x144xbf16>
    %102 = vector.broadcast %101 : vector<1x144xbf16> to vector<8x144xbf16>
    %103 = arith.mulf %100, %102 : vector<8x144xbf16>
    %c48_95 = arith.constant 48 : index
    %c0_96 = arith.constant 0 : index
    %104 = vector.load %arg10[%c48_95, %c0_96] : memref<128x144xbf16, #tpu.memory_space<vmem>>, vector<8x144xbf16>
    tpu.vector_store %arg10[%c48_95, %c0_96], %103 {strides = array<i32>} : memref<128x144xbf16, #tpu.memory_space<vmem>>, vector<8x144xbf16>,
    %c16_97 = arith.constant 16 : index
    %c2_98 = arith.constant 2 : index
    %105 = vector.load %arg9[%c16_97, %c2_98] : memref<32x170xbf16, #tpu.memory_space<vmem>>, vector<8x144xbf16>
    %c2_99 = arith.constant 2 : index
    %c0_100 = arith.constant 0 : index
    %106 = vector.load %arg2[%c2_99, %c0_100] : memref<9x144xbf16, #tpu.memory_space<vmem>>, vector<1x144xbf16>
    %107 = vector.broadcast %106 : vector<1x144xbf16> to vector<8x144xbf16>
    %108 = arith.mulf %105, %107 : vector<8x144xbf16>
    %c56 = arith.constant 56 : index
    %c0_101 = arith.constant 0 : index
    %109 = vector.load %arg10[%c56, %c0_101] : memref<128x144xbf16, #tpu.memory_space<vmem>>, vector<8x144xbf16>
    tpu.vector_store %arg10[%c56, %c0_101], %108 {strides = array<i32>} : memref<128x144xbf16, #tpu.memory_space<vmem>>, vector<8x144xbf16>,
    %c16_102 = arith.constant 16 : index
    %c13_103 = arith.constant 13 : index
    %110 = vector.load %arg9[%c16_102, %c13_103] : memref<32x170xbf16, #tpu.memory_space<vmem>>, vector<8x144xbf16>
    %c4_104 = arith.constant 4 : index
    %c0_105 = arith.constant 0 : index
    %111 = vector.load %arg2[%c4_104, %c0_105] : memref<9x144xbf16, #tpu.memory_space<vmem>>, vector<1x144xbf16>
    %112 = vector.broadcast %111 : vector<1x144xbf16> to vector<8x144xbf16>
    %113 = arith.mulf %110, %112 : vector<8x144xbf16>
    %c64_106 = arith.constant 64 : index
    %c0_107 = arith.constant 0 : index
    %114 = vector.load %arg10[%c64_106, %c0_107] : memref<128x144xbf16, #tpu.memory_space<vmem>>, vector<8x144xbf16>
    tpu.vector_store %arg10[%c64_106, %c0_107], %113 {strides = array<i32>} : memref<128x144xbf16, #tpu.memory_space<vmem>>, vector<8x144xbf16>,
    %c24_108 = arith.constant 24 : index
    %c12_109 = arith.constant 12 : index
    %115 = vector.load %arg9[%c24_108, %c12_109] : memref<32x170xbf16, #tpu.memory_space<vmem>>, vector<8x144xbf16>
    %c3_110 = arith.constant 3 : index
    %c0_111 = arith.constant 0 : index
    %116 = vector.load %arg2[%c3_110, %c0_111] : memref<9x144xbf16, #tpu.memory_space<vmem>>, vector<1x144xbf16>
    %117 = vector.broadcast %116 : vector<1x144xbf16> to vector<8x144xbf16>
    %118 = arith.mulf %115, %117 : vector<8x144xbf16>
    %c72 = arith.constant 72 : index
    %c0_112 = arith.constant 0 : index
    %119 = vector.load %arg10[%c72, %c0_112] : memref<128x144xbf16, #tpu.memory_space<vmem>>, vector<8x144xbf16>
    tpu.vector_store %arg10[%c72, %c0_112], %118 {strides = array<i32>} : memref<128x144xbf16, #tpu.memory_space<vmem>>, vector<8x144xbf16>,
    %c24_113 = arith.constant 24 : index
    %c13_114 = arith.constant 13 : index
    %120 = vector.load %arg9[%c24_113, %c13_114] : memref<32x170xbf16, #tpu.memory_space<vmem>>, vector<8x144xbf16>
    %c4_115 = arith.constant 4 : index
    %c0_116 = arith.constant 0 : index
    %121 = vector.load %arg2[%c4_115, %c0_116] : memref<9x144xbf16, #tpu.memory_space<vmem>>, vector<1x144xbf16>
    %122 = vector.broadcast %121 : vector<1x144xbf16> to vector<8x144xbf16>
    %123 = arith.mulf %120, %122 : vector<8x144xbf16>
    %c80_117 = arith.constant 80 : index
    %c0_118 = arith.constant 0 : index
    %124 = vector.load %arg10[%c80_117, %c0_118] : memref<128x144xbf16, #tpu.memory_space<vmem>>, vector<8x144xbf16>
    tpu.vector_store %arg10[%c80_117, %c0_118], %123 {strides = array<i32>} : memref<128x144xbf16, #tpu.memory_space<vmem>>, vector<8x144xbf16>,
    %c16_119 = arith.constant 16 : index
    %c14_120 = arith.constant 14 : index
    %125 = vector.load %arg9[%c16_119, %c14_120] : memref<32x170xbf16, #tpu.memory_space<vmem>>, vector<8x144xbf16>
    %c5_121 = arith.constant 5 : index
    %c0_122 = arith.constant 0 : index
    %126 = vector.load %arg2[%c5_121, %c0_122] : memref<9x144xbf16, #tpu.memory_space<vmem>>, vector<1x144xbf16>
    %127 = vector.broadcast %126 : vector<1x144xbf16> to vector<8x144xbf16>
    %128 = arith.mulf %125, %127 : vector<8x144xbf16>
    %c88 = arith.constant 88 : index
    %c0_123 = arith.constant 0 : index
    %129 = vector.load %arg10[%c88, %c0_123] : memref<128x144xbf16, #tpu.memory_space<vmem>>, vector<8x144xbf16>
    tpu.vector_store %arg10[%c88, %c0_123], %128 {strides = array<i32>} : memref<128x144xbf16, #tpu.memory_space<vmem>>, vector<8x144xbf16>,
    %c0_124 = arith.constant 0 : index
    %c25_125 = arith.constant 25 : index
    %130 = vector.load %arg9[%c0_124, %c25_125] : memref<32x170xbf16, #tpu.memory_space<vmem>>, vector<8x144xbf16>
    %c7_126 = arith.constant 7 : index
    %c0_127 = arith.constant 0 : index
    %131 = vector.load %arg2[%c7_126, %c0_127] : memref<9x144xbf16, #tpu.memory_space<vmem>>, vector<1x144xbf16>
    %132 = vector.broadcast %131 : vector<1x144xbf16> to vector<8x144xbf16>
    %133 = arith.mulf %130, %132 : vector<8x144xbf16>
    %c96_128 = arith.constant 96 : index
    %c0_129 = arith.constant 0 : index
    %134 = vector.load %arg10[%c96_128, %c0_129] : memref<128x144xbf16, #tpu.memory_space<vmem>>, vector<8x144xbf16>
    tpu.vector_store %arg10[%c96_128, %c0_129], %133 {strides = array<i32>} : memref<128x144xbf16, #tpu.memory_space<vmem>>, vector<8x144xbf16>,
    %c8_130 = arith.constant 8 : index
    %c24_131 = arith.constant 24 : index
    %135 = vector.load %arg9[%c8_130, %c24_131] : memref<32x170xbf16, #tpu.memory_space<vmem>>, vector<8x144xbf16>
    %c6_132 = arith.constant 6 : index
    %c0_133 = arith.constant 0 : index
    %136 = vector.load %arg2[%c6_132, %c0_133] : memref<9x144xbf16, #tpu.memory_space<vmem>>, vector<1x144xbf16>
    %137 = vector.broadcast %136 : vector<1x144xbf16> to vector<8x144xbf16>
    %138 = arith.mulf %135, %137 : vector<8x144xbf16>
    %c104 = arith.constant 104 : index
    %c0_134 = arith.constant 0 : index
    %139 = vector.load %arg10[%c104, %c0_134] : memref<128x144xbf16, #tpu.memory_space<vmem>>, vector<8x144xbf16>
    tpu.vector_store %arg10[%c104, %c0_134], %138 {strides = array<i32>} : memref<128x144xbf16, #tpu.memory_space<vmem>>, vector<8x144xbf16>,
    %c8_135 = arith.constant 8 : index
    %c25_136 = arith.constant 25 : index
    %140 = vector.load %arg9[%c8_135, %c25_136] : memref<32x170xbf16, #tpu.memory_space<vmem>>, vector<8x144xbf16>
    %c7_137 = arith.constant 7 : index
    %c0_138 = arith.constant 0 : index
    %141 = vector.load %arg2[%c7_137, %c0_138] : memref<9x144xbf16, #tpu.memory_space<vmem>>, vector<1x144xbf16>
    %142 = vector.broadcast %141 : vector<1x144xbf16> to vector<8x144xbf16>
    %143 = arith.mulf %140, %142 : vector<8x144xbf16>
    %c112_139 = arith.constant 112 : index
    %c0_140 = arith.constant 0 : index
    %144 = vector.load %arg10[%c112_139, %c0_140] : memref<128x144xbf16, #tpu.memory_space<vmem>>, vector<8x144xbf16>
    tpu.vector_store %arg10[%c112_139, %c0_140], %143 {strides = array<i32>} : memref<128x144xbf16, #tpu.memory_space<vmem>>, vector<8x144xbf16>,
    %c0_141 = arith.constant 0 : index
    %c26_142 = arith.constant 26 : index
    %145 = vector.load %arg9[%c0_141, %c26_142] : memref<32x170xbf16, #tpu.memory_space<vmem>>, vector<8x144xbf16>
    %c8_143 = arith.constant 8 : index
    %c0_144 = arith.constant 0 : index
    %146 = vector.load %arg2[%c8_143, %c0_144] : memref<9x144xbf16, #tpu.memory_space<vmem>>, vector<1x144xbf16>
    %147 = vector.broadcast %146 : vector<1x144xbf16> to vector<8x144xbf16>
    %148 = arith.mulf %145, %147 : vector<8x144xbf16>
    %c120 = arith.constant 120 : index
    %c0_145 = arith.constant 0 : index
    %149 = vector.load %arg10[%c120, %c0_145] : memref<128x144xbf16, #tpu.memory_space<vmem>>, vector<8x144xbf16>
    tpu.vector_store %arg10[%c120, %c0_145], %148 {strides = array<i32>} : memref<128x144xbf16, #tpu.memory_space<vmem>>, vector<8x144xbf16>,
    %c0_146 = arith.constant 0 : index
    %c0_147 = arith.constant 0 : index
    %150 = vector.load %arg5[%c0_146, %c0_147] : memref<32x128xbf16, #tpu.memory_space<vmem>>, vector<32x128xbf16>
    %c0_148 = arith.constant 0 : index
    %c0_149 = arith.constant 0 : index
    %151 = vector.load %arg10[%c0_148, %c0_149] : memref<128x144xbf16, #tpu.memory_space<vmem>>, vector<128x144xbf16>
    %cst_150 = arith.constant dense<0.000000e+00> : vector<32x144xf32>
    %152 = tpu.matmul %150, %151, %cst_150 {dimension_numbers = #tpu.dot_dimension_numbers<[1], [0], [0], [1], [0, 0, 1, 1], [], []>} : vector<32x128xbf16>, vector<128x144xbf16>, vector<32x144xf32> -> vector<32x144xf32>
    %c0_151 = arith.constant 0 : index
    %c0_152 = arith.constant 0 : index
    %153 = vector.load %arg6[%c0_151, %c0_152] : memref<32x1xf32, #tpu.memory_space<vmem>>, vector<32x1xf32>
    %154 = vector.broadcast %153 : vector<32x1xf32> to vector<32x144xf32>
    %155 = arith.addf %152, %154 : vector<32x144xf32>
    %156 = arith.truncf %155 : vector<32x144xf32> to vector<32x144xbf16>
    %c0_153 = arith.constant 0 : index
    %c0_154 = arith.constant 0 : index
    %c0_155 = arith.constant 0 : index
    %157 = vector.load %arg7[%c0_153, %c0_154, %c0_155] : memref<1x32x144xbf16, #tpu.memory_space<vmem>>, vector<1x32x144xbf16>
    %158 = vector.shape_cast %157 : vector<1x32x144xbf16> to vector<32x144xbf16>
    %159 = vector.shape_cast %156 : vector<32x144xbf16> to vector<1x32x144xbf16>
    tpu.vector_store %arg7[%c0_153, %c0_154, %c0_155], %159 {strides = array<i32>} : memref<1x32x144xbf16, #tpu.memory_space<vmem>>, vector<1x32x144xbf16>,
    return
  }
  func.func @transform_0(%arg0: i32) -> (i32, i32, i32) {
    %c0_i32 = arith.constant 0 : i32
    %c0_i32_0 = arith.constant 0 : i32
    %c0_i32_1 = arith.constant 0 : i32
    return %arg0, %c0_i32, %c0_i32_0 : i32, i32, i32
  }
  func.func @transform_1(%arg0: i32) -> (i32, i32) {
    %c0_i32 = arith.constant 0 : i32
    %c0_i32_0 = arith.constant 0 : i32
    %c0_i32_1 = arith.constant 0 : i32
    return %c0_i32, %c0_i32_0 : i32, i32
  }
  func.func @transform_2(%arg0: i32) -> (i32, i32) {
    %c0_i32 = arith.constant 0 : i32
    %c0_i32_0 = arith.constant 0 : i32
    %c0_i32_1 = arith.constant 0 : i32
    return %c0_i32, %c0_i32_0 : i32, i32
  }
  func.func @transform_3(%arg0: i32) -> (i32, i32) {
    %c0_i32 = arith.constant 0 : i32
    %c0_i32_0 = arith.constant 0 : i32
    %c0_i32_1 = arith.constant 0 : i32
    return %c0_i32, %c0_i32_0 : i32, i32
  }
  func.func @transform_4(%arg0: i32) -> (i32, i32) {
    %c0_i32 = arith.constant 0 : i32
    %c0_i32_0 = arith.constant 0 : i32
    %c0_i32_1 = arith.constant 0 : i32
    return %c0_i32, %c0_i32_0 : i32, i32
  }
  func.func @transform_5(%arg0: i32) -> (i32, i32) {
    %c0_i32 = arith.constant 0 : i32
    %c0_i32_0 = arith.constant 0 : i32
    %c0_i32_1 = arith.constant 0 : i32
    return %c0_i32, %c0_i32_0 : i32, i32
  }
  func.func @transform_6(%arg0: i32) -> (i32, i32, i32) {
    %c0_i32 = arith.constant 0 : i32
    %c0_i32_0 = arith.constant 0 : i32
    %c0_i32_1 = arith.constant 0 : i32
    return %arg0, %c0_i32, %c0_i32_0 : i32, i32, i32
  }
}

module attributes {stable_mosaic.version = 11 : i64} {
  func.func @kernel(%arg0: i32, %arg1: memref<1x8x626xbf16, #tpu.memory_space<vmem>>, %arg2: memref<9x576xbf16, #tpu.memory_space<vmem>>, %arg3: memref<12x128xbf16, #tpu.memory_space<vmem>>, %arg4: memref<12x1xf32, #tpu.memory_space<vmem>>, %arg5: memref<1x12x576xf32, #tpu.memory_space<vmem>>, %arg6: memref<128x576xbf16, #tpu.memory_space<vmem>>) attributes {dimension_semantics = [#tpu.dimension_semantics<parallel>], iteration_bounds = array<i64: 2>, scalar_prefetch = 0 : i64, scratch_operands = 1 : i64, tpu.core_type = #tpu.core_type<tc>, window_params = [{transform_indices = @transform_0, window_bounds = array<i64: 1, 8, 626>}, {pipeline_mode = #tpu.pipeline_mode<synchronous>, transform_indices = @transform_1, window_bounds = array<i64: 9, 576>}, {pipeline_mode = #tpu.pipeline_mode<synchronous>, transform_indices = @transform_2, window_bounds = array<i64: 12, 128>}, {pipeline_mode = #tpu.pipeline_mode<synchronous>, transform_indices = @transform_3, window_bounds = array<i64: 12, 1>}, {transform_indices = @transform_4, window_bounds = array<i64: 1, 12, 576>}]} {
    %c0 = arith.constant 0 : index
    %c0_0 = arith.constant 0 : index
    %c0_1 = arith.constant 0 : index
    %0 = vector.load %arg1[%c0, %c0_0, %c0_1] : memref<1x8x626xbf16, #tpu.memory_space<vmem>>, vector<1x8x576xbf16>
    %1 = vector.shape_cast %0 : vector<1x8x576xbf16> to vector<8x576xbf16>
    %c0_2 = arith.constant 0 : index
    %c0_3 = arith.constant 0 : index
    %2 = vector.load %arg2[%c0_2, %c0_3] : memref<9x576xbf16, #tpu.memory_space<vmem>>, vector<1x576xbf16>
    %3 = vector.broadcast %2 : vector<1x576xbf16> to vector<8x576xbf16>
    %4 = arith.mulf %1, %3 : vector<8x576xbf16>
    %c0_4 = arith.constant 0 : index
    %c0_5 = arith.constant 0 : index
    %5 = vector.load %arg6[%c0_4, %c0_5] : memref<128x576xbf16, #tpu.memory_space<vmem>>, vector<8x576xbf16>
    tpu.vector_store %arg6[%c0_4, %c0_5], %4 {strides = array<i32>} : memref<128x576xbf16, #tpu.memory_space<vmem>>, vector<8x576xbf16>,
    %c0_6 = arith.constant 0 : index
    %c0_7 = arith.constant 0 : index
    %c1 = arith.constant 1 : index
    %6 = vector.load %arg1[%c0_6, %c0_7, %c1] : memref<1x8x626xbf16, #tpu.memory_space<vmem>>, vector<1x8x576xbf16>
    %7 = vector.shape_cast %6 : vector<1x8x576xbf16> to vector<8x576xbf16>
    %c1_8 = arith.constant 1 : index
    %c0_9 = arith.constant 0 : index
    %8 = vector.load %arg2[%c1_8, %c0_9] : memref<9x576xbf16, #tpu.memory_space<vmem>>, vector<1x576xbf16>
    %9 = vector.broadcast %8 : vector<1x576xbf16> to vector<8x576xbf16>
    %10 = arith.mulf %7, %9 : vector<8x576xbf16>
    %c8 = arith.constant 8 : index
    %c0_10 = arith.constant 0 : index
    %11 = vector.load %arg6[%c8, %c0_10] : memref<128x576xbf16, #tpu.memory_space<vmem>>, vector<8x576xbf16>
    tpu.vector_store %arg6[%c8, %c0_10], %10 {strides = array<i32>} : memref<128x576xbf16, #tpu.memory_space<vmem>>, vector<8x576xbf16>,
    %c0_11 = arith.constant 0 : index
    %c0_12 = arith.constant 0 : index
    %c2 = arith.constant 2 : index
    %12 = vector.load %arg1[%c0_11, %c0_12, %c2] : memref<1x8x626xbf16, #tpu.memory_space<vmem>>, vector<1x8x576xbf16>
    %13 = vector.shape_cast %12 : vector<1x8x576xbf16> to vector<8x576xbf16>
    %c2_13 = arith.constant 2 : index
    %c0_14 = arith.constant 0 : index
    %14 = vector.load %arg2[%c2_13, %c0_14] : memref<9x576xbf16, #tpu.memory_space<vmem>>, vector<1x576xbf16>
    %15 = vector.broadcast %14 : vector<1x576xbf16> to vector<8x576xbf16>
    %16 = arith.mulf %13, %15 : vector<8x576xbf16>
    %c16 = arith.constant 16 : index
    %c0_15 = arith.constant 0 : index
    %17 = vector.load %arg6[%c16, %c0_15] : memref<128x576xbf16, #tpu.memory_space<vmem>>, vector<8x576xbf16>
    tpu.vector_store %arg6[%c16, %c0_15], %16 {strides = array<i32>} : memref<128x576xbf16, #tpu.memory_space<vmem>>, vector<8x576xbf16>,
    %c0_16 = arith.constant 0 : index
    %c0_17 = arith.constant 0 : index
    %c24 = arith.constant 24 : index
    %18 = vector.load %arg1[%c0_16, %c0_17, %c24] : memref<1x8x626xbf16, #tpu.memory_space<vmem>>, vector<1x8x576xbf16>
    %19 = vector.shape_cast %18 : vector<1x8x576xbf16> to vector<8x576xbf16>
    %c3 = arith.constant 3 : index
    %c0_18 = arith.constant 0 : index
    %20 = vector.load %arg2[%c3, %c0_18] : memref<9x576xbf16, #tpu.memory_space<vmem>>, vector<1x576xbf16>
    %21 = vector.broadcast %20 : vector<1x576xbf16> to vector<8x576xbf16>
    %22 = arith.mulf %19, %21 : vector<8x576xbf16>
    %c24_19 = arith.constant 24 : index
    %c0_20 = arith.constant 0 : index
    %23 = vector.load %arg6[%c24_19, %c0_20] : memref<128x576xbf16, #tpu.memory_space<vmem>>, vector<8x576xbf16>
    tpu.vector_store %arg6[%c24_19, %c0_20], %22 {strides = array<i32>} : memref<128x576xbf16, #tpu.memory_space<vmem>>, vector<8x576xbf16>,
    %c0_21 = arith.constant 0 : index
    %c0_22 = arith.constant 0 : index
    %c25 = arith.constant 25 : index
    %24 = vector.load %arg1[%c0_21, %c0_22, %c25] : memref<1x8x626xbf16, #tpu.memory_space<vmem>>, vector<1x8x576xbf16>
    %25 = vector.shape_cast %24 : vector<1x8x576xbf16> to vector<8x576xbf16>
    %c4 = arith.constant 4 : index
    %c0_23 = arith.constant 0 : index
    %26 = vector.load %arg2[%c4, %c0_23] : memref<9x576xbf16, #tpu.memory_space<vmem>>, vector<1x576xbf16>
    %27 = vector.broadcast %26 : vector<1x576xbf16> to vector<8x576xbf16>
    %28 = arith.mulf %25, %27 : vector<8x576xbf16>
    %c32 = arith.constant 32 : index
    %c0_24 = arith.constant 0 : index
    %29 = vector.load %arg6[%c32, %c0_24] : memref<128x576xbf16, #tpu.memory_space<vmem>>, vector<8x576xbf16>
    tpu.vector_store %arg6[%c32, %c0_24], %28 {strides = array<i32>} : memref<128x576xbf16, #tpu.memory_space<vmem>>, vector<8x576xbf16>,
    %c0_25 = arith.constant 0 : index
    %c0_26 = arith.constant 0 : index
    %c26 = arith.constant 26 : index
    %30 = vector.load %arg1[%c0_25, %c0_26, %c26] : memref<1x8x626xbf16, #tpu.memory_space<vmem>>, vector<1x8x576xbf16>
    %31 = vector.shape_cast %30 : vector<1x8x576xbf16> to vector<8x576xbf16>
    %c5 = arith.constant 5 : index
    %c0_27 = arith.constant 0 : index
    %32 = vector.load %arg2[%c5, %c0_27] : memref<9x576xbf16, #tpu.memory_space<vmem>>, vector<1x576xbf16>
    %33 = vector.broadcast %32 : vector<1x576xbf16> to vector<8x576xbf16>
    %34 = arith.mulf %31, %33 : vector<8x576xbf16>
    %c40 = arith.constant 40 : index
    %c0_28 = arith.constant 0 : index
    %35 = vector.load %arg6[%c40, %c0_28] : memref<128x576xbf16, #tpu.memory_space<vmem>>, vector<8x576xbf16>
    tpu.vector_store %arg6[%c40, %c0_28], %34 {strides = array<i32>} : memref<128x576xbf16, #tpu.memory_space<vmem>>, vector<8x576xbf16>,
    %c0_29 = arith.constant 0 : index
    %c0_30 = arith.constant 0 : index
    %c48 = arith.constant 48 : index
    %36 = vector.load %arg1[%c0_29, %c0_30, %c48] : memref<1x8x626xbf16, #tpu.memory_space<vmem>>, vector<1x8x576xbf16>
    %37 = vector.shape_cast %36 : vector<1x8x576xbf16> to vector<8x576xbf16>
    %c6 = arith.constant 6 : index
    %c0_31 = arith.constant 0 : index
    %38 = vector.load %arg2[%c6, %c0_31] : memref<9x576xbf16, #tpu.memory_space<vmem>>, vector<1x576xbf16>
    %39 = vector.broadcast %38 : vector<1x576xbf16> to vector<8x576xbf16>
    %40 = arith.mulf %37, %39 : vector<8x576xbf16>
    %c48_32 = arith.constant 48 : index
    %c0_33 = arith.constant 0 : index
    %41 = vector.load %arg6[%c48_32, %c0_33] : memref<128x576xbf16, #tpu.memory_space<vmem>>, vector<8x576xbf16>
    tpu.vector_store %arg6[%c48_32, %c0_33], %40 {strides = array<i32>} : memref<128x576xbf16, #tpu.memory_space<vmem>>, vector<8x576xbf16>,
    %c0_34 = arith.constant 0 : index
    %c0_35 = arith.constant 0 : index
    %c49 = arith.constant 49 : index
    %42 = vector.load %arg1[%c0_34, %c0_35, %c49] : memref<1x8x626xbf16, #tpu.memory_space<vmem>>, vector<1x8x576xbf16>
    %43 = vector.shape_cast %42 : vector<1x8x576xbf16> to vector<8x576xbf16>
    %c7 = arith.constant 7 : index
    %c0_36 = arith.constant 0 : index
    %44 = vector.load %arg2[%c7, %c0_36] : memref<9x576xbf16, #tpu.memory_space<vmem>>, vector<1x576xbf16>
    %45 = vector.broadcast %44 : vector<1x576xbf16> to vector<8x576xbf16>
    %46 = arith.mulf %43, %45 : vector<8x576xbf16>
    %c56 = arith.constant 56 : index
    %c0_37 = arith.constant 0 : index
    %47 = vector.load %arg6[%c56, %c0_37] : memref<128x576xbf16, #tpu.memory_space<vmem>>, vector<8x576xbf16>
    tpu.vector_store %arg6[%c56, %c0_37], %46 {strides = array<i32>} : memref<128x576xbf16, #tpu.memory_space<vmem>>, vector<8x576xbf16>,
    %c0_38 = arith.constant 0 : index
    %c0_39 = arith.constant 0 : index
    %c50 = arith.constant 50 : index
    %48 = vector.load %arg1[%c0_38, %c0_39, %c50] : memref<1x8x626xbf16, #tpu.memory_space<vmem>>, vector<1x8x576xbf16>
    %49 = vector.shape_cast %48 : vector<1x8x576xbf16> to vector<8x576xbf16>
    %c8_40 = arith.constant 8 : index
    %c0_41 = arith.constant 0 : index
    %50 = vector.load %arg2[%c8_40, %c0_41] : memref<9x576xbf16, #tpu.memory_space<vmem>>, vector<1x576xbf16>
    %51 = vector.broadcast %50 : vector<1x576xbf16> to vector<8x576xbf16>
    %52 = arith.mulf %49, %51 : vector<8x576xbf16>
    %c64 = arith.constant 64 : index
    %c0_42 = arith.constant 0 : index
    %53 = vector.load %arg6[%c64, %c0_42] : memref<128x576xbf16, #tpu.memory_space<vmem>>, vector<8x576xbf16>
    tpu.vector_store %arg6[%c64, %c0_42], %52 {strides = array<i32>} : memref<128x576xbf16, #tpu.memory_space<vmem>>, vector<8x576xbf16>,
    %cst = arith.constant 0.000000e+00 : bf16
    %54 = vector.broadcast %cst : bf16 to vector<56x576xbf16>
    %c72 = arith.constant 72 : index
    %c0_43 = arith.constant 0 : index
    %55 = vector.load %arg6[%c72, %c0_43] : memref<128x576xbf16, #tpu.memory_space<vmem>>, vector<56x576xbf16>
    tpu.vector_store %arg6[%c72, %c0_43], %54 {strides = array<i32>} : memref<128x576xbf16, #tpu.memory_space<vmem>>, vector<56x576xbf16>,
    %c0_44 = arith.constant 0 : index
    %c0_45 = arith.constant 0 : index
    %56 = vector.load %arg3[%c0_44, %c0_45] : memref<12x128xbf16, #tpu.memory_space<vmem>>, vector<12x128xbf16>
    %c0_46 = arith.constant 0 : index
    %c0_47 = arith.constant 0 : index
    %57 = vector.load %arg6[%c0_46, %c0_47] : memref<128x576xbf16, #tpu.memory_space<vmem>>, vector<128x576xbf16>
    %cst_48 = arith.constant dense<0.000000e+00> : vector<12x576xf32>
    %58 = tpu.matmul %56, %57, %cst_48 {dimension_numbers = #tpu.dot_dimension_numbers<[1], [0], [0], [1], [0, 0, 1, 1], [], []>} : vector<12x128xbf16>, vector<128x576xbf16>, vector<12x576xf32> -> vector<12x576xf32>
    %c0_49 = arith.constant 0 : index
    %c0_50 = arith.constant 0 : index
    %59 = vector.load %arg4[%c0_49, %c0_50] : memref<12x1xf32, #tpu.memory_space<vmem>>, vector<12x1xf32>
    %60 = vector.broadcast %59 : vector<12x1xf32> to vector<12x576xf32>
    %61 = arith.addf %58, %60 : vector<12x576xf32>
    %62 = math.tanh %61 : vector<12x576xf32>
    %c0_51 = arith.constant 0 : index
    %c0_52 = arith.constant 0 : index
    %c0_53 = arith.constant 0 : index
    %63 = vector.load %arg5[%c0_51, %c0_52, %c0_53] : memref<1x12x576xf32, #tpu.memory_space<vmem>>, vector<1x12x576xf32>
    %64 = vector.shape_cast %63 : vector<1x12x576xf32> to vector<12x576xf32>
    %65 = vector.shape_cast %62 : vector<12x576xf32> to vector<1x12x576xf32>
    tpu.vector_store %arg5[%c0_51, %c0_52, %c0_53], %65 {strides = array<i32>} : memref<1x12x576xf32, #tpu.memory_space<vmem>>, vector<1x12x576xf32>,
    return
  }
  func.func @transform_0(%arg0: i32) -> (i32, i32, i32) {
    %c0_i32 = arith.constant 0 : i32
    %c0_i32_0 = arith.constant 0 : i32
    %c0_i32_1 = arith.constant 0 : i32
    return %arg0, %c0_i32, %c0_i32_0 : i32, i32, i32
  }
  func.func @transform_1(%arg0: i32) -> (i32, i32) {
    %c0_i32 = arith.constant 0 : i32
    %c0_i32_0 = arith.constant 0 : i32
    %c0_i32_1 = arith.constant 0 : i32
    return %c0_i32, %c0_i32_0 : i32, i32
  }
  func.func @transform_2(%arg0: i32) -> (i32, i32) {
    %c0_i32 = arith.constant 0 : i32
    %c0_i32_0 = arith.constant 0 : i32
    %c0_i32_1 = arith.constant 0 : i32
    return %c0_i32, %c0_i32_0 : i32, i32
  }
  func.func @transform_3(%arg0: i32) -> (i32, i32) {
    %c0_i32 = arith.constant 0 : i32
    %c0_i32_0 = arith.constant 0 : i32
    %c0_i32_1 = arith.constant 0 : i32
    return %c0_i32, %c0_i32_0 : i32, i32
  }
  func.func @transform_4(%arg0: i32) -> (i32, i32, i32) {
    %c0_i32 = arith.constant 0 : i32
    %c0_i32_0 = arith.constant 0 : i32
    %c0_i32_1 = arith.constant 0 : i32
    return %arg0, %c0_i32, %c0_i32_0 : i32, i32, i32
  }
}

</mosaic_0001>

<bundles_post_ra>
// kernel: _lambda_.4
= control target key start
LH: loop header
LB: loop body
LE: loop exit
PB: predicated region body
PF: predicated region fallthrough
CT: control target
= control target key end

     0   :  { %11 = vsyncpa [#allocation6], 0  ;;  %s2167_s0 = inlined_call_operand.vmem [shape: bf16[2,24,50], index: 0, kind: input, shape index: {}]   ;;  %s2168_s1 = inlined_call_operand.hbm [shape: bf16[9,36], index: 1, kind: input, shape index: {}]   ;;  %s2169_s2 = inlined_call_operand.hbm [shape: bf16[24,256], index: 2, kind: input, shape index: {}]   ;;  %s2170_s3 = inlined_call_operand.hbm [shape: f32[24,1], index: 3, kind: input, shape index: {}]   ;;  %s2171_s4 = inlined_call_operand.hbm [shape: bf16[24,256], index: 4, kind: input, shape index: {}]   ;;  %s2172_s5 = inlined_call_operand.hbm [shape: f32[24,1], index: 5, kind: input, shape index: {}]   ;;  %s2173_s6 = inlined_call_operand.vmem [shape: bf16[2,24,36], index: 6, kind: output, shape index: {}]  }
   0x1   :  { %12 = vsyncpa [#allocation8], 0 }
   0x2   :  { %13 = vsyncpa [#allocation11], 0  ;;  %s1801_s21 = smov 0  }
   0x3 LB: > { %s1740_s22 = smov [#allocation7]   ;;  %s1807_s24 = sadd.s32 4294967295, %s1738_s21   ;;  %s1738_s21 = sphi %s1801_s21, %s19_s21  }
   0x4   : > { %s206_s23 = sshll.u32 %s1740_s22, 4  ;;  %p1340_p0 = scmp.ge.s32.totalorder %s1738_s21, 1  ;;  %s1812_s23 = int_to_ptr.vmem [resolvable:$true] %s206_s23 }
   0x5   : > { %p181_p1 = scmp.lt.s32.totalorder %s1738_s21, 3  ;;  %p2174_p2 = scmp.eq.s32.totalorder %s1807_s24, 0 }
   0x6   : > { %s1741_s26 = smov [#allocation10]   ;;  %s1742_s29 = smov [#allocation5]  }
   0x7   : > { %p1814_p3 = pnand %p1340_p0, %p181_p1  ;;  %s232_s27 = sshll.u32 %s1741_s26, 4  ;;  %s1820_s27 = int_to_ptr.vmem [resolvable:$true] %s232_s27 }
   0x8   : > { %s193_s30 = sshll.u32 %s1742_s29, 4  ;;  %s1580_s9 = scalar_lea.hbm %s2169_s2, 384  ;;  %s1828_s30 = int_to_ptr.vmem [resolvable:$true] %s193_s30 }
   0x9   : > { %s2176_s25 = scalar_select %p1814_p3, 1, 0 }
   0xa   : > { %p1508_p4 = pneg %p1814_p3  ;;  %p1581_p6 = scmp.ne.s32.totalorder %s2169_s2, %s1580_s9 }
   0xb   : > { %p1587_p10 = scmp.lt.u32.totalorder %s1580_s9, %s2169_s2 }
   0xc   : > { %p1824_p5 = pnand %p2174_p2, %p1508_p4 }
   0xe   : > { %p1838_p7 = pneg %p1824_p5 }
  0x10   : > { %p1583_p8 = pnand %p1838_p7, %p1581_p6 }
  0x12   : > { %p1584_p9 = pneg %p1583_p8 }
  0x14   : > { %p1589_p11 = pnand %p1587_p10, %p1584_p9 }
  0x16   : > { %1592 = shalt.err (!%p1589_p11)
}
  0x17   : > { %s1593_s15 = scalar_lea.vmem %s1812_s23, 384  ;;  %p1601_p1 = scmp.lt.s32.totalorder %s1812_s23, %s1812_s23 }
  0x18   : > { %p1594_p12 = scmp.ne.s32.totalorder %s1812_s23, %s1593_s15  ;;  %p1602_p4 = scmp.lt.s32.totalorder %s1593_s15, %s1593_s15 }
  0x1a   : > { %p1596_p13 = pnand %p1594_p12, %p1838_p7  ;;  %p1603_p6 = por %p1602_p4, %p1601_p1 }
  0x1c   : > { %p1597_p0 = pneg %p1596_p13 }
  0x1e   : > { %p1604_p8 = pnand %p1603_p6, %p1597_p0 }
  0x20   : > { %1607 = shalt.err (!%p1604_p8)
}
  0x21   : > { %s1743_s16 = smov 128   ;;  %s1744_s17 = smov 8  }
  0x22   : > { %1514 = dma.hbm_to_vmem [thread:$0]  (!%p1824_p5), %s2169_s2, 384, %s1812_s23, [#allocation8], %s1743_s16, %s1743_s16, %s1744_s17  }
  0x23   : > { %s1608_s26 = scalar_lea.hbm %s2171_s4, 384 }
  0x24   : > { %p1609_p9 = scmp.ne.s32.totalorder %s2171_s4, %s1608_s26  ;;  %p1615_p12 = scmp.lt.u32.totalorder %s1608_s26, %s2171_s4 }
  0x26   : > { %p1611_p10 = pnand %p1609_p9, %p1838_p7 }
  0x28   : > { %p1612_p11 = pneg %p1611_p10 }
  0x2a   : > { %p1617_p13 = pnand %p1615_p12, %p1612_p11 }
  0x2c   : > { %1620 = shalt.err (!%p1617_p13)
}
  0x2d   : > { %s1621_s23 = scalar_lea.vmem %s1820_s27, 384  ;;  %p1629_p6 = scmp.lt.s32.totalorder %s1820_s27, %s1820_s27 }
  0x2e   : > { %p1622_p0 = scmp.ne.s32.totalorder %s1820_s27, %s1621_s23  ;;  %p1630_p8 = scmp.lt.s32.totalorder %s1621_s23, %s1621_s23 }
  0x30   : > { %p1624_p1 = pnand %p1622_p0, %p1838_p7  ;;  %p1631_p9 = por %p1630_p8, %p1629_p6 }
  0x32   : > { %p1625_p4 = pneg %p1624_p1 }
  0x34   : > { %p1632_p10 = pnand %p1631_p9, %p1625_p4 }
  0x36   : > { %1635 = shalt.err (!%p1632_p10)
}
  0x37   : > { %1520 = dma.hbm_to_vmem [thread:$0]  (!%p1824_p5), %s2171_s4, 384, %s1820_s27, [#allocation11], %s1743_s16, %s1743_s16, %s1744_s17  }
  0x38   : > { %s1636_s15 = scalar_lea.hbm %s2168_s1, 128 }
  0x39   : > { %p1637_p11 = scmp.ne.s32.totalorder %s2168_s1, %s1636_s15  ;;  %p1643_p0 = scmp.lt.u32.totalorder %s1636_s15, %s2168_s1 }
  0x3b   : > { %p1639_p12 = pnand %p1637_p11, %p1838_p7 }
  0x3d   : > { %p1640_p13 = pneg %p1639_p12 }
  0x3f   : > { %p1645_p1 = pnand %p1643_p0, %p1640_p13 }
  0x41   : > { %1648 = shalt.err (!%p1645_p1)
}
  0x42   : > { %s1649_s27 = scalar_lea.vmem %s1828_s30, 128  ;;  %p1657_p9 = scmp.lt.s32.totalorder %s1828_s30, %s1828_s30 }
  0x43   : > { %p1650_p4 = scmp.ne.s32.totalorder %s1828_s30, %s1649_s27  ;;  %p1658_p10 = scmp.lt.s32.totalorder %s1649_s27, %s1649_s27 }
  0x45   : > { %p1652_p6 = pnand %p1650_p4, %p1838_p7  ;;  %p1659_p11 = por %p1658_p10, %p1657_p9 }
  0x47   : > { %p1653_p8 = pneg %p1652_p6 }
  0x49   : > { %p1660_p12 = pnand %p1659_p11, %p1653_p8 }
  0x4b   : > { %1663 = shalt.err (!%p1660_p12)
}
  0x4c   : > { %s1745_s26 = smov 64   ;;  %s1746_s29 = smov 4  }
  0x4d   : > { %1511 = dma.hbm_to_vmem [thread:$0]  (!%p1824_p5), %s2168_s1, 128, %s1828_s30, [#allocation6], %s1745_s26, %s1745_s26, %s1746_s29  }
  0x4e   : > { %s1747_s9 = smov [#allocation9]   ;;  %s1748_s10 = smov [#allocation12]  }
  0x4f   : > { %s219_s23 = sshll.u32 %s1747_s9, 4  ;;  %s245_s11 = sshll.u32 %s1748_s10, 4  ;;  %s220_s23 = int_to_ptr.vmem [resolvable:$true] %s219_s23  ;;  %s1911_s11 = int_to_ptr.vmem [resolvable:$true] %s245_s11 }
  0x50   : > { %s1664_s15 = scalar_lea.hbm %s2170_s3, 384 }
  0x51   : > { %p1665_p13 = scmp.ne.s32.totalorder %s2170_s3, %s1664_s15  ;;  %p1671_p4 = scmp.lt.u32.totalorder %s1664_s15, %s2170_s3 }
  0x53   : > { %p1667_p0 = pnand %p1665_p13, %p1838_p7 }
  0x55   : > { %p1668_p1 = pneg %p1667_p0 }
  0x57   : > { %p1673_p6 = pnand %p1671_p4, %p1668_p1 }
  0x59   : > { %1676 = shalt.err (!%p1673_p6)
}
  0x5a   : > { %s1677_s22 = scalar_lea.vmem %s220_s23, 384  ;;  %p1685_p11 = scmp.lt.s32.totalorder %s220_s23, %s220_s23 }
  0x5b   : > { %p1678_p8 = scmp.ne.s32.totalorder %s220_s23, %s1677_s22  ;;  %p1686_p12 = scmp.lt.s32.totalorder %s1677_s22, %s1677_s22 }
  0x5d   : > { %p1680_p9 = pnand %p1678_p8, %p1838_p7  ;;  %p1687_p2 = por %p1686_p12, %p1685_p11 }
  0x5f   : > { %p1681_p10 = pneg %p1680_p9 }
  0x61   : > { %p1688_p3 = pnand %p1687_p2, %p1681_p10 }
  0x63   : > { %1691 = shalt.err (!%p1688_p3)
}
  0x64   : > { %1517 = dma.hbm_to_vmem [thread:$0]  (!%p1824_p5), %s2170_s3, 384, %s220_s23, [#allocation8], %s1743_s16, %s1743_s16, %s1744_s17  }
  0x65   : > { %s1692_s8 = scalar_lea.hbm %s2172_s5, 384 }
  0x66   : > { %p1693_p13 = scmp.ne.s32.totalorder %s2172_s5, %s1692_s8  ;;  %p1699_p0 = scmp.lt.u32.totalorder %s1692_s8, %s2172_s5 }
  0x68   : > { %p1695_p2 = pnand %p1693_p13, %p1838_p7 }
  0x6a   : > { %p1696_p3 = pneg %p1695_p2 }
  0x6c   : > { %p1701_p1 = pnand %p1699_p0, %p1696_p3 }
  0x6e   : > { %1704 = shalt.err (!%p1701_p1)
}
  0x6f   : > { %s1705_s23 = scalar_lea.vmem %s1911_s11, 384  ;;  %p1713_p9 = scmp.lt.s32.totalorder %s1911_s11, %s1911_s11 }
  0x70   : > { %p1706_p4 = scmp.ne.s32.totalorder %s1911_s11, %s1705_s23  ;;  %p1714_p10 = scmp.lt.s32.totalorder %s1705_s23, %s1705_s23 }
  0x72   : > { %p1708_p6 = pnand %p1706_p4, %p1838_p7  ;;  %p1715_p11 = por %p1714_p10, %p1713_p9 }
  0x74   : > { %p1709_p8 = pneg %p1708_p6 }
  0x76   : > { %p1716_p12 = pnand %p1715_p11, %p1709_p8 }
  0x78   : > { %1719 = shalt.err (!%p1716_p12)
}
  0x79   : > { %1523 = dma.hbm_to_vmem [thread:$0]  (!%p1824_p5), %s2172_s5, 384, %s1911_s11, [#allocation11], %s1743_s16, %s1743_s16, %s1744_s17  }
  0x7a   : > { %p2179_p13 = scmp.ne.s32.totalorder %s2176_s25, 0 }
  0x7b   : > { %p2180_p7 = scmp.eq.s32.totalorder (!%p2179_p13), %s1807_s24, 0 }
  0x7c   : > { %269 = sbr.rel (%p2179_p13) target bundleno = 1171 (0x493), region = 44 }
  0x83   : > { %1725 = dma.done.wait (%p2180_p7), [#allocation6], 128   ;;  %p2181_p2 = pmov %p2180_p7 }
  0x85   : > { %1727 = vsyncadd (%p2181_p2), [#allocation6], 4294967168  ;;  %p2182_p3 = pmov %p2181_p2 }
  0x86   : > { %p2183_p0 = pmov %p2181_p2 }
  0x87   : > { %1729 = dma.done.wait (%p2182_p3), [#allocation8], 768  }
  0x88   : > { %1731 = vsyncadd (%p2183_p0), [#allocation8], 4294966528  ;;  %p2184_p1 = pmov %p2183_p0 }
  0x89   : > { %p2185_p5 = pmov %p2183_p0 }
  0x8a   : > { %1733 = dma.done.wait (%p2184_p1), [#allocation11], 768  }
  0x8b   : > { %1735 = vsyncadd (%p2185_p5), [#allocation11], 4294966528  ;;  %v333_v0 = vlaneseq  ;;  %v508_v4 = vld [vmem:[#allocation5] sm:$0x4]  ;;  %v545_v5 = vld [vmem:[#allocation5] sm:$0x8] }
  0x8c   : > { %v361_v6 = vld [vmem:[#allocation5] sm:$0x1]  ;;  %v510_v7 = vshrl.u32 %v508_v4, 16  ;;  %v547_v8 = vpack.i.b16 %v545_v5, %v545_v5  ;;  %v581_v11 = vld [vmem:[#allocation5] sm:$0x8]  ;;  %s1749_s25 = smov 8  }
  0x8d   : > { %v334_v1 = vshrl.u32 %v333_v0, 7  ;;  %v363_v10 = vshrl.u32 %v361_v6, 16  ;;  %v399_v12 = vld [vmem:[#allocation5] sm:$0x2]  ;;  %v618_v13 = vld [vmem:[#allocation5 + $0x4] sm:$0x1] }
  0x8e   : > { %v511_v14 = vpack.i.b16 %v510_v7, %v510_v7  ;;  %v583_v16 = vshrl.u32 %v581_v11, 16  ;;  %v435_v17 = vld [vmem:[#allocation5] sm:$0x2]  ;;  %v401_v19 = vpack.i.b16 %v399_v12, %v399_v12  ;;  %v620_v21 = vpack.i.b16 %v618_v13, %v618_v13  ;;  %v472_v25 = vld [vmem:[#allocation5] sm:$0x4]  ;;  %s1750_s28 = smov 1  }
  0x8f   : > { %v1974_v2 = vsub.s32 2, %v334_v1  ;;  %v1976_v3 = vsub.s32 3, %v334_v1  ;;  %v1978_v9 = vsub.s32 0, %v334_v1  ;;  %v364_v15 = vpack.i.b16 %v363_v10, %v363_v10  ;;  %s1751_s12 = smov 12   ;;  %s1752_s16 = smov 13  }
  0x90   : > { %v1981_v20 = vsub.s32 1, %v334_v1  ;;  %v584_v24 = vpack.i.b16 %v583_v16, %v583_v16  ;;  %v437_v29 = vshrl.u32 %v435_v17, 16  ;;  %v474_v35 = vpack.i.b16 %v472_v25, %v472_v25  ;;  %s1753_s17 = smov 2   ;;  %s1754_s11 = smov 14   ;;  %v329_v42 = vld [vmem:[#allocation5] sm:$0x1] }
  0x91   : > { %v552_v18 = vrot.slane %v547_v8, %v1976_v3  ;;  %v516_v22 = vrot.slane %v511_v14, %v1974_v2  ;;  %v369_v23 = vrot.slane %v364_v15, %v1978_v9  ;;  %v625_v32 = vrot.slane %v620_v21, %v1978_v9  ;;  %s1755_s19 = smov 6   ;;  %s1756_s20 = smov 7  }
  0x92   : > { %v589_v28 = vrot.slane %v584_v24, %v1976_v3  ;;  %v406_v31 = vrot.slane %v401_v19, %v1981_v20  ;;  %v438_v34 = vpack.i.b16 %v437_v29, %v437_v29  ;;  %v479_v39 = vrot.slane %v474_v35, %v1974_v2  ;;  %p315_p4 = scmp.lt.s32.totalorder %s1807_s24, 1  ;;  %s1757_s29 = smov 120  }
  0x93   : > { %v1370_v26 = vcombine.low %v516_v22, %v516_v22  ;;  %v1358_v27 = vcombine.low %v369_v23, %v369_v23  ;;  %v1373_v30 = vcombine.low %v552_v18, %v552_v18  ;;  %v1379_v37 = vcombine.low %v625_v32, %v625_v32  ;;  %s1758_s7 = smov 116   ;;  %s1759_s8 = smov 127  }
  0x94   : > { %v1376_v33 = vcombine.low %v589_v28, %v589_v28  ;;  %v1361_v36 = vcombine.low %v406_v31, %v406_v31  ;;  %v443_v38 = vrot.slane %v438_v34, %v1981_v20  ;;  %v1367_v41 = vcombine.low %v479_v39, %v479_v39  ;;  %s2187_s24 = smov (!%p315_p4, %s1807_s24), 1  ;;  %s1760_s9 = smov 115  }
  0x95   : > { %520 = vrot.lane.b32.xlu0 %v1370_v26, %s1749_s25  ;;  %373 = vrot.lane.b32.xlu1 %v1358_v27, %s1750_s28  ;;  %v331_v43 = vpack.i.b16 %v329_v42, %v329_v42  ;;  %s1487_s30 = smul.u32 12, %s2187_s24  ;;  %vm354_vm0 = vcmask 293888   ;;  %vm356_vm1 = vcmask 289792   ;;  %vm393_vm2 = vcmask 293892   ;;  %s1762_s10 = smov 126  }
  0x96   : > { %v1364_v40 = vcombine.low %v443_v38, %v443_v38  ;;  %s1763_s13 = smov 114   ;;  %s1764_s14 = smov 122   ;;  %vm759_vm3 = vcmask 52224   ;;  %vm763_vm4 = vcmask 404824   ;;  %vm786_vm5 = vcmask 347192  }
  0x97   : > { %v336_v44 = vrot.slane %v331_v43, %v1978_v9  ;;  %s2009_s26 = scalar_lea.vmem %s2167_s0, %s1487_s30  ;;  %s1765_s23 = smov 121  }
  0x98   : > { %v326_v46 = vld [vmem:[%s2009_s26] sm:$0xf]  ;;  %v327_v47 = vld [vmem:[%s2009_s26 + $0x4] sm:$0xf]  ;;  %v328_v51 = vld [vmem:[%s2009_s26 + $0x8] sm:$0xf] }
  0x99   : > { %556 = vrot.lane.b32.xlu0 %v1373_v30, %s1751_s12  ;;  %593 = vrot.lane.b32.xlu1 %v1376_v33, %s1752_s16  ;;  %v1355_v45 = vcombine.low %v336_v44, %v336_v44  ;;  %v506_v54 = vld [vmem:[%s2009_s26 + $0x4] sm:$0xf]  ;;  %v507_v55 = vld [vmem:[%s2009_s26 + $0x8] sm:$0xf] }
  0x9a   : > { %v358_v56 = vld [vmem:[%s2009_s26] sm:$0xf]  ;;  %v543_v63 = vld [vmem:[%s2009_s26 + $0x4] sm:$0xf]  ;;  %v544_v4 = vld [vmem:[%s2009_s26 + $0x8] sm:$0xf] }
  0x9b   : > { %v341_v48 = vmul.bf16 %v1355_v45, %v326_v46  ;;  %v342_v49 = vmul.bf16 %v1355_v45, %v327_v47  ;;  %v343_v52 = vmul.bf16 %v1355_v45, %v328_v51  ;;  %v542_v62 = vld [vmem:[%s2009_s26] sm:$0xf]  ;;  %v359_v13 = vld [vmem:[%s2009_s26 + $0x4] sm:$0xf]  ;;  %v360_v15 = vld [vmem:[%s2009_s26 + $0x8] sm:$0xf] }
  0x9c   : > { %v578_v0 = vld [vmem:[%s2009_s26] sm:$0xf]  ;;  %v579_v16 = vld [vmem:[%s2009_s26 + $0x4] sm:$0xf]  ;;  %v580_v17 = vld [vmem:[%s2009_s26 + $0x8] sm:$0xf] }
  0x9d   : > { %410 = vrot.lane.b32.xlu0 %v1361_v36, %s1753_s17  ;;  %629 = vrot.lane.b32.xlu1 %v1379_v37, %s1754_s11  ;;  %v1356_v50 = vcombine.low %v341_v48, %v342_v49  ;;  %v1357_v53 = vcombine.low %v343_v52, %v343_v52  ;;  %v396_v21 = vld [vmem:[%s2009_s26] sm:$0xf]  ;;  %v397_v23 = vld [vmem:[%s2009_s26 + $0x4] sm:$0xf] }
  0x9e   : > { %v615_v24 = vld [vmem:[%s2009_s26] sm:$0xf]  ;;  %v616_v25 = vld [vmem:[%s2009_s26 + $0x4] sm:$0xf]  ;;  %v398_v39 = vld [vmem:[%s2009_s26 + $0x8] sm:$0xf] }
  0x9f   : > { %355 = vst.msk [vmem:[#allocation2] sm:$0xff] %vm354_vm0, %v1356_v50  ;;  %v432_v35 = vld [vmem:[%s2009_s26] sm:$0xf]  ;;  %v617_v45 = vld [vmem:[%s2009_s26 + $0x8] sm:$0xf] }
  0xa0   : > { %357 = vst.msk [vmem:[#allocation2 + $0x8] sm:$0xf] %vm356_vm1, %v1357_v53  ;;  %v433_v46 = vld [vmem:[%s2009_s26 + $0x4] sm:$0xf]  ;;  %v434_v47 = vld [vmem:[%s2009_s26 + $0x8] sm:$0xf] }
  0xa1   : > { %447 = vrot.lane.b32.xlu0 %v1364_v40, %s1755_s19  ;;  %483 = vrot.lane.b32.xlu1 %v1367_v41, %s1756_s20  ;;  %v1761_v40 = vmov 0   ;;  %v469_v49 = vld [vmem:[%s2009_s26] sm:$0xf]  ;;  %v470_v50 = vld [vmem:[%s2009_s26 + $0x4] sm:$0xf] }
  0xa2   : > { %651 = vst.msk [vmem:[#allocation2 + $0x68] sm:$0xf0] %vm393_vm2, %v1761_v40  ;;  %1112 = vst.msk [vmem:[#allocation4 + $0x68] sm:$0xf0] %vm393_vm2, %v1761_v40  ;;  %1569 = vset.pattern.permute.xlu1 %v1761_v40  ;;  %1568 = vset.pattern.permute.xlu0 %v1761_v40  ;;  %v471_v51 = vld [vmem:[%s2009_s26 + $0x8] sm:$0xf] }
  0xa3   : > { %652 = vst.msk [vmem:[#allocation2 + $0x70] sm:$0xff] %vm354_vm0, %v1761_v40  ;;  %653 = vst.msk [vmem:[#allocation2 + $0x78] sm:$0xff] %vm354_vm0, %v1761_v40 }
  0xa4   : > { %1113 = vst.msk [vmem:[#allocation4 + $0x70] sm:$0xff] %vm354_vm0, %v1761_v40  ;;  %1114 = vst.msk [vmem:[#allocation4 + $0x78] sm:$0xff] %vm354_vm0, %v1761_v40 }
  0xa5   : > { %761 = vst.msk [vmem:[#allocation3 + $0x4] sm:$0xf] %vm759_vm3, %v1761_v40  ;;  %760 = vst.msk [vmem:[#allocation3] sm:$0xf] %vm759_vm3, %v1761_v40 }
  0xa6   : > { %762 = vst.msk [vmem:[#allocation3 + $0x8] sm:$0xf] %vm759_vm3, %v1761_v40 }
  0xa7   : > { %765 = vst.msk [vmem:[#allocation3 + $0x4] sm:$0xf] %vm763_vm4, %v1761_v40  ;;  %764 = vst.msk [vmem:[#allocation3] sm:$0xf] %vm763_vm4, %v1761_v40 }
  0xa8   : > { %766 = vst.msk [vmem:[#allocation3 + $0x8] sm:$0xf] %vm763_vm4, %v1761_v40 }
 0x107   : > { %v2019_v57 = vpop.permute.xlu0 %520  ;;  %v374_v58 = vpop.permute.xlu1 %373 }
 0x108   : > { %v524_v59 = vmul.bf16 %v2019_v57, %v506_v54  ;;  %v525_v60 = vmul.bf16 %v2019_v57, %v507_v55  ;;  %v376_v61 = vmul.bf16 %v374_v58, %v358_v56  ;;  %v377_v22 = vmul.bf16 %v374_v58, %v359_v13  ;;  %v657_v13 = vld [vmem:[#allocation2] sm:$0xff] }
 0x109   : > { %v378_v27 = vmul.bf16 %v374_v58, %v360_v15 }
 0x10a   : > { %v1372_v1 = vcombine.low %v524_v59, %v525_v60  ;;  %v1359_v11 = vcombine.low %v376_v61, %v376_v61 }
 0x10b   : > { %v557_v5 = vpop.permute.xlu0 %556  ;;  %v594_v6 = vpop.permute.xlu1 %593  ;;  %v1360_v37 = vcombine.low %v377_v22, %v378_v27 }
 0x10c   : > { %v559_v7 = vmul.bf16 %v557_v5, %v542_v62  ;;  %v560_v8 = vmul.bf16 %v557_v5, %v543_v63  ;;  %536 = vrot.lane.b32.xlu0 %v1372_v1, %s1757_s29  ;;  %v596_v10 = vmul.bf16 %v594_v6, %v578_v0  ;;  %v561_v12 = vmul.bf16 %v557_v5, %v544_v4  ;;  %v505_v63 = vld [vmem:[%s2009_s26] sm:$0xf] }
 0x10d   : > { %v597_v28 = vmul.bf16 %v594_v6, %v579_v16  ;;  %v598_v29 = vmul.bf16 %v594_v6, %v580_v17  ;;  %v523_v4 = vmul.bf16 %v2019_v57, %v505_v63  ;;  %v1572_v5 = vld [vmem:[#allocation7 + $0x4] ss:$8 sps:$4 sm:$0xff]  }
 0x10e   : > { %v1374_v14 = vcombine.low %v559_v7, %v560_v8  ;;  %v1377_v19 = vcombine.low %v596_v10, %v596_v10  ;;  %v1375_v30 = vcombine.low %v561_v12, %v561_v12  ;;  %740 = vmatprep.mubr.bf16.mxu0 %v1572_v5  ;;  %v675_v7 = vld [vmem:[#allocation9 + $0x10] sm:$0xff]  ;;  %v674_v8 = vld [vmem:[#allocation9 + $0x8] sm:$0xff]  ;;  %v673_v10 = vld [vmem:[#allocation9] sm:$0xff] }
 0x10f   : > { %v411_v18 = vpop.permute.xlu0 %410  ;;  %v630_v26 = vpop.permute.xlu1 %629  ;;  %v1378_v38 = vcombine.low %v597_v28, %v598_v29  ;;  %v1371_v6 = vcombine.low %v523_v4, %v523_v4 }
 0x110   : > { %570 = vrot.lane.b32.xlu1 %v1374_v14, %s1758_s7  ;;  %387 = vrot.lane.b32.xlu0 %v1359_v11, %s1759_s8  ;;  %v413_v31 = vmul.bf16 %v411_v18, %v396_v21  ;;  %v414_v32 = vmul.bf16 %v411_v18, %v397_v23  ;;  %v632_v33 = vmul.bf16 %v630_v26, %v615_v24 }
 0x111   : > { %v633_v34 = vmul.bf16 %v630_v26, %v616_v25  ;;  %v415_v44 = vmul.bf16 %v411_v18, %v398_v39  ;;  %v634_v53 = vmul.bf16 %v630_v26, %v617_v45  ;;  %v671_v39 = vld [vmem:[#allocation2 + $0x70] sm:$0xff] }
 0x112   : > { %v1362_v42 = vcombine.low %v413_v31, %v414_v32  ;;  %v1570_v45 = vld [vmem:[#allocation7] ss:$8 sps:$4 sm:$0xff]  }
 0x113   : > { %v448_v36 = vpop.permute.xlu0 %447  ;;  %v1380_v43 = vcombine.low %v632_v33, %v633_v34  ;;  %v484_v52 = vpop.permute.xlu1 %483  ;;  %v1363_v56 = vcombine.low %v415_v44, %v415_v44  ;;  %v1381_v61 = vcombine.low %v634_v53, %v634_v53 }
 0x114   : > { %572 = vrot.lane.b32.xlu1 %v1375_v30, %s1758_s7  ;;  %607 = vrot.lane.b32.xlu0 %v1377_v19, %s1760_s9  ;;  %v450_v41 = vmul.bf16 %v448_v36, %v432_v35  ;;  %v451_v54 = vmul.bf16 %v448_v36, %v433_v46  ;;  %v452_v55 = vmul.bf16 %v448_v36, %v434_v47 }
 0x115   : > { %v486_v58 = vmul.bf16 %v484_v52, %v469_v49  ;;  %v487_v59 = vmul.bf16 %v484_v52, %v470_v50  ;;  %v488_v60 = vmul.bf16 %v484_v52, %v471_v51 }
 0x116   : > { %v1365_v48 = vcombine.low %v450_v41, %v450_v41  ;;  %v1366_v62 = vcombine.low %v451_v54, %v452_v55  ;;  %v969_v54 = vld [vmem:[#allocation5] sm:$0x4] }
 0x117   : > { %v1368_v0 = vcombine.low %v486_v58, %v487_v59  ;;  %v1369_v1 = vcombine.low %v488_v60, %v488_v60  ;;  %v1006_v59 = vld [vmem:[#allocation5] sm:$0x8]  ;;  %v971_v60 = vshrl.u32 %v969_v54, 16 }
 0x118   : > { %389 = vrot.lane.b32.xlu1 %v1360_v37, %s1759_s8  ;;  %609 = vrot.lane.b32.xlu0 %v1378_v38, %s1760_s9  ;;  %v1008_v5 = vpack.i.b16 %v1006_v59, %v1006_v59 }
 0x11c   : > { %424 = vrot.lane.b32.xlu1 %v1362_v42, %s1762_s10  ;;  %643 = vrot.lane.b32.xlu0 %v1380_v43, %s1763_s13  ;;  %v672_v42 = vld [vmem:[#allocation2 + $0x78] sm:$0xff]  ;;  %v656_v43 = vld [vmem:[#allocation7 + $0x10] sm:$0xff] }
 0x11d   : > { %v1385_v46 = vcombine.high %v656_v43, %v656_v43  ;;  %v1384_v47 = vcombine.low %v656_v43, %v656_v43 }
 0x120   : > { %426 = vrot.lane.b32.xlu1 %v1363_v56, %s1762_s10  ;;  %461 = vrot.lane.b32.xlu0 %v1365_v48, %s1764_s14 }
 0x124   : > { %645 = vrot.lane.b32.xlu1 %v1381_v61, %s1763_s13  ;;  %463 = vrot.lane.b32.xlu0 %v1366_v62, %s1764_s14  ;;  %v1042_v61 = vld [vmem:[#allocation5] sm:$0x8] }
 0x125   : > { %v1044_v40 = vshrl.u32 %v1042_v61, 16 }
 0x128   : > { %497 = vrot.lane.b32.xlu1 %v1368_v0, %s1765_s23  ;;  %499 = vrot.lane.b32.xlu0 %v1369_v1, %s1765_s23  ;;  %v823_v0 = vld [vmem:[#allocation5] sm:$0x1] }
 0x12c   : > { %534 = vrot.lane.b32.xlu1 %v1371_v6, %s1757_s29  ;;  %683 = vperm.xlu0 %1568, %v674_v8  }
 0x130   : > { %688 = vperm.xlu1 %1569, %v675_v7   ;;  %v972_v7 = vpack.i.b16 %v971_v60, %v971_v60 }
 0x134   : > { %678 = vperm.xlu1 %1569, %v673_v10  }
 0x17e   : > { %v537_v11 = vpop.permute.xlu0 %536 }
 0x17f   : > { %541 = vst.msk [vmem:[#allocation2 + $0x40] sm:$0xff] %vm354_vm0, %v537_v11 }
 0x182   : > { %v571_v57 = vpop.permute.xlu1 %570  ;;  %v388_v12 = vpop.permute.xlu0 %387 }
 0x183   : > { %576 = vst.msk [vmem:[#allocation2 + $0x48] sm:$0xff] %vm354_vm0, %v571_v57 }
 0x184   : > { %394 = vst.msk [vmem:[#allocation2 + $0x8] sm:$0xf0] %vm393_vm2, %v388_v12  ;;  %v825_v12 = vshrl.u32 %v823_v0, 16 }
 0x186   : > { %v573_v14 = vpop.permute.xlu1 %572  ;;  %v608_v15 = vpop.permute.xlu0 %607  ;;  %v665_v16 = vld [vmem:[#allocation2 + $0x40] sm:$0xff] }
 0x187   : > { %577 = vst.msk [vmem:[#allocation2 + $0x50] sm:$0xf] %vm356_vm1, %v573_v14  ;;  %1431 = vmatprep.subr.bf16.mxu0 %v665_v16  ;;  %v1045_v16 = vpack.i.b16 %v1044_v40, %v1044_v40 }
 0x188   : > { %613 = vst.msk [vmem:[#allocation2 + $0x50] sm:$0xf0] %vm393_vm2, %v608_v15  ;;  %1432 = vmatpush3.bf16.msra.mxu0 %v657_v13  ;;  %v1013_v15 = vrot.slane %v1008_v5, %v1976_v3 }
 0x18a   : > { %v390_v17 = vpop.permute.xlu1 %389  ;;  %v610_v18 = vpop.permute.xlu0 %609  ;;  %v666_v19 = vld [vmem:[#allocation2 + $0x48] sm:$0xff] }
 0x18b   : > { %v658_v21 = vld [vmem:[#allocation2 + $0x8] sm:$0xff]  ;;  %395 = vst.msk [vmem:[#allocation2 + $0x10] sm:$0xff] %vm354_vm0, %v390_v17  ;;  %614 = vst.msk [vmem:[#allocation2 + $0x58] sm:$0xff] %vm354_vm0, %v610_v18  ;;  %1433 = vmatprep.subr.bf16.mxu0 %v666_v19  ;;  %v1079_v17 = vld [vmem:[#allocation5 + $0x4] sm:$0x1] }
 0x18c   : > { %1434 = vmatpush3.bf16.msra.mxu0 %v658_v21  ;;  %v977_v21 = vrot.slane %v972_v7, %v1974_v2 }
 0x18e   : > { %v425_v22 = vpop.permute.xlu1 %424  ;;  %v644_v23 = vpop.permute.xlu0 %643 }
 0x18f   : > { %v667_v24 = vld [vmem:[#allocation2 + $0x50] sm:$0xff]  ;;  %430 = vst.msk [vmem:[#allocation2 + $0x18] sm:$0xff] %vm354_vm0, %v425_v22  ;;  %649 = vst.msk [vmem:[#allocation2 + $0x60] sm:$0xff] %vm354_vm0, %v644_v23  ;;  %v826_v22 = vpack.i.b16 %v825_v12, %v825_v12  ;;  %v860_v23 = vld [vmem:[#allocation5] sm:$0x2] }
 0x190   : > { %1435 = vmatprep.subr.bf16.mxu0 %v667_v24  ;;  %v896_v24 = vld [vmem:[#allocation5] sm:$0x2] }
 0x192   : > { %v427_v25 = vpop.permute.xlu1 %426  ;;  %v462_v26 = vpop.permute.xlu0 %461  ;;  %v659_v27 = vld [vmem:[#allocation2 + $0x10] sm:$0xff]  ;;  %v668_v28 = vld [vmem:[#allocation2 + $0x58] sm:$0xff] }
 0x193   : > { %431 = vst.msk [vmem:[#allocation2 + $0x20] sm:$0xf] %vm356_vm1, %v427_v25  ;;  %1436 = vmatpush3.bf16.msra.mxu0 %v659_v27  ;;  %v1050_v27 = vrot.slane %v1045_v16, %v1976_v3 }
 0x194   : > { %467 = vst.msk [vmem:[#allocation2 + $0x20] sm:$0xf0] %vm393_vm2, %v462_v26  ;;  %1437 = vmatprep.subr.bf16.mxu0 %v668_v28  ;;  %v1407_v26 = vcombine.low %v1013_v15, %v1013_v15  ;;  %v1081_v28 = vpack.i.b16 %v1079_v17, %v1079_v17 }
 0x196   : > { %v646_v29 = vpop.permute.xlu1 %645  ;;  %v464_v30 = vpop.permute.xlu0 %463  ;;  %v660_v31 = vld [vmem:[#allocation2 + $0x18] sm:$0xff]  ;;  %v669_v32 = vld [vmem:[#allocation2 + $0x60] sm:$0xff] }
 0x197   : > { %650 = vst.msk [vmem:[#allocation2 + $0x68] sm:$0xf] %vm356_vm1, %v646_v29  ;;  %1438 = vmatpush3.bf16.msra.mxu0 %v660_v31  ;;  %v933_v29 = vld [vmem:[#allocation5] sm:$0x4]  ;;  %v831_v31 = vrot.slane %v826_v22, %v1978_v9 }
 0x198   : > { %468 = vst.msk [vmem:[#allocation2 + $0x28] sm:$0xff] %vm354_vm0, %v464_v30  ;;  %1439 = vmatprep.subr.bf16.mxu0 %v669_v32  ;;  %v1404_v30 = vcombine.low %v977_v21, %v977_v21  ;;  %v862_v32 = vpack.i.b16 %v860_v23, %v860_v23 }
 0x19a   : > { %v498_v33 = vpop.permute.xlu1 %497  ;;  %v500_v34 = vpop.permute.xlu0 %499  ;;  %v867_v3 = vrot.slane %v862_v32, %v1981_v20 }
 0x19b   : > { %v661_v35 = vld [vmem:[#allocation2 + $0x20] sm:$0xff]  ;;  %503 = vst.msk [vmem:[#allocation2 + $0x30] sm:$0xff] %vm354_vm0, %v498_v33  ;;  %v898_v33 = vshrl.u32 %v896_v24, 16 }
 0x19c   : > { %504 = vst.msk [vmem:[#allocation2 + $0x38] sm:$0xf] %vm356_vm1, %v500_v34  ;;  %1440 = vmatpush3.bf16.msra.mxu0 %v661_v35  ;;  %v1410_v34 = vcombine.low %v1050_v27, %v1050_v27  ;;  %v1086_v35 = vrot.slane %v1081_v28, %v1978_v9 }
 0x19e   : > { %v535_v36 = vpop.permute.xlu1 %534  ;;  %v670_v37 = vld [vmem:[#allocation2 + $0x68] sm:$0xff] }
 0x19f   : > { %v662_v38 = vld [vmem:[#allocation2 + $0x28] sm:$0xff]  ;;  %540 = vst.msk [vmem:[#allocation2 + $0x38] sm:$0xf0] %vm393_vm2, %v535_v36  ;;  %1441 = vmatprep.subr.bf16.mxu0 %v670_v37  ;;  %v935_v36 = vpack.i.b16 %v933_v29, %v933_v29  ;;  %v1392_v37 = vcombine.low %v831_v31, %v831_v31 }
 0x1a0   : > { %1442 = vmatpush3.bf16.msra.mxu0 %v662_v38  ;;  %v899_v38 = vpack.i.b16 %v898_v33, %v898_v33 }
 0x1a1   : > { %1443 = vmatprep.subr.bf16.mxu0 %v671_v39  ;;  %v1413_v39 = vcombine.low %v1086_v35, %v1086_v35 }
 0x1a2   : > { %v663_v41 = vld [vmem:[#allocation2 + $0x30] sm:$0xff]  ;;  %v904_v43 = vrot.slane %v899_v38, %v1981_v20 }
 0x1a4   : > { %1444 = vmatpush3.bf16.msra.mxu0 %v663_v41  ;;  %v940_v41 = vrot.slane %v935_v36, %v1974_v2 }
 0x1a5   : > { %1445 = vmatprep.subr.bf16.mxu0 %v672_v42  ;;  %v1395_v42 = vcombine.low %v867_v3, %v867_v3 }
 0x1a6   : > { %v664_v44 = vld [vmem:[#allocation2 + $0x38] sm:$0xff] }
 0x1a8   : > { %1446 = vmatpush3.bf16.msra.mxu0 %v664_v44  ;;  %v1401_v44 = vcombine.low %v940_v41, %v940_v41 }
 0x1ab   : > { %741 = vmatmul.mubr.bf16.vlgmr.msra.gmra.mrb[0].mxu0 %v1570_v45  ;;  %v684_v56 = vpop.permute.xlu0 %683  ;;  %v1398_v45 = vcombine.low %v904_v43, %v904_v43 }
 0x1ac   : > { %748 = vmatprep.mubr.bf16.mxu0 %v1385_v46 }
 0x1af   : > { %v689_v48 = vpop.permute.xlu1 %688 }
 0x1b3   : > { %749 = vmatmul.mubr.bf16.gmra.mrb[4].mxu0 %v1384_v47  ;;  %v679_v53 = vpop.permute.xlu1 %678  ;;  %v793_v47 = vld [vmem:[#allocation5] sm:$0x1] }
 0x27e   : > { %v1447_v49 = vpop.f32.mrb[0].mxu0 }
 0x27f   : > { %v1448_v50 = vpop.f32.mrb[1].mxu0 }
 0x280   : > { %v1449_v51 = vadd.f32 %v1448_v50, %v1447_v49  ;;  %v1450_v52 = vpop.f32.mrb[2].mxu0 }
 0x281   : > { %v1451_v55 = vpop.f32.mrb[3].mxu0 }
 0x282   : > { %v1452_v58 = vadd.f32 %v1451_v55, %v1450_v52  ;;  %v743_v62 = vadd.f32 %v1449_v51, %v679_v53 }
 0x284   : > { %v746_v63 = vadd.f32 %v1452_v58, %v684_v56  ;;  %v756_v8 = vmax.f32 %v743_v62, 0.0 }
 0x286   : > { %v757_v1 = vmax.f32 %v746_v63, 0.0  ;;  %v1453_v4 = vpop.f32.mrb[4].mxu0  ;;  %v1425_v18 = vpack.c.bf16 %v756_v8, %v756_v8 }
 0x287   : > { %v1454_v6 = vpop.f32.mrb[5].mxu0 }
 0x288   : > { %v1426_v10 = vpack.c.bf16 %v757_v1, %v757_v1  ;;  %v1455_v11 = vadd.f32 %v1454_v6, %v1453_v4  ;;  %v1456_v57 = vpop.f32.mrb[6].mxu0 }
 0x289   : > { %v1457_v13 = vpop.f32.mrb[7].mxu0 }
 0x28a   : > { %v751_v14 = vadd.f32 %v1455_v11, %v689_v48  ;;  %779 = vrot.lane.b32.xlu0 %v1426_v10, %s1756_s20  ;;  %v795_v48 = vpack.i.b16 %v793_v47, %v793_v47 }
 0x28c   : > { %v758_v19 = vmax.f32 %v751_v14, 0.0  ;;  %v800_v20 = vrot.slane %v795_v48, %v1978_v9 }
 0x28e   : > { %v1427_v25 = vpack.c.bf16 %v758_v19, %v758_v19  ;;  %777 = vrot.lane.b32.xlu0 %v1425_v18, %s1756_s20  ;;  %v1389_v54 = vcombine.low %v800_v20, %v800_v20 }
 0x290   : > { %781 = vrot.lane.b32.xlu1 %v1427_v25, %s1756_s20 }
 0x292   : > { %1017 = vrot.lane.b32.xlu0 %v1407_v26, %s1751_s12 }
 0x294   : > { %981 = vrot.lane.b32.xlu1 %v1404_v30, %s1749_s25  ;;  %s324_s25 = scalar_lea.vmem %s2173_s6, %s1487_s30 }
 0x296   : > { %1054 = vrot.lane.b32.xlu0 %v1410_v34, %s1752_s16 }
 0x298   : > { %835 = vrot.lane.b32.xlu1 %v1392_v37, %s1750_s28 }
 0x29a   : > { %1090 = vrot.lane.b32.xlu0 %v1413_v39, %s1754_s11 }
 0x29c   : > { %871 = vrot.lane.b32.xlu1 %v1395_v42, %s1753_s17 }
 0x29e   : > { %944 = vrot.lane.b32.xlu0 %v1401_v44, %s1756_s20 }
 0x2a0   : > { %908 = vrot.lane.b32.xlu1 %v1398_v45, %s1755_s19 }
 0x2fc   : > { %v780_v46 = vpop.permute.xlu0 %779 }
 0x2fd   : > { %788 = vst.msk [vmem:[#allocation3 + $0x4] sm:$0xf] %vm786_vm5, %v780_v46 }
 0x300   : > { %v778_v2 = vpop.permute.xlu0 %777 }
 0x301   : > { %787 = vst.msk [vmem:[#allocation3] sm:$0xf] %vm786_vm5, %v778_v2 }
 0x302   : > { %v782_v49 = vpop.permute.xlu1 %781 }
 0x303   : > { %789 = vst.msk [vmem:[#allocation3 + $0x8] sm:$0xf] %vm786_vm5, %v782_v49 }
 0x304   : > { %v1004_v51 = vld [vmem:[#allocation3 + $0x4] sm:$0xf]  ;;  %v1018_v52 = vpop.permute.xlu0 %1017 }
 0x305   : > { %v1021_v59 = vmul.bf16 %v1018_v52, %v1004_v51  ;;  %v967_v63 = vld [vmem:[#allocation3 + $0x4] sm:$0xf] }
 0x306   : > { %v2117_v50 = vpop.permute.xlu1 %981  ;;  %v791_v40 = vld [vmem:[#allocation3 + $0x4] sm:$0xf] }
 0x307   : > { %v985_v9 = vmul.bf16 %v2117_v50, %v967_v63  ;;  %v821_v14 = vld [vmem:[#allocation3 + $0x4] sm:$0xf]  ;;  %v806_v15 = vmul.bf16 %v1389_v54, %v791_v40 }
 0x308   : > { %v1003_v53 = vld [vmem:[#allocation3] sm:$0xf]  ;;  %v1055_v13 = vpop.permute.xlu0 %1054  ;;  %v858_v26 = vld [vmem:[#allocation3 + $0x4] sm:$0xf] }
 0x309   : > { %v1020_v55 = vmul.bf16 %v1018_v52, %v1003_v53  ;;  %v790_v61 = vld [vmem:[#allocation3] sm:$0xf]  ;;  %v1040_v32 = vld [vmem:[#allocation3 + $0x4] sm:$0xf] }
 0x30a   : > { %v792_v56 = vld [vmem:[#allocation3 + $0x8] sm:$0xf]  ;;  %v836_v1 = vpop.permute.xlu1 %835  ;;  %v820_v8 = vld [vmem:[#allocation3] sm:$0xf]  ;;  %v805_v10 = vmul.bf16 %v1389_v54, %v790_v61  ;;  %v1058_v35 = vmul.bf16 %v1055_v13, %v1040_v32  ;;  %v1077_v38 = vld [vmem:[#allocation3 + $0x4] sm:$0xf] }
 0x30b   : > { %v1005_v58 = vld [vmem:[#allocation3 + $0x8] sm:$0xf]  ;;  %v807_v62 = vmul.bf16 %v1389_v54, %v792_v56  ;;  %v1408_v5 = vcombine.low %v1020_v55, %v1021_v59  ;;  %v838_v11 = vmul.bf16 %v836_v1, %v820_v8  ;;  %v1039_v12 = vld [vmem:[#allocation3] sm:$0xf]  ;;  %v839_v16 = vmul.bf16 %v836_v1, %v821_v14  ;;  %v931_v51 = vld [vmem:[#allocation3 + $0x4] sm:$0xf] }
 0x30c   : > { %v968_v60 = vld [vmem:[#allocation3 + $0x8] sm:$0xf]  ;;  %v1022_v4 = vmul.bf16 %v1018_v52, %v1005_v58  ;;  %v1057_v21 = vmul.bf16 %v1055_v13, %v1039_v12  ;;  %v1390_v23 = vcombine.low %v805_v10, %v806_v15  ;;  %v857_v25 = vld [vmem:[#allocation3] sm:$0xf]  ;;  %v1091_v33 = vpop.permute.xlu0 %1090  ;;  %v894_v58 = vld [vmem:[#allocation3 + $0x4] sm:$0xf] }
 0x30d   : > { %v986_v0 = vmul.bf16 %v2117_v50, %v968_v60  ;;  %v1391_v6 = vcombine.low %v807_v62, %v807_v62  ;;  %v822_v7 = vld [vmem:[#allocation3 + $0x8] sm:$0xf]  ;;  %1031 = vrot.lane.b32.xlu0 %v1408_v5, %s1758_s7  ;;  %v1393_v22 = vcombine.low %v838_v11, %v838_v11  ;;  %v1076_v3 = vld [vmem:[#allocation3] sm:$0xf]  ;;  %v1094_v41 = vmul.bf16 %v1091_v33, %v1077_v38 }
 0x30e   : > { %v840_v17 = vmul.bf16 %v836_v1, %v822_v7  ;;  %v1409_v18 = vcombine.low %v1022_v4, %v1022_v4  ;;  %v872_v19 = vpop.permute.xlu1 %871  ;;  %v1041_v24 = vld [vmem:[#allocation3 + $0x8] sm:$0xf]  ;;  %818 = vst.msk [vmem:[#allocation4] sm:$0xff] %vm354_vm0, %v1390_v23  ;;  %v1411_v31 = vcombine.low %v1057_v21, %v1057_v21  ;;  %v1093_v39 = vmul.bf16 %v1091_v33, %v1076_v3  ;;  %v893_v2 = vld [vmem:[#allocation3] sm:$0xf] }
 0x30f   : > { %v1406_v57 = vcombine.low %v985_v9, %v986_v0  ;;  %819 = vst.msk [vmem:[#allocation4 + $0x8] sm:$0xf] %vm356_vm1, %v1391_v6  ;;  %v874_v27 = vmul.bf16 %v872_v19, %v857_v25  ;;  %v875_v28 = vmul.bf16 %v872_v19, %v858_v26  ;;  %v1059_v30 = vmul.bf16 %v1055_v13, %v1041_v24  ;;  %v859_v34 = vld [vmem:[#allocation3 + $0x8] sm:$0xf]  ;;  %v930_v20 = vld [vmem:[#allocation3] sm:$0xf] }
 0x310   : > { %v1394_v29 = vcombine.low %v839_v16, %v840_v17  ;;  %v876_v36 = vmul.bf16 %v872_v19, %v859_v34  ;;  %v1078_v43 = vld [vmem:[#allocation3 + $0x8] sm:$0xf]  ;;  %v945_v47 = vpop.permute.xlu0 %944  ;;  %v1414_v49 = vcombine.low %v1093_v39, %v1094_v41  ;;  %v966_v55 = vld [vmem:[#allocation3] sm:$0xf]  ;;  %v1117_v39 = vld [vmem:[#allocation10 + $0x10] sm:$0xff] }
 0x311   : > { %997 = vrot.lane.b32.xlu1 %v1406_v57, %s1757_s29  ;;  %1033 = vrot.lane.b32.xlu0 %v1409_v18, %s1758_s7  ;;  %v1396_v37 = vcombine.low %v874_v27, %v875_v28  ;;  %v1412_v42 = vcombine.low %v1058_v35, %v1059_v30  ;;  %v1095_v45 = vmul.bf16 %v1091_v33, %v1078_v43  ;;  %v895_v56 = vld [vmem:[#allocation3 + $0x8] sm:$0xf]  ;;  %v1134_v7 = vld [vmem:[#allocation12] sm:$0xff] }
 0x312   : > { %v909_v44 = vpop.permute.xlu1 %908  ;;  %v1397_v46 = vcombine.low %v876_v36, %v876_v36  ;;  %v947_v52 = vmul.bf16 %v945_v47, %v930_v20  ;;  %v948_v53 = vmul.bf16 %v945_v47, %v931_v51  ;;  %v984_v62 = vmul.bf16 %v2117_v50, %v966_v55  ;;  %v932_v0 = vld [vmem:[#allocation3 + $0x8] sm:$0xf]  ;;  %v1136_v50 = vld [vmem:[#allocation12 + $0x10] sm:$0xff]  ;;  %v1132_v36 = vld [vmem:[#allocation4 + $0x70] sm:$0xff] }
 0x313   : > { %v911_v48 = vmul.bf16 %v909_v44, %v893_v2  ;;  %v1415_v54 = vcombine.low %v1095_v45, %v1095_v45  ;;  %v912_v59 = vmul.bf16 %v909_v44, %v894_v58  ;;  %v913_v60 = vmul.bf16 %v909_v44, %v895_v56  ;;  %v1135_v40 = vld [vmem:[#allocation12 + $0x8] sm:$0xff] }
 0x314   : > { %v1402_v63 = vcombine.low %v947_v52, %v948_v53  ;;  %v949_v1 = vmul.bf16 %v945_v47, %v932_v0  ;;  %v1405_v9 = vcombine.low %v984_v62, %v984_v62  ;;  %v1577_v6 = vld [vmem:[#allocation10 + $0x4] ss:$8 sps:$4 sm:$0xff]   ;;  %v1419_v43 = vcombine.high %v1117_v39, %v1117_v39 }
 0x315   : > { %849 = vrot.lane.b32.xlu1 %v1393_v22, %s1759_s8  ;;  %851 = vrot.lane.b32.xlu0 %v1394_v29, %s1759_s8  ;;  %v1399_v61 = vcombine.low %v911_v48, %v911_v48  ;;  %v1400_v4 = vcombine.low %v912_v59, %v913_v60  ;;  %v1118_v15 = vld [vmem:[#allocation4] sm:$0xff]  ;;  %v1133_v3 = vld [vmem:[#allocation4 + $0x78] sm:$0xff]  ;;  %v1418_v44 = vcombine.low %v1117_v39, %v1117_v39 }
 0x316   : > { %v1403_v5 = vcombine.low %v949_v1, %v949_v1  ;;  %1201 = vmatprep.mubr.bf16.mxu1 %v1577_v6 }
 0x319   : > { %1068 = vrot.lane.b32.xlu1 %v1411_v31, %s1760_s9  ;;  %885 = vrot.lane.b32.xlu0 %v1396_v37, %s1762_s10 }
 0x31d   : > { %1070 = vrot.lane.b32.xlu1 %v1412_v42, %s1760_s9  ;;  %887 = vrot.lane.b32.xlu0 %v1397_v46, %s1762_s10  ;;  %v1575_v42 = vld [vmem:[#allocation10] ss:$8 sps:$4 sm:$0xff]  }
 0x321   : > { %1104 = vrot.lane.b32.xlu1 %v1414_v49, %s1763_s13  ;;  %1106 = vrot.lane.b32.xlu0 %v1415_v54, %s1763_s13 }
 0x325   : > { %922 = vrot.lane.b32.xlu1 %v1399_v61, %s1764_s14  ;;  %958 = vrot.lane.b32.xlu0 %v1402_v63, %s1765_s23 }
 0x329   : > { %924 = vrot.lane.b32.xlu1 %v1400_v4, %s1764_s14  ;;  %995 = vrot.lane.b32.xlu0 %v1405_v9, %s1757_s29 }
 0x32d   : > { %960 = vrot.lane.b32.xlu1 %v1403_v5, %s1765_s23  ;;  %1144 = vperm.xlu0 %1568, %v1135_v40  }
 0x331   : > { %1139 = vperm.xlu1 %1569, %v1134_v7  }
 0x335   : > { %1149 = vperm.xlu1 %1569, %v1136_v50  }
 0x37f   : > { %v1032_v8 = vpop.permute.xlu0 %1031 }
 0x380   : > { %1037 = vst.msk [vmem:[#allocation4 + $0x48] sm:$0xff] %vm354_vm0, %v1032_v8 }
 0x383   : > { %v998_v10 = vpop.permute.xlu1 %997  ;;  %v1034_v11 = vpop.permute.xlu0 %1033 }
 0x384   : > { %1002 = vst.msk [vmem:[#allocation4 + $0x40] sm:$0xff] %vm354_vm0, %v998_v10 }
 0x385   : > { %1038 = vst.msk [vmem:[#allocation4 + $0x50] sm:$0xf] %vm356_vm1, %v1034_v11 }
 0x387   : > { %v850_v57 = vpop.permute.xlu1 %849  ;;  %v852_v12 = vpop.permute.xlu0 %851  ;;  %v1127_v17 = vld [vmem:[#allocation4 + $0x48] sm:$0xff] }
 0x388   : > { %855 = vst.msk [vmem:[#allocation4 + $0x8] sm:$0xf0] %vm393_vm2, %v850_v57 }
 0x389   : > { %856 = vst.msk [vmem:[#allocation4 + $0x10] sm:$0xff] %vm354_vm0, %v852_v12 }
 0x38b   : > { %v1069_v13 = vpop.permute.xlu1 %1068  ;;  %v1126_v14 = vld [vmem:[#allocation4 + $0x40] sm:$0xff]  ;;  %v886_v16 = vpop.permute.xlu0 %885 }
 0x38c   : > { %1074 = vst.msk [vmem:[#allocation4 + $0x50] sm:$0xf0] %vm393_vm2, %v1069_v13  ;;  %1459 = vmatprep.subr.bf16.mxu1 %v1126_v14 }
 0x38d   : > { %1460 = vmatpush3.bf16.msra.mxu1 %v1118_v15  ;;  %891 = vst.msk [vmem:[#allocation4 + $0x18] sm:$0xff] %vm354_vm0, %v886_v16 }
 0x38e   : > { %1461 = vmatprep.subr.bf16.mxu1 %v1127_v17 }
 0x38f   : > { %v1071_v18 = vpop.permute.xlu1 %1070  ;;  %v1119_v19 = vld [vmem:[#allocation4 + $0x8] sm:$0xff]  ;;  %v888_v21 = vpop.permute.xlu0 %887 }
 0x390   : > { %1075 = vst.msk [vmem:[#allocation4 + $0x58] sm:$0xff] %vm354_vm0, %v1071_v18  ;;  %v1120_v24 = vld [vmem:[#allocation4 + $0x10] sm:$0xff] }
 0x391   : > { %1462 = vmatpush3.bf16.msra.mxu1 %v1119_v19  ;;  %892 = vst.msk [vmem:[#allocation4 + $0x20] sm:$0xf] %vm356_vm1, %v888_v21 }
 0x393   : > { %v1105_v22 = vpop.permute.xlu1 %1104  ;;  %v1128_v23 = vld [vmem:[#allocation4 + $0x50] sm:$0xff]  ;;  %v1107_v25 = vpop.permute.xlu0 %1106 }
 0x394   : > { %1110 = vst.msk [vmem:[#allocation4 + $0x60] sm:$0xff] %vm354_vm0, %v1105_v22  ;;  %1463 = vmatprep.subr.bf16.mxu1 %v1128_v23  ;;  %v1121_v28 = vld [vmem:[#allocation4 + $0x18] sm:$0xff] }
 0x395   : > { %1464 = vmatpush3.bf16.msra.mxu1 %v1120_v24  ;;  %1111 = vst.msk [vmem:[#allocation4 + $0x68] sm:$0xf] %vm356_vm1, %v1107_v25 }
 0x397   : > { %v923_v26 = vpop.permute.xlu1 %922  ;;  %v1129_v27 = vld [vmem:[#allocation4 + $0x58] sm:$0xff]  ;;  %v959_v29 = vpop.permute.xlu0 %958 }
 0x398   : > { %928 = vst.msk [vmem:[#allocation4 + $0x20] sm:$0xf0] %vm393_vm2, %v923_v26  ;;  %1465 = vmatprep.subr.bf16.mxu1 %v1129_v27 }
 0x399   : > { %1466 = vmatpush3.bf16.msra.mxu1 %v1121_v28  ;;  %964 = vst.msk [vmem:[#allocation4 + $0x30] sm:$0xff] %vm354_vm0, %v959_v29 }
 0x39b   : > { %v925_v30 = vpop.permute.xlu1 %924  ;;  %v1130_v31 = vld [vmem:[#allocation4 + $0x60] sm:$0xff]  ;;  %v996_v32 = vpop.permute.xlu0 %995 }
 0x39c   : > { %929 = vst.msk [vmem:[#allocation4 + $0x28] sm:$0xff] %vm354_vm0, %v925_v30  ;;  %1467 = vmatprep.subr.bf16.mxu1 %v1130_v31  ;;  %v1131_v35 = vld [vmem:[#allocation4 + $0x68] sm:$0xff] }
 0x39d   : > { %1001 = vst.msk [vmem:[#allocation4 + $0x38] sm:$0xf0] %vm393_vm2, %v996_v32 }
 0x39f   : > { %v961_v33 = vpop.permute.xlu1 %960  ;;  %v1122_v34 = vld [vmem:[#allocation4 + $0x20] sm:$0xff] }
 0x3a0   : > { %965 = vst.msk [vmem:[#allocation4 + $0x38] sm:$0xf] %vm356_vm1, %v961_v33  ;;  %1468 = vmatpush3.bf16.msra.mxu1 %v1122_v34  ;;  %v1124_v38 = vld [vmem:[#allocation4 + $0x30] sm:$0xff] }
 0x3a1   : > { %1469 = vmatprep.subr.bf16.mxu1 %v1131_v35 }
 0x3a3   : > { %v1123_v37 = vld [vmem:[#allocation4 + $0x28] sm:$0xff] }
 0x3a4   : > { %1470 = vmatpush3.bf16.msra.mxu1 %v1123_v37 }
 0x3a5   : > { %1471 = vmatprep.subr.bf16.mxu1 %v1132_v36 }
 0x3a7   : > { %v1125_v41 = vld [vmem:[#allocation4 + $0x38] sm:$0xff] }
 0x3a8   : > { %1472 = vmatpush3.bf16.msra.mxu1 %v1124_v38 }
 0x3a9   : > { %1473 = vmatprep.subr.bf16.mxu1 %v1133_v3 }
 0x3ac   : > { %1474 = vmatpush3.bf16.msra.mxu1 %v1125_v41  ;;  %v1145_v52 = vpop.permute.xlu0 %1144 }
 0x3af   : > { %1202 = vmatmul.mubr.bf16.vlgmr.msra.gmra.mrb[0].mxu1 %v1575_v42 }
 0x3b0   : > { %1209 = vmatprep.mubr.bf16.mxu1 %v1419_v43  ;;  %v1140_v48 = vpop.permute.xlu1 %1139 }
 0x3b4   : > { %v1150_v61 = vpop.permute.xlu1 %1149 }
 0x3b7   : > { %1210 = vmatmul.mubr.bf16.gmra.mrb[4].mxu1 %v1418_v44 }
 0x482   : > { %v1475_v45 = vpop.f32.mrb[0].mxu1 }
 0x483   : > { %v1476_v46 = vpop.f32.mrb[1].mxu1 }
 0x484   : > { %v1477_v47 = vadd.f32 %v1476_v46, %v1475_v45  ;;  %v1478_v2 = vpop.f32.mrb[2].mxu1 }
 0x485   : > { %v1479_v49 = vpop.f32.mrb[3].mxu1 }
 0x486   : > { %v1204_v20 = vadd.f32 %v1477_v47, %v1140_v48  ;;  %v1480_v51 = vadd.f32 %v1479_v49, %v1478_v2 }
 0x488   : > { %v1428_v53 = vpack.c.bf16 %v1204_v20, %v1204_v20  ;;  %v1207_v54 = vadd.f32 %v1480_v51, %v1145_v52 }
 0x48a   : > { %1230 = vst.msk [vmem:[%s324_s25] sm:$0xf] %vm356_vm1, %v1428_v53  ;;  %v1429_v55 = vpack.c.bf16 %v1207_v54, %v1207_v54  ;;  %v1481_v56 = vpop.f32.mrb[4].mxu1 }
 0x48b   : > { %v1482_v58 = vpop.f32.mrb[5].mxu1 }
 0x48c   : > { %1231 = vst.msk [vmem:[%s324_s25 + $0x4] sm:$0xf] %vm356_vm1, %v1429_v55  ;;  %v1483_v59 = vadd.f32 %v1482_v58, %v1481_v56  ;;  %v1484_v60 = vpop.f32.mrb[6].mxu1 }
 0x48d   : > { %v1485_v62 = vpop.f32.mrb[7].mxu1 }
 0x48e   : > { %v1212_v63 = vadd.f32 %v1483_v59, %v1150_v61 }
 0x490   : > { %v1430_v0 = vpack.c.bf16 %v1212_v63, %v1212_v63 }
 0x492   : > { %1232 = vst.msk [vmem:[%s324_s25 + $0x8] sm:$0xf] %vm356_vm1, %v1430_v0 }
 0x493 PF: > { %s19_s21 = sadd.s32 1, %s1738_s21  }
 0x494   : > { %p16_p6 = scmp.ge.s32.totalorder %s19_s21, 4  }
 0x496   :  { %18 = sbr.rel (!%p16_p6) target bundleno = 3 (0x3), region = 95 }
 0x49d   :  { %1254 = vsyncpa [#allocation6], 1 }
 0x49e   :  { %1256 = vsyncpa [#allocation6 + $0x1], 1 }
 0x49f   :  { %1257 = vsyncpa [#allocation8], 1 }
 0x4a0   :  { %1258 = vsyncpa [#allocation11], 1 }

// kernel: _lambda_.5
= control target key start
LH: loop header
LB: loop body
LE: loop exit
PB: predicated region body
PF: predicated region fallthrough
CT: control target
= control target key end

     0   :  { %11 = vsyncpa [#allocation6], 0  ;;  %s2230_s0 = inlined_call_operand.vmem [shape: bf16[2,24,50], index: 0, kind: input, shape index: {}]   ;;  %s2231_s1 = inlined_call_operand.hbm [shape: bf16[9,36], index: 1, kind: input, shape index: {}]   ;;  %s2232_s2 = inlined_call_operand.vmem [shape: bf16[64,256], index: 2, kind: input, shape index: {}]   ;;  %s2233_s3 = inlined_call_operand.hbm [shape: f32[64,1], index: 3, kind: input, shape index: {}]   ;;  %s2234_s4 = inlined_call_operand.vmem [shape: bf16[64,256], index: 4, kind: input, shape index: {}]   ;;  %s2235_s5 = inlined_call_operand.hbm [shape: f32[64,1], index: 5, kind: input, shape index: {}]   ;;  %s2236_s6 = inlined_call_operand.vmem [shape: bf16[2,64,36], index: 6, kind: output, shape index: {}]  }
   0x1   :  { %12 = vsyncpa [#allocation8], 0  ;;  %s1854_s21 = smov 0  }
   0x2 LB: > { %s1795_s22 = smov [#allocation7]   ;;  %s1860_s24 = sadd.s32 4294967295, %s1793_s21   ;;  %s1793_s21 = sphi %s1854_s21, %s18_s21  }
   0x3   : > { %s208_s23 = sshll.u32 %s1795_s22, 4  ;;  %p1454_p0 = scmp.ge.s32.totalorder %s1793_s21, 1  ;;  %s1869_s23 = int_to_ptr.vmem [resolvable:$true] %s208_s23 }
   0x4   : > { %p180_p1 = scmp.lt.s32.totalorder %s1793_s21, 3  ;;  %p2237_p2 = scmp.eq.s32.totalorder %s1860_s24, 0 }
   0x5   : > { %s1796_s26 = smov [#allocation5]   ;;  %s1797_s29 = smov [#allocation9]  }
   0x6   : > { %p1865_p3 = pnand %p1454_p0, %p180_p1  ;;  %s192_s27 = sshll.u32 %s1796_s26, 4  ;;  %s1873_s27 = int_to_ptr.vmem [resolvable:$true] %s192_s27 }
   0x7   : > { %s1881_s30 = sshll.u32 %s1797_s29, 4  ;;  %s1695_s9 = scalar_lea.hbm %s2233_s3, 1024  ;;  %s225_s30 = int_to_ptr.vmem [resolvable:$true] %s1881_s30 }
   0x8   : > { %s2244_s25 = scalar_select %p1865_p3, 1, 0 }
   0x9   : > { %p1621_p4 = pneg %p1865_p3  ;;  %p1696_p6 = scmp.ne.s32.totalorder %s2233_s3, %s1695_s9 }
   0xa   : > { %p1702_p10 = scmp.lt.u32.totalorder %s1695_s9, %s2233_s3 }
   0xb   : > { %p1877_p5 = pnand %p2237_p2, %p1621_p4 }
   0xd   : > { %p1891_p7 = pneg %p1877_p5 }
   0xf   : > { %p1698_p8 = pnand %p1891_p7, %p1696_p6 }
  0x11   : > { %p1699_p9 = pneg %p1698_p8 }
  0x13   : > { %p1704_p11 = pnand %p1702_p10, %p1699_p9 }
  0x15   : > { %1707 = shalt.err (!%p1704_p11)
}
  0x16   : > { %s1708_s15 = scalar_lea.vmem %s1869_s23, 1024  ;;  %p1716_p1 = scmp.lt.s32.totalorder %s1869_s23, %s1869_s23 }
  0x17   : > { %p1709_p12 = scmp.ne.s32.totalorder %s1869_s23, %s1708_s15  ;;  %p1717_p4 = scmp.lt.s32.totalorder %s1708_s15, %s1708_s15 }
  0x19   : > { %p1711_p13 = pnand %p1709_p12, %p1891_p7  ;;  %p1718_p6 = por %p1717_p4, %p1716_p1 }
  0x1b   : > { %p1712_p0 = pneg %p1711_p13 }
  0x1d   : > { %p1719_p8 = pnand %p1718_p6, %p1712_p0 }
  0x1f   : > { %1722 = shalt.err (!%p1719_p8)
}
  0x20   : > { %s1798_s16 = smov 128   ;;  %s1799_s17 = smov 8  }
  0x21   : > { %1627 = dma.hbm_to_vmem [thread:$0]  (!%p1877_p5), %s2233_s3, 1024, %s1869_s23, [#allocation8], %s1798_s16, %s1798_s16, %s1799_s17  }
  0x22   : > { %s1723_s26 = scalar_lea.hbm %s2231_s1, 128 }
  0x23   : > { %p1724_p9 = scmp.ne.s32.totalorder %s2231_s1, %s1723_s26  ;;  %p1730_p12 = scmp.lt.u32.totalorder %s1723_s26, %s2231_s1 }
  0x25   : > { %p1726_p10 = pnand %p1724_p9, %p1891_p7 }
  0x27   : > { %p1727_p11 = pneg %p1726_p10 }
  0x29   : > { %p1732_p13 = pnand %p1730_p12, %p1727_p11 }
  0x2b   : > { %1735 = shalt.err (!%p1732_p13)
}
  0x2c   : > { %s1736_s23 = scalar_lea.vmem %s1873_s27, 128  ;;  %p1744_p6 = scmp.lt.s32.totalorder %s1873_s27, %s1873_s27 }
  0x2d   : > { %p1737_p0 = scmp.ne.s32.totalorder %s1873_s27, %s1736_s23  ;;  %p1745_p8 = scmp.lt.s32.totalorder %s1736_s23, %s1736_s23 }
  0x2f   : > { %p1739_p1 = pnand %p1737_p0, %p1891_p7  ;;  %p1746_p9 = por %p1745_p8, %p1744_p6 }
  0x31   : > { %p1740_p4 = pneg %p1739_p1 }
  0x33   : > { %p1747_p10 = pnand %p1746_p9, %p1740_p4 }
  0x35   : > { %1750 = shalt.err (!%p1747_p10)
}
  0x36   : > { %s1800_s10 = smov 64   ;;  %s1801_s11 = smov 4  }
  0x37   : > { %1624 = dma.hbm_to_vmem [thread:$0]  (!%p1877_p5), %s2231_s1, 128, %s1873_s27, [#allocation6], %s1800_s10, %s1800_s10, %s1801_s11  }
  0x38   : > { %s1751_s19 = scalar_lea.hbm %s2235_s5, 1024 }
  0x39   : > { %p1752_p11 = scmp.ne.s32.totalorder %s2235_s5, %s1751_s19  ;;  %p1758_p0 = scmp.lt.u32.totalorder %s1751_s19, %s2235_s5 }
  0x3b   : > { %p1754_p12 = pnand %p1752_p11, %p1891_p7 }
  0x3d   : > { %p1755_p13 = pneg %p1754_p12 }
  0x3f   : > { %p1760_p1 = pnand %p1758_p0, %p1755_p13 }
  0x41   : > { %1763 = shalt.err (!%p1760_p1)
}
  0x42   : > { %s1764_s7 = scalar_lea.vmem %s225_s30, 1024  ;;  %p1772_p9 = scmp.lt.s32.totalorder %s225_s30, %s225_s30 }
  0x43   : > { %p1765_p4 = scmp.ne.s32.totalorder %s225_s30, %s1764_s7  ;;  %p1773_p10 = scmp.lt.s32.totalorder %s1764_s7, %s1764_s7 }
  0x45   : > { %p1767_p6 = pnand %p1765_p4, %p1891_p7  ;;  %p1774_p2 = por %p1773_p10, %p1772_p9 }
  0x47   : > { %p1768_p8 = pneg %p1767_p6 }
  0x49   : > { %p1775_p3 = pnand %p1774_p2, %p1768_p8 }
  0x4b   : > { %1778 = shalt.err (!%p1775_p3)
}
  0x4c   : > { %1630 = dma.hbm_to_vmem [thread:$0]  (!%p1877_p5), %s2235_s5, 1024, %s225_s30, [#allocation8], %s1798_s16, %s1798_s16, %s1799_s17  }
  0x4d   : > { %p2247_p11 = scmp.ne.s32.totalorder %s2244_s25, 0 }
  0x4e   : > { %p2248_p7 = scmp.eq.s32.totalorder (!%p2247_p11), %s1860_s24, 0 }
  0x4f   : > { %248 = sbr.rel (%p2247_p11) target bundleno = 1147 (0x47b), region = 44 }
  0x56   : > { %1784 = dma.done.wait (%p2248_p7), [#allocation6], 128   ;;  %p2249_p12 = pmov %p2248_p7 }
  0x57   : > { %p2250_p2 = pmov %p2248_p7 }
  0x58   : > { %1786 = vsyncadd (%p2249_p12), [#allocation6], 4294967168 }
  0x59   : > { %1788 = dma.done.wait (%p2250_p2), [#allocation8], 2048   ;;  %p2251_p3 = pmov %p2250_p2 }
  0x5a   : > { %v304_v0 = vlaneseq  ;;  %v479_v5 = vld [vmem:[#allocation5] sm:$0x4]  ;;  %v516_v6 = vld [vmem:[#allocation5] sm:$0x8]  ;;  %v332_v7 = vld [vmem:[#allocation5] sm:$0x1] }
  0x5b   : > { %1790 = vsyncadd (%p2251_p3), [#allocation8], 4294965248  ;;  %v481_v8 = vshrl.u32 %v479_v5, 16  ;;  %v518_v9 = vpack.i.b16 %v516_v6, %v516_v6  ;;  %v334_v10 = vshrl.u32 %v332_v7, 16  ;;  %v552_v11 = vld [vmem:[#allocation5] sm:$0x8] }
  0x5c   : > { %v305_v1 = vshrl.u32 %v304_v0, 7  ;;  %v370_v12 = vld [vmem:[#allocation5] sm:$0x2]  ;;  %v554_v13 = vshrl.u32 %v552_v11, 16  ;;  %v589_v14 = vld [vmem:[#allocation5 + $0x4] sm:$0x1] }
  0x5d   : > { %v406_v15 = vld [vmem:[#allocation5] sm:$0x2]  ;;  %v482_v16 = vpack.i.b16 %v481_v8, %v481_v8  ;;  %v335_v17 = vpack.i.b16 %v334_v10, %v334_v10  ;;  %v372_v20 = vpack.i.b16 %v370_v12, %v370_v12  ;;  %v591_v24 = vpack.i.b16 %v589_v14, %v589_v14  ;;  %v443_v26 = vld [vmem:[#allocation5] sm:$0x4]  ;;  %s1802_s25 = smov 8   ;;  %s1803_s28 = smov 1  }
  0x5e   : > { %v1970_v2 = vsub.s32 2, %v305_v1  ;;  %v1972_v3 = vsub.s32 3, %v305_v1  ;;  %v1974_v4 = vsub.s32 0, %v305_v1  ;;  %v555_v19 = vpack.i.b16 %v554_v13, %v554_v13  ;;  %s1804_s30 = smov 12   ;;  %s1805_s12 = smov 13  }
  0x5f   : > { %v1977_v21 = vsub.s32 1, %v305_v1  ;;  %v408_v25 = vshrl.u32 %v406_v15, 16  ;;  %v445_v32 = vpack.i.b16 %v443_v26, %v443_v26  ;;  %s1806_s16 = smov 2   ;;  %s1807_s17 = smov 14   ;;  %v300_v42 = vld [vmem:[#allocation5] sm:$0x1] }
  0x60   : > { %v523_v18 = vrot.slane %v518_v9, %v1972_v3  ;;  %v487_v22 = vrot.slane %v482_v16, %v1970_v2  ;;  %v340_v23 = vrot.slane %v335_v17, %v1974_v4  ;;  %v560_v27 = vrot.slane %v555_v19, %v1972_v3  ;;  %s1808_s9 = smov 6   ;;  %s1809_s23 = smov 7  }
  0x61   : > { %v377_v31 = vrot.slane %v372_v20, %v1977_v21  ;;  %v596_v34 = vrot.slane %v591_v24, %v1974_v4  ;;  %v409_v35 = vpack.i.b16 %v408_v25, %v408_v25  ;;  %v450_v39 = vrot.slane %v445_v32, %v1970_v2  ;;  %p286_p5 = scmp.lt.s32.totalorder %s1860_s24, 1  ;;  %s1811_s15 = smov 120  }
  0x62   : > { %v1481_v28 = vcombine.low %v487_v22, %v487_v22  ;;  %v1469_v29 = vcombine.low %v340_v23, %v340_v23  ;;  %v1484_v30 = vcombine.low %v523_v18, %v523_v18  ;;  %v1487_v33 = vcombine.low %v560_v27, %v560_v27  ;;  %s2240_s18 = smov 116   ;;  %s1813_s19 = smov 127  }
  0x63   : > { %v1472_v36 = vcombine.low %v377_v31, %v377_v31  ;;  %v1490_v37 = vcombine.low %v596_v34, %v596_v34  ;;  %v414_v38 = vrot.slane %v409_v35, %v1977_v21  ;;  %v1478_v41 = vcombine.low %v450_v39, %v450_v39  ;;  %s2257_s24 = smov (!%p286_p5, %s1860_s24), 1  ;;  %s2242_s20 = smov 115  }
  0x64   : > { %491 = vrot.lane.b32.xlu0 %v1481_v28, %s1802_s25  ;;  %344 = vrot.lane.b32.xlu1 %v1469_v29, %s1803_s28  ;;  %s1608_s10 = smul.u32 12, %s2257_s24  ;;  %v302_v43 = vpack.i.b16 %v300_v42, %v300_v42  ;;  %vm325_vm0 = vcmask 293888   ;;  %vm364_vm1 = vcmask 293892   ;;  %vm327_vm2 = vcmask 289792   ;;  %s2239_s22 = smov 126  }
  0x65   : > { %v1475_v40 = vcombine.low %v414_v38, %v414_v38  ;;  %v1810_v54 = vmov 0   ;;  %s2241_s26 = smov 114   ;;  %s1817_s29 = smov 122   ;;  %vm810_vm3 = vcmask 56320   ;;  %vm815_vm4 = vcmask 408920  }
  0x66   : > { %v307_v44 = vrot.slane %v302_v43, %v1974_v4  ;;  %s2003_s14 = scalar_lea.vmem %s2230_s0, %s1608_s10  ;;  %622 = vst.msk [vmem:[#allocation2 + $0x68] sm:$0xf0] %vm364_vm1, %v1810_v54  ;;  %1670 = vset.pattern.permute.xlu1 %v1810_v54  ;;  %1669 = vset.pattern.permute.xlu0 %v1810_v54  ;;  %s1818_s7 = smov 121   ;;  %vm840_vm5 = vcmask 351288  }
  0x67   : > { %v297_v46 = vld [vmem:[%s2003_s14] sm:$0xf]  ;;  %v298_v47 = vld [vmem:[%s2003_s14 + $0x4] sm:$0xf]  ;;  %v299_v51 = vld [vmem:[%s2003_s14 + $0x8] sm:$0xf] }
  0x68   : > { %527 = vrot.lane.b32.xlu0 %v1484_v30, %s1804_s30  ;;  %564 = vrot.lane.b32.xlu1 %v1487_v33, %s1805_s12  ;;  %v1466_v45 = vcombine.low %v307_v44, %v307_v44  ;;  %623 = vst.msk [vmem:[#allocation2 + $0x70] sm:$0xff] %vm325_vm0, %v1810_v54  ;;  %624 = vst.msk [vmem:[#allocation2 + $0x78] sm:$0xff] %vm325_vm0, %v1810_v54  ;;  %v477_v55 = vld [vmem:[%s2003_s14 + $0x4] sm:$0xf]  ;;  %v478_v56 = vld [vmem:[%s2003_s14 + $0x8] sm:$0xf] }
  0x69   : > { %v329_v57 = vld [vmem:[%s2003_s14] sm:$0xf]  ;;  %v514_v0 = vld [vmem:[%s2003_s14 + $0x4] sm:$0xf]  ;;  %v515_v6 = vld [vmem:[%s2003_s14 + $0x8] sm:$0xf] }
  0x6a   : > { %v312_v48 = vmul.bf16 %v1466_v45, %v297_v46  ;;  %v313_v49 = vmul.bf16 %v1466_v45, %v298_v47  ;;  %v314_v52 = vmul.bf16 %v1466_v45, %v299_v51  ;;  %v513_v63 = vld [vmem:[%s2003_s14] sm:$0xf]  ;;  %v330_v14 = vld [vmem:[%s2003_s14 + $0x4] sm:$0xf]  ;;  %v331_v16 = vld [vmem:[%s2003_s14 + $0x8] sm:$0xf] }
  0x6b   : > { %v549_v1 = vld [vmem:[%s2003_s14] sm:$0xf]  ;;  %v550_v17 = vld [vmem:[%s2003_s14 + $0x4] sm:$0xf]  ;;  %v551_v18 = vld [vmem:[%s2003_s14 + $0x8] sm:$0xf] }
  0x6c   : > { %381 = vrot.lane.b32.xlu0 %v1472_v36, %s1806_s16  ;;  %600 = vrot.lane.b32.xlu1 %v1490_v37, %s1807_s17  ;;  %v1467_v50 = vcombine.low %v312_v48, %v313_v49  ;;  %v1468_v53 = vcombine.low %v314_v52, %v314_v52  ;;  %v367_v22 = vld [vmem:[%s2003_s14] sm:$0xf]  ;;  %v368_v24 = vld [vmem:[%s2003_s14 + $0x4] sm:$0xf]  ;;  %811 = vst.msk [vmem:[#allocation3] sm:$0xff] %vm810_vm3, %v1810_v54  ;;  %812 = vst.msk [vmem:[#allocation3 + $0x8] sm:$0xff] %vm810_vm3, %v1810_v54 }
  0x6d   : > { %v586_v25 = vld [vmem:[%s2003_s14] sm:$0xf]  ;;  %v587_v26 = vld [vmem:[%s2003_s14 + $0x4] sm:$0xf]  ;;  %v588_v45 = vld [vmem:[%s2003_s14 + $0x8] sm:$0xf] }
  0x6e   : > { %326 = vst.msk [vmem:[#allocation2] sm:$0xff] %vm325_vm0, %v1467_v50  ;;  %v403_v36 = vld [vmem:[%s2003_s14] sm:$0xf]  ;;  %v404_v46 = vld [vmem:[%s2003_s14 + $0x4] sm:$0xf]  ;;  %s1519_s13 = sshll.u32 %s2257_s24, 5 }
  0x6f   : > { %328 = vst.msk [vmem:[#allocation2 + $0x8] sm:$0xf] %vm327_vm2, %v1468_v53  ;;  %v405_v47 = vld [vmem:[%s2003_s14 + $0x8] sm:$0xf]  ;;  %v440_v49 = vld [vmem:[%s2003_s14] sm:$0xf] }
  0x70   : > { %418 = vrot.lane.b32.xlu0 %v1475_v40, %s1808_s9  ;;  %454 = vrot.lane.b32.xlu1 %v1478_v41, %s1809_s23  ;;  %v369_v40 = vld [vmem:[%s2003_s14 + $0x8] sm:$0xf]  ;;  %v441_v50 = vld [vmem:[%s2003_s14 + $0x4] sm:$0xf]  ;;  %813 = vst.msk [vmem:[#allocation3 + $0x10] sm:$0xff] %vm810_vm3, %v1810_v54  ;;  %814 = vst.msk [vmem:[#allocation3 + $0x18] sm:$0xff] %vm810_vm3, %v1810_v54 }
  0x71   : > { %v442_v51 = vld [vmem:[%s2003_s14 + $0x8] sm:$0xf]  ;;  %816 = vst.msk [vmem:[#allocation3] sm:$0xff] %vm815_vm4, %v1810_v54  ;;  %817 = vst.msk [vmem:[#allocation3 + $0x8] sm:$0xff] %vm815_vm4, %v1810_v54 }
  0x72   : > { %818 = vst.msk [vmem:[#allocation3 + $0x10] sm:$0xff] %vm815_vm4, %v1810_v54  ;;  %819 = vst.msk [vmem:[#allocation3 + $0x18] sm:$0xff] %vm815_vm4, %v1810_v54 }
  0xd6   : > { %v2021_v58 = vpop.permute.xlu0 %491  ;;  %v345_v59 = vpop.permute.xlu1 %344 }
  0xd7   : > { %v495_v60 = vmul.bf16 %v2021_v58, %v477_v55  ;;  %v496_v61 = vmul.bf16 %v2021_v58, %v478_v56  ;;  %v347_v62 = vmul.bf16 %v345_v59, %v329_v57  ;;  %v348_v23 = vmul.bf16 %v345_v59, %v330_v14  ;;  %v651_v14 = vld [vmem:[#allocation7 + $0x10] sm:$0xff] }
  0xd8   : > { %v349_v28 = vmul.bf16 %v345_v59, %v331_v16 }
  0xd9   : > { %v1483_v5 = vcombine.low %v495_v60, %v496_v61  ;;  %v1470_v12 = vcombine.low %v347_v62, %v347_v62 }
  0xda   : > { %v528_v7 = vpop.permute.xlu0 %527  ;;  %v565_v8 = vpop.permute.xlu1 %564  ;;  %v1471_v38 = vcombine.low %v348_v23, %v349_v28 }
  0xdb   : > { %v530_v9 = vmul.bf16 %v528_v7, %v513_v63  ;;  %v531_v10 = vmul.bf16 %v528_v7, %v514_v0  ;;  %507 = vrot.lane.b32.xlu0 %v1483_v5, %s1811_s15  ;;  %v567_v11 = vmul.bf16 %v565_v8, %v549_v1  ;;  %v532_v13 = vmul.bf16 %v528_v7, %v515_v6  ;;  %v476_v0 = vld [vmem:[%s2003_s14] sm:$0xf]  ;;  %v1673_v7 = vld [vmem:[%s2232_s2 + $0x4] ss:$8 sps:$4 sm:$0xff]  }
  0xdc   : > { %v568_v29 = vmul.bf16 %v565_v8, %v550_v17  ;;  %v569_v30 = vmul.bf16 %v565_v8, %v551_v18  ;;  %v494_v6 = vmul.bf16 %v2021_v58, %v476_v0  ;;  %769 = vmatprep.mubr.bf16.mxu0 %v1673_v7  ;;  %v655_v58 = vld [vmem:[#allocation7 + $0x30] sm:$0xff] }
  0xdd   : > { %v1485_v15 = vcombine.low %v530_v9, %v531_v10  ;;  %v1488_v20 = vcombine.low %v567_v11, %v567_v11  ;;  %v1486_v31 = vcombine.low %v532_v13, %v532_v13  ;;  %v654_v9 = vld [vmem:[#allocation7 + $0x28] sm:$0xff]  ;;  %v653_v10 = vld [vmem:[#allocation7 + $0x20] sm:$0xff]  ;;  %v656_v13 = vld [vmem:[#allocation7 + $0x38] sm:$0xff] }
  0xde   : > { %v382_v19 = vpop.permute.xlu0 %381  ;;  %v601_v27 = vpop.permute.xlu1 %600  ;;  %v1489_v39 = vcombine.low %v568_v29, %v569_v30  ;;  %v1482_v8 = vcombine.low %v494_v6, %v494_v6  ;;  %v649_v11 = vld [vmem:[#allocation7] sm:$0xff] }
  0xdf   : > { %541 = vrot.lane.b32.xlu1 %v1485_v15, %s2240_s18  ;;  %358 = vrot.lane.b32.xlu0 %v1470_v12, %s1813_s19  ;;  %v384_v32 = vmul.bf16 %v382_v19, %v367_v22  ;;  %v385_v33 = vmul.bf16 %v382_v19, %v368_v24  ;;  %v603_v34 = vmul.bf16 %v601_v27, %v586_v25  ;;  %v650_v12 = vld [vmem:[#allocation7 + $0x8] sm:$0xff]  ;;  %v652_v15 = vld [vmem:[#allocation7 + $0x18] sm:$0xff] }
  0xe0   : > { %v604_v35 = vmul.bf16 %v601_v27, %v587_v26  ;;  %v386_v44 = vmul.bf16 %v382_v19, %v369_v40  ;;  %v605_v53 = vmul.bf16 %v601_v27, %v588_v45  ;;  %v633_v19 = vld [vmem:[#allocation2] sm:$0xff]  ;;  %v647_v45 = vld [vmem:[#allocation2 + $0x70] sm:$0xff] }
  0xe1   : > { %v1473_v42 = vcombine.low %v384_v32, %v385_v33 }
  0xe2   : > { %v419_v37 = vpop.permute.xlu0 %418  ;;  %v1491_v43 = vcombine.low %v603_v34, %v604_v35  ;;  %v455_v52 = vpop.permute.xlu1 %454  ;;  %v1474_v57 = vcombine.low %v386_v44, %v386_v44  ;;  %v1492_v62 = vcombine.low %v605_v53, %v605_v53  ;;  %v1679_v53 = vld [vmem:[%s2232_s2 + $0x20] ss:$8 sps:$4 sm:$0xff]  }
  0xe3   : > { %543 = vrot.lane.b32.xlu1 %v1486_v31, %s2240_s18  ;;  %578 = vrot.lane.b32.xlu0 %v1488_v20, %s2242_s20  ;;  %v421_v41 = vmul.bf16 %v419_v37, %v403_v36  ;;  %v422_v55 = vmul.bf16 %v419_v37, %v404_v46  ;;  %v423_v56 = vmul.bf16 %v419_v37, %v405_v47  ;;  %v648_v47 = vld [vmem:[#allocation2 + $0x78] sm:$0xff] }
  0xe4   : > { %v457_v59 = vmul.bf16 %v455_v52, %v440_v49  ;;  %v458_v60 = vmul.bf16 %v455_v52, %v441_v50  ;;  %v459_v61 = vmul.bf16 %v455_v52, %v442_v51  ;;  %v1671_v49 = vld [vmem:[%s2232_s2] ss:$8 sps:$4 sm:$0xff]   ;;  %v1674_v50 = vld [vmem:[%s2232_s2 + $0x14] ss:$8 sps:$4 sm:$0xff]   ;;  %v1676_v51 = vld [vmem:[%s2232_s2 + $0x10] ss:$8 sps:$4 sm:$0xff]  }
  0xe5   : > { %v1476_v48 = vcombine.low %v421_v41, %v421_v41  ;;  %v1477_v63 = vcombine.low %v422_v55, %v423_v56  ;;  %v1677_v52 = vld [vmem:[%s2232_s2 + $0x24] ss:$8 sps:$4 sm:$0xff]   ;;  %v1680_v55 = vld [vmem:[%s2232_s2 + $0x34] ss:$8 sps:$4 sm:$0xff]   ;;  %v1682_v56 = vld [vmem:[%s2232_s2 + $0x30] ss:$8 sps:$4 sm:$0xff]  }
  0xe6   : > { %v1479_v1 = vcombine.low %v457_v59, %v458_v60  ;;  %v1480_v5 = vcombine.low %v459_v61, %v459_v61 }
  0xe7   : > { %360 = vrot.lane.b32.xlu1 %v1471_v38, %s1813_s19  ;;  %580 = vrot.lane.b32.xlu0 %v1489_v39, %s2242_s20 }
  0xeb   : > { %395 = vrot.lane.b32.xlu1 %v1473_v42, %s2239_s22  ;;  %614 = vrot.lane.b32.xlu0 %v1491_v43, %s2241_s26 }
  0xef   : > { %397 = vrot.lane.b32.xlu1 %v1474_v57, %s2239_s22  ;;  %432 = vrot.lane.b32.xlu0 %v1476_v48, %s1817_s29 }
  0xf3   : > { %616 = vrot.lane.b32.xlu1 %v1492_v62, %s2241_s26  ;;  %434 = vrot.lane.b32.xlu0 %v1477_v63, %s1817_s29 }
  0xf7   : > { %468 = vrot.lane.b32.xlu1 %v1479_v1, %s1818_s7  ;;  %470 = vrot.lane.b32.xlu0 %v1480_v5, %s1818_s7 }
  0xfb   : > { %505 = vrot.lane.b32.xlu1 %v1482_v8, %s1811_s15  ;;  %679 = vperm.xlu0 %1669, %v653_v10  }
  0xff   : > { %684 = vperm.xlu1 %1670, %v654_v9   ;;  %664 = vperm.xlu0 %1669, %v650_v12  }
 0x103   : > { %659 = vperm.xlu1 %1670, %v649_v11   ;;  %694 = vperm.xlu0 %1669, %v656_v13  }
 0x107   : > { %689 = vperm.xlu1 %1670, %v655_v58   ;;  %674 = vperm.xlu0 %1669, %v652_v15  }
 0x10b   : > { %669 = vperm.xlu1 %1670, %v651_v14  }
 0x14d   : > { %v508_v16 = vpop.permute.xlu0 %507 }
 0x14e   : > { %512 = vst.msk [vmem:[#allocation2 + $0x40] sm:$0xff] %vm325_vm0, %v508_v16 }
 0x151   : > { %v542_v17 = vpop.permute.xlu1 %541  ;;  %v359_v18 = vpop.permute.xlu0 %358 }
 0x152   : > { %547 = vst.msk [vmem:[#allocation2 + $0x48] sm:$0xff] %vm325_vm0, %v542_v17 }
 0x153   : > { %365 = vst.msk [vmem:[#allocation2 + $0x8] sm:$0xf0] %vm364_vm1, %v359_v18 }
 0x155   : > { %v544_v20 = vpop.permute.xlu1 %543  ;;  %v579_v22 = vpop.permute.xlu0 %578  ;;  %v641_v23 = vld [vmem:[#allocation2 + $0x40] sm:$0xff] }
 0x156   : > { %548 = vst.msk [vmem:[#allocation2 + $0x50] sm:$0xf] %vm327_vm2, %v544_v20  ;;  %1528 = vmatprep.subr.bf16.mxu0 %v641_v23  ;;  %v865_v23 = vld [vmem:[#allocation5] sm:$0x2] }
 0x157   : > { %584 = vst.msk [vmem:[#allocation2 + $0x50] sm:$0xf0] %vm364_vm1, %v579_v22  ;;  %1529 = vmatpush3.bf16.msra.mxu0 %v633_v19  ;;  %v846_v22 = vld [vmem:[#allocation5] sm:$0x4] }
 0x159   : > { %v361_v24 = vpop.permute.xlu1 %360  ;;  %v581_v25 = vpop.permute.xlu0 %580  ;;  %v642_v26 = vld [vmem:[#allocation2 + $0x48] sm:$0xff] }
 0x15a   : > { %v634_v27 = vld [vmem:[#allocation2 + $0x8] sm:$0xff]  ;;  %366 = vst.msk [vmem:[#allocation2 + $0x10] sm:$0xff] %vm325_vm0, %v361_v24  ;;  %585 = vst.msk [vmem:[#allocation2 + $0x58] sm:$0xff] %vm325_vm0, %v581_v25  ;;  %1530 = vmatprep.subr.bf16.mxu0 %v642_v26 }
 0x15b   : > { %1531 = vmatpush3.bf16.msra.mxu0 %v634_v27 }
 0x15d   : > { %v396_v28 = vpop.permute.xlu1 %395  ;;  %v615_v29 = vpop.permute.xlu0 %614 }
 0x15e   : > { %v643_v30 = vld [vmem:[#allocation2 + $0x50] sm:$0xff]  ;;  %401 = vst.msk [vmem:[#allocation2 + $0x18] sm:$0xff] %vm325_vm0, %v396_v28  ;;  %620 = vst.msk [vmem:[#allocation2 + $0x60] sm:$0xff] %vm325_vm0, %v615_v29  ;;  %v848_v28 = vpack.i.b16 %v846_v22, %v846_v22  ;;  %v867_v29 = vshrl.u32 %v865_v23, 16  ;;  %v1072_v23 = vld [vmem:[#allocation5] sm:$0x8] }
 0x15f   : > { %1532 = vmatprep.subr.bf16.mxu0 %v643_v30 }
 0x161   : > { %v398_v31 = vpop.permute.xlu1 %397  ;;  %v433_v32 = vpop.permute.xlu0 %432  ;;  %v635_v33 = vld [vmem:[#allocation2 + $0x10] sm:$0xff]  ;;  %v644_v34 = vld [vmem:[#allocation2 + $0x58] sm:$0xff] }
 0x162   : > { %402 = vst.msk [vmem:[#allocation2 + $0x20] sm:$0xf] %vm327_vm2, %v398_v31  ;;  %1533 = vmatpush3.bf16.msra.mxu0 %v635_v33 }
 0x163   : > { %438 = vst.msk [vmem:[#allocation2 + $0x20] sm:$0xf0] %vm364_vm1, %v433_v32  ;;  %1534 = vmatprep.subr.bf16.mxu0 %v644_v34 }
 0x165   : > { %v617_v35 = vpop.permute.xlu1 %616  ;;  %v435_v36 = vpop.permute.xlu0 %434  ;;  %v636_v37 = vld [vmem:[#allocation2 + $0x18] sm:$0xff]  ;;  %v645_v38 = vld [vmem:[#allocation2 + $0x60] sm:$0xff] }
 0x166   : > { %621 = vst.msk [vmem:[#allocation2 + $0x68] sm:$0xf] %vm327_vm2, %v617_v35  ;;  %1535 = vmatpush3.bf16.msra.mxu0 %v636_v37  ;;  %v853_v37 = vrot.slane %v848_v28, %v1970_v2 }
 0x167   : > { %439 = vst.msk [vmem:[#allocation2 + $0x28] sm:$0xff] %vm325_vm0, %v435_v36  ;;  %1536 = vmatprep.subr.bf16.mxu0 %v645_v38  ;;  %v868_v38 = vpack.i.b16 %v867_v29, %v867_v29 }
 0x169   : > { %v469_v39 = vpop.permute.xlu1 %468  ;;  %v471_v40 = vpop.permute.xlu0 %470 }
 0x16a   : > { %v637_v41 = vld [vmem:[#allocation2 + $0x20] sm:$0xff]  ;;  %474 = vst.msk [vmem:[#allocation2 + $0x30] sm:$0xff] %vm325_vm0, %v469_v39 }
 0x16b   : > { %475 = vst.msk [vmem:[#allocation2 + $0x38] sm:$0xf] %vm327_vm2, %v471_v40  ;;  %1537 = vmatpush3.bf16.msra.mxu0 %v637_v41  ;;  %v904_v39 = vld [vmem:[#allocation5] sm:$0x4] }
 0x16c   : > { %v885_v40 = vld [vmem:[#allocation5] sm:$0x4] }
 0x16d   : > { %v506_v42 = vpop.permute.xlu1 %505  ;;  %v646_v43 = vld [vmem:[#allocation2 + $0x68] sm:$0xff] }
 0x16e   : > { %v638_v44 = vld [vmem:[#allocation2 + $0x28] sm:$0xff]  ;;  %511 = vst.msk [vmem:[#allocation2 + $0x38] sm:$0xf0] %vm364_vm1, %v506_v42  ;;  %1538 = vmatprep.subr.bf16.mxu0 %v646_v43  ;;  %v906_v42 = vshrl.u32 %v904_v39, 16 }
 0x16f   : > { %1539 = vmatpush3.bf16.msra.mxu0 %v638_v44 }
 0x170   : > { %1540 = vmatprep.subr.bf16.mxu0 %v647_v45 }
 0x171   : > { %v639_v46 = vld [vmem:[#allocation2 + $0x30] sm:$0xff] }
 0x173   : > { %1541 = vmatpush3.bf16.msra.mxu0 %v639_v46  ;;  %v873_v46 = vrot.slane %v868_v38, %v1977_v21 }
 0x174   : > { %1542 = vmatprep.subr.bf16.mxu0 %v648_v47  ;;  %v887_v47 = vpack.i.b16 %v885_v40, %v885_v40 }
 0x175   : > { %v640_v48 = vld [vmem:[#allocation2 + $0x38] sm:$0xff] }
 0x177   : > { %1543 = vmatpush3.bf16.msra.mxu0 %v640_v48 }
 0x17a   : > { %770 = vmatmul.mubr.bf16.vlgmr.msra.gmra.mrb[0].mxu0 %v1671_v49  ;;  %v680_v59 = vpop.permute.xlu0 %679  ;;  %v924_v49 = vld [vmem:[#allocation5] sm:$0x1] }
 0x17b   : > { %777 = vmatprep.mubr.bf16.mxu0 %v1674_v50 }
 0x17e   : > { %v685_v57 = vpop.permute.xlu1 %684  ;;  %v665_v61 = vpop.permute.xlu0 %664 }
 0x182   : > { %778 = vmatmul.mubr.bf16.gmra.mrb[4].mxu0 %v1676_v51  ;;  %v660_v60 = vpop.permute.xlu1 %659  ;;  %v695_v9 = vpop.permute.xlu0 %694 }
 0x183   : > { %785 = vmatprep.mubr.bf16.mxu0 %v1677_v52 }
 0x186   : > { %v690_v6 = vpop.permute.xlu1 %689  ;;  %v675_v18 = vpop.permute.xlu0 %674 }
 0x18a   : > { %786 = vmatmul.mubr.bf16.gmra.mrb[8].mxu0 %v1679_v53  ;;  %v670_v14 = vpop.permute.xlu1 %669 }
 0x18b   : > { %793 = vmatprep.mubr.bf16.mxu0 %v1680_v55  ;;  %v907_v55 = vpack.i.b16 %v906_v42, %v906_v42 }
 0x192   : > { %794 = vmatmul.mubr.bf16.gmra.mrb[12].mxu0 %v1682_v56 }
 0x24d   : > { %v1544_v62 = vpop.f32.mrb[0].mxu0 }
 0x24e   : > { %v1545_v63 = vpop.f32.mrb[1].mxu0 }
 0x24f   : > { %v1546_v0 = vadd.f32 %v1545_v63, %v1544_v62  ;;  %v1547_v1 = vpop.f32.mrb[2].mxu0  ;;  %v1013_v62 = vld [vmem:[#allocation5] sm:$0x2]  ;;  %v1111_v63 = vld [vmem:[#allocation5] sm:$0x8] }
 0x250   : > { %v1548_v5 = vpop.f32.mrb[3].mxu0 }
 0x251   : > { %v772_v7 = vadd.f32 %v1546_v0, %v660_v60  ;;  %v1549_v8 = vadd.f32 %v1548_v5, %v1547_v1  ;;  %v994_v60 = vld [vmem:[#allocation5] sm:$0x4]  ;;  %v912_v1 = vrot.slane %v907_v55, %v1970_v2 }
 0x252   : > { %v996_v5 = vpack.i.b16 %v994_v60, %v994_v60 }
 0x253   : > { %v775_v10 = vadd.f32 %v1549_v8, %v665_v61  ;;  %v802_v11 = vmax.f32 %v772_v7, 0.0  ;;  %v926_v61 = vshrl.u32 %v924_v49, 16  ;;  %v1015_v7 = vshrl.u32 %v1013_v62, 16  ;;  %v944_v49 = vld [vmem:[#allocation5] sm:$0x1] }
 0x255   : > { %v803_v12 = vmax.f32 %v775_v10, 0.0  ;;  %v1550_v58 = vpop.f32.mrb[4].mxu0 }
 0x256   : > { %v1551_v13 = vpop.f32.mrb[5].mxu0 }
 0x257   : > { %v820_v54 = vpack.c.bf16 %v803_v12, %v802_v11  ;;  %v1552_v15 = vadd.f32 %v1551_v13, %v1550_v58  ;;  %v1553_v16 = vpop.f32.mrb[6].mxu0  ;;  %v1113_v11 = vshrl.u32 %v1111_v63, 16  ;;  %v1016_v58 = vpack.i.b16 %v1015_v7, %v1015_v7 }
 0x258   : > { %v1554_v17 = vpop.f32.mrb[7].mxu0  ;;  %v1001_v13 = vrot.slane %v996_v5, %v1970_v2 }
 0x259   : > { %v780_v19 = vadd.f32 %v1552_v15, %v670_v14  ;;  %v1555_v20 = vadd.f32 %v1554_v17, %v1553_v16  ;;  %828 = vrot.lane.b32.xlu0 %v820_v54, %s1809_s23  ;;  %v1114_v14 = vpack.i.b16 %v1113_v11, %v1113_v11  ;;  %v1033_v54 = vld [vmem:[#allocation5] sm:$0x4]  ;;  %v1131_v15 = vld [vmem:[#allocation5 + $0x4] sm:$0x1]  ;;  %v1021_v17 = vrot.slane %v1016_v58, %v1977_v21 }
 0x25a   : > { %v1052_v16 = vld [vmem:[#allocation5] sm:$0x4] }
 0x25b   : > { %v783_v24 = vadd.f32 %v1555_v20, %v675_v18  ;;  %v804_v25 = vmax.f32 %v780_v19, 0.0  ;;  %v1119_v18 = vrot.slane %v1114_v14, %v1972_v3  ;;  %v1035_v19 = vpack.i.b16 %v1033_v54, %v1033_v54 }
 0x25c   : > { %v1133_v20 = vpack.i.b16 %v1131_v15, %v1131_v15  ;;  %v1054_v22 = vshrl.u32 %v1052_v16, 16  ;;  %v1177_v15 = vld [vmem:[#allocation9 + $0x20] sm:$0xff] }
 0x25d   : > { %v805_v26 = vmax.f32 %v783_v24, 0.0  ;;  %v1556_v27 = vpop.f32.mrb[8].mxu0  ;;  %v1040_v24 = vrot.slane %v1035_v19, %v1970_v2 }
 0x25e   : > { %v1557_v30 = vpop.f32.mrb[9].mxu0 }
 0x25f   : > { %v821_v31 = vpack.c.bf16 %v805_v26, %v804_v25  ;;  %v1558_v32 = vadd.f32 %v1557_v30, %v1556_v27  ;;  %v1559_v33 = vpop.f32.mrb[10].mxu0  ;;  %v1138_v25 = vrot.slane %v1133_v20, %v1974_v4  ;;  %v1055_v26 = vpack.i.b16 %v1054_v22, %v1054_v22  ;;  %v1092_v30 = vld [vmem:[#allocation5] sm:$0x8]  ;;  %v1685_v20 = vld [vmem:[%s2234_s4 + $0x4] ss:$8 sps:$4 sm:$0xff]  }
 0x260   : > { %v1560_v34 = vpop.f32.mrb[11].mxu0  ;;  %v1074_v27 = vshrl.u32 %v1072_v23, 16  ;;  %1293 = vmatprep.mubr.bf16.mxu1 %v1685_v20 }
 0x261   : > { %v788_v35 = vadd.f32 %v1558_v32, %v680_v59  ;;  %v1561_v36 = vadd.f32 %v1560_v34, %v1559_v33  ;;  %830 = vrot.lane.b32.xlu0 %v821_v31, %s1809_s23  ;;  %v1060_v28 = vrot.slane %v1055_v26, %v1970_v2  ;;  %v955_v31 = vld [vmem:[#allocation5] sm:$0x1]  ;;  %v1094_v33 = vpack.i.b16 %v1092_v30, %v1092_v30  ;;  %v1178_v26 = vld [vmem:[#allocation9 + $0x28] sm:$0xff] }
 0x262   : > { %v1075_v29 = vpack.i.b16 %v1074_v27, %v1074_v27  ;;  %v957_v34 = vshrl.u32 %v955_v31, 16  ;;  %v1180_v27 = vld [vmem:[#allocation9 + $0x38] sm:$0xff] }
 0x263   : > { %v791_v41 = vadd.f32 %v1561_v36, %v685_v57  ;;  %v806_v43 = vmax.f32 %v788_v35, 0.0  ;;  %v892_v57 = vrot.slane %v887_v47, %v1970_v2  ;;  %v1099_v35 = vrot.slane %v1094_v33, %v1972_v3 }
 0x264   : > { %v1080_v32 = vrot.slane %v1075_v29, %v1972_v3  ;;  %v958_v36 = vpack.i.b16 %v957_v34, %v957_v34 }
 0x265   : > { %v807_v44 = vmax.f32 %v791_v41, 0.0  ;;  %v1562_v45 = vpop.f32.mrb[12].mxu0  ;;  %855 = vrot.lane.b32.xlu0 %v853_v37, %s1809_s23  ;;  %v975_v37 = vld [vmem:[#allocation5] sm:$0x2] }
 0x266   : > { %v1563_v48 = vpop.f32.mrb[13].mxu0  ;;  %v963_v38 = vrot.slane %v958_v36, %v1974_v4  ;;  %v977_v2 = vpack.i.b16 %v975_v37, %v975_v37 }
 0x267   : > { %v1564_v50 = vadd.f32 %v1563_v48, %v1562_v45  ;;  %v1565_v51 = vpop.f32.mrb[14].mxu0  ;;  %v822_v52 = vpack.c.bf16 %v807_v44, %v806_v43 }
 0x268   : > { %v1566_v53 = vpop.f32.mrb[15].mxu0  ;;  %v982_v39 = vrot.slane %v977_v2, %v1977_v21 }
 0x269   : > { %v796_v56 = vadd.f32 %v1564_v50, %v690_v6  ;;  %v1567_v59 = vadd.f32 %v1566_v53, %v1565_v51  ;;  %832 = vrot.lane.b32.xlu1 %v822_v52, %s1809_s23  ;;  %875 = vrot.lane.b32.xlu0 %v873_v46, %s1808_s9  ;;  %v927_v6 = vpack.i.b16 %v926_v61, %v926_v61 }
 0x26a   : > { %v946_v52 = vpack.i.b16 %v944_v49, %v944_v49 }
 0x26b   : > { %v799_v0 = vadd.f32 %v1567_v59, %v695_v9  ;;  %v808_v8 = vmax.f32 %v796_v56, 0.0  ;;  %v932_v9 = vrot.slane %v927_v6, %v1974_v4 }
 0x26d   : > { %v809_v10 = vmax.f32 %v799_v0, 0.0  ;;  %894 = vrot.lane.b32.xlu0 %v892_v57, %s1809_s23  ;;  %v951_v57 = vrot.slane %v946_v52, %v1974_v4 }
 0x26f   : > { %v823_v12 = vpack.c.bf16 %v809_v10, %v808_v8 }
 0x271   : > { %834 = vrot.lane.b32.xlu1 %v823_v12, %s1809_s23  ;;  %914 = vrot.lane.b32.xlu0 %v912_v1, %s1802_s25  ;;  %v1173_v12 = vld [vmem:[#allocation9] sm:$0xff] }
 0x275   : > { %1003 = vrot.lane.b32.xlu1 %v1001_v13, %s1809_s23  ;;  %934 = vrot.lane.b32.xlu0 %v932_v9, %s1803_s28  ;;  %v1175_v9 = vld [vmem:[#allocation9 + $0x10] sm:$0xff] }
 0x279   : > { %1023 = vrot.lane.b32.xlu1 %v1021_v17, %s1808_s9  ;;  %1121 = vrot.lane.b32.xlu0 %v1119_v18, %s1805_s12  ;;  %v1179_v18 = vld [vmem:[#allocation9 + $0x30] sm:$0xff] }
 0x27d   : > { %1042 = vrot.lane.b32.xlu1 %v1040_v24, %s1809_s23  ;;  %1140 = vrot.lane.b32.xlu0 %v1138_v25, %s1807_s17  ;;  %s2255_s17 = smov 126   ;;  %v1174_v24 = vld [vmem:[#allocation9 + $0x8] sm:$0xff]  ;;  %v1176_v25 = vld [vmem:[#allocation9 + $0x18] sm:$0xff] }
 0x281   : > { %1062 = vrot.lane.b32.xlu1 %v1060_v28, %s1802_s25  ;;  %s2252_s25 = smov 115  }
 0x285   : > { %1082 = vrot.lane.b32.xlu1 %v1080_v32, %s1805_s12 }
 0x289   : > { %1101 = vrot.lane.b32.xlu1 %v1099_v35, %s1804_s30  ;;  %s2254_s30 = smov 116  }
 0x28d   : > { %965 = vrot.lane.b32.xlu1 %v963_v38, %s1803_s28  ;;  %s2253_s28 = smov 114  }
 0x291   : > { %984 = vrot.lane.b32.xlu1 %v982_v39, %s1806_s16 }
 0x2cb   : > { %v829_v40 = vpop.permute.xlu0 %828 }
 0x2cc   : > { %841 = vst.msk [vmem:[#allocation3] sm:$0xff] %vm840_vm5, %v829_v40 }
 0x2d3   : > { %v831_v41 = vpop.permute.xlu0 %830  ;;  %v845_v3 = vld [vmem:[#allocation3] sm:$0xff] }
 0x2d4   : > { %842 = vst.msk [vmem:[#allocation3 + $0x8] sm:$0xff] %vm840_vm5, %v831_v41 }
 0x2d7   : > { %v856_v42 = vpop.permute.xlu0 %855 }
 0x2d8   : > { %v858_v43 = vmul.bf16 %v856_v42, %v845_v3 }
 0x2da   : > { %860 = vrot.lane.b32.xlu1 %v858_v43, %s1818_s7 }
 0x2db   : > { %v833_v44 = vpop.permute.xlu1 %832  ;;  %v864_v45 = vld [vmem:[#allocation3 + $0x8] sm:$0xff]  ;;  %v876_v46 = vpop.permute.xlu0 %875 }
 0x2dc   : > { %843 = vst.msk [vmem:[#allocation3 + $0x10] sm:$0xff] %vm840_vm5, %v833_v44  ;;  %v878_v21 = vmul.bf16 %v876_v46, %v864_v45 }
 0x2de   : > { %880 = vrot.lane.b32.xlu1 %v878_v21, %s1817_s29 }
 0x2df   : > { %v895_v47 = vpop.permute.xlu0 %894 }
 0x2e0   : > { %v897_v48 = vmul.bf16 %v895_v47, %v864_v45 }
 0x2e2   : > { %899 = vrot.lane.b32.xlu1 %v897_v48, %s1818_s7 }
 0x2e3   : > { %v835_v50 = vpop.permute.xlu1 %834  ;;  %v915_v51 = vpop.permute.xlu0 %914  ;;  %v993_v55 = vld [vmem:[#allocation3 + $0x10] sm:$0xff] }
 0x2e4   : > { %844 = vst.msk [vmem:[#allocation3 + $0x18] sm:$0xff] %vm840_vm5, %v835_v50  ;;  %v917_v53 = vmul.bf16 %v915_v51, %v845_v3 }
 0x2e6   : > { %919 = vrot.lane.b32.xlu1 %v917_v53, %s1811_s15 }
 0x2e7   : > { %v1004_v56 = vpop.permute.xlu1 %1003  ;;  %v935_v59 = vpop.permute.xlu0 %934 }
 0x2e8   : > { %v1006_v60 = vmul.bf16 %v1004_v56, %v993_v55  ;;  %v937_v61 = vmul.bf16 %v993_v55, %v935_v59  ;;  %v1683_v59 = vld [vmem:[%s2234_s4] ss:$8 sps:$4 sm:$0xff]  }
 0x2ea   : > { %1008 = vrot.lane.b32.xlu0 %v1006_v60, %s1818_s7  ;;  %939 = vrot.lane.b32.xlu1 %v937_v61, %s1813_s19  ;;  %v1688_v60 = vld [vmem:[%s2234_s4 + $0x10] ss:$8 sps:$4 sm:$0xff]   ;;  %v1689_v61 = vld [vmem:[%s2234_s4 + $0x24] ss:$8 sps:$4 sm:$0xff]  }
 0x2eb   : > { %v943_v62 = vld [vmem:[#allocation3 + $0x18] sm:$0xff]  ;;  %v1024_v63 = vpop.permute.xlu1 %1023  ;;  %v1122_v0 = vpop.permute.xlu0 %1121 }
 0x2ec   : > { %v952_v1 = vmul.bf16 %v951_v57, %v943_v62  ;;  %v1026_v5 = vmul.bf16 %v1024_v63, %v943_v62  ;;  %v1124_v7 = vmul.bf16 %v1122_v0, %v864_v45  ;;  %v1686_v57 = vld [vmem:[%s2234_s4 + $0x14] ss:$8 sps:$4 sm:$0xff]   ;;  %v1694_v0 = vld [vmem:[%s2234_s4 + $0x30] ss:$8 sps:$4 sm:$0xff]  }
 0x2ed   : > { %v1692_v63 = vld [vmem:[%s2234_s4 + $0x34] ss:$8 sps:$4 sm:$0xff]  }
 0x2ee   : > { %953 = vst.msk [vmem:[#allocation4 + $0x28] sm:$0xff] %vm325_vm0, %v952_v1  ;;  %1028 = vrot.lane.b32.xlu0 %v1026_v5, %s1817_s29  ;;  %1126 = vrot.lane.b32.xlu1 %v1124_v7, %s2252_s25 }
 0x2ef   : > { %v1043_v8 = vpop.permute.xlu1 %1042  ;;  %v1141_v4 = vpop.permute.xlu0 %1140 }
 0x2f0   : > { %v1045_v10 = vmul.bf16 %v1043_v8, %v943_v62  ;;  %v1143_v6 = vmul.bf16 %v1141_v4, %v845_v3 }
 0x2f2   : > { %1047 = vrot.lane.b32.xlu0 %v1045_v10, %s1818_s7  ;;  %1145 = vrot.lane.b32.xlu1 %v1143_v6, %s2253_s28  ;;  %s2209_s28 = scalar_lea.vmem %s2236_s6, %s1519_s13 }
 0x2f3   : > { %v1063_v11 = vpop.permute.xlu1 %1062 }
 0x2f4   : > { %v1065_v58 = vmul.bf16 %v1063_v11, %v993_v55 }
 0x2f5   : > { %v1162_v51 = vld [vmem:[#allocation4 + $0x28] sm:$0xff] }
 0x2f6   : > { %1067 = vrot.lane.b32.xlu0 %v1065_v58, %s1811_s15  ;;  %1183 = vperm.xlu1 %1670, %v1173_v12  }
 0x2f7   : > { %v1083_v13 = vpop.permute.xlu1 %1082 }
 0x2f8   : > { %v1085_v14 = vmul.bf16 %v1083_v13, %v845_v3 }
 0x2fa   : > { %1087 = vrot.lane.b32.xlu0 %v1085_v14, %s2252_s25  ;;  %1193 = vperm.xlu1 %1670, %v1175_v9  }
 0x2fb   : > { %v1102_v54 = vpop.permute.xlu1 %1101 }
 0x2fc   : > { %v1104_v16 = vmul.bf16 %v1102_v54, %v864_v45 }
 0x2fe   : > { %1106 = vrot.lane.b32.xlu0 %v1104_v16, %s2254_s30  ;;  %1203 = vperm.xlu1 %1670, %v1177_v15  }
 0x2ff   : > { %v966_v17 = vpop.permute.xlu1 %965 }
 0x300   : > { %v968_v19 = vmul.bf16 %v966_v17, %v943_v62  ;;  %v1691_v62 = vld [vmem:[%s2234_s4 + $0x20] ss:$8 sps:$4 sm:$0xff]  }
 0x302   : > { %970 = vrot.lane.b32.xlu0 %v968_v19, %s1813_s19  ;;  %1213 = vperm.xlu1 %1670, %v1179_v18  }
 0x303   : > { %v985_v22 = vpop.permute.xlu1 %984 }
 0x304   : > { %v987_v23 = vmul.bf16 %v993_v55, %v985_v22 }
 0x306   : > { %989 = vrot.lane.b32.xlu0 %v987_v23, %s2255_s17 }
 0x30a   : > { %1188 = vperm.xlu0 %1669, %v1174_v24  }
 0x30e   : > { %1198 = vperm.xlu0 %1669, %v1176_v25  }
 0x312   : > { %1208 = vperm.xlu0 %1669, %v1178_v26  }
 0x316   : > { %1218 = vperm.xlu0 %1669, %v1180_v27  }
 0x34c   : > { %v861_v28 = vpop.permute.xlu1 %860 }
 0x34d   : > { %863 = vst.msk [vmem:[#allocation4] sm:$0xff] %vm325_vm0, %v861_v28 }
 0x350   : > { %v881_v29 = vpop.permute.xlu1 %880 }
 0x351   : > { %883 = vst.msk [vmem:[#allocation4 + $0x8] sm:$0xff] %vm325_vm0, %v881_v29 }
 0x354   : > { %v900_v30 = vpop.permute.xlu1 %899  ;;  %v1157_v2 = vld [vmem:[#allocation4] sm:$0xff] }
 0x355   : > { %902 = vst.msk [vmem:[#allocation4 + $0x10] sm:$0xff] %vm325_vm0, %v900_v30 }
 0x358   : > { %v920_v31 = vpop.permute.xlu1 %919  ;;  %v1158_v41 = vld [vmem:[#allocation4 + $0x8] sm:$0xff] }
 0x359   : > { %922 = vst.msk [vmem:[#allocation4 + $0x18] sm:$0xff] %vm325_vm0, %v920_v31 }
 0x35c   : > { %v940_v32 = vpop.permute.xlu1 %939  ;;  %v1009_v33 = vpop.permute.xlu0 %1008  ;;  %v1159_v43 = vld [vmem:[#allocation4 + $0x10] sm:$0xff] }
 0x35d   : > { %942 = vst.msk [vmem:[#allocation4 + $0x20] sm:$0xff] %vm325_vm0, %v940_v32  ;;  %1011 = vst.msk [vmem:[#allocation4 + $0x40] sm:$0xff] %vm325_vm0, %v1009_v33 }
 0x360   : > { %v1127_v34 = vpop.permute.xlu1 %1126  ;;  %v1029_v35 = vpop.permute.xlu0 %1028  ;;  %v1160_v46 = vld [vmem:[#allocation4 + $0x18] sm:$0xff] }
 0x361   : > { %1129 = vst.msk [vmem:[#allocation4 + $0x70] sm:$0xff] %vm325_vm0, %v1127_v34  ;;  %1031 = vst.msk [vmem:[#allocation4 + $0x48] sm:$0xff] %vm325_vm0, %v1029_v35 }
 0x364   : > { %v1146_v36 = vpop.permute.xlu1 %1145  ;;  %v1048_v37 = vpop.permute.xlu0 %1047  ;;  %v1165_v38 = vld [vmem:[#allocation4 + $0x40] sm:$0xff] }
 0x365   : > { %1148 = vst.msk [vmem:[#allocation4 + $0x78] sm:$0xff] %vm325_vm0, %v1146_v36  ;;  %1050 = vst.msk [vmem:[#allocation4 + $0x50] sm:$0xff] %vm325_vm0, %v1048_v37  ;;  %1568 = vmatprep.subr.bf16.mxu1 %v1165_v38  ;;  %v1161_v48 = vld [vmem:[#allocation4 + $0x20] sm:$0xff] }
 0x366   : > { %1569 = vmatpush3.bf16.msra.mxu1 %v1157_v2 }
 0x368   : > { %v1068_v39 = vpop.permute.xlu0 %1067  ;;  %v1166_v40 = vld [vmem:[#allocation4 + $0x48] sm:$0xff]  ;;  %v1171_v52 = vld [vmem:[#allocation4 + $0x70] sm:$0xff] }
 0x369   : > { %1070 = vst.msk [vmem:[#allocation4 + $0x58] sm:$0xff] %vm325_vm0, %v1068_v39  ;;  %1570 = vmatprep.subr.bf16.mxu1 %v1166_v40 }
 0x36a   : > { %1571 = vmatpush3.bf16.msra.mxu1 %v1158_v41 }
 0x36c   : > { %v1088_v3 = vpop.permute.xlu0 %1087  ;;  %v1167_v42 = vld [vmem:[#allocation4 + $0x50] sm:$0xff]  ;;  %v1172_v55 = vld [vmem:[#allocation4 + $0x78] sm:$0xff] }
 0x36d   : > { %1090 = vst.msk [vmem:[#allocation4 + $0x60] sm:$0xff] %vm325_vm0, %v1088_v3  ;;  %1572 = vmatprep.subr.bf16.mxu1 %v1167_v42 }
 0x36e   : > { %1573 = vmatpush3.bf16.msra.mxu1 %v1159_v43 }
 0x370   : > { %v1107_v44 = vpop.permute.xlu0 %1106  ;;  %v1168_v45 = vld [vmem:[#allocation4 + $0x58] sm:$0xff] }
 0x371   : > { %1109 = vst.msk [vmem:[#allocation4 + $0x68] sm:$0xff] %vm325_vm0, %v1107_v44  ;;  %1574 = vmatprep.subr.bf16.mxu1 %v1168_v45 }
 0x372   : > { %1575 = vmatpush3.bf16.msra.mxu1 %v1160_v46 }
 0x374   : > { %v971_v21 = vpop.permute.xlu0 %970  ;;  %v1169_v47 = vld [vmem:[#allocation4 + $0x60] sm:$0xff] }
 0x375   : > { %973 = vst.msk [vmem:[#allocation4 + $0x30] sm:$0xff] %vm325_vm0, %v971_v21  ;;  %1576 = vmatprep.subr.bf16.mxu1 %v1169_v47  ;;  %v1184_v4 = vpop.permute.xlu1 %1183 }
 0x376   : > { %1577 = vmatpush3.bf16.msra.mxu1 %v1161_v48 }
 0x378   : > { %v990_v49 = vpop.permute.xlu0 %989  ;;  %v1170_v50 = vld [vmem:[#allocation4 + $0x68] sm:$0xff] }
 0x379   : > { %992 = vst.msk [vmem:[#allocation4 + $0x38] sm:$0xff] %vm325_vm0, %v990_v49  ;;  %1578 = vmatprep.subr.bf16.mxu1 %v1170_v50  ;;  %v1194_v17 = vpop.permute.xlu1 %1193 }
 0x37a   : > { %1579 = vmatpush3.bf16.msra.mxu1 %v1162_v51 }
 0x37b   : > { %1580 = vmatprep.subr.bf16.mxu1 %v1171_v52 }
 0x37c   : > { %v1163_v53 = vld [vmem:[#allocation4 + $0x30] sm:$0xff] }
 0x37d   : > { %v1204_v30 = vpop.permute.xlu1 %1203 }
 0x37e   : > { %1581 = vmatpush3.bf16.msra.mxu1 %v1163_v53 }
 0x37f   : > { %1582 = vmatprep.subr.bf16.mxu1 %v1172_v55 }
 0x380   : > { %v1164_v56 = vld [vmem:[#allocation4 + $0x38] sm:$0xff] }
 0x381   : > { %v1214_v41 = vpop.permute.xlu1 %1213 }
 0x382   : > { %1583 = vmatpush3.bf16.msra.mxu1 %v1164_v56 }
 0x385   : > { %1294 = vmatmul.mubr.bf16.vlgmr.msra.gmra.mrb[0].mxu1 %v1683_v59 }
 0x386   : > { %1301 = vmatprep.mubr.bf16.mxu1 %v1686_v57 }
 0x389   : > { %v1189_v12 = vpop.permute.xlu0 %1188 }
 0x38d   : > { %1302 = vmatmul.mubr.bf16.gmra.mrb[4].mxu1 %v1688_v60  ;;  %v1199_v22 = vpop.permute.xlu0 %1198 }
 0x38e   : > { %1309 = vmatprep.mubr.bf16.mxu1 %v1689_v61 }
 0x391   : > { %v1209_v34 = vpop.permute.xlu0 %1208 }
 0x395   : > { %1310 = vmatmul.mubr.bf16.gmra.mrb[8].mxu1 %v1691_v62  ;;  %v1219_v44 = vpop.permute.xlu0 %1218 }
 0x396   : > { %1317 = vmatprep.mubr.bf16.mxu1 %v1692_v63 }
 0x39d   : > { %1318 = vmatmul.mubr.bf16.gmra.mrb[12].mxu1 %v1694_v0 }
 0x458   : > { %v1584_v1 = vpop.f32.mrb[0].mxu1 }
 0x459   : > { %v1585_v5 = vpop.f32.mrb[1].mxu1 }
 0x45a   : > { %v1586_v7 = vadd.f32 %v1585_v5, %v1584_v1  ;;  %v1587_v8 = vpop.f32.mrb[2].mxu1 }
 0x45b   : > { %v1588_v10 = vpop.f32.mrb[3].mxu1 }
 0x45c   : > { %v1296_v6 = vadd.f32 %v1586_v7, %v1184_v4  ;;  %v1589_v11 = vadd.f32 %v1588_v10, %v1587_v8 }
 0x45e   : > { %v1520_v58 = vpack.c.bf16 %v1296_v6, %v1296_v6  ;;  %v1299_v13 = vadd.f32 %v1589_v11, %v1189_v12 }
 0x460   : > { %1358 = vst.msk [vmem:[%s2209_s28] sm:$0xf] %vm327_vm2, %v1520_v58  ;;  %v1521_v9 = vpack.c.bf16 %v1299_v13, %v1299_v13  ;;  %v1590_v14 = vpop.f32.mrb[4].mxu1 }
 0x461   : > { %v1591_v54 = vpop.f32.mrb[5].mxu1 }
 0x462   : > { %1359 = vst.msk [vmem:[%s2209_s28 + $0x4] sm:$0xf] %vm327_vm2, %v1521_v9  ;;  %v1592_v15 = vadd.f32 %v1591_v54, %v1590_v14  ;;  %v1593_v16 = vpop.f32.mrb[6].mxu1 }
 0x463   : > { %v1594_v18 = vpop.f32.mrb[7].mxu1 }
 0x464   : > { %v1304_v19 = vadd.f32 %v1592_v15, %v1194_v17  ;;  %v1595_v20 = vadd.f32 %v1594_v18, %v1593_v16 }
 0x466   : > { %v1522_v23 = vpack.c.bf16 %v1304_v19, %v1304_v19  ;;  %v1307_v24 = vadd.f32 %v1595_v20, %v1199_v22 }
 0x468   : > { %1360 = vst.msk [vmem:[%s2209_s28 + $0x8] sm:$0xf] %vm327_vm2, %v1522_v23  ;;  %v1523_v25 = vpack.c.bf16 %v1307_v24, %v1307_v24  ;;  %v1596_v26 = vpop.f32.mrb[8].mxu1 }
 0x469   : > { %v1597_v27 = vpop.f32.mrb[9].mxu1 }
 0x46a   : > { %1361 = vst.msk [vmem:[%s2209_s28 + $0xc] sm:$0xf] %vm327_vm2, %v1523_v25  ;;  %v1598_v28 = vadd.f32 %v1597_v27, %v1596_v26  ;;  %v1599_v29 = vpop.f32.mrb[10].mxu1 }
 0x46b   : > { %v1600_v31 = vpop.f32.mrb[11].mxu1 }
 0x46c   : > { %v1312_v32 = vadd.f32 %v1598_v28, %v1204_v30  ;;  %v1601_v33 = vadd.f32 %v1600_v31, %v1599_v29 }
 0x46e   : > { %v1524_v35 = vpack.c.bf16 %v1312_v32, %v1312_v32  ;;  %v1315_v36 = vadd.f32 %v1601_v33, %v1209_v34 }
 0x470   : > { %1362 = vst.msk [vmem:[%s2209_s28 + $0x10] sm:$0xf] %vm327_vm2, %v1524_v35  ;;  %v1525_v37 = vpack.c.bf16 %v1315_v36, %v1315_v36  ;;  %v1602_v38 = vpop.f32.mrb[12].mxu1 }
 0x471   : > { %v1603_v2 = vpop.f32.mrb[13].mxu1 }
 0x472   : > { %1363 = vst.msk [vmem:[%s2209_s28 + $0x14] sm:$0xf] %vm327_vm2, %v1525_v37  ;;  %v1604_v39 = vadd.f32 %v1603_v2, %v1602_v38  ;;  %v1605_v40 = vpop.f32.mrb[14].mxu1 }
 0x473   : > { %v1606_v3 = vpop.f32.mrb[15].mxu1 }
 0x474   : > { %v1320_v42 = vadd.f32 %v1604_v39, %v1214_v41  ;;  %v1607_v43 = vadd.f32 %v1606_v3, %v1605_v40 }
 0x476   : > { %v1526_v45 = vpack.c.bf16 %v1320_v42, %v1320_v42  ;;  %v1323_v46 = vadd.f32 %v1607_v43, %v1219_v44 }
 0x478   : > { %1364 = vst.msk [vmem:[%s2209_s28 + $0x18] sm:$0xf] %vm327_vm2, %v1526_v45  ;;  %v1527_v21 = vpack.c.bf16 %v1323_v46, %v1323_v46 }
 0x47a   : > { %1365 = vst.msk [vmem:[%s2209_s28 + $0x1c] sm:$0xf] %vm327_vm2, %v1527_v21 }
 0x47b PF: > { %s18_s21 = sadd.s32 1, %s1793_s21  }
 0x47c   : > { %p15_p13 = scmp.ge.s32.totalorder %s18_s21, 4  }
 0x47e   :  { %17 = sbr.rel (!%p15_p13) target bundleno = 2 (0x2), region = 87 }
 0x485   :  { %1387 = vsyncpa [#allocation6], 1 }
 0x486   :  { %1389 = vsyncpa [#allocation6 + $0x1], 1 }
 0x487   :  { %1390 = vsyncpa [#allocation8], 1 }

// kernel: _lambda_.6
= control target key start
LH: loop header
LB: loop body
LE: loop exit
PB: predicated region body
PF: predicated region fallthrough
CT: control target
= control target key end

     0   :  { %11 = vsyncpa [#allocation6], 0  ;;  %s2887_s0 = inlined_call_operand.vmem [shape: bf16[2,16,170], index: 0, kind: input, shape index: {}]   ;;  %s2888_s1 = inlined_call_operand.hbm [shape: bf16[9,144], index: 1, kind: input, shape index: {}]   ;;  %s2889_s2 = inlined_call_operand.vmem [shape: bf16[32,256], index: 2, kind: input, shape index: {}]   ;;  %s2890_s3 = inlined_call_operand.hbm [shape: f32[32,1], index: 3, kind: input, shape index: {}]   ;;  %s2891_s4 = inlined_call_operand.hbm [shape: bf16[32,128], index: 4, kind: input, shape index: {}]   ;;  %s2892_s5 = inlined_call_operand.hbm [shape: f32[32,1], index: 5, kind: input, shape index: {}]   ;;  %s2893_s6 = inlined_call_operand.vmem [shape: bf16[2,32,144], index: 6, kind: output, shape index: {}]  }
   0x1   :  { %12 = vsyncpa [#allocation8], 0 }
   0x2   :  { %13 = vsyncpa [#allocation11], 0  ;;  %s2365_s21 = smov 0  }
   0x3 LB: > { %s2371_s22 = sadd.s32 4294967295, %s2303_s21   ;;  %p1933_p0 = scmp.ge.s32.totalorder %s2303_s21, 1  ;;  %s2303_s21 = sphi %s2365_s21, %s19_s21  }
   0x4   : > { %p181_p1 = scmp.lt.s32.totalorder %s2303_s21, 3  ;;  %p2894_p2 = scmp.eq.s32.totalorder %s2371_s22, 0 }
   0x5   : > { %s2305_s24 = smov [#allocation7]   ;;  %s2306_s26 = smov [#allocation5]  }
   0x6   : > { %p2376_p3 = pnand %p1933_p0, %p181_p1  ;;  %s209_s25 = sshll.u32 %s2305_s24, 4  ;;  %s2380_s25 = int_to_ptr.vmem [resolvable:$true] %s209_s25 }
   0x7   : > { %s193_s27 = sshll.u32 %s2306_s26, 4  ;;  %s2307_s29 = smov [#allocation9]   ;;  %s2384_s27 = int_to_ptr.vmem [resolvable:$true] %s193_s27 }
   0x8   : > { %s2898_s23 = scalar_select %p2376_p3, 1, 0 }
   0x9   : > { %p2059_p4 = pneg %p2376_p3  ;;  %s222_s30 = sshll.u32 %s2307_s29, 4  ;;  %s2392_s30 = int_to_ptr.vmem [resolvable:$true] %s222_s30 }
   0xa   : > { %s2173_s9 = scalar_lea.hbm %s2890_s3, 512 }
   0xb   : > { %p2388_p5 = pnand %p2894_p2, %p2059_p4  ;;  %p2174_p6 = scmp.ne.s32.totalorder %s2890_s3, %s2173_s9 }
   0xc   : > { %p2180_p10 = scmp.lt.u32.totalorder %s2173_s9, %s2890_s3 }
   0xd   : > { %p2402_p7 = pneg %p2388_p5 }
   0xf   : > { %p2176_p8 = pnand %p2402_p7, %p2174_p6 }
  0x11   : > { %p2177_p9 = pneg %p2176_p8 }
  0x13   : > { %p2182_p11 = pnand %p2180_p10, %p2177_p9 }
  0x15   : > { %2185 = shalt.err (!%p2182_p11)
}
  0x16   : > { %s2186_s15 = scalar_lea.vmem %s2380_s25, 512  ;;  %p2194_p1 = scmp.lt.s32.totalorder %s2380_s25, %s2380_s25 }
  0x17   : > { %p2187_p12 = scmp.ne.s32.totalorder %s2380_s25, %s2186_s15  ;;  %p2195_p4 = scmp.lt.s32.totalorder %s2186_s15, %s2186_s15 }
  0x19   : > { %p2189_p13 = pnand %p2187_p12, %p2402_p7  ;;  %p2196_p6 = por %p2195_p4, %p2194_p1 }
  0x1b   : > { %p2190_p0 = pneg %p2189_p13 }
  0x1d   : > { %p2197_p8 = pnand %p2196_p6, %p2190_p0 }
  0x1f   : > { %2200 = shalt.err (!%p2197_p8)
}
  0x20   : > { %s2308_s16 = smov 128   ;;  %s2309_s17 = smov 8  }
  0x21   : > { %2065 = dma.hbm_to_vmem [thread:$0]  (!%p2388_p5), %s2890_s3, 512, %s2380_s25, [#allocation8], %s2308_s16, %s2308_s16, %s2309_s17  }
  0x22   : > { %s2201_s26 = scalar_lea.hbm %s2888_s1, 256 }
  0x23   : > { %p2202_p9 = scmp.ne.s32.totalorder %s2888_s1, %s2201_s26  ;;  %p2208_p12 = scmp.lt.u32.totalorder %s2201_s26, %s2888_s1 }
  0x25   : > { %p2204_p10 = pnand %p2202_p9, %p2402_p7 }
  0x27   : > { %p2205_p11 = pneg %p2204_p10 }
  0x29   : > { %p2210_p13 = pnand %p2208_p12, %p2205_p11 }
  0x2b   : > { %2213 = shalt.err (!%p2210_p13)
}
  0x2c   : > { %s2214_s25 = scalar_lea.vmem %s2384_s27, 256  ;;  %p2222_p6 = scmp.lt.s32.totalorder %s2384_s27, %s2384_s27 }
  0x2d   : > { %p2215_p0 = scmp.ne.s32.totalorder %s2384_s27, %s2214_s25  ;;  %p2223_p8 = scmp.lt.s32.totalorder %s2214_s25, %s2214_s25 }
  0x2f   : > { %p2217_p1 = pnand %p2215_p0, %p2402_p7  ;;  %p2224_p9 = por %p2223_p8, %p2222_p6 }
  0x31   : > { %p2218_p4 = pneg %p2217_p1 }
  0x33   : > { %p2225_p10 = pnand %p2224_p9, %p2218_p4 }
  0x35   : > { %2228 = shalt.err (!%p2225_p10)
}
  0x36   : > { %2062 = dma.hbm_to_vmem [thread:$0]  (!%p2388_p5), %s2888_s1, 256, %s2384_s27, [#allocation6], %s2308_s16, %s2308_s16, %s2309_s17  }
  0x37   : > { %s2229_s15 = scalar_lea.hbm %s2891_s4, 256 }
  0x38   : > { %p2230_p11 = scmp.ne.s32.totalorder %s2891_s4, %s2229_s15  ;;  %p2236_p0 = scmp.lt.u32.totalorder %s2229_s15, %s2891_s4 }
  0x3a   : > { %p2232_p12 = pnand %p2230_p11, %p2402_p7 }
  0x3c   : > { %p2233_p13 = pneg %p2232_p12 }
  0x3e   : > { %p2238_p1 = pnand %p2236_p0, %p2233_p13 }
  0x40   : > { %2241 = shalt.err (!%p2238_p1)
}
  0x41   : > { %s2242_s27 = scalar_lea.vmem %s2392_s30, 256  ;;  %p2250_p9 = scmp.lt.s32.totalorder %s2392_s30, %s2392_s30 }
  0x42   : > { %p2243_p4 = scmp.ne.s32.totalorder %s2392_s30, %s2242_s27  ;;  %p2251_p10 = scmp.lt.s32.totalorder %s2242_s27, %s2242_s27 }
  0x44   : > { %p2245_p6 = pnand %p2243_p4, %p2402_p7  ;;  %p2252_p11 = por %p2251_p10, %p2250_p9 }
  0x46   : > { %p2246_p8 = pneg %p2245_p6 }
  0x48   : > { %p2253_p12 = pnand %p2252_p11, %p2246_p8 }
  0x4a   : > { %2256 = shalt.err (!%p2253_p12)
}
  0x4b   : > { %s2310_s26 = smov 64   ;;  %s2311_s29 = smov 4  }
  0x4c   : > { %2068 = dma.hbm_to_vmem [thread:$0]  (!%p2388_p5), %s2891_s4, 256, %s2392_s30, [#allocation8], %s2310_s26, %s2310_s26, %s2311_s29  }
  0x4d   : > { %s2312_s9 = smov [#allocation10]   ;;  %s2257_s13 = scalar_lea.hbm %s2892_s5, 512 }
  0x4e   : > { %s235_s25 = sshll.u32 %s2312_s9, 4  ;;  %p2258_p13 = scmp.ne.s32.totalorder %s2892_s5, %s2257_s13  ;;  %s236_s25 = int_to_ptr.vmem [resolvable:$true] %s235_s25 }
  0x4f   : > { %p2264_p4 = scmp.lt.u32.totalorder %s2257_s13, %s2892_s5 }
  0x50   : > { %p2260_p0 = pnand %p2258_p13, %p2402_p7 }
  0x52   : > { %p2261_p1 = pneg %p2260_p0 }
  0x54   : > { %p2266_p6 = pnand %p2264_p4, %p2261_p1 }
  0x56   : > { %2269 = shalt.err (!%p2266_p6)
}
  0x57   : > { %s2270_s30 = scalar_lea.vmem %s236_s25, 512  ;;  %p2278_p11 = scmp.lt.s32.totalorder %s236_s25, %s236_s25 }
  0x58   : > { %p2271_p8 = scmp.ne.s32.totalorder %s236_s25, %s2270_s30  ;;  %p2279_p12 = scmp.lt.s32.totalorder %s2270_s30, %s2270_s30 }
  0x5a   : > { %p2273_p9 = pnand %p2271_p8, %p2402_p7  ;;  %p2280_p2 = por %p2279_p12, %p2278_p11 }
  0x5c   : > { %p2274_p10 = pneg %p2273_p9 }
  0x5e   : > { %p2281_p3 = pnand %p2280_p2, %p2274_p10 }
  0x60   : > { %2284 = shalt.err (!%p2281_p3)
}
  0x61   : > { %2071 = dma.hbm_to_vmem [thread:$0]  (!%p2388_p5), %s2892_s5, 512, %s236_s25, [#allocation11], %s2308_s16, %s2308_s16, %s2309_s17  }
  0x62   : > { %p2901_p13 = scmp.ne.s32.totalorder %s2898_s23, 0 }
  0x63   : > { %p2902_p7 = scmp.eq.s32.totalorder (!%p2901_p13), %s2371_s22, 0 }
  0x64   : > { %259 = sbr.rel (%p2901_p13) target bundleno = 1198 (0x4ae), region = 44 }
  0x6b   : > { %2290 = dma.done.wait (%p2902_p7), [#allocation6], 256   ;;  %p2903_p0 = pmov %p2902_p7 }
  0x6d   : > { %2292 = vsyncadd (%p2903_p0), [#allocation6], 4294967040  ;;  %p2904_p2 = pmov %p2903_p0 }
  0x6e   : > { %p2905_p3 = pmov %p2903_p0 }
  0x6f   : > { %2294 = dma.done.wait (%p2904_p2), [#allocation8], 768  }
  0x70   : > { %2296 = vsyncadd (%p2905_p3), [#allocation8], 4294966528  ;;  %p2906_p1 = pmov %p2903_p0 }
  0x71   : > { %p2907_p5 = pmov %p2903_p0 }
  0x72   : > { %2298 = dma.done.wait (%p2906_p1), [#allocation11], 512  }
  0x73   : > { %2300 = vsyncadd (%p2907_p5), [#allocation11], 4294966784  ;;  %v323_v0 = vlaneseq  ;;  %v357_v6 = vld [vmem:[#allocation5] sm:$0x11]  ;;  %v412_v7 = vld [vmem:[#allocation5] sm:$0x22] }
  0x74   : > { %v465_v8 = vld [vmem:[#allocation5] sm:$0x22]  ;;  %v1953_v9 = vcombine.low %v357_v6, %v357_v6  ;;  %v1954_v10 = vcombine.high %v357_v6, %v357_v6  ;;  %v1958_v11 = vcombine.low %v412_v7, %v412_v7  ;;  %v1959_v12 = vcombine.high %v412_v7, %v412_v7  ;;  %v520_v13 = vld [vmem:[#allocation5] sm:$0x44]  ;;  %v628_v35 = vld [vmem:[#allocation5] sm:$0x88] }
  0x75   : > { %v324_v1 = vshrl.u32 %v323_v0, 7  ;;  %v1963_v14 = vcombine.low %v465_v8, %v465_v8  ;;  %v1964_v15 = vcombine.high %v465_v8, %v465_v8  ;;  %v1968_v16 = vcombine.low %v520_v13, %v520_v13  ;;  %v573_v26 = vld [vmem:[#allocation5] sm:$0x44]  ;;  %v681_v40 = vld [vmem:[#allocation5] sm:$0x88]  ;;  %s2313_s23 = smov 1  }
  0x76   : > { %v1969_v17 = vcombine.high %v520_v13, %v520_v13  ;;  %v364_v18 = vshrl.u32 %v1953_v9, 16  ;;  %v372_v19 = vshrl.u32 %v1954_v10, 16  ;;  %v419_v20 = vpack.i.b16 %v1958_v11, %v1958_v11  ;;  %v736_v45 = vld [vmem:[#allocation5 + $0x8] sm:$0x11]  ;;  %s2314_s28 = smov 12   ;;  %s2315_s12 = smov 2  }
  0x77   : > { %v2510_v2 = vsub.s32 0, %v324_v1  ;;  %v2512_v3 = vsub.s32 2, %v324_v1  ;;  %v2514_v4 = vsub.s32 1, %v324_v1  ;;  %v2516_v5 = vsub.s32 3, %v324_v1  ;;  %s2316_s16 = smov 13   ;;  %s2317_s17 = smov 14  }
  0x78   : > { %v426_v21 = vpack.i.b16 %v1959_v12, %v1959_v12  ;;  %v472_v22 = vshrl.u32 %v1963_v14, 16  ;;  %v480_v23 = vshrl.u32 %v1964_v15, 16  ;;  %v527_v24 = vpack.i.b16 %v1968_v16, %v1968_v16  ;;  %s2318_s27 = smov 24   ;;  %s2319_s26 = smov 25  }
  0x79   : > { %v534_v25 = vpack.i.b16 %v1969_v17, %v1969_v17  ;;  %v365_v27 = vpack.i.b16 %v364_v18, %v364_v18  ;;  %v373_v28 = vpack.i.b16 %v372_v19, %v372_v19  ;;  %v424_v29 = vrot.slane %v419_v20, %v2514_v4  ;;  %s2320_s29 = smov 26   ;;  %p301_p4 = scmp.lt.s32.totalorder %s2371_s22, 1  ;;  %v314_v18 = vld [vmem:[#allocation5] sm:$0x11] }
  0x7a   : > { %v431_v30 = vrot.slane %v426_v21, %v2514_v4  ;;  %v473_v31 = vpack.i.b16 %v472_v22, %v472_v22  ;;  %v481_v32 = vpack.i.b16 %v480_v23, %v480_v23  ;;  %v532_v33 = vrot.slane %v527_v24, %v2512_v3  ;;  %s2321_s10 = smov 127   ;;  %s2322_s11 = smov 126  }
  0x7b   : > { %v539_v34 = vrot.slane %v534_v25, %v2512_v3  ;;  %v370_v36 = vrot.slane %v365_v27, %v2510_v2  ;;  %v378_v37 = vrot.slane %v373_v28, %v2510_v2  ;;  %v1973_v39 = vcombine.low %v573_v26, %v573_v26  ;;  %s2913_s22 = smov (!%p301_p4, %s2371_s22), 1  ;;  %s2323_s13 = smov 116  }
  0x7c   : > { %v1960_v38 = vcombine.low %v424_v29, %v431_v30  ;;  %v478_v41 = vrot.slane %v473_v31, %v2514_v4  ;;  %v486_v42 = vrot.slane %v481_v32, %v2514_v4  ;;  %v1974_v44 = vcombine.high %v573_v26, %v573_v26  ;;  %s2037_s7 = sshll.u32 %s2913_s22, 4  ;;  %s2324_s14 = smov 115  }
  0x7d   : > { %v1970_v43 = vcombine.low %v532_v33, %v539_v34  ;;  %v1955_v46 = vcombine.low %v370_v36, %v378_v37  ;;  %v580_v47 = vshrl.u32 %v1973_v39, 16  ;;  %v1978_v48 = vcombine.low %v628_v35, %v628_v35  ;;  %s305_s25 = scalar_lea.vmem %s2887_s0, %s2037_s7  ;;  %s2325_s15 = smov 114  }
  0x7e   : > { %v1979_v49 = vcombine.high %v628_v35, %v628_v35  ;;  %v1965_v50 = vcombine.low %v478_v41, %v486_v42  ;;  %v588_v51 = vshrl.u32 %v1974_v44, 16  ;;  %v1983_v52 = vcombine.low %v681_v40, %v681_v40  ;;  %v2552_v26 = vld [vmem:[%s305_s25] sm:$0xff]  ;;  %v2554_v27 = vld [vmem:[%s305_s25 + $0x8] sm:$0xff]  ;;  %s2327_s18 = smov 104   ;;  %s2328_s19 = smov 103  }
  0x7f   : > { %v1984_v53 = vcombine.high %v681_v40, %v681_v40  ;;  %384 = vrot.lane.b32.xlu0 %v1955_v46, %s2313_s23  ;;  %v581_v54 = vpack.i.b16 %v580_v47, %v580_v47  ;;  %v635_v55 = vpack.i.b16 %v1978_v48, %v1978_v48  ;;  %v1988_v57 = vcombine.low %v736_v45, %v736_v45  ;;  %s2329_s30 = smov 102  }
  0x80   : > { %v642_v56 = vpack.i.b16 %v1979_v49, %v1979_v49  ;;  %492 = vrot.lane.b32.xlu1 %v1965_v50, %s2314_s28  ;;  %v589_v58 = vpack.i.b16 %v588_v51, %v588_v51  ;;  %v688_v59 = vshrl.u32 %v1983_v52, 16  ;;  %v1989_v61 = vcombine.high %v736_v45, %v736_v45 }
  0x81   : > { %v696_v60 = vshrl.u32 %v1984_v53, 16  ;;  %v586_v62 = vrot.slane %v581_v54, %v2512_v3  ;;  %v640_v63 = vrot.slane %v635_v55, %v2516_v5  ;;  %v743_v1 = vpack.i.b16 %v1988_v57, %v1988_v57 }
  0x82   : > { %v647_v0 = vrot.slane %v642_v56, %v2516_v5  ;;  %v594_v6 = vrot.slane %v589_v58, %v2512_v3  ;;  %v689_v7 = vpack.i.b16 %v688_v59, %v688_v59  ;;  %v750_v9 = vpack.i.b16 %v1989_v61, %v1989_v61 }
  0x83   : > { %v697_v8 = vpack.i.b16 %v696_v60, %v696_v60  ;;  %437 = vrot.lane.b32.xlu0 %v1960_v38, %s2315_s12  ;;  %v748_v11 = vrot.slane %v743_v1, %v2510_v2  ;;  %v1948_v19 = vcombine.low %v314_v18, %v314_v18  ;;  %v1949_v20 = vcombine.high %v314_v18, %v314_v18 }
  0x84   : > { %v1980_v10 = vcombine.low %v640_v63, %v647_v0  ;;  %545 = vrot.lane.b32.xlu1 %v1970_v43, %s2316_s16  ;;  %v1975_v12 = vcombine.low %v586_v62, %v594_v6  ;;  %v694_v13 = vrot.slane %v689_v7, %v2516_v5  ;;  %v755_v15 = vrot.slane %v750_v9, %v2510_v2 }
  0x85   : > { %v702_v14 = vrot.slane %v697_v8, %v2516_v5  ;;  %v321_v21 = vpack.i.b16 %v1948_v19, %v1948_v19  ;;  %v328_v22 = vpack.i.b16 %v1949_v20, %v1949_v20  ;;  %vm353_vm0 = vcmask 130048  }
  0x86   : > { %v1990_v17 = vcombine.low %v748_v11, %v755_v15  ;;  %vm387_vm1 = vcmask 7168   ;;  %vm495_vm2 = vcmask 97280   ;;  %vm440_vm3 = vcmask 15360  }
  0x87   : > { %600 = vrot.lane.b32.xlu0 %v1975_v12, %s2317_s17  ;;  %v1985_v16 = vcombine.low %v694_v13, %v702_v14  ;;  %v326_v23 = vrot.slane %v321_v21, %v2510_v2  ;;  %v333_v24 = vrot.slane %v328_v22, %v2510_v2  ;;  %vm548_vm4 = vcmask 105472  }
  0x88   : > { %653 = vrot.lane.b32.xlu1 %v1980_v10, %s2318_s27  ;;  %vm603_vm5 = vcmask 113664   ;;  %vm656_vm6 = vcmask 195584   ;;  %vm711_vm7 = vcmask 203776   ;;  %vm764_vm8 = vcmask 211968  }
  0x89   : > { %v1950_v25 = vcombine.low %v326_v23, %v333_v24  ;;  %v2326_v23 = vmov 0   ;;  %vm404_vm9 = vcmask 1039360   ;;  %vm2896_vm10 = vcmask 1031168  }
  0x8a   : > { %788 = vst.msk [vmem:[#allocation2 + $0x98] sm:$0xff] %vm353_vm0, %v2326_v23  ;;  %787 = vst [vmem:[#allocation2 + $0x90] sm:$0xff] %v2326_v23  ;;  %2114 = vset.pattern.permute.xlu1 %v2326_v23  ;;  %2113 = vset.pattern.permute.xlu0 %v2326_v23  ;;  %vm512_vm11 = vcmask 949248   ;;  %vm565_vm12 = vcmask 941056   ;;  %vm620_vm13 = vcmask 932864   ;;  %vm673_vm14 = vcmask 850944  }
  0x8b   : > { %708 = vrot.lane.b32.xlu0 %v1985_v16, %s2319_s26  ;;  %v340_v28 = vmul.bf16 %v1950_v25, %v2552_v26  ;;  %v341_v29 = vmul.bf16 %v1950_v25, %v2554_v27  ;;  %790 = vst.msk [vmem:[#allocation2 + $0xa8] sm:$0xff] %vm353_vm0, %v2326_v23  ;;  %792 = vst.msk [vmem:[#allocation2 + $0xb8] sm:$0xff] %vm353_vm0, %v2326_v23  ;;  %1784 = vmatprep.mubr.bf16.mxu1 %v2326_v23  ;;  %vm728_vm15 = vcmask 842752  }
  0x8c   : > { %761 = vrot.lane.b32.xlu1 %v1990_v17, %s2320_s29  ;;  %794 = vst.msk [vmem:[#allocation2 + $0xc8] sm:$0xff] %vm353_vm0, %v2326_v23  ;;  %796 = vst.msk [vmem:[#allocation2 + $0xd8] sm:$0xff] %vm353_vm0, %v2326_v23 }
  0x8d   : > { %v1952_v30 = vcombine.high %v340_v28, %v341_v29  ;;  %v1951_v32 = vcombine.low %v340_v28, %v341_v29  ;;  %798 = vst.msk [vmem:[#allocation2 + $0xe8] sm:$0xff] %vm353_vm0, %v2326_v23  ;;  %800 = vst.msk [vmem:[#allocation2 + $0xf8] sm:$0xff] %vm353_vm0, %v2326_v23 }
  0x8e   : > { %943 = vst.msk [vmem:[#allocation3] sm:$0xff] %vm548_vm4, %v2326_v23  ;;  %944 = vst.msk [vmem:[#allocation3 + $0x10] sm:$0xff] %vm548_vm4, %v2326_v23 }
  0x8f   : > { %354 = vst.msk [vmem:[#allocation2 + $0x8] sm:$0xff] %vm353_vm0, %v1952_v30 }
  0x96   : > { %v806_v31 = vld [vmem:[#allocation2 + $0x8] sm:$0xff] }
  0x97   : > { %881 = vmatprep.subr.bf16.mxu0 %v806_v31 }
  0x98   : > { %882 = vmatpush1.bf16.msra.mxu0 %v1951_v32  ;;  %v837_v32 = vld [vmem:[#allocation7] sm:$0xff] }
  0xf1   : > { %v385_v33 = vpop.permute.xlu0 %384 }
  0xf2   : > { %v386_v34 = vrot.slane %v385_v33, 4  ;;  %v493_v35 = vpop.permute.xlu1 %492 }
  0xf3   : > { %v494_v36 = vrot.slane %v493_v35, 4 }
  0xf4   : > { %v388_v37 = vsel %vm387_vm1, %v386_v34, %v385_v33  ;;  %v839_v33 = vld [vmem:[#allocation7 + $0x10] sm:$0xff] }
  0xf5   : > { %v390_v38 = vmul.bf16 %v388_v37, %v2552_v26  ;;  %v391_v39 = vmul.bf16 %v388_v37, %v2554_v27  ;;  %v438_v40 = vpop.permute.xlu0 %437  ;;  %v496_v43 = vsel %vm495_vm2, %v494_v36, %v493_v35  ;;  %v978_v34 = vld [vmem:[#allocation5] sm:$0x44]  ;;  %v1023_v35 = vld [vmem:[#allocation5] sm:$0x22]  ;;  %v840_v36 = vld [vmem:[#allocation7 + $0x18] sm:$0xff] }
  0xf6   : > { %v439_v41 = vrot.slane %v438_v40, 4  ;;  %v546_v42 = vpop.permute.xlu1 %545  ;;  %v498_v51 = vmul.bf16 %v496_v43, %v2552_v26  ;;  %v499_v52 = vmul.bf16 %v496_v43, %v2554_v27  ;;  %v1997_v37 = vcombine.low %v978_v34, %v978_v34 }
  0xf7   : > { %v1957_v44 = vcombine.high %v390_v38, %v391_v39  ;;  %v1956_v45 = vcombine.low %v390_v38, %v391_v39  ;;  %v547_v46 = vrot.slane %v546_v42, 4  ;;  %v1998_v38 = vcombine.high %v978_v34, %v978_v34 }
  0xf8   : > { %v441_v47 = vsel %vm440_vm3, %v439_v41, %v438_v40  ;;  %v1967_v60 = vcombine.high %v498_v51, %v499_v52  ;;  %v1966_v61 = vcombine.low %v498_v51, %v499_v52  ;;  %v1999_v39 = vcombine.low %v1023_v35, %v1023_v35  ;;  %v1070_v41 = vld [vmem:[#allocation5] sm:$0x44] }
  0xf9   : > { %v443_v48 = vmul.bf16 %v441_v47, %v2552_v26  ;;  %v444_v49 = vmul.bf16 %v441_v47, %v2554_v27  ;;  %402 = vrot.lane.b32.xlu1 %v1957_v44, %s2321_s10  ;;  %400 = vrot.lane.b32.xlu0 %v1956_v45, %s2321_s10  ;;  %v601_v50 = vpop.permute.xlu0 %600  ;;  %v549_v53 = vsel %vm548_vm4, %v547_v46, %v546_v42  ;;  %v1116_v42 = vld [vmem:[#allocation5] sm:$0x44] }
  0xfa   : > { %v602_v56 = vrot.slane %v601_v50, 4  ;;  %v654_v57 = vpop.permute.xlu1 %653  ;;  %v551_v58 = vmul.bf16 %v549_v53, %v2552_v26  ;;  %v552_v59 = vmul.bf16 %v549_v53, %v2554_v27  ;;  %v2000_v40 = vcombine.high %v1023_v35, %v1023_v35 }
  0xfb   : > { %v1962_v54 = vcombine.high %v443_v48, %v444_v49  ;;  %v1961_v55 = vcombine.low %v443_v48, %v444_v49  ;;  %v655_v62 = vrot.slane %v654_v57, 4  ;;  %v2001_v43 = vcombine.low %v1070_v41, %v1070_v41 }
  0xfc   : > { %v604_v63 = vsel %vm603_vm5, %v602_v56, %v601_v50  ;;  %v1972_v1 = vcombine.high %v551_v58, %v552_v59  ;;  %v1971_v9 = vcombine.low %v551_v58, %v552_v59  ;;  %v2002_v44 = vcombine.high %v1070_v41, %v1070_v41 }
  0xfd   : > { %455 = vrot.lane.b32.xlu1 %v1962_v54, %s2322_s11  ;;  %453 = vrot.lane.b32.xlu0 %v1961_v55, %s2322_s11  ;;  %v709_v0 = vpop.permute.xlu0 %708  ;;  %v606_v6 = vmul.bf16 %v604_v63, %v2552_v26  ;;  %v607_v7 = vmul.bf16 %v604_v63, %v2554_v27  ;;  %v657_v8 = vsel %vm656_vm6, %v655_v62, %v654_v57  ;;  %v1030_v48 = vshrl.u32 %v1999_v39, 16  ;;  %v1164_v55 = vld [vmem:[#allocation5] sm:$0x11] }
  0xfe   : > { %v710_v10 = vrot.slane %v709_v0, 4  ;;  %v762_v11 = vpop.permute.xlu1 %761  ;;  %v659_v12 = vmul.bf16 %v657_v8, %v2552_v26  ;;  %v660_v13 = vmul.bf16 %v657_v8, %v2554_v27  ;;  %v2003_v45 = vcombine.low %v1116_v42, %v1116_v42 }
  0xff   : > { %v1977_v14 = vcombine.high %v606_v6, %v607_v7  ;;  %v1976_v15 = vcombine.low %v606_v6, %v607_v7  ;;  %v763_v17 = vrot.slane %v762_v11, 4  ;;  %v985_v46 = vpack.i.b16 %v1997_v37, %v1997_v37 }
 0x100   : > { %v712_v16 = vsel %vm711_vm7, %v710_v10, %v709_v0  ;;  %v1982_v18 = vcombine.high %v659_v12, %v660_v13  ;;  %v1981_v21 = vcombine.low %v659_v12, %v660_v13  ;;  %v992_v47 = vpack.i.b16 %v1998_v38, %v1998_v38 }
 0x101   : > { %510 = vrot.lane.b32.xlu1 %v1967_v60, %s2323_s13  ;;  %508 = vrot.lane.b32.xlu0 %v1966_v61, %s2323_s13  ;;  %v714_v19 = vmul.bf16 %v712_v16, %v2552_v26  ;;  %v715_v20 = vmul.bf16 %v712_v16, %v2554_v27  ;;  %v765_v22 = vsel %vm764_vm8, %v763_v17, %v762_v11  ;;  %v1038_v49 = vshrl.u32 %v2000_v40, 16 }
 0x102   : > { %v767_v24 = vmul.bf16 %v765_v22, %v2552_v26  ;;  %v768_v25 = vmul.bf16 %v765_v22, %v2554_v27  ;;  %v2135_v26 = vld [vmem:[%s2889_s2 + $0x4] ss:$8 sps:$4 sm:$0xff]   ;;  %v838_v27 = vld [vmem:[#allocation7 + $0x8] sm:$0xff]  ;;  %v2004_v50 = vcombine.high %v1116_v42, %v1116_v42  ;;  %v990_v51 = vrot.slane %v985_v46, %v2512_v3 }
 0x103   : > { %v1987_v28 = vcombine.high %v714_v19, %v715_v20  ;;  %v1986_v29 = vcombine.low %v714_v19, %v715_v20  ;;  %913 = vmatprep.mubr.bf16.mxu0 %v2135_v26  ;;  %v997_v52 = vrot.slane %v992_v47, %v2512_v3  ;;  %v1031_v53 = vpack.i.b16 %v1030_v48, %v1030_v48 }
 0x104   : > { %v1992_v30 = vcombine.high %v767_v24, %v768_v25  ;;  %v1991_v31 = vcombine.low %v767_v24, %v768_v25  ;;  %v1039_v54 = vpack.i.b16 %v1038_v49, %v1038_v49  ;;  %v1077_v57 = vpack.i.b16 %v2001_v43, %v2001_v43  ;;  %v824_v49 = vld [vmem:[#allocation2 + $0x98] sm:$0xff] }
 0x105   : > { %563 = vrot.lane.b32.xlu1 %v1972_v1, %s2324_s14  ;;  %561 = vrot.lane.b32.xlu0 %v1971_v9, %s2324_s14  ;;  %v1036_v56 = vrot.slane %v1031_v53, %v2514_v4  ;;  %v1084_v58 = vpack.i.b16 %v2002_v44, %v2002_v44  ;;  %v1123_v59 = vshrl.u32 %v2003_v45, 16  ;;  %v1131_v61 = vshrl.u32 %v2004_v50, 16  ;;  %v826_v50 = vld [vmem:[#allocation2 + $0xa8] sm:$0xff]  ;;  %v832_v53 = vld [vmem:[#allocation2 + $0xd8] sm:$0xff] }
 0x106   : > { %v1044_v60 = vrot.slane %v1039_v54, %v2514_v4  ;;  %v2005_v62 = vcombine.low %v1164_v55, %v1164_v55  ;;  %v2006_v63 = vcombine.high %v1164_v55, %v1164_v55  ;;  %v1082_v0 = vrot.slane %v1077_v57, %v2512_v3  ;;  %v834_v54 = vld [vmem:[#allocation2 + $0xe8] sm:$0xff]  ;;  %v836_v55 = vld [vmem:[#allocation2 + $0xf8] sm:$0xff] }
 0x107   : > { %v1124_v1 = vpack.i.b16 %v1123_v59, %v1123_v59  ;;  %v1089_v6 = vrot.slane %v1084_v58, %v2512_v3  ;;  %v1132_v7 = vpack.i.b16 %v1131_v61, %v1131_v61  ;;  %v2136_v57 = vld [vmem:[%s2889_s2 + $0x14] ss:$8 sps:$4 sm:$0xff]   ;;  %v2138_v58 = vld [vmem:[%s2889_s2 + $0x10] ss:$8 sps:$4 sm:$0xff]   ;;  %v1236_v59 = vld [vmem:[#allocation5] sm:$0x11] }
 0x108   : > { %v1171_v8 = vshrl.u32 %v2005_v62, 16  ;;  %v1179_v9 = vshrl.u32 %v2006_v63, 16  ;;  %v2010_v61 = vcombine.high %v1236_v59, %v1236_v59 }
 0x109   : > { %618 = vrot.lane.b32.xlu1 %v1977_v14, %s2325_s15  ;;  %616 = vrot.lane.b32.xlu0 %v1976_v15, %s2325_s15  ;;  %v1129_v10 = vrot.slane %v1124_v1, %v2512_v3  ;;  %v1137_v11 = vrot.slane %v1132_v7, %v2512_v3 }
 0x10a   : > { %v1172_v12 = vpack.i.b16 %v1171_v8, %v1171_v8  ;;  %v1180_v13 = vpack.i.b16 %v1179_v9, %v1179_v9  ;;  %v1251_v63 = vshrl.u32 %v2010_v61, 16 }
 0x10c   : > { %v1177_v14 = vrot.slane %v1172_v12, %v2510_v2  ;;  %v1185_v15 = vrot.slane %v1180_v13, %v2510_v2  ;;  %v1252_v1 = vpack.i.b16 %v1251_v63, %v1251_v63 }
 0x10d   : > { %671 = vrot.lane.b32.xlu1 %v1982_v18, %s2327_s18  ;;  %669 = vrot.lane.b32.xlu0 %v1981_v21, %s2327_s18 }
 0x10e   : > { %v1257_v9 = vrot.slane %v1252_v1, %v2510_v2  ;;  %v1514_v1 = vld [vmem:[#allocation5] sm:$0x88] }
 0x111   : > { %726 = vrot.lane.b32.xlu1 %v1987_v28, %s2328_s19  ;;  %724 = vrot.lane.b32.xlu0 %v1986_v29, %s2328_s19 }
 0x115   : > { %779 = vrot.lane.b32.xlu1 %v1992_v30, %s2329_s30  ;;  %777 = vrot.lane.b32.xlu0 %v1991_v31, %s2329_s30 }
 0x119   : > { %848 = vperm.xlu1 %2114, %v838_v27   ;;  %843 = vperm.xlu0 %2113, %v837_v32  }
 0x11d   : > { %853 = vperm.xlu1 %2114, %v839_v33   ;;  %858 = vperm.xlu0 %2113, %v840_v36  }
 0x121   : > { %1000 = vrot.lane.b32.xlu1 %v990_v51, %s2316_s16  ;;  %1002 = vrot.lane.b32.xlu0 %v997_v52, %s2316_s16  ;;  %v828_v51 = vld [vmem:[#allocation2 + $0xb8] sm:$0xff]  ;;  %v830_v52 = vld [vmem:[#allocation2 + $0xc8] sm:$0xff] }
 0x125   : > { %1047 = vrot.lane.b32.xlu1 %v1036_v56, %s2314_s28  ;;  %1049 = vrot.lane.b32.xlu0 %v1044_v60, %s2314_s28  ;;  %v2133_v56 = vld [vmem:[%s2889_s2] ss:$8 sps:$4 sm:$0xff]   ;;  %v2009_v60 = vcombine.low %v1236_v59, %v1236_v59 }
 0x127   : > { %v1243_v62 = vshrl.u32 %v2009_v60, 16 }
 0x129   : > { %1092 = vrot.lane.b32.xlu1 %v1082_v0, %s2316_s16  ;;  %1094 = vrot.lane.b32.xlu0 %v1089_v6, %s2316_s16  ;;  %v1244_v0 = vpack.i.b16 %v1243_v62, %v1243_v62  ;;  %v1284_v6 = vld [vmem:[#allocation5] sm:$0x22] }
 0x12a   : > { %v2011_v8 = vcombine.low %v1284_v6, %v1284_v6 }
 0x12b   : > { %v1249_v7 = vrot.slane %v1244_v0, %v2510_v2 }
 0x12d   : > { %1140 = vrot.lane.b32.xlu1 %v1129_v10, %s2317_s17  ;;  %1142 = vrot.lane.b32.xlu0 %v1137_v11, %s2317_s17  ;;  %v2012_v10 = vcombine.high %v1284_v6, %v1284_v6  ;;  %v1291_v11 = vpack.i.b16 %v2011_v8, %v2011_v8 }
 0x12f   : > { %v1298_v12 = vpack.i.b16 %v2012_v10, %v2012_v10  ;;  %v1296_v13 = vrot.slane %v1291_v11, %v2514_v4  ;;  %v2021_v11 = vcombine.low %v1514_v1, %v1514_v1 }
 0x131   : > { %1188 = vrot.lane.b32.xlu1 %v1177_v14, %s2313_s23  ;;  %1190 = vrot.lane.b32.xlu0 %v1185_v15, %s2313_s23  ;;  %v1303_v14 = vrot.slane %v1298_v12, %v2514_v4 }
 0x135   : > { %1260 = vrot.lane.b32.xlu1 %v1249_v7, %s2313_s23  ;;  %1262 = vrot.lane.b32.xlu0 %v1257_v9, %s2313_s23  ;;  %s2038_s23 = sshll.u32 %s2913_s22, 5 }
 0x139   : > { %1306 = vrot.lane.b32.xlu1 %v1296_v13, %s2315_s12  ;;  %1308 = vrot.lane.b32.xlu0 %v1303_v14, %s2315_s12 }
 0x16b   : > { %v403_v16 = vpop.permute.xlu1 %402  ;;  %v401_v17 = vpop.permute.xlu0 %400 }
 0x16c   : > { %409 = vst.msk [vmem:[#allocation2 + $0x18] sm:$0xff] %vm353_vm0, %v403_v16  ;;  %v405_v18 = vsel %vm404_vm9, %v401_v17, %v403_v16  ;;  %v1330_v16 = vld [vmem:[#allocation5] sm:$0x44] }
 0x16f   : > { %v456_v19 = vpop.permute.xlu1 %455  ;;  %v454_v20 = vpop.permute.xlu0 %453 }
 0x170   : > { %462 = vst.msk [vmem:[#allocation2 + $0x28] sm:$0xff] %vm353_vm0, %v456_v19  ;;  %v458_v21 = vsel %vm2896_vm10, %v454_v20, %v456_v19  ;;  %vm2897_vm10 = vcmask 834560   ;;  %v2013_v20 = vcombine.low %v1330_v16, %v1330_v16 }
 0x173   : > { %v511_v22 = vpop.permute.xlu1 %510  ;;  %v509_v24 = vpop.permute.xlu0 %508  ;;  %v808_v25 = vld [vmem:[#allocation2 + $0x18] sm:$0xff] }
 0x174   : > { %517 = vst.msk [vmem:[#allocation2 + $0x38] sm:$0xff] %vm353_vm0, %v511_v22  ;;  %v513_v28 = vsel %vm512_vm11, %v509_v24, %v511_v22  ;;  %883 = vmatprep.subr.bf16.mxu0 %v808_v25 }
 0x175   : > { %884 = vmatpush1.bf16.msra.mxu0 %v405_v18 }
 0x177   : > { %v564_v29 = vpop.permute.xlu1 %563  ;;  %v562_v30 = vpop.permute.xlu0 %561  ;;  %v810_v31 = vld [vmem:[#allocation2 + $0x28] sm:$0xff] }
 0x178   : > { %570 = vst.msk [vmem:[#allocation2 + $0x48] sm:$0xff] %vm353_vm0, %v564_v29  ;;  %v566_v26 = vsel %vm565_vm12, %v562_v30, %v564_v29  ;;  %885 = vmatprep.subr.bf16.mxu0 %v810_v31 }
 0x179   : > { %886 = vmatpush1.bf16.msra.mxu0 %v458_v21  ;;  %v1374_v21 = vld [vmem:[#allocation5] sm:$0x22] }
 0x17b   : > { %v619_v27 = vpop.permute.xlu1 %618  ;;  %v617_v32 = vpop.permute.xlu0 %616  ;;  %v812_v33 = vld [vmem:[#allocation2 + $0x38] sm:$0xff] }
 0x17c   : > { %625 = vst.msk [vmem:[#allocation2 + $0x58] sm:$0xff] %vm353_vm0, %v619_v27  ;;  %v621_v34 = vsel %vm620_vm13, %v617_v32, %v619_v27  ;;  %887 = vmatprep.subr.bf16.mxu0 %v812_v33  ;;  %v2016_v27 = vcombine.high %v1374_v21, %v1374_v21 }
 0x17d   : > { %888 = vmatpush1.bf16.msra.mxu0 %v513_v28  ;;  %v2014_v28 = vcombine.high %v1330_v16, %v1330_v16 }
 0x17f   : > { %v672_v35 = vpop.permute.xlu1 %671  ;;  %v670_v36 = vpop.permute.xlu0 %669  ;;  %v814_v37 = vld [vmem:[#allocation2 + $0x48] sm:$0xff] }
 0x180   : > { %678 = vst.msk [vmem:[#allocation2 + $0x68] sm:$0xff] %vm353_vm0, %v672_v35  ;;  %v674_v38 = vsel %vm673_vm14, %v670_v36, %v672_v35  ;;  %889 = vmatprep.subr.bf16.mxu0 %v814_v37  ;;  %v1344_v36 = vpack.i.b16 %v2014_v28, %v2014_v28 }
 0x181   : > { %890 = vmatpush1.bf16.msra.mxu0 %v566_v26  ;;  %v2015_v26 = vcombine.low %v1374_v21, %v1374_v21 }
 0x183   : > { %v727_v39 = vpop.permute.xlu1 %726  ;;  %v725_v40 = vpop.permute.xlu0 %724  ;;  %v816_v41 = vld [vmem:[#allocation2 + $0x58] sm:$0xff] }
 0x184   : > { %733 = vst.msk [vmem:[#allocation2 + $0x78] sm:$0xff] %vm353_vm0, %v727_v39  ;;  %v729_v42 = vsel %vm728_vm15, %v725_v40, %v727_v39  ;;  %891 = vmatprep.subr.bf16.mxu0 %v816_v41  ;;  %v1381_v41 = vshrl.u32 %v2015_v26, 16 }
 0x185   : > { %892 = vmatpush1.bf16.msra.mxu0 %v621_v34  ;;  %v1337_v34 = vpack.i.b16 %v2013_v20, %v2013_v20 }
 0x187   : > { %v780_v43 = vpop.permute.xlu1 %779  ;;  %v778_v44 = vpop.permute.xlu0 %777  ;;  %v818_v45 = vld [vmem:[#allocation2 + $0x68] sm:$0xff] }
 0x188   : > { %786 = vst.msk [vmem:[#allocation2 + $0x88] sm:$0xff] %vm353_vm0, %v780_v43  ;;  %v782_v46 = vsel %vm2897_vm10, %v778_v44, %v780_v43  ;;  %893 = vmatprep.subr.bf16.mxu0 %v818_v45  ;;  %vm945_vm0 = vcmask 343272   ;;  %v1342_v45 = vrot.slane %v1337_v34, %v2512_v3  ;;  %vm972_vm10 = vcmask 236544  }
 0x189   : > { %894 = vmatpush1.bf16.msra.mxu0 %v674_v38  ;;  %946 = vst.msk [vmem:[#allocation3 + $0x8] sm:$0xff] %vm945_vm0, %v2326_v23  ;;  %947 = vst.msk [vmem:[#allocation3 + $0x18] sm:$0xff] %vm945_vm0, %v2326_v23  ;;  %vm970_vm0 = vcmask 1047656  }
 0x18b   : > { %v820_v47 = vld [vmem:[#allocation2 + $0x78] sm:$0xff] }
 0x18c   : > { %895 = vmatprep.subr.bf16.mxu0 %v820_v47 }
 0x18d   : > { %896 = vmatpush1.bf16.msra.mxu0 %v729_v42  ;;  %v1389_v42 = vshrl.u32 %v2016_v27, 16 }
 0x18f   : > { %v822_v48 = vld [vmem:[#allocation2 + $0x88] sm:$0xff] }
 0x190   : > { %897 = vmatprep.subr.bf16.mxu0 %v822_v48 }
 0x191   : > { %898 = vmatpush1.bf16.msra.mxu0 %v782_v46 }
 0x192   : > { %899 = vmatprep.subr.bf16.mxu0 %v824_v49  ;;  %v1349_v49 = vrot.slane %v1344_v36, %v2512_v3 }
 0x195   : > { %900 = vmatpush1.bf16.msra.mxu0 %v2326_v23 }
 0x196   : > { %901 = vmatprep.subr.bf16.mxu0 %v826_v50  ;;  %v1420_v50 = vld [vmem:[#allocation5] sm:$0x44] }
 0x197   : > { %v2017_v59 = vcombine.low %v1420_v50, %v1420_v50  ;;  %v2018_v63 = vcombine.high %v1420_v50, %v1420_v50 }
 0x198   : > { %v844_v15 = vpop.permute.xlu0 %843  ;;  %v849_v22 = vpop.permute.xlu1 %848 }
 0x199   : > { %902 = vmatpush1.bf16.msra.mxu0 %v2326_v23  ;;  %v1427_v9 = vpack.i.b16 %v2017_v59, %v2017_v59  ;;  %v1434_v13 = vpack.i.b16 %v2018_v63, %v2018_v63 }
 0x19a   : > { %903 = vmatprep.subr.bf16.mxu0 %v828_v51  ;;  %v1466_v51 = vld [vmem:[#allocation5] sm:$0x44] }
 0x19b   : > { %v2019_v60 = vcombine.low %v1466_v51, %v1466_v51  ;;  %v2020_v0 = vcombine.high %v1466_v51, %v1466_v51  ;;  %v1432_v16 = vrot.slane %v1427_v9, %v2512_v3 }
 0x19c   : > { %v854_v38 = vpop.permute.xlu1 %853  ;;  %v859_v46 = vpop.permute.xlu0 %858 }
 0x19d   : > { %904 = vmatpush1.bf16.msra.mxu0 %v2326_v23  ;;  %v1473_v10 = vshrl.u32 %v2019_v60, 16  ;;  %v1481_v14 = vshrl.u32 %v2020_v0, 16 }
 0x19e   : > { %905 = vmatprep.subr.bf16.mxu0 %v830_v52 }
 0x19f   : > { %v1482_v20 = vpack.i.b16 %v1481_v14, %v1481_v14 }
 0x1a0   : > { %v1003_v50 = vpop.permute.xlu0 %1002 }
 0x1a1   : > { %906 = vmatpush1.bf16.msra.mxu0 %v2326_v23 }
 0x1a2   : > { %907 = vmatprep.subr.bf16.mxu0 %v832_v53 }
 0x1a5   : > { %908 = vmatpush1.bf16.msra.mxu0 %v2326_v23 }
 0x1a6   : > { %909 = vmatprep.subr.bf16.mxu0 %v834_v54 }
 0x1a9   : > { %910 = vmatpush1.bf16.msra.mxu0 %v2326_v23 }
 0x1aa   : > { %911 = vmatprep.subr.bf16.mxu0 %v836_v55  ;;  %v1382_v55 = vpack.i.b16 %v1381_v41, %v1381_v41 }
 0x1ac   : > { %v1387_v8 = vrot.slane %v1382_v55, %v2514_v4 }
 0x1ad   : > { %912 = vmatpush1.bf16.msra.mxu0 %v2326_v23 }
 0x1b0   : > { %914 = vmatmul.mubr.bf16.vlgmr.msra.gmra.mrb[0].mxu0 %v2133_v56  ;;  %v1390_v56 = vpack.i.b16 %v1389_v42, %v1389_v42 }
 0x1b1   : > { %923 = vmatprep.mubr.bf16.mxu0 %v2136_v57 }
 0x1b2   : > { %v1395_v12 = vrot.slane %v1390_v56, %v2514_v4 }
 0x1b8   : > { %924 = vmatmul.mubr.bf16.gmra.mrb[4].mxu0 %v2138_v58 }
 0x283   : > { %v915_v17 = vpop.f32.mrb[0].mxu0 }
 0x284   : > { %v916_v18 = vadd.f32 %v915_v17, %v844_v15  ;;  %v917_v19 = vpop.f32.mrb[1].mxu0  ;;  %v1474_v17 = vpack.i.b16 %v1473_v10, %v1473_v10 }
 0x285   : > { %v918_v24 = vadd.f32 %v917_v19, %v844_v15  ;;  %v919_v25 = vpop.f32.mrb[2].mxu0  ;;  %v2022_v15 = vcombine.high %v1514_v1, %v1514_v1  ;;  %v1439_v19 = vrot.slane %v1434_v13, %v2512_v3  ;;  %v1210_v1 = vld [vmem:[#allocation5] sm:$0x11] }
 0x286   : > { %v920_v29 = vadd.f32 %v919_v25, %v849_v22  ;;  %v921_v30 = vpop.f32.mrb[3].mxu0  ;;  %v934_v32 = vmax.f32 %v916_v18, 0.0  ;;  %v1521_v18 = vshrl.u32 %v2021_v11, 16  ;;  %v1479_v4 = vrot.slane %v1474_v17, %v2512_v3 }
 0x287   : > { %v922_v31 = vadd.f32 %v921_v30, %v849_v22  ;;  %v935_v23 = vmax.f32 %v918_v24, 0.0  ;;  %v1529_v21 = vshrl.u32 %v2022_v15, 16  ;;  %v1560_v22 = vld [vmem:[#allocation5] sm:$0x88]  ;;  %v1487_v30 = vrot.slane %v1482_v20, %v2512_v3 }
 0x288   : > { %v936_v33 = vmax.f32 %v920_v29, 0.0  ;;  %v1604_v24 = vld [vmem:[#allocation5] sm:$0x88]  ;;  %v1522_v25 = vpack.i.b16 %v1521_v18, %v1521_v18  ;;  %v2023_v28 = vcombine.low %v1560_v22, %v1560_v22  ;;  %v2024_v26 = vcombine.high %v1560_v22, %v1560_v22 }
 0x289   : > { %v937_v35 = vmax.f32 %v922_v31, 0.0  ;;  %v2025_v29 = vcombine.low %v1604_v24, %v1604_v24  ;;  %v1530_v31 = vpack.i.b16 %v1529_v21, %v1529_v21  ;;  %v2026_v27 = vcombine.high %v1604_v24, %v1604_v24 }
 0x28a   : > { %v948_v37 = vpack.c.bf16 %v936_v33, %v934_v32  ;;  %v1527_v32 = vrot.slane %v1522_v25, %v2516_v5  ;;  %v1567_v33 = vpack.i.b16 %v2023_v28, %v2023_v28  ;;  %v2008_v9 = vcombine.high %v1210_v1, %v1210_v1 }
 0x28b   : > { %v949_v39 = vpack.c.bf16 %v937_v35, %v935_v23  ;;  %v925_v40 = vpop.f32.mrb[4].mxu0  ;;  %v1611_v34 = vshrl.u32 %v2025_v29, 16  ;;  %v1535_v23 = vrot.slane %v1530_v31, %v2516_v5  ;;  %v1574_v35 = vpack.i.b16 %v2024_v26, %v2024_v26 }
 0x28c   : > { %v926_v43 = vadd.f32 %v925_v40, %v854_v38  ;;  %v927_v44 = vpop.f32.mrb[5].mxu0  ;;  %956 = vrot.lane.b32.xlu1 %v948_v37, %s2316_s16  ;;  %v1619_v36 = vshrl.u32 %v2026_v27, 16  ;;  %v1652_v37 = vld [vmem:[#allocation5 + $0x8] sm:$0x11]  ;;  %v1572_v3 = vrot.slane %v1567_v33, %v2516_v5  ;;  %v1224_v20 = vpack.i.b16 %v2008_v9, %v2008_v9 }
 0x28d   : > { %v928_v47 = vadd.f32 %v927_v44, %v854_v38  ;;  %v929_v48 = vpop.f32.mrb[6].mxu0  ;;  %958 = vrot.lane.b32.xlu0 %v949_v39, %s2316_s16  ;;  %v1612_v38 = vpack.i.b16 %v1611_v34, %v1611_v34  ;;  %v2027_v39 = vcombine.low %v1652_v37, %v1652_v37  ;;  %v1579_v40 = vrot.slane %v1574_v35, %v2516_v5 }
 0x28e   : > { %v930_v52 = vadd.f32 %v929_v48, %v859_v46  ;;  %v931_v53 = vpop.f32.mrb[7].mxu0  ;;  %v938_v57 = vmax.f32 %v926_v43, 0.0  ;;  %v1620_v41 = vpack.i.b16 %v1619_v36, %v1619_v36  ;;  %v2028_v42 = vcombine.high %v1652_v37, %v1652_v37 }
 0x28f   : > { %v932_v54 = vadd.f32 %v931_v53, %v859_v46  ;;  %v939_v61 = vmax.f32 %v928_v47, 0.0  ;;  %v1617_v43 = vrot.slane %v1612_v38, %v2516_v5  ;;  %v1659_v44 = vpack.i.b16 %v2027_v39, %v2027_v39 }
 0x290   : > { %v940_v58 = vmax.f32 %v930_v52, 0.0  ;;  %1352 = vrot.lane.b32.xlu1 %v1342_v45, %s2316_s16  ;;  %v1625_v45 = vrot.slane %v1620_v41, %v2516_v5  ;;  %v1666_v46 = vpack.i.b16 %v2028_v42, %v2028_v42  ;;  %v1050_v52 = vpop.permute.xlu0 %1049 }
 0x291   : > { %v941_v62 = vmax.f32 %v932_v54, 0.0  ;;  %1354 = vrot.lane.b32.xlu0 %v1349_v49, %s2316_s16  ;;  %v1664_v47 = vrot.slane %v1659_v44, %v2510_v2  ;;  %v1001_v49 = vpop.permute.xlu1 %1000 }
 0x292   : > { %v950_v6 = vpack.c.bf16 %v940_v58, %v938_v57  ;;  %v1671_v48 = vrot.slane %v1666_v46, %v2510_v2  ;;  %v1004_v14 = vsel %vm548_vm4, %v1001_v49, %v1003_v50 }
 0x293   : > { %v951_v7 = vpack.c.bf16 %v941_v62, %v939_v61 }
 0x294   : > { %960 = vrot.lane.b32.xlu1 %v950_v6, %s2316_s16  ;;  %v2724_v5 = vpop.permute.xlu0 %1094 }
 0x295   : > { %962 = vrot.lane.b32.xlu0 %v951_v7, %s2316_s16  ;;  %v1048_v51 = vpop.permute.xlu1 %1047 }
 0x296   : > { %v1051_v25 = vsel %vm495_vm2, %v1048_v51, %v1050_v52 }
 0x298   : > { %1398 = vrot.lane.b32.xlu1 %v1387_v8, %s2314_s28  ;;  %v2728_v55 = vpop.permute.xlu0 %1142  ;;  %v2007_v8 = vcombine.low %v1210_v1, %v1210_v1 }
 0x299   : > { %1400 = vrot.lane.b32.xlu0 %v1395_v12, %s2314_s28  ;;  %v2722_v53 = vpop.permute.xlu1 %1092 }
 0x29a   : > { %v1217_v18 = vpack.i.b16 %v2007_v8, %v2007_v8 }
 0x29c   : > { %1442 = vrot.lane.b32.xlu1 %v1432_v16, %s2316_s16  ;;  %v2732_v57 = vpop.permute.xlu0 %1190  ;;  %v1222_v28 = vrot.slane %v1217_v18, %v2510_v2 }
 0x29d   : > { %1444 = vrot.lane.b32.xlu0 %v1439_v19, %s2316_s16  ;;  %v2726_v54 = vpop.permute.xlu1 %1140  ;;  %s310_s16 = scalar_lea.vmem %s2893_s6, %s2038_s23 }
 0x29e   : > { %v1144_v8 = vsel %vm603_vm5, %v2726_v54, %v2728_v55 }
 0x2a0   : > { %1490 = vrot.lane.b32.xlu1 %v1479_v4, %s2317_s17  ;;  %v2736_v59 = vpop.permute.xlu0 %1262 }
 0x2a1   : > { %1492 = vrot.lane.b32.xlu0 %v1487_v30, %s2317_s17  ;;  %v2730_v56 = vpop.permute.xlu1 %1188  ;;  %v1229_v30 = vrot.slane %v1224_v20, %v2510_v2 }
 0x2a4   : > { %1538 = vrot.lane.b32.xlu1 %v1527_v32, %s2319_s26  ;;  %v2740_v61 = vpop.permute.xlu0 %1308 }
 0x2a5   : > { %1540 = vrot.lane.b32.xlu0 %v1535_v23, %s2319_s26  ;;  %v2734_v58 = vpop.permute.xlu1 %1260 }
 0x2a8   : > { %1582 = vrot.lane.b32.xlu1 %v1572_v3, %s2318_s27 }
 0x2a9   : > { %1584 = vrot.lane.b32.xlu0 %v1579_v40, %s2318_s27  ;;  %v2738_v60 = vpop.permute.xlu1 %1306 }
 0x2ac   : > { %1628 = vrot.lane.b32.xlu1 %v1617_v43, %s2319_s26 }
 0x2ad   : > { %1630 = vrot.lane.b32.xlu0 %v1625_v45, %s2319_s26 }
 0x2b0   : > { %1674 = vrot.lane.b32.xlu1 %v1664_v47, %s2320_s29 }
 0x2b1   : > { %1676 = vrot.lane.b32.xlu0 %v1671_v48, %s2320_s29  ;;  %v1096_v48 = vsel %vm548_vm4, %v2722_v53, %v2724_v5 }
 0x2fe   : > { %v957_v62 = vpop.permute.xlu1 %956 }
 0x2ff   : > { %971 = vst.msk [vmem:[#allocation3] sm:$0xff] %vm970_vm0, %v957_v62  ;;  %v959_v63 = vpop.permute.xlu0 %958 }
 0x300   : > { %v964_v0 = vsel %vm548_vm4, %v957_v62, %v959_v63 }
 0x301   : > { %973 = vst.msk [vmem:[#allocation3 + $0x8] sm:$0xff] %vm972_vm10, %v964_v0 }
 0x302   : > { %v2744_v6 = vpop.permute.xlu1 %1352 }
 0x303   : > { %v2746_v7 = vpop.permute.xlu0 %1354 }
 0x306   : > { %v961_v10 = vpop.permute.xlu1 %960  ;;  %v976_v11 = vld [vmem:[#allocation3] sm:$0xf]  ;;  %v1021_v17 = vld [vmem:[#allocation3] sm:$0xf0] }
 0x307   : > { %974 = vst.msk [vmem:[#allocation3 + $0x10] sm:$0xff] %vm970_vm0, %v961_v10  ;;  %v963_v12 = vpop.permute.xlu0 %962  ;;  %v1007_v13 = vmul.bf16 %v1001_v49, %v976_v11  ;;  %v1054_v4 = vmul.bf16 %v1048_v51, %v1021_v17  ;;  %v1512_v36 = vld [vmem:[#allocation3] sm:$0xf]  ;;  %v1068_v40 = vld [vmem:[#allocation3] sm:$0xf0]  ;;  %v1356_v17 = vsel %vm548_vm4, %v2744_v6, %v2746_v7 }
 0x308   : > { %v965_v15 = vsel %vm548_vm4, %v961_v10, %v963_v12  ;;  %v977_v16 = vld [vmem:[#allocation3 + $0x8] sm:$0xf]  ;;  %v1022_v22 = vld [vmem:[#allocation3 + $0x8] sm:$0xf0]  ;;  %v1558_v42 = vld [vmem:[#allocation3] sm:$0xf0]  ;;  %v1099_v47 = vmul.bf16 %v2722_v53, %v1068_v40 }
 0x309   : > { %975 = vst.msk [vmem:[#allocation3 + $0x18] sm:$0xff] %vm972_vm10, %v965_v15  ;;  %1011 = vrot.lane.b32.xlu1 %v1007_v13, %s2324_s14  ;;  %v1008_v19 = vmul.bf16 %v1004_v14, %v977_v16  ;;  %v1055_v29 = vmul.bf16 %v1051_v25, %v1022_v22  ;;  %vm1066_vm10 = vcmask 130052   ;;  %v1513_v38 = vld [vmem:[#allocation3 + $0x8] sm:$0xf]  ;;  %v1069_v44 = vld [vmem:[#allocation3 + $0x8] sm:$0xf0]  ;;  %v1264_v25 = vsel %vm387_vm1, %v2734_v58, %v2736_v59 }
 0x30a   : > { %v2752_v21 = vpop.permute.xlu1 %1398  ;;  %v1559_v49 = vld [vmem:[#allocation3 + $0x8] sm:$0xf0]  ;;  %v1114_v51 = vld [vmem:[#allocation3] sm:$0xf]  ;;  %v1100_v62 = vmul.bf16 %v1096_v48, %v1069_v44  ;;  %v1115_v63 = vld [vmem:[#allocation3 + $0x8] sm:$0xf] }
 0x30b   : > { %v2754_v24 = vpop.permute.xlu0 %1400  ;;  %1013 = vrot.lane.b32.xlu0 %v1008_v19, %s2324_s14  ;;  %v1103_v0 = vrot.slane %v1099_v47, 4  ;;  %v1147_v1 = vmul.bf16 %v2726_v54, %v1114_v51  ;;  %v1148_v5 = vmul.bf16 %v1144_v8, %v1115_v63  ;;  %v1192_v54 = vsel %vm387_vm1, %v2730_v56, %v2732_v57  ;;  %v1651_v63 = vld [vmem:[#allocation3 + $0x8] sm:$0xf] }
 0x30c   : > { %v1104_v53 = vrot.slane %v1100_v62, 4  ;;  %vm1019_vm1 = vcmask 125952  }
 0x30d   : > { %1058 = vrot.lane.b32.xlu1 %v1054_v4, %s2323_s13  ;;  %v1151_v9 = vrot.slane %v1147_v1, 4  ;;  %v1152_v11 = vrot.slane %v1148_v5, 4  ;;  %v1716_v5 = vld [vmem:[#allocation10] sm:$0xff] }
 0x30e   : > { %v1208_v31 = vld [vmem:[#allocation3 + $0x10] sm:$0xf0]  ;;  %v2761_v26 = vpop.permute.xlu1 %1442  ;;  %v1162_v10 = vld [vmem:[#allocation3 + $0x10] sm:$0xf] }
 0x30f   : > { %v2763_v27 = vpop.permute.xlu0 %1444  ;;  %1060 = vrot.lane.b32.xlu0 %v1055_v29, %s2323_s13  ;;  %v1230_v33 = vmul.bf16 %v1222_v28, %v1208_v31  ;;  %v1195_v13 = vmul.bf16 %v2730_v56, %v1162_v10  ;;  %v1328_v55 = vld [vmem:[#allocation3 + $0x10] sm:$0xf]  ;;  %v1372_v18 = vld [vmem:[#allocation3 + $0x10] sm:$0xf0] }
 0x310   : > { %v1209_v32 = vld [vmem:[#allocation3 + $0x18] sm:$0xf0]  ;;  %v1163_v12 = vld [vmem:[#allocation3 + $0x18] sm:$0xf]  ;;  %v1359_v16 = vmul.bf16 %v2744_v6, %v1328_v55  ;;  %v1234_v19 = vld [vmem:[#allocation3 + $0x10] sm:$0xf0]  ;;  %v1405_v57 = vmul.bf16 %v2752_v21, %v1372_v18  ;;  %v1402_v6 = vsel %vm495_vm2, %v2752_v21, %v2754_v24 }
 0x311   : > { %v1231_v34 = vmul.bf16 %v1229_v30, %v1209_v32  ;;  %1232 = vst [vmem:[#allocation4 + $0x20] sm:$0xf0] %v1230_v33  ;;  %v1196_v14 = vmul.bf16 %v1192_v54, %v1163_v12  ;;  %v1329_v15 = vld [vmem:[#allocation3 + $0x18] sm:$0xf]  ;;  %v1373_v22 = vld [vmem:[#allocation3 + $0x18] sm:$0xf0]  ;;  %v1267_v4 = vmul.bf16 %v2734_v58, %v1234_v19  ;;  %v1310_v33 = vsel %vm440_vm3, %v2738_v60, %v2740_v61 }
 0x312   : > { %v2766_v23 = vpop.permute.xlu1 %1490  ;;  %v1360_v20 = vmul.bf16 %v1356_v17, %v1329_v15  ;;  %v1235_v56 = vld [vmem:[#allocation3 + $0x18] sm:$0xf0]  ;;  %v1282_v7 = vld [vmem:[#allocation3 + $0x10] sm:$0xf]  ;;  %v1406_v28 = vmul.bf16 %v1402_v6, %v1373_v22  ;;  %v1283_v30 = vld [vmem:[#allocation3 + $0x18] sm:$0xf] }
 0x313   : > { %v2768_v35 = vpop.permute.xlu0 %1492  ;;  %1233 = vst.msk [vmem:[#allocation4 + $0x28] sm:$0xf0] %vm1066_vm10, %v1231_v34  ;;  %v1268_v29 = vmul.bf16 %v1264_v25, %v1235_v56  ;;  %v1271_v31 = vrot.slane %v1267_v4, 4  ;;  %v1313_v32 = vmul.bf16 %v2738_v60, %v1282_v7  ;;  %v1418_v58 = vld [vmem:[#allocation3 + $0x10] sm:$0xf0]  ;;  %v1314_v21 = vmul.bf16 %v1310_v33, %v1283_v30 }
 0x314   : > { %v1419_v24 = vld [vmem:[#allocation3 + $0x18] sm:$0xf0]  ;;  %v1446_v34 = vsel %vm548_vm4, %v2761_v26, %v2763_v27  ;;  %v1464_v61 = vld [vmem:[#allocation3 + $0x10] sm:$0xf]  ;;  %vm2908_vm2 = vcmask 1031168   ;;  %vm2909_vm3 = vcmask 834560  }
 0x315   : > { %v1272_v59 = vrot.slane %v1268_v29, 4  ;;  %v1318_v60 = vrot.slane %v1314_v21, 4  ;;  %v1718_v10 = vld [vmem:[#allocation10 + $0x10] sm:$0xff]  ;;  %vm1829_vm4 = vcmask 1043456  }
 0x316   : > { %v1539_v2 = vpop.permute.xlu1 %1538 }
 0x317   : > { %v1545_v37 = vmul.bf16 %v1539_v2, %v1512_v36  ;;  %v1541_v3 = vpop.permute.xlu0 %1540  ;;  %v1449_v36 = vmul.bf16 %v2761_v26, %v1418_v58  ;;  %v1465_v26 = vld [vmem:[#allocation3 + $0x18] sm:$0xf] }
 0x318   : > { %v1542_v39 = vsel %vm711_vm7, %v1539_v2, %v1541_v3  ;;  %v1317_v2 = vrot.slane %v1313_v32, 4 }
 0x319   : > { %v1546_v41 = vmul.bf16 %v1542_v39, %v1513_v38  ;;  %1549 = vrot.lane.b32.xlu1 %v1545_v37, %s2328_s19  ;;  %v1450_v37 = vmul.bf16 %v1446_v34, %v1419_v24  ;;  %v1494_v39 = vsel %vm603_vm5, %v2766_v23, %v2768_v35  ;;  %v1453_v40 = vrot.slane %v1449_v36, 4  ;;  %v1603_v35 = vld [vmem:[#allocation3 + $0x8] sm:$0xf0]  ;;  %vm2872_vm5 = vmor %vm1066_vm10, %vm1829_vm4 }
 0x31a   : > { %v1583_v43 = vpop.permute.xlu1 %1582 }
 0x31b   : > { %v1589_v45 = vmul.bf16 %v1583_v43, %v1558_v42  ;;  %v1585_v46 = vpop.permute.xlu0 %1584  ;;  %1551 = vrot.lane.b32.xlu0 %v1546_v41, %s2328_s19  ;;  %v1497_v41 = vmul.bf16 %v2766_v23, %v1464_v61  ;;  %v1454_v27 = vrot.slane %v1450_v37, 4  ;;  %v1498_v42 = vmul.bf16 %v1494_v39, %v1465_v26  ;;  %v1650_v23 = vld [vmem:[#allocation3] sm:$0xf] }
 0x31c   : > { %v1586_v50 = vsel %vm656_vm6, %v1583_v43, %v1585_v46  ;;  %v1602_v43 = vld [vmem:[#allocation3] sm:$0xf0] }
 0x31d   : > { %v1590_v52 = vmul.bf16 %v1586_v50, %v1559_v49  ;;  %1593 = vrot.lane.b32.xlu1 %v1589_v45, %s2327_s18  ;;  %v1501_v45 = vrot.slane %v1497_v41, 4  ;;  %v1502_v49 = vrot.slane %v1498_v42, 4 }
 0x31e   : > { %v1629_v3 = vpop.permute.xlu1 %1628 }
 0x31f   : > { %1595 = vrot.lane.b32.xlu0 %v1590_v52, %s2327_s18  ;;  %v1631_v38 = vpop.permute.xlu0 %1630  ;;  %v1635_v46 = vmul.bf16 %v1629_v3, %v1602_v43 }
 0x320   : > { %v1632_v44 = vsel %vm711_vm7, %v1629_v3, %v1631_v38 }
 0x321   : > { %1105 = vrot.lane.b32.xlu1 %v1103_v0, %s2324_s14  ;;  %v1636_v50 = vmul.bf16 %v1632_v44, %v1603_v35  ;;  %v1639_v52 = vrot.slane %v1635_v46, 4 }
 0x322   : > { %v1675_v47 = vpop.permute.xlu1 %1674 }
 0x323   : > { %1107 = vrot.lane.b32.xlu0 %v1104_v53, %s2324_s14  ;;  %v1677_v48 = vpop.permute.xlu0 %1676  ;;  %v1681_v62 = vmul.bf16 %v1675_v47, %v1650_v23  ;;  %v1640_v0 = vrot.slane %v1636_v50, 4 }
 0x324   : > { %v1678_v51 = vsel %vm764_vm8, %v1675_v47, %v1677_v48 }
 0x325   : > { %1153 = vrot.lane.b32.xlu1 %v1151_v9, %s2325_s15  ;;  %v1682_v1 = vmul.bf16 %v1678_v51, %v1651_v63  ;;  %v1685_v8 = vrot.slane %v1681_v62, 4  ;;  %v1717_v9 = vld [vmem:[#allocation10 + $0x8] sm:$0xff] }
 0x327   : > { %1155 = vrot.lane.b32.xlu0 %v1152_v11, %s2325_s15  ;;  %v1686_v53 = vrot.slane %v1682_v1, 4  ;;  %v1719_v11 = vld [vmem:[#allocation10 + $0x18] sm:$0xff] }
 0x329   : > { %1199 = vrot.lane.b32.xlu1 %v1195_v13, %s2321_s10 }
 0x32b   : > { %1201 = vrot.lane.b32.xlu0 %v1196_v14, %s2321_s10 }
 0x32d   : > { %1363 = vrot.lane.b32.xlu1 %v1359_v16, %s2324_s14 }
 0x32f   : > { %1365 = vrot.lane.b32.xlu0 %v1360_v20, %s2324_s14 }
 0x331   : > { %1409 = vrot.lane.b32.xlu1 %v1405_v57, %s2323_s13 }
 0x333   : > { %1411 = vrot.lane.b32.xlu0 %v1406_v28, %s2323_s13 }
 0x335   : > { %1273 = vrot.lane.b32.xlu1 %v1271_v31, %s2321_s10 }
 0x337   : > { %1275 = vrot.lane.b32.xlu0 %v1272_v59, %s2321_s10 }
 0x339   : > { %1319 = vrot.lane.b32.xlu1 %v1317_v2, %s2322_s11 }
 0x33b   : > { %1321 = vrot.lane.b32.xlu0 %v1318_v60, %s2322_s11 }
 0x33d   : > { %1455 = vrot.lane.b32.xlu1 %v1453_v40, %s2324_s14 }
 0x33f   : > { %1457 = vrot.lane.b32.xlu0 %v1454_v27, %s2324_s14 }
 0x341   : > { %1503 = vrot.lane.b32.xlu1 %v1501_v45, %s2325_s15 }
 0x343   : > { %1505 = vrot.lane.b32.xlu0 %v1502_v49, %s2325_s15 }
 0x345   : > { %1641 = vrot.lane.b32.xlu1 %v1639_v52, %s2328_s19 }
 0x347   : > { %1643 = vrot.lane.b32.xlu0 %v1640_v0, %s2328_s19 }
 0x349   : > { %1687 = vrot.lane.b32.xlu1 %v1685_v8, %s2329_s30 }
 0x34b   : > { %1689 = vrot.lane.b32.xlu0 %v1686_v53, %s2329_s30 }
 0x34d   : > { %1722 = vperm.xlu1 %2114, %v1716_v5  }
 0x34f   : > { %1727 = vperm.xlu0 %2113, %v1717_v9   ;;  %v2170_v9 = vld [vmem:[#allocation9] sm:$0xff]  }
 0x351   : > { %1732 = vperm.xlu1 %2114, %v1718_v10   ;;  %v2172_v10 = vld [vmem:[#allocation2 + $0x90] sm:$0xff] }
 0x353   : > { %1737 = vperm.xlu0 %2113, %v1719_v11   ;;  %v2171_v11 = vld [vmem:[#allocation9 + $0x8] sm:$0xff]  }
 0x37b   : > { %v1012_v12 = vpop.permute.xlu1 %1011 }
 0x37d   : > { %v1014_v13 = vpop.permute.xlu0 %1013 }
 0x37e   : > { %v1015_v54 = vsel %vm565_vm12, %v1012_v12, %v1014_v13  ;;  %1020 = vst.msk [vmem:[#allocation4 + $0x8] sm:$0xf] %vm1019_vm1, %v1014_v13 }
 0x37f   : > { %1018 = vst [vmem:[#allocation4] sm:$0xf] %v1015_v54  ;;  %v1059_v55 = vpop.permute.xlu1 %1058 }
 0x381   : > { %v1061_v14 = vpop.permute.xlu0 %1060 }
 0x382   : > { %v1062_v15 = vsel %vm512_vm11, %v1059_v55, %v1061_v14  ;;  %1067 = vst.msk [vmem:[#allocation4 + $0x8] sm:$0xf0] %vm1066_vm10, %v1061_v14 }
 0x383   : > { %1065 = vst [vmem:[#allocation4] sm:$0xf0] %v1062_v15 }
 0x389   : > { %v1701_v16 = vld [vmem:[#allocation4 + $0x8] sm:$0xff] }
 0x38a   : > { %1752 = vmatprep.subr.bf16.mxu1 %v1701_v16  ;;  %v1700_v17 = vld [vmem:[#allocation4] sm:$0xff] }
 0x38b   : > { %1753 = vmatpush1.bf16.msra.mxu1 %v1700_v17  ;;  %v1550_v18 = vpop.permute.xlu1 %1549 }
 0x38d   : > { %v1552_v19 = vpop.permute.xlu0 %1551 }
 0x38e   : > { %v1553_v20 = vsel %vm728_vm15, %v1550_v18, %v1552_v19  ;;  %1557 = vst.msk [vmem:[#allocation4 + $0x68] sm:$0xf] %vm1019_vm1, %v1552_v19 }
 0x38f   : > { %1556 = vst [vmem:[#allocation4 + $0x60] sm:$0xf] %v1553_v20  ;;  %v1594_v22 = vpop.permute.xlu1 %1593 }
 0x391   : > { %v1596_v56 = vpop.permute.xlu0 %1595 }
 0x392   : > { %v1597_v57 = vsel %vm673_vm14, %v1594_v22, %v1596_v56  ;;  %1601 = vst.msk [vmem:[#allocation4 + $0x68] sm:$0xf0] %vm1066_vm10, %v1596_v56 }
 0x393   : > { %1600 = vst [vmem:[#allocation4 + $0x60] sm:$0xf0] %v1597_v57  ;;  %v1106_v4 = vpop.permute.xlu1 %1105 }
 0x395   : > { %v1108_v25 = vpop.permute.xlu0 %1107 }
 0x396   : > { %v1109_v6 = vsel %vm565_vm12, %v1106_v4, %v1108_v25  ;;  %1113 = vst.msk [vmem:[#allocation4 + $0x18] sm:$0xf] %vm1019_vm1, %v1108_v25 }
 0x397   : > { %1112 = vst [vmem:[#allocation4 + $0x10] sm:$0xf] %v1109_v6  ;;  %v1154_v7 = vpop.permute.xlu1 %1153 }
 0x399   : > { %v1156_v28 = vpop.permute.xlu0 %1155  ;;  %v1713_v1 = vld [vmem:[#allocation4 + $0x68] sm:$0xff] }
 0x39a   : > { %v1157_v29 = vsel %vm620_vm13, %v1154_v7, %v1156_v28  ;;  %1161 = vst.msk [vmem:[#allocation4 + $0x18] sm:$0xf0] %vm1066_vm10, %v1156_v28  ;;  %v1712_v8 = vld [vmem:[#allocation4 + $0x60] sm:$0xff] }
 0x39b   : > { %1160 = vst [vmem:[#allocation4 + $0x10] sm:$0xf0] %v1157_v29  ;;  %v1200_v30 = vpop.permute.xlu1 %1199 }
 0x39d   : > { %v1202_v31 = vpop.permute.xlu0 %1201 }
 0x39e   : > { %v1203_v32 = vsel %vm404_vm9, %v1200_v30, %v1202_v31  ;;  %1207 = vst.msk [vmem:[#allocation4 + $0x28] sm:$0xf] %vm1019_vm1, %v1202_v31 }
 0x39f   : > { %1206 = vst [vmem:[#allocation4 + $0x20] sm:$0xf] %v1203_v32  ;;  %v1364_v33 = vpop.permute.xlu1 %1363 }
 0x3a1   : > { %v1366_v58 = vpop.permute.xlu0 %1365  ;;  %v1703_v59 = vld [vmem:[#allocation4 + $0x18] sm:$0xff] }
 0x3a2   : > { %v1367_v21 = vsel %vm565_vm12, %v1364_v33, %v1366_v58  ;;  %1371 = vst.msk [vmem:[#allocation4 + $0x48] sm:$0xf] %vm1019_vm1, %v1366_v58  ;;  %1754 = vmatprep.subr.bf16.mxu1 %v1703_v59  ;;  %v1702_v24 = vld [vmem:[#allocation4 + $0x10] sm:$0xff] }
 0x3a3   : > { %1370 = vst [vmem:[#allocation4 + $0x40] sm:$0xf] %v1367_v21  ;;  %1755 = vmatpush1.bf16.msra.mxu1 %v1702_v24  ;;  %v1410_v34 = vpop.permute.xlu1 %1409 }
 0x3a5   : > { %v1412_v36 = vpop.permute.xlu0 %1411  ;;  %v1705_v2 = vld [vmem:[#allocation4 + $0x28] sm:$0xff] }
 0x3a6   : > { %v1413_v37 = vsel %vm512_vm11, %v1410_v34, %v1412_v36  ;;  %1417 = vst.msk [vmem:[#allocation4 + $0x48] sm:$0xf0] %vm1066_vm10, %v1412_v36  ;;  %1756 = vmatprep.subr.bf16.mxu1 %v1705_v2  ;;  %v1704_v3 = vld [vmem:[#allocation4 + $0x20] sm:$0xff] }
 0x3a7   : > { %1416 = vst [vmem:[#allocation4 + $0x40] sm:$0xf0] %v1413_v37  ;;  %1757 = vmatpush1.bf16.msra.mxu1 %v1704_v3  ;;  %v1274_v38 = vpop.permute.xlu1 %1273 }
 0x3a9   : > { %v1276_v60 = vpop.permute.xlu0 %1275 }
 0x3aa   : > { %v1277_v61 = vsel %vm404_vm9, %v1274_v38, %v1276_v60  ;;  %1281 = vst.msk [vmem:[#allocation4 + $0x38] sm:$0xf] %vm1019_vm1, %v1276_v60 }
 0x3ab   : > { %1280 = vst [vmem:[#allocation4 + $0x30] sm:$0xf] %v1277_v61  ;;  %v1320_v39 = vpop.permute.xlu1 %1319 }
 0x3ad   : > { %v1322_v40 = vpop.permute.xlu0 %1321  ;;  %v1709_v35 = vld [vmem:[#allocation4 + $0x48] sm:$0xff] }
 0x3ae   : > { %v1323_v41 = vsel %vm2908_vm2, %v1320_v39, %v1322_v40  ;;  %1327 = vst.msk [vmem:[#allocation4 + $0x38] sm:$0xf0] %vm1066_vm10, %v1322_v40  ;;  %v1708_v23 = vld [vmem:[#allocation4 + $0x40] sm:$0xff] }
 0x3af   : > { %1326 = vst [vmem:[#allocation4 + $0x30] sm:$0xf0] %v1323_v41  ;;  %v1456_v26 = vpop.permute.xlu1 %1455 }
 0x3b1   : > { %v1458_v27 = vpop.permute.xlu0 %1457 }
 0x3b2   : > { %v1459_v42 = vsel %vm565_vm12, %v1456_v26, %v1458_v27  ;;  %1463 = vst.msk [vmem:[#allocation4 + $0x58] sm:$0xf] %vm1019_vm1, %v1458_v27 }
 0x3b3   : > { %1462 = vst [vmem:[#allocation4 + $0x50] sm:$0xf] %v1459_v42  ;;  %v1504_v43 = vpop.permute.xlu1 %1503 }
 0x3b5   : > { %v1506_v44 = vpop.permute.xlu0 %1505  ;;  %v1707_v45 = vld [vmem:[#allocation4 + $0x38] sm:$0xff] }
 0x3b6   : > { %v1507_v46 = vsel %vm620_vm13, %v1504_v43, %v1506_v44  ;;  %1511 = vst.msk [vmem:[#allocation4 + $0x58] sm:$0xf0] %vm1066_vm10, %v1506_v44  ;;  %1758 = vmatprep.subr.bf16.mxu1 %v1707_v45  ;;  %v1706_v47 = vld [vmem:[#allocation4 + $0x30] sm:$0xff] }
 0x3b7   : > { %1510 = vst [vmem:[#allocation4 + $0x50] sm:$0xf0] %v1507_v46  ;;  %1759 = vmatpush1.bf16.msra.mxu1 %v1706_v47  ;;  %v1642_v48 = vpop.permute.xlu1 %1641 }
 0x3b8   : > { %1760 = vmatprep.subr.bf16.mxu1 %v1709_v35 }
 0x3b9   : > { %v1644_v49 = vpop.permute.xlu0 %1643 }
 0x3ba   : > { %v1645_v50 = vsel %vm728_vm15, %v1642_v48, %v1644_v49  ;;  %1649 = vst.msk [vmem:[#allocation4 + $0x78] sm:$0xf] %vm1019_vm1, %v1644_v49 }
 0x3bb   : > { %1648 = vst [vmem:[#allocation4 + $0x70] sm:$0xf] %v1645_v50  ;;  %1761 = vmatpush1.bf16.msra.mxu1 %v1708_v23  ;;  %v1688_v51 = vpop.permute.xlu1 %1687 }
 0x3bd   : > { %v1690_v52 = vpop.permute.xlu0 %1689  ;;  %v1711_v62 = vld [vmem:[#allocation4 + $0x58] sm:$0xff] }
 0x3be   : > { %v1691_v63 = vsel %vm2909_vm3, %v1688_v51, %v1690_v52  ;;  %1695 = vst.msk [vmem:[#allocation4 + $0x78] sm:$0xf0] %vm1066_vm10, %v1690_v52  ;;  %1762 = vmatprep.subr.bf16.mxu1 %v1711_v62  ;;  %v1710_v0 = vld [vmem:[#allocation4 + $0x50] sm:$0xff] }
 0x3bf   : > { %1694 = vst [vmem:[#allocation4 + $0x70] sm:$0xf0] %v1691_v63  ;;  %1763 = vmatpush1.bf16.msra.mxu1 %v1710_v0 }
 0x3c0   : > { %1764 = vmatprep.subr.bf16.mxu1 %v1713_v1 }
 0x3c3   : > { %1765 = vmatpush1.bf16.msra.mxu1 %v1712_v8 }
 0x3c5   : > { %v1715_v53 = vld [vmem:[#allocation4 + $0x78] sm:$0xff] }
 0x3c6   : > { %1766 = vmatprep.subr.bf16.mxu1 %v1715_v53  ;;  %v1714_v5 = vld [vmem:[#allocation4 + $0x70] sm:$0xff] }
 0x3c7   : > { %1767 = vmatpush1.bf16.msra.mxu1 %v1714_v5 }
 0x3ca   : > { %1785 = vmatmul.mubr.bf16.vlgmr.msra.gmra.mrb[0].mxu1 %v2170_v9 }
 0x3cb   : > { %1794 = vmatprep.mubr.bf16.mxu1 %v2172_v10 }
 0x3cc   : > { %v1723_v12 = vpop.permute.xlu1 %1722 }
 0x3ce   : > { %v1728_v14 = vpop.permute.xlu0 %1727 }
 0x3d0   : > { %v1733_v57 = vpop.permute.xlu1 %1732 }
 0x3d2   : > { %1795 = vmatmul.mubr.bf16.gmra.mrb[4].mxu1 %v2171_v11  ;;  %v1738_v7 = vpop.permute.xlu0 %1737 }
 0x49d   : > { %v1786_v13 = vpop.f32.mrb[0].mxu1 }
 0x49e   : > { %v1787_v54 = vadd.f32 %v1786_v13, %v1723_v12  ;;  %v1788_v55 = vpop.f32.mrb[1].mxu1 }
 0x49f   : > { %v1789_v15 = vadd.f32 %v1788_v55, %v1723_v12  ;;  %v1790_v16 = vpop.f32.mrb[2].mxu1 }
 0x4a0   : > { %v1791_v18 = vadd.f32 %v1790_v16, %v1728_v14  ;;  %v1792_v19 = vpop.f32.mrb[3].mxu1 }
 0x4a1   : > { %v2039_v20 = vpack.c.bf16 %v1789_v15, %v1787_v54  ;;  %v1793_v22 = vadd.f32 %v1792_v19, %v1728_v14 }
 0x4a3   : > { %1831 = vst.msk [vmem:[%s310_s16] sm:$0xff] %vm2872_vm5, %v2039_v20  ;;  %v2040_v56 = vpack.c.bf16 %v1793_v22, %v1791_v18 }
 0x4a5   : > { %1832 = vst.msk [vmem:[%s310_s16 + $0x8] sm:$0xff] %vm2872_vm5, %v2040_v56  ;;  %v1796_v4 = vpop.f32.mrb[4].mxu1 }
 0x4a6   : > { %v1797_v25 = vadd.f32 %v1796_v4, %v1733_v57  ;;  %v1798_v6 = vpop.f32.mrb[5].mxu1 }
 0x4a7   : > { %v1799_v28 = vadd.f32 %v1798_v6, %v1733_v57  ;;  %v1800_v29 = vpop.f32.mrb[6].mxu1 }
 0x4a8   : > { %v1801_v30 = vadd.f32 %v1800_v29, %v1738_v7  ;;  %v1802_v31 = vpop.f32.mrb[7].mxu1 }
 0x4a9   : > { %v2041_v32 = vpack.c.bf16 %v1799_v28, %v1797_v25  ;;  %v1803_v33 = vadd.f32 %v1802_v31, %v1738_v7 }
 0x4ab   : > { %1833 = vst.msk [vmem:[%s310_s16 + $0x10] sm:$0xff] %vm2872_vm5, %v2041_v32  ;;  %v2042_v58 = vpack.c.bf16 %v1803_v33, %v1801_v30 }
 0x4ad   : > { %1834 = vst.msk [vmem:[%s310_s16 + $0x18] sm:$0xff] %vm2872_vm5, %v2042_v58 }
 0x4ae PF: > { %s19_s21 = sadd.s32 1, %s2303_s21  }
 0x4af   : > { %p16_p6 = scmp.ge.s32.totalorder %s19_s21, 4  }
 0x4b1   :  { %18 = sbr.rel (!%p16_p6) target bundleno = 3 (0x3), region = 91 }
 0x4b8   :  { %1856 = vsyncpa [#allocation6], 1 }
 0x4b9   :  { %1858 = vsyncpa [#allocation6 + $0x1], 1 }
 0x4ba   :  { %1859 = vsyncpa [#allocation8], 1 }
 0x4bb   :  { %1860 = vsyncpa [#allocation11], 1 }

// kernel: _lambda_.7
= control target key start
LH: loop header
LB: loop body
LE: loop exit
PB: predicated region body
PF: predicated region fallthrough
CT: control target
= control target key end

     0   :  { %9 = vsyncpa [#allocation4], 0  ;;  %s2708_s0 = inlined_call_operand.vmem [shape: bf16[2,8,626], index: 0, kind: input, shape index: {}]   ;;  %s2709_s1 = inlined_call_operand.hbm [shape: bf16[9,576], index: 1, kind: input, shape index: {}]   ;;  %s2710_s2 = inlined_call_operand.hbm [shape: bf16[12,128], index: 2, kind: input, shape index: {}]   ;;  %s2711_s3 = inlined_call_operand.hbm [shape: f32[12,1], index: 3, kind: input, shape index: {}]   ;;  %s2712_s4 = inlined_call_operand.vmem [shape: f32[2,12,576], index: 4, kind: output, shape index: {}]  }
   0x1   :  { %10 = vsyncpa [#allocation6], 0  ;;  %s2117_s15 = smov 0  }
   0x2 LB: > { %s2064_s16 = smov [#allocation5]   ;;  %s2123_s18 = sadd.s32 4294967295, %s2062_s15   ;;  %s2062_s15 = sphi %s2117_s15, %s16_s15  }
   0x3   : > { %s161_s17 = sshll.u32 %s2064_s16, 4  ;;  %p1670_p0 = scmp.ge.s32.totalorder %s2062_s15, 1  ;;  %s2128_s17 = int_to_ptr.vmem [resolvable:$true] %s161_s17 }
   0x4   : > { %p136_p1 = scmp.lt.s32.totalorder %s2062_s15, 3  ;;  %p2713_p2 = scmp.eq.s32.totalorder %s2123_s18, 0 }
   0x5   : > { %s2065_s20 = smov [#allocation3]   ;;  %s2066_s23 = smov [#allocation7]  }
   0x6   : > { %p2130_p3 = pnand %p1670_p0, %p136_p1  ;;  %s148_s21 = sshll.u32 %s2065_s20, 4  ;;  %s2136_s21 = int_to_ptr.vmem [resolvable:$true] %s148_s21 }
   0x7   : > { %s2144_s24 = sshll.u32 %s2066_s23, 4  ;;  %s1964_s27 = scalar_lea.hbm %s2710_s2, 128  ;;  %s175_s24 = int_to_ptr.vmem [resolvable:$true] %s2144_s24 }
   0x8   : > { %s2715_s19 = scalar_select %p2130_p3, 1, 0 }
   0x9   : > { %p1844_p4 = pneg %p2130_p3  ;;  %p1965_p6 = scmp.ne.s32.totalorder %s2710_s2, %s1964_s27 }
   0xa   : > { %p1971_p10 = scmp.lt.u32.totalorder %s1964_s27, %s2710_s2 }
   0xb   : > { %p2140_p5 = pnand %p2713_p2, %p1844_p4 }
   0xd   : > { %p2154_p7 = pneg %p2140_p5 }
   0xf   : > { %p1967_p8 = pnand %p2154_p7, %p1965_p6 }
  0x11   : > { %p1968_p9 = pneg %p1967_p8 }
  0x13   : > { %p1973_p11 = pnand %p1971_p10, %p1968_p9 }
  0x15   : > { %1976 = shalt.err (!%p1973_p11)
}
  0x16   : > { %s1977_s7 = scalar_lea.vmem %s2128_s17, 128  ;;  %p1985_p1 = scmp.lt.s32.totalorder %s2128_s17, %s2128_s17 }
  0x17   : > { %p1978_p12 = scmp.ne.s32.totalorder %s2128_s17, %s1977_s7  ;;  %p1986_p4 = scmp.lt.s32.totalorder %s1977_s7, %s1977_s7 }
  0x19   : > { %p1980_p13 = pnand %p1978_p12, %p2154_p7  ;;  %p1987_p6 = por %p1986_p4, %p1985_p1 }
  0x1b   : > { %p1981_p0 = pneg %p1980_p13 }
  0x1d   : > { %p1988_p8 = pnand %p1987_p6, %p1981_p0 }
  0x1f   : > { %1991 = shalt.err (!%p1988_p8)
}
  0x20   : > { %s2067_s8 = smov 64   ;;  %s2068_s9 = smov 4  }
  0x21   : > { %1850 = dma.hbm_to_vmem [thread:$0]  (!%p2140_p5), %s2710_s2, 128, %s2128_s17, [#allocation6], %s2067_s8, %s2067_s8, %s2068_s9  }
  0x22   : > { %s1992_s14 = scalar_lea.hbm %s2709_s1, 640 }
  0x23   : > { %p1993_p9 = scmp.ne.s32.totalorder %s2709_s1, %s1992_s14  ;;  %p1999_p12 = scmp.lt.u32.totalorder %s1992_s14, %s2709_s1 }
  0x25   : > { %p1995_p10 = pnand %p1993_p9, %p2154_p7 }
  0x27   : > { %p1996_p11 = pneg %p1995_p10 }
  0x29   : > { %p2001_p13 = pnand %p1999_p12, %p1996_p11 }
  0x2b   : > { %2004 = shalt.err (!%p2001_p13)
}
  0x2c   : > { %s2005_s17 = scalar_lea.vmem %s2136_s21, 640  ;;  %p2013_p6 = scmp.lt.s32.totalorder %s2136_s21, %s2136_s21 }
  0x2d   : > { %p2006_p0 = scmp.ne.s32.totalorder %s2136_s21, %s2005_s17  ;;  %p2014_p8 = scmp.lt.s32.totalorder %s2005_s17, %s2005_s17 }
  0x2f   : > { %p2008_p1 = pnand %p2006_p0, %p2154_p7  ;;  %p2015_p9 = por %p2014_p8, %p2013_p6 }
  0x31   : > { %p2009_p4 = pneg %p2008_p1 }
  0x33   : > { %p2016_p10 = pnand %p2015_p9, %p2009_p4 }
  0x35   : > { %2019 = shalt.err (!%p2016_p10)
}
  0x36   : > { %s2069_s26 = smov 320   ;;  %s2070_s27 = smov 20  }
  0x37   : > { %1847 = dma.hbm_to_vmem [thread:$0]  (!%p2140_p5), %s2709_s1, 640, %s2136_s21, [#allocation4], %s2069_s26, %s2069_s26, %s2070_s27  }
  0x38   : > { %s2020_s7 = scalar_lea.hbm %s2711_s3, 256 }
  0x39   : > { %p2021_p11 = scmp.ne.s32.totalorder %s2711_s3, %s2020_s7  ;;  %p2027_p0 = scmp.lt.u32.totalorder %s2020_s7, %s2711_s3 }
  0x3b   : > { %p2023_p12 = pnand %p2021_p11, %p2154_p7 }
  0x3d   : > { %p2024_p13 = pneg %p2023_p12 }
  0x3f   : > { %p2029_p1 = pnand %p2027_p0, %p2024_p13 }
  0x41   : > { %2032 = shalt.err (!%p2029_p1)
}
  0x42   : > { %s2033_s12 = scalar_lea.vmem %s175_s24, 256  ;;  %p2041_p9 = scmp.lt.s32.totalorder %s175_s24, %s175_s24 }
  0x43   : > { %p2034_p4 = scmp.ne.s32.totalorder %s175_s24, %s2033_s12  ;;  %p2042_p10 = scmp.lt.s32.totalorder %s2033_s12, %s2033_s12 }
  0x45   : > { %p2036_p6 = pnand %p2034_p4, %p2154_p7  ;;  %p2043_p2 = por %p2042_p10, %p2041_p9 }
  0x47   : > { %p2037_p8 = pneg %p2036_p6 }
  0x49   : > { %p2044_p3 = pnand %p2043_p2, %p2037_p8 }
  0x4b   : > { %2047 = shalt.err (!%p2044_p3)
}
  0x4c   : > { %s2071_s21 = smov 128   ;;  %s2072_s13 = smov 8  }
  0x4d   : > { %1853 = dma.hbm_to_vmem [thread:$0]  (!%p2140_p5), %s2711_s3, 256, %s175_s24, [#allocation6], %s2071_s21, %s2071_s21, %s2072_s13  }
  0x4e   : > { %p2718_p11 = scmp.ne.s32.totalorder %s2715_s19, 0 }
  0x4f   : > { %p2719_p12 = scmp.eq.s32.totalorder (!%p2718_p11), %s2123_s18, 0 }
  0x50   : > { %198 = sbr.rel (%p2718_p11) target bundleno = 687 (0x2af), region = 36 }
  0x57   : > { %2053 = dma.done.wait (%p2719_p12), [#allocation4], 640   ;;  %p2720_p7 = pmov %p2719_p12 }
  0x59   : > { %2055 = vsyncadd (%p2720_p7), [#allocation4], 4294966656  ;;  %p2721_p2 = pmov %p2720_p7 }
  0x5b   : > { %2057 = dma.done.wait (%p2721_p2), [#allocation6], 384   ;;  %p2722_p3 = pmov %p2721_p2 }
  0x5c   : > { %v265_v0 = vlaneseq  ;;  %v727_v6 = vld [vmem:[#allocation3] sm:$0x44]  ;;  %v474_v7 = vld [vmem:[#allocation3] sm:$0x22]  ;;  %v475_v8 = vld [vmem:[#allocation3 + $0x8] sm:$0x22] }
  0x5d   : > { %2059 = vsyncadd (%p2722_p3), [#allocation6], 4294966912  ;;  %v1733_v9 = vcombine.low %v727_v6, %v727_v6  ;;  %v1734_v10 = vcombine.high %v727_v6, %v727_v6  ;;  %v1707_v11 = vcombine.low %v474_v7, %v474_v7  ;;  %v1708_v12 = vcombine.high %v474_v7, %v474_v7  ;;  %v343_v13 = vld [vmem:[#allocation3] sm:$0x11]  ;;  %v728_v26 = vld [vmem:[#allocation3 + $0x8] sm:$0x44] }
  0x5e   : > { %v266_v1 = vshrl.u32 %v265_v0, 7  ;;  %v1709_v14 = vcombine.low %v475_v8, %v475_v8  ;;  %v1710_v15 = vcombine.high %v475_v8, %v475_v8  ;;  %v1694_v16 = vcombine.low %v343_v13, %v343_v13  ;;  %v344_v31 = vld [vmem:[#allocation3 + $0x8] sm:$0x11]  ;;  %v599_v36 = vld [vmem:[#allocation3 + $0x8] sm:$0x22]  ;;  %s2073_s19 = smov 25  }
  0x5f   : > { %v1695_v17 = vcombine.high %v343_v13, %v343_v13  ;;  %v744_v18 = vpack.i.b16 %v1733_v9, %v1733_v9  ;;  %v751_v19 = vpack.i.b16 %v1734_v10, %v1734_v10  ;;  %v491_v20 = vpack.i.b16 %v1707_v11, %v1707_v11  ;;  %v2241_v41 = vld [vmem:[#allocation3 + $0x10] ss:$0 sps:$4 sm:$0x11]   ;;  %v598_v46 = vld [vmem:[#allocation3] sm:$0x22]  ;;  %s2074_s22 = smov 2  }
  0x60   : > { %v2227_v2 = vsub.s32 0, %v266_v1  ;;  %v2229_v3 = vsub.s32 2, %v266_v1  ;;  %v2231_v4 = vsub.s32 1, %v266_v1  ;;  %v2233_v5 = vsub.s32 3, %v266_v1  ;;  %v852_v55 = vld [vmem:[#allocation3 + $0x8] sm:$0x44] }
  0x61   : > { %v498_v21 = vpack.i.b16 %v1708_v12, %v1708_v12  ;;  %v505_v22 = vpack.i.b16 %v1709_v14, %v1709_v14  ;;  %v512_v23 = vpack.i.b16 %v1710_v15, %v1710_v15  ;;  %v360_v24 = vshrl.u32 %v1694_v16, 16  ;;  %s2075_s24 = smov 1   ;;  %v851_v8 = vld [vmem:[#allocation3] sm:$0x44]  ;;  %s2076_s30 = smov 24  }
  0x62   : > { %v368_v25 = vshrl.u32 %v1695_v17, 16  ;;  %v749_v27 = vrot.slane %v744_v18, %v2229_v3  ;;  %v756_v28 = vrot.slane %v751_v19, %v2229_v3  ;;  %v496_v29 = vrot.slane %v491_v20, %v2231_v4  ;;  %s2077_s20 = smov 26   ;;  %s2078_s23 = smov 48  }
  0x63   : > { %v503_v30 = vrot.slane %v498_v21, %v2231_v4  ;;  %v510_v32 = vrot.slane %v505_v22, %v2231_v4  ;;  %v517_v33 = vrot.slane %v512_v23, %v2231_v4  ;;  %v361_v34 = vpack.i.b16 %v360_v24, %v360_v24  ;;  %v981_v21 = vld [vmem:[#allocation3 + $0x8] sm:$0x88]  ;;  %s2079_s25 = smov 49   ;;  %s2080_s17 = smov 50  }
  0x64   : > { %v369_v35 = vpack.i.b16 %v368_v25, %v368_v25  ;;  %v1738_v37 = vcombine.low %v749_v27, %v756_v28  ;;  %v1735_v39 = vcombine.low %v728_v26, %v728_v26  ;;  %v1736_v40 = vcombine.high %v728_v26, %v728_v26  ;;  %v980_v26 = vld [vmem:[#allocation3] sm:$0x88]  ;;  %p232_p5 = scmp.lt.s32.totalorder %s2123_s18, 1  ;;  %s2081_s5 = smov 126  }
  0x65   : > { %v1712_v38 = vcombine.low %v496_v29, %v503_v30  ;;  %v1713_v42 = vcombine.low %v510_v32, %v517_v33  ;;  %v366_v43 = vrot.slane %v361_v34, %v2227_v2  ;;  %v1696_v45 = vcombine.low %v344_v31, %v344_v31  ;;  %s2082_s6 = smov 103   ;;  %s2083_s7 = smov 80  }
  0x66   : > { %v374_v44 = vrot.slane %v369_v35, %v2227_v2  ;;  %791 = vrot.lane.b32.xlu0 %v1738_v37, %s2073_s19  ;;  %v758_v47 = vpack.i.b16 %v1735_v39, %v1735_v39  ;;  %v765_v48 = vpack.i.b16 %v1736_v40, %v1736_v40  ;;  %v1697_v49 = vcombine.high %v344_v31, %v344_v31  ;;  %v1105_v35 = vld [vmem:[#allocation3 + $0x8] sm:$0x88]  ;;  %s2724_s18 = smov (!%p232_p5, %s2123_s18), 1  ;;  %s2084_s8 = smov 104  }
  0x67   : > { %538 = vrot.lane.b32.xlu1 %v1712_v38, %s2074_s22  ;;  %v392_v50 = vshrl.u32 %v2241_v41, 16  ;;  %v376_v52 = vshrl.u32 %v1696_v45, 16  ;;  %v1722_v53 = vcombine.low %v599_v36, %v599_v36  ;;  %v1723_v54 = vcombine.high %v599_v36, %v599_v36  ;;  %s1830_s26 = smul.u32 20, %s2724_s18  ;;  %s2085_s9 = smov 127  }
  0x68   : > { %v1699_v51 = vcombine.low %v366_v43, %v374_v44  ;;  %v763_v56 = vrot.slane %v758_v47, %v2229_v3  ;;  %v770_v57 = vrot.slane %v765_v48, %v2229_v3  ;;  %v384_v58 = vshrl.u32 %v1697_v49, 16  ;;  %v1104_v49 = vld [vmem:[#allocation3] sm:$0x88]  ;;  %s2086_s10 = smov 102   ;;  %s2087_s11 = smov 79  }
  0x69   : > { %v1720_v59 = vcombine.low %v598_v46, %v598_v46  ;;  %v377_v60 = vpack.i.b16 %v376_v52, %v376_v52  ;;  %v631_v61 = vshrl.u32 %v1722_v53, 16  ;;  %v639_v62 = vshrl.u32 %v1723_v54, 16  ;;  %s2310_s29 = scalar_lea.vmem %s2708_s0, %s1830_s26  ;;  %s2089_s12 = smov 78  }
  0x6a   : > { %v1721_v63 = vcombine.high %v598_v46, %v598_v46  ;;  %412 = vrot.lane.b32.xlu0 %v1699_v51, %s2075_s24  ;;  %v1739_v0 = vcombine.low %v763_v56, %v770_v57  ;;  %v385_v1 = vpack.i.b16 %v384_v58, %v384_v58  ;;  %v1748_v7 = vcombine.low %v852_v55, %v852_v55  ;;  %s1831_s21 = smul.u32 80, %s2724_s18 }
  0x6b   : > { %540 = vrot.lane.b32.xlu1 %v1713_v42, %s2074_s22  ;;  %v615_v6 = vshrl.u32 %v1720_v59, 16  ;;  %v382_v9 = vrot.slane %v377_v60, %v2227_v2  ;;  %v632_v10 = vpack.i.b16 %v631_v61, %v631_v61  ;;  %v640_v11 = vpack.i.b16 %v639_v62, %v639_v62 }
  0x6c   : > { %v623_v12 = vshrl.u32 %v1721_v63, 16  ;;  %v390_v13 = vrot.slane %v385_v1, %v2227_v2  ;;  %v1749_v15 = vcombine.high %v852_v55, %v852_v55  ;;  %v884_v16 = vshrl.u32 %v1748_v7, 16  ;;  %v1234_v55 = vld [vmem:[#allocation3 + $0x1c] sm:$0x11]  ;;  %s2691_s16 = scalar_lea.vmem %s2712_s4, %s1831_s21 }
  0x6d   : > { %v616_v14 = vpack.i.b16 %v615_v6, %v615_v6  ;;  %v637_v17 = vrot.slane %v632_v10, %v2231_v4  ;;  %v645_v18 = vrot.slane %v640_v11, %v2231_v4  ;;  %v1746_v20 = vcombine.low %v851_v8, %v851_v8 }
  0x6e   : > { %v624_v19 = vpack.i.b16 %v623_v12, %v623_v12  ;;  %v1700_v22 = vcombine.low %v382_v9, %v390_v13  ;;  %v885_v24 = vpack.i.b16 %v884_v16, %v884_v16  ;;  %v892_v25 = vshrl.u32 %v1749_v15, 16  ;;  %v1930_v9 = vld [vmem:[#allocation3 + $0x10] ss:$0 sps:$4 sm:$0x22]  }
  0x6f   : > { %793 = vrot.lane.b32.xlu1 %v1739_v0, %s2073_s19  ;;  %v621_v23 = vrot.slane %v616_v14, %v2231_v4  ;;  %v1726_v27 = vcombine.low %v637_v17, %v645_v18  ;;  %v1747_v29 = vcombine.high %v851_v8, %v851_v8  ;;  %v868_v30 = vshrl.u32 %v1746_v20, 16  ;;  %v1233_v0 = vld [vmem:[#allocation3 + $0x14] sm:$0x11] }
  0x70   : > { %v629_v28 = vrot.slane %v624_v19, %v2231_v4  ;;  %414 = vrot.lane.b32.xlu0 %v1700_v22, %s2075_s24  ;;  %v890_v31 = vrot.slane %v885_v24, %v2229_v3  ;;  %v893_v32 = vpack.i.b16 %v892_v25, %v892_v25  ;;  %v1761_v33 = vcombine.low %v981_v21, %v981_v21 }
  0x71   : > { %v1762_v34 = vcombine.high %v981_v21, %v981_v21  ;;  %v869_v37 = vpack.i.b16 %v868_v30, %v868_v30  ;;  %v876_v38 = vshrl.u32 %v1747_v29, 16  ;;  %v1759_v39 = vcombine.low %v980_v26, %v980_v26 }
  0x72   : > { %v1725_v36 = vcombine.low %v621_v23, %v629_v28  ;;  %v898_v40 = vrot.slane %v893_v32, %v2229_v3  ;;  %v1011_v42 = vpack.i.b16 %v1761_v33, %v1761_v33  ;;  %v1760_v44 = vcombine.high %v980_v26, %v980_v26  ;;  %v1932_v26 = vld [vmem:[#allocation3 + $0x10] ss:$0 sps:$4 sm:$0x44]  }
  0x73   : > { %669 = vrot.lane.b32.xlu1 %v1726_v27, %s2076_s30  ;;  %v1018_v43 = vpack.i.b16 %v1762_v34, %v1762_v34  ;;  %v874_v45 = vrot.slane %v869_v37, %v2229_v3  ;;  %v877_v46 = vpack.i.b16 %v876_v38, %v876_v38  ;;  %v997_v47 = vpack.i.b16 %v1759_v39, %v1759_v39  ;;  %v1933_v27 = vld [vmem:[#allocation3 + $0x10] ss:$0 sps:$4 sm:$0x22]  }
  0x74   : > { %v1774_v48 = vcombine.low %v1105_v35, %v1105_v35  ;;  %667 = vrot.lane.b32.xlu0 %v1725_v36, %s2076_s30  ;;  %v1752_v51 = vcombine.low %v890_v31, %v898_v40  ;;  %v1016_v52 = vrot.slane %v1011_v42, %v2233_v5  ;;  %v1004_v54 = vpack.i.b16 %v1760_v44, %v1760_v44 }
  0x75   : > { %v1023_v53 = vrot.slane %v1018_v43, %v2233_v5  ;;  %v882_v56 = vrot.slane %v877_v46, %v2229_v3  ;;  %v1002_v57 = vrot.slane %v997_v47, %v2233_v5  ;;  %v1775_v58 = vcombine.high %v1105_v35, %v1105_v35  ;;  %v1935_v35 = vld [vmem:[#allocation3 + $0x10] ss:$0 sps:$4 sm:$0x44]  }
  0x76   : > { %v1137_v59 = vshrl.u32 %v1774_v48, 16  ;;  %v1009_v61 = vrot.slane %v1004_v54, %v2233_v5  ;;  %v1772_v62 = vcombine.low %v1104_v49, %v1104_v49  ;;  %v1773_v63 = vcombine.high %v1104_v49, %v1104_v49  ;;  %v1934_v43 = vld [vmem:[#allocation3 + $0x10] ss:$0 sps:$4 sm:$0x88]  }
  0x77   : > { %922 = vrot.lane.b32.xlu1 %v1752_v51, %s2077_s20  ;;  %v1765_v60 = vcombine.low %v1016_v52, %v1023_v53  ;;  %v1751_v1 = vcombine.low %v874_v45, %v882_v56  ;;  %v1145_v7 = vshrl.u32 %v1775_v58, 16  ;;  %v1787_v8 = vcombine.low %v1234_v55, %v1234_v55  ;;  %v1936_v46 = vld [vmem:[#allocation3 + $0x10] ss:$0 sps:$4 sm:$0x88]  }
  0x78   : > { %v1138_v6 = vpack.i.b16 %v1137_v59, %v1137_v59  ;;  %v1764_v10 = vcombine.low %v1002_v57, %v1009_v61  ;;  %v1121_v11 = vshrl.u32 %v1772_v62, 16  ;;  %v1129_v12 = vshrl.u32 %v1773_v63, 16  ;;  %v1937_v51 = vld [vmem:[#allocation3 + $0x24] ss:$0 sps:$4 sm:$0x11]  }
  0x79   : > { %v1788_v13 = vcombine.high %v1234_v55, %v1234_v55  ;;  %920 = vrot.lane.b32.xlu0 %v1751_v1, %s2077_s20  ;;  %v1146_v15 = vpack.i.b16 %v1145_v7, %v1145_v7  ;;  %v1264_v16 = vpack.i.b16 %v1787_v8, %v1787_v8  ;;  %v1785_v17 = vcombine.low %v1233_v0, %v1233_v0  ;;  %v2313_v7 = vld [vmem:[%s2310_s29] sm:$0xff] }
  0x7a   : > { %v1143_v14 = vrot.slane %v1138_v6, %v2233_v5  ;;  %v1122_v18 = vpack.i.b16 %v1121_v11, %v1121_v11  ;;  %v1130_v19 = vpack.i.b16 %v1129_v12, %v1129_v12  ;;  %v1786_v21 = vcombine.high %v1233_v0, %v1233_v0 }
  0x7b   : > { %1046 = vrot.lane.b32.xlu1 %v1765_v60, %s2078_s23  ;;  %v1271_v20 = vpack.i.b16 %v1788_v13, %v1788_v13  ;;  %v1151_v22 = vrot.slane %v1146_v15, %v2233_v5  ;;  %v1269_v23 = vrot.slane %v1264_v16, %v2227_v2  ;;  %v1250_v24 = vpack.i.b16 %v1785_v17, %v1785_v17  ;;  %v2323_v15 = vld [vmem:[%s2310_s29 + $0x8] sm:$0xff] }
  0x7c   : > { %v519_v25 = vpack.i.b16 %v1930_v9, %v1930_v9  ;;  %v1127_v28 = vrot.slane %v1122_v18, %v2233_v5  ;;  %v1135_v29 = vrot.slane %v1130_v19, %v2233_v5  ;;  %v1257_v31 = vpack.i.b16 %v1786_v21, %v1786_v21 }
  0x7d   : > { %v1276_v30 = vrot.slane %v1271_v20, %v2227_v2  ;;  %1044 = vrot.lane.b32.xlu0 %v1764_v10, %s2078_s23  ;;  %v1778_v32 = vcombine.low %v1143_v14, %v1151_v22  ;;  %v1255_v33 = vrot.slane %v1250_v24, %v2227_v2  ;;  %v393_v34 = vpack.i.b16 %v392_v50, %v392_v50 }
  0x7e   : > { %v1777_v36 = vcombine.low %v1127_v28, %v1135_v29  ;;  %v1262_v37 = vrot.slane %v1257_v31, %v2227_v2  ;;  %v524_v39 = vrot.slane %v519_v25, %v2231_v4  ;;  %v772_v40 = vpack.i.b16 %v1932_v26, %v1932_v26 }
  0x7f   : > { %1175 = vrot.lane.b32.xlu1 %v1778_v32, %s2079_s25  ;;  %v1791_v38 = vcombine.low %v1269_v23, %v1276_v30  ;;  %v647_v42 = vshrl.u32 %v1933_v27, 16  ;;  %v398_v41 = vrot.slane %v393_v34, %v2227_v2  ;;  %v900_v50 = vshrl.u32 %v1935_v35, 16  ;;  %v246_v35 = vld [vmem:[#allocation3] sm:$0x11] }
  0x80   : > { %v1790_v44 = vcombine.low %v1255_v33, %v1262_v37  ;;  %v1714_v47 = vcombine.low %v524_v39, %v524_v39  ;;  %v777_v48 = vrot.slane %v772_v40, %v2229_v3  ;;  %v1025_v49 = vpack.i.b16 %v1934_v43, %v1934_v43 }
  0x81   : > { %1173 = vrot.lane.b32.xlu0 %v1777_v36, %s2079_s25  ;;  %v648_v45 = vpack.i.b16 %v647_v42, %v647_v42  ;;  %v1701_v52 = vcombine.low %v398_v41, %v398_v41  ;;  %v901_v54 = vpack.i.b16 %v900_v50, %v900_v50  ;;  %v1153_v55 = vshrl.u32 %v1936_v46, 16 }
  0x82   : > { %v1740_v56 = vcombine.low %v777_v48, %v777_v48  ;;  %v1030_v57 = vrot.slane %v1025_v49, %v2233_v5  ;;  %v1278_v58 = vpack.i.b16 %v1937_v51, %v1937_v51  ;;  %vm546_vm0 = vcmask 15360  }
  0x83   : > { %1299 = vrot.lane.b32.xlu1 %v1791_v38, %s2080_s17  ;;  %v653_v53 = vrot.slane %v648_v45, %v2231_v4  ;;  %v906_v60 = vrot.slane %v901_v54, %v2229_v3  ;;  %v1154_v61 = vpack.i.b16 %v1153_v55, %v1153_v55  ;;  %vm799_vm1 = vcmask 203776  }
  0x84   : > { %v1766_v62 = vcombine.low %v1030_v57, %v1030_v57  ;;  %v1283_v4 = vrot.slane %v1278_v58, %v2227_v2  ;;  %vm422_vm2 = vcmask 1043456   ;;  %v1681_v38 = vcombine.low %v246_v35, %v246_v35 }
  0x85   : > { %1297 = vrot.lane.b32.xlu0 %v1790_v44, %s2080_s17  ;;  %v1727_v59 = vcombine.low %v653_v53, %v653_v53  ;;  %v1753_v63 = vcombine.low %v906_v60, %v906_v60  ;;  %v1159_v0 = vrot.slane %v1154_v61, %v2233_v5  ;;  %v1682_v39 = vcombine.high %v246_v35, %v246_v35 }
  0x86   : > { %v1792_v1 = vcombine.low %v1283_v4, %v1283_v4  ;;  %v263_v43 = vpack.i.b16 %v1681_v38, %v1681_v38  ;;  %vm420_vm3 = vcmask 7168   ;;  %vm675_vm4 = vcmask 195584  }
  0x87   : > { %542 = vrot.lane.b32.xlu1 %v1714_v47, %s2074_s22  ;;  %v1779_v6 = vcombine.low %v1159_v0, %v1159_v0  ;;  %v270_v45 = vpack.i.b16 %v1682_v39, %v1682_v39  ;;  %vm1052_vm5 = vcmask 392192   ;;  %vm928_vm6 = vcmask 211968  }
  0x88   : > { %v268_v46 = vrot.slane %v263_v43, %v2227_v2  ;;  %vm1181_vm7 = vcmask 400384   ;;  %vm1305_vm8 = vcmask 408576   ;;  %vm469_vm9 = vcmask 523268  }
  0x89   : > { %416 = vrot.lane.b32.xlu0 %v1701_v52, %s2075_s24  ;;  %v275_v48 = vrot.slane %v270_v45, %v2227_v2  ;;  %vm338_vm10 = vcmask 519168   ;;  %vm1363_vm11 = vcmask 523264   ;;  %vm580_vm12 = vcmask 1031168  }
  0x8a   : > { %vm833_vm13 = vcmask 842752   ;;  %vm1086_vm14 = vcmask 654336   ;;  %vm455_vm15 = vcmask 1039360  }
  0x8b   : > { %795 = vrot.lane.b32.xlu1 %v1740_v56, %s2073_s19  ;;  %v1686_v58 = vcombine.low %v268_v46, %v275_v48 }
  0x8d   : > { %671 = vrot.lane.b32.xlu0 %v1727_v59, %s2076_s30 }
  0x8f   : > { %1048 = vrot.lane.b32.xlu1 %v1766_v62, %s2078_s23  ;;  %v313_v62 = vmul.bf16 %v1686_v58, %v2313_v7 }
  0x91   : > { %924 = vrot.lane.b32.xlu0 %v1753_v63, %s2077_s20 }
  0x93   : > { %1301 = vrot.lane.b32.xlu1 %v1792_v1, %s2080_s17 }
  0x95   : > { %1177 = vrot.lane.b32.xlu0 %v1779_v6, %s2079_s25 }
  0xd8   : > { %v792_v3 = vpop.permute.xlu0 %791 }
  0xd9   : > { %v539_v5 = vpop.permute.xlu1 %538  ;;  %v797_v9 = vrot.slane %v792_v3, 4 }
  0xda   : > { %v544_v8 = vrot.slane %v539_v5, 4 }
  0xdb   : > { %v800_v17 = vsel %vm799_vm1, %v797_v9, %v792_v3 }
  0xdc   : > { %v547_v10 = vsel %vm546_vm0, %v544_v8, %v539_v5  ;;  %v2319_v13 = vpop.permute.xlu0 %412  ;;  %v807_v23 = vmul.bf16 %v800_v17, %v2313_v7  ;;  %v1690_v5 = vcombine.high %v313_v62, %v313_v62 }
  0xdd   : > { %v554_v11 = vmul.bf16 %v2313_v7, %v547_v10  ;;  %v2317_v12 = vpop.permute.xlu1 %540  ;;  %v418_v42 = vrot.slane %v2319_v13, 4 }
  0xde   : > { %v545_v14 = vrot.slane %v2317_v12, 4  ;;  %v1742_v32 = vcombine.high %v807_v23, %v807_v23  ;;  %v1741_v36 = vcombine.low %v807_v23, %v807_v23  ;;  %335 = vst [vmem:[#allocation2 + $0x8] sm:$0xf] %v1690_v5 }
  0xdf   : > { %v1716_v16 = vcombine.high %v554_v11, %v554_v11  ;;  %v1715_v25 = vcombine.low %v554_v11, %v554_v11  ;;  %v421_v49 = vsel %vm420_vm3, %v418_v42, %v2319_v13 }
  0xe0   : > { %v548_v18 = vsel %vm422_vm2, %v544_v8, %v545_v14  ;;  %v429_v4 = vmul.bf16 %v2313_v7, %v421_v49  ;;  %v1689_v8 = vcombine.low %v313_v62, %v313_v62 }
  0xe1   : > { %v549_v19 = vsel %vm546_vm0, %v548_v18, %v2317_v12  ;;  %v2331_v20 = vpop.permute.xlu1 %793  ;;  %572 = vrot.lane.b32.xlu1 %v1716_v16, %s2081_s5 }
  0xe2   : > { %v2335_v21 = vmul.bf16 %v549_v19, %v2323_v15  ;;  %v798_v22 = vrot.slane %v2331_v20, 4  ;;  %v2339_v24 = vpop.permute.xlu0 %414  ;;  %v1703_v13 = vcombine.high %v429_v4, %v429_v4  ;;  %334 = vst [vmem:[#allocation2] sm:$0xf] %v1689_v8  ;;  %v1702_v19 = vcombine.low %v429_v4, %v429_v4  ;;  %v342_v4 = vld [vmem:[%s2310_s29 + $0x10] sm:$0xf] }
  0xe3   : > { %v419_v55 = vrot.slane %v2339_v24, 4  ;;  %v473_v8 = vld [vmem:[%s2310_s29 + $0x10] sm:$0xf] }
  0xe4   : > { %v801_v26 = vsel %vm422_vm2, %v797_v9, %v798_v22  ;;  %v1717_v27 = vcombine.low %v2335_v21, %v2335_v21 }
  0xe5   : > { %v802_v28 = vsel %vm799_vm1, %v801_v26, %v2331_v20  ;;  %v2348_v29 = vpop.permute.xlu1 %669  ;;  %570 = vrot.lane.b32.xlu1 %v1715_v25, %s2081_s5  ;;  %v423_v1 = vsel %vm422_vm2, %v418_v42, %v419_v55  ;;  %v1940_v26 = vld [vmem:[#allocation3 + $0x10] ss:$0 sps:$4 sm:$0x11]  }
  0xe6   : > { %v2352_v30 = vmul.bf16 %v802_v28, %v2323_v15  ;;  %574 = vrot.lane.b32.xlu0 %v1717_v27, %s2081_s5  ;;  %v2355_v31 = vpop.permute.xlu0 %667  ;;  %v424_v11 = vsel %vm420_vm3, %v423_v1, %v2339_v24  ;;  %v674_v27 = vrot.slane %v2348_v29, 4 }
  0xe7   : > { %v673_v44 = vrot.slane %v2355_v31, 4  ;;  %v2422_v17 = vmul.bf16 %v2323_v15, %v424_v11 }
  0xe8   : > { %v1743_v33 = vcombine.low %v2352_v30, %v2352_v30 }
  0xe9   : > { %v2359_v34 = vpop.permute.xlu1 %922  ;;  %825 = vrot.lane.b32.xlu1 %v1742_v32, %s2082_s6  ;;  %v676_v51 = vsel %vm675_vm4, %v673_v44, %v2355_v31  ;;  %v1704_v32 = vcombine.low %v2422_v17, %v2422_v17  ;;  %v677_v42 = vsel %vm422_vm2, %v673_v44, %v674_v27 }
  0xea   : > { %827 = vrot.lane.b32.xlu0 %v1743_v33, %s2082_s6  ;;  %v683_v60 = vmul.bf16 %v2313_v7, %v676_v51  ;;  %v291_v33 = vpack.i.b16 %v1940_v26, %v1940_v26  ;;  %v927_v43 = vrot.slane %v2359_v34, 4  ;;  %v678_v48 = vsel %vm675_vm4, %v677_v42, %v2348_v29 }
  0xeb   : > { %v2363_v37 = vpop.permute.xlu0 %920 }
  0xec   : > { %v926_v52 = vrot.slane %v2363_v37, 4  ;;  %v1729_v10 = vcombine.high %v683_v60, %v683_v60  ;;  %v1728_v35 = vcombine.low %v683_v60, %v683_v60  ;;  %v296_v39 = vrot.slane %v291_v33, %v2227_v2 }
  0xed   : > { %v2365_v40 = vpop.permute.xlu1 %1046  ;;  %823 = vrot.lane.b32.xlu1 %v1741_v36, %s2082_s6 }
  0xee   : > { %v1051_v41 = vrot.slane %v2365_v40, 4  ;;  %v929_v63 = vsel %vm928_vm6, %v926_v52, %v2363_v37  ;;  %v930_v44 = vsel %vm422_vm2, %v926_v52, %v927_v43 }
  0xef   : > { %v1045_v50 = vpop.permute.xlu0 %1044  ;;  %v936_v9 = vmul.bf16 %v929_v63, %v2313_v7 }
  0xf0   : > { %v1050_v47 = vrot.slane %v1045_v50, 4 }
  0xf1   : > { %v1755_v18 = vcombine.high %v936_v9, %v936_v9  ;;  %v2433_v36 = vpop.permute.xlu1 %1175  ;;  %v1754_v46 = vcombine.low %v936_v9, %v936_v9 }
  0xf2   : > { %v1053_v53 = vsel %vm1052_vm5, %v1050_v47, %v1045_v50  ;;  %v1054_v54 = vsel %vm422_vm2, %v1050_v47, %v1051_v41  ;;  %v1688_v50 = vcombine.low %v296_v39, %v296_v39  ;;  %v245_v47 = vld [vmem:[%s2310_s29 + $0x10] sm:$0xf]  ;;  %v1180_v51 = vrot.slane %v2433_v36, 4 }
  0xf3   : > { %v1055_v56 = vsel %vm1052_vm5, %v1054_v54, %v2365_v40  ;;  %v2388_v57 = vmul.bf16 %v1053_v53, %v2313_v7  ;;  %v2407_v6 = vpop.permute.xlu0 %1173  ;;  %v2088_v54 = vmov 0  }
  0xf4   : > { %v2391_v59 = vmul.bf16 %v1055_v56, %v2323_v15  ;;  %v1179_v3 = vrot.slane %v2407_v6, 4  ;;  %v315_v31 = vmul.bf16 %v1688_v50, %v245_v47  ;;  %1358 = vst.msk [vmem:[#allocation2 + $0xc0] sm:$0xf0] %vm469_vm9, %v2088_v54  ;;  %1354 = vst [vmem:[#allocation2 + $0xa0] sm:$0xf0] %v2088_v54  ;;  %1467 = vmatprep.mubr.bf16.mxu0 %v2088_v54  ;;  %1510 = vmatprep.mubr.bf16.mxu1 %v2088_v54 }
  0xf5   : > { %v1768_v61 = vcombine.high %v2388_v57, %v2388_v57  ;;  %v2458_v53 = vpop.permute.xlu1 %1299  ;;  %1355 = vst [vmem:[#allocation2 + $0xa8] sm:$0xf0] %v2088_v54  ;;  %1356 = vst [vmem:[#allocation2 + $0xb0] sm:$0xf0] %v2088_v54  ;;  %v2471_v56 = vmul.bf16 %v678_v48, %v2323_v15  ;;  %1897 = vset.pattern.permute.xlu1 %v2088_v54  ;;  %1896 = vset.pattern.permute.xlu0 %v2088_v54 }
  0xf6   : > { %v1769_v0 = vcombine.low %v2391_v59, %v2391_v59  ;;  %v1182_v16 = vsel %vm1181_vm7, %v1179_v3, %v2407_v6  ;;  %1357 = vst [vmem:[#allocation2 + $0xb8] sm:$0xf0] %v2088_v54  ;;  %v1693_v37 = vcombine.low %v315_v31, %v315_v31  ;;  %v1304_v62 = vrot.slane %v2458_v53, 4  ;;  %1364 = vst.msk [vmem:[#allocation2 + $0xe8] sm:$0xff] %vm1363_vm11, %v2088_v54 }
  0xf7   : > { %1078 = vrot.lane.b32.xlu1 %v1768_v61, %s2083_s7  ;;  %v1189_v23 = vmul.bf16 %v1182_v16, %v2313_v7  ;;  %v2425_v25 = vpop.permute.xlu0 %1297  ;;  %v1183_v61 = vsel %vm422_vm2, %v1179_v3, %v1180_v51  ;;  %v1770_v40 = vcombine.high %v2391_v59, %v2391_v59  ;;  %1369 = vst.msk [vmem:[#allocation2 + $0x110] sm:$0xff] %vm1363_vm11, %v2088_v54  ;;  %1374 = vst.msk [vmem:[#allocation2 + $0x138] sm:$0xff] %vm1363_vm11, %v2088_v54 }
  0xf8   : > { %1080 = vrot.lane.b32.xlu0 %v1769_v0, %s2083_s7  ;;  %v1303_v28 = vrot.slane %v2425_v25, 4  ;;  %339 = vst.msk [vmem:[#allocation2 + $0x20] sm:$0xf] %vm338_vm10, %v1693_v37  ;;  %v1730_v0 = vcombine.low %v2471_v56, %v2471_v56  ;;  %v1184_v6 = vsel %vm1181_vm7, %v1183_v61, %v2433_v36  ;;  %v1705_v36 = vcombine.high %v2422_v17, %v2422_v17 }
  0xf9   : > { %v1781_v38 = vcombine.high %v1189_v23, %v1189_v23  ;;  %v1780_v52 = vcombine.low %v1189_v23, %v1189_v23  ;;  %v543_v5 = vpop.permute.xlu1 %542  ;;  %v2509_v11 = vmul.bf16 %v1184_v6, %v2323_v15  ;;  %v1232_v6 = vld [vmem:[%s2310_s29 + $0x10] sm:$0xf] }
  0xfa   : > { %v1306_v45 = vsel %vm1305_vm8, %v1303_v28, %v2425_v25  ;;  %v1307_v24 = vsel %vm422_vm2, %v1303_v28, %v1304_v62  ;;  %v550_v9 = vsel %vm546_vm0, %v545_v14, %v543_v5  ;;  %v597_v25 = vld [vmem:[%s2310_s29 + $0x10] sm:$0xf]  ;;  %vm709_vm0 = vcmask 850944  }
  0xfb   : > { %701 = vrot.lane.b32.xlu1 %v1729_v10, %s2084_s8  ;;  %v1313_v49 = vmul.bf16 %v1306_v45, %v2313_v7  ;;  %v1767_v7 = vcombine.low %v2388_v57, %v2388_v57  ;;  %v931_v57 = vsel %vm928_vm6, %v930_v44, %v2359_v34  ;;  %v417_v58 = vpop.permute.xlu0 %416  ;;  %v1782_v28 = vcombine.low %v2509_v11, %v2509_v11  ;;  %v726_v45 = vld [vmem:[%s2310_s29 + $0x10] sm:$0xf] }
  0xfc   : > { %447 = vrot.lane.b32.xlu0 %v1703_v13, %s2085_s9  ;;  %v425_v63 = vsel %vm420_vm3, %v419_v55, %v417_v58  ;;  %v2493_v1 = vmul.bf16 %v931_v57, %v2323_v15  ;;  %v1308_v13 = vsel %vm1305_vm8, %v1307_v24, %v2458_v53  ;;  %v1783_v17 = vcombine.high %v2509_v11, %v2509_v11 }
  0xfd   : > { %v1794_v60 = vcombine.high %v1313_v49, %v1313_v49  ;;  %v1793_v3 = vcombine.low %v1313_v49, %v1313_v49  ;;  %v431_v55 = vmul.bf16 %v425_v63, %v342_v4  ;;  %v796_v33 = vpop.permute.xlu1 %795  ;;  %v1103_v4 = vld [vmem:[%s2310_s29 + $0x10] sm:$0xf]  ;;  %vm1215_vm2 = vcmask 646144  }
  0xfe   : > { %v1756_v10 = vcombine.low %v2493_v1, %v2493_v1  ;;  %v803_v50 = vsel %vm799_vm1, %v798_v22, %v796_v33  ;;  %v1718_v22 = vcombine.high %v2335_v21, %v2335_v21  ;;  %v1744_v21 = vcombine.high %v2352_v30, %v2352_v30 }
  0xff   : > { %954 = vrot.lane.b32.xlu1 %v1755_v18, %s2086_s10  ;;  %v672_v16 = vpop.permute.xlu0 %671  ;;  %v247_v18 = vld [vmem:[#allocation3 + $0x8] sm:$0x11]  ;;  %v1706_v23 = vcombine.low %v431_v55, %v431_v55  ;;  %v809_v49 = vmul.bf16 %v803_v50, %v726_v45  ;;  %v1757_v53 = vcombine.high %v2493_v1, %v2493_v1  ;;  %v1417_v1 = vld [vmem:[#allocation7] sm:$0xff]  ;;  %vm962_vm1 = vcmask 834560  }
 0x100   : > { %445 = vrot.lane.b32.xlu0 %v1702_v19, %s2085_s9  ;;  %v556_v19 = vmul.bf16 %v550_v9, %v473_v8  ;;  %v1683_v12 = vcombine.low %v247_v18, %v247_v18  ;;  %v1684_v14 = vcombine.high %v247_v18, %v247_v18  ;;  %v679_v26 = vsel %vm675_vm4, %v674_v27, %v672_v16 }
 0x101   : > { %v685_v42 = vmul.bf16 %v679_v26, %v597_v25  ;;  %v1745_v57 = vcombine.low %v809_v49, %v809_v49  ;;  %vm1339_vm3 = vcmask 637952   ;;  %vm2091_vm4 = vmmov 0  }
 0x102   : > { %v1719_v39 = vcombine.low %v556_v19, %v556_v19 }
 0x103   : > { %449 = vrot.lane.b32.xlu1 %v1704_v32, %s2085_s9  ;;  %v2522_v32 = vmul.bf16 %v1308_v13, %v2323_v15  ;;  %v925_v47 = vpop.permute.xlu0 %924  ;;  %v1732_v31 = vcombine.low %v685_v42, %v685_v42 }
 0x104   : > { %699 = vrot.lane.b32.xlu0 %v1728_v35, %s2084_s8  ;;  %v277_v35 = vpack.i.b16 %v1683_v12, %v1683_v12  ;;  %v932_v20 = vsel %vm928_vm6, %v927_v43, %v925_v47 }
 0x106   : > { %v282_v29 = vrot.slane %v277_v35, %v2227_v2 }
 0x107   : > { %1207 = vrot.lane.b32.xlu1 %v1781_v38, %s2087_s11  ;;  %v284_v38 = vpack.i.b16 %v1684_v14, %v1684_v14  ;;  %v1178_v43 = vpop.permute.xlu0 %1177 }
 0x108   : > { %952 = vrot.lane.b32.xlu0 %v1754_v46, %s2086_s10  ;;  %v1795_v46 = vcombine.low %v2522_v32, %v2522_v32  ;;  %v1185_v63 = vsel %vm1181_vm7, %v1180_v51, %v1178_v43 }
 0x109   : > { %v289_v27 = vrot.slane %v284_v38, %v2227_v2  ;;  %v850_v2 = vld [vmem:[%s2310_s29 + $0x10] sm:$0xf] }
 0x10a   : > { %v938_v58 = vmul.bf16 %v932_v20, %v850_v2 }
 0x10b   : > { %1076 = vrot.lane.b32.xlu1 %v1767_v7, %s2083_s7  ;;  %v1687_v48 = vcombine.low %v282_v29, %v289_v27  ;;  %v1049_v7 = vpop.permute.xlu1 %1048 }
 0x10c   : > { %1205 = vrot.lane.b32.xlu0 %v1780_v52, %s2087_s11  ;;  %v1056_v34 = vsel %vm1052_vm5, %v1051_v41, %v1049_v7  ;;  %v1758_v61 = vcombine.low %v938_v58, %v938_v58  ;;  %v1191_v41 = vmul.bf16 %v1185_v63, %v1103_v4 }
 0x10d   : > { %v314_v44 = vmul.bf16 %v1687_v48, %v2323_v15  ;;  %v979_v15 = vld [vmem:[%s2310_s29 + $0x10] sm:$0xf] }
 0x10e   : > { %v1784_v59 = vcombine.low %v1191_v41, %v1191_v41 }
 0x10f   : > { %1331 = vrot.lane.b32.xlu1 %v1794_v60, %s2089_s12  ;;  %v1692_v37 = vcombine.high %v314_v44, %v314_v44  ;;  %v1691_v52 = vcombine.low %v314_v44, %v314_v44  ;;  %v1062_v60 = vmul.bf16 %v1056_v34, %v979_v15 }
 0x110   : > { %703 = vrot.lane.b32.xlu0 %v1730_v0, %s2084_s8  ;;  %v1302_v0 = vpop.permute.xlu1 %1301 }
 0x111   : > { %337 = vst [vmem:[#allocation2 + $0x18] sm:$0xf] %v1692_v37  ;;  %336 = vst [vmem:[#allocation2 + $0x10] sm:$0xf] %v1691_v52  ;;  %v1771_v30 = vcombine.low %v1062_v60, %v1062_v60  ;;  %v1309_v5 = vsel %vm1305_vm8, %v1304_v62, %v1302_v0  ;;  %v1418_v62 = vld [vmem:[#allocation7 + $0x8] sm:$0xf] }
 0x112   : > { %v1315_v51 = vmul.bf16 %v1309_v5, %v1232_v6 }
 0x113   : > { %1329 = vrot.lane.b32.xlu1 %v1793_v3, %s2089_s12  ;;  %v1731_v3 = vcombine.high %v2471_v56, %v2471_v56  ;;  %v1796_v56 = vcombine.high %v2522_v32, %v2522_v32 }
 0x114   : > { %956 = vrot.lane.b32.xlu0 %v1756_v10, %s2086_s10  ;;  %v1797_v24 = vcombine.low %v1315_v51, %v1315_v51 }
 0x117   : > { %453 = vrot.lane.b32.xlu1 %v1706_v23, %s2085_s9 }
 0x118   : > { %1209 = vrot.lane.b32.xlu0 %v1782_v28, %s2087_s11 }
 0x11b   : > { %578 = vrot.lane.b32.xlu1 %v1719_v39, %s2081_s5 }
 0x11c   : > { %1333 = vrot.lane.b32.xlu0 %v1795_v46, %s2089_s12 }
 0x11f   : > { %707 = vrot.lane.b32.xlu1 %v1732_v31, %s2084_s8 }
 0x120   : > { %576 = vrot.lane.b32.xlu0 %v1718_v22, %s2081_s5 }
 0x123   : > { %831 = vrot.lane.b32.xlu1 %v1745_v57, %s2082_s6 }
 0x124   : > { %829 = vrot.lane.b32.xlu0 %v1744_v21, %s2082_s6 }
 0x127   : > { %960 = vrot.lane.b32.xlu1 %v1758_v61, %s2086_s10 }
 0x128   : > { %1082 = vrot.lane.b32.xlu0 %v1770_v40, %s2083_s7 }
 0x12b   : > { %1084 = vrot.lane.b32.xlu1 %v1771_v30, %s2083_s7 }
 0x12c   : > { %451 = vrot.lane.b32.xlu0 %v1705_v36, %s2085_s9 }
 0x12f   : > { %1213 = vrot.lane.b32.xlu1 %v1784_v59, %s2087_s11 }
 0x130   : > { %705 = vrot.lane.b32.xlu0 %v1731_v3, %s2084_s8 }
 0x133   : > { %1337 = vrot.lane.b32.xlu1 %v1797_v24, %s2089_s12 }
 0x134   : > { %958 = vrot.lane.b32.xlu0 %v1757_v53, %s2086_s10 }
 0x137   : > { %1426 = vperm.xlu1 %1897, %v1418_v62  }
 0x138   : > { %1211 = vrot.lane.b32.xlu0 %v1783_v17, %s2087_s11 }
 0x13c   : > { %1335 = vrot.lane.b32.xlu0 %v1796_v56, %s2089_s12 }
 0x140   : > { %1421 = vperm.xlu0 %1896, %v1417_v1  }
 0x153   : > { %v573_v55 = vpop.permute.xlu1 %572 }
 0x157   : > { %v571_v8 = vpop.permute.xlu1 %570 }
 0x158   : > { %v581_v9 = vsel %vm580_vm12, %v571_v8, %v573_v55  ;;  %v2590_v10 = vpop.permute.xlu0 %574 }
 0x159   : > { %590 = vst [vmem:[#allocation2 + $0x28] sm:$0xf] %v581_v9  ;;  %v582_v11 = vsel %vm580_vm12, %v573_v55, %v2590_v10 }
 0x15a   : > { %591 = vst [vmem:[#allocation2 + $0x30] sm:$0xf] %v582_v11 }
 0x15b   : > { %v826_v13 = vpop.permute.xlu1 %825 }
 0x15c   : > { %v2594_v16 = vpop.permute.xlu0 %827 }
 0x15d   : > { %v835_v18 = vsel %vm833_vm13, %v826_v13, %v2594_v16 }
 0x15e   : > { %844 = vst [vmem:[#allocation2 + $0x58] sm:$0xf] %v835_v18 }
 0x15f   : > { %v824_v19 = vpop.permute.xlu1 %823 }
 0x160   : > { %v834_v23 = vsel %vm833_vm13, %v824_v19, %v826_v13 }
 0x161   : > { %843 = vst [vmem:[#allocation2 + $0x50] sm:$0xf] %v834_v23  ;;  %v2656_v23 = vld [vmem:[#allocation5] sm:$0x3f]  }
 0x169   : > { %v1079_v12 = vpop.permute.xlu1 %1078 }
 0x16a   : > { %v2599_v14 = vpop.permute.xlu0 %1080 }
 0x16b   : > { %v1088_v25 = vsel %vm1086_vm14, %v1079_v12, %v2599_v14 }
 0x16c   : > { %1097 = vst [vmem:[#allocation2 + $0x80] sm:$0xf] %v1088_v25  ;;  %v2090_v25 = vmov 0.0  }
 0x16d   : > { %v702_v26 = vpop.permute.xlu1 %701 }
 0x16e   : > { %v448_v28 = vpop.permute.xlu0 %447 }
 0x171   : > { %v955_v32 = vpop.permute.xlu1 %954 }
 0x172   : > { %v446_v33 = vpop.permute.xlu0 %445 }
 0x173   : > { %v456_v35 = vsel %vm455_vm15, %v446_v33, %v448_v28 }
 0x174   : > { %465 = vst [vmem:[#allocation2] sm:$0xf0] %v456_v35 }
 0x175   : > { %v2604_v38 = vpop.permute.xlu1 %449 }
 0x176   : > { %v457_v39 = vsel %vm455_vm15, %v448_v28, %v2604_v38  ;;  %v700_v42 = vpop.permute.xlu0 %699 }
 0x177   : > { %466 = vst [vmem:[#allocation2 + $0x8] sm:$0xf0] %v457_v39  ;;  %v710_v29 = vsel %vm709_vm0, %v700_v42, %v702_v26 }
 0x178   : > { %719 = vst [vmem:[#allocation2 + $0x28] sm:$0xf0] %v710_v29 }
 0x179   : > { %v1208_v27 = vpop.permute.xlu1 %1207 }
 0x17a   : > { %v953_v45 = vpop.permute.xlu0 %952 }
 0x17b   : > { %v963_v50 = vsel %vm962_vm1, %v953_v45, %v955_v32  ;;  %v1377_v44 = vld [vmem:[#allocation2] sm:$0xff] }
 0x17c   : > { %972 = vst [vmem:[#allocation2 + $0x50] sm:$0xf0] %v963_v50 }
 0x17d   : > { %v1077_v46 = vpop.permute.xlu1 %1076 }
 0x17e   : > { %v1087_v47 = vsel %vm1086_vm14, %v1077_v46, %v1079_v12  ;;  %v1206_v48 = vpop.permute.xlu0 %1205  ;;  %v1378_v49 = vld [vmem:[#allocation2 + $0x8] sm:$0xff] }
 0x17f   : > { %1096 = vst [vmem:[#allocation2 + $0x78] sm:$0xf] %v1087_v47  ;;  %v1216_v31 = vsel %vm1215_vm2, %v1206_v48, %v1208_v27  ;;  %1435 = vmatprep.subr.bf16.mxu0 %v1378_v49  ;;  %v1382_v43 = vld [vmem:[#allocation2 + $0x28] sm:$0xff] }
 0x180   : > { %1225 = vst [vmem:[#allocation2 + $0x78] sm:$0xf0] %v1216_v31  ;;  %1436 = vmatpush1.bf16.msra.mxu0 %v1377_v44 }
 0x181   : > { %v1332_v2 = vpop.permute.xlu1 %1331 }
 0x182   : > { %v2612_v20 = vpop.permute.xlu0 %703 }
 0x183   : > { %v711_v22 = vsel %vm709_vm0, %v702_v26, %v2612_v20  ;;  %v1387_v40 = vld [vmem:[#allocation2 + $0x50] sm:$0xff] }
 0x184   : > { %720 = vst [vmem:[#allocation2 + $0x30] sm:$0xf0] %v711_v22 }
 0x185   : > { %v1330_v7 = vpop.permute.xlu1 %1329 }
 0x186   : > { %v1340_v37 = vsel %vm1339_vm3, %v1330_v7, %v1332_v2  ;;  %v2617_v52 = vpop.permute.xlu0 %956 }
 0x187   : > { %1349 = vst [vmem:[#allocation2 + $0xa0] sm:$0xf] %v1340_v37  ;;  %v964_v57 = vsel %vm962_vm1, %v955_v32, %v2617_v52  ;;  %v1392_v36 = vld [vmem:[#allocation2 + $0x78] sm:$0xff] }
 0x188   : > { %973 = vst [vmem:[#allocation2 + $0x58] sm:$0xf0] %v964_v57  ;;  %v1411_v57 = vld [vmem:[#allocation2 + $0x110] sm:$0xff] }
 0x189   : > { %v454_v58 = vpop.permute.xlu1 %453 }
 0x18a   : > { %470 = vst.msk [vmem:[#allocation2 + $0x20] sm:$0xf0] %vm469_vm9, %v454_v58  ;;  %v2622_v15 = vpop.permute.xlu0 %1209 }
 0x18b   : > { %v1217_v34 = vsel %vm1215_vm2, %v1208_v27, %v2622_v15  ;;  %v1383_v21 = vld [vmem:[#allocation2 + $0x30] sm:$0xff] }
 0x18c   : > { %1226 = vst [vmem:[#allocation2 + $0x80] sm:$0xf0] %v1217_v34  ;;  %1437 = vmatprep.subr.bf16.mxu0 %v1383_v21 }
 0x18d   : > { %v579_v60 = vpop.permute.xlu1 %578  ;;  %1438 = vmatpush1.bf16.msra.mxu0 %v1382_v43 }
 0x18e   : > { %594 = vst.msk [vmem:[#allocation2 + $0x48] sm:$0xf] %vm338_vm10, %v579_v60  ;;  %v2627_v61 = vpop.permute.xlu0 %1333  ;;  %v1397_v17 = vld [vmem:[#allocation2 + $0xa0] sm:$0xff] }
 0x18f   : > { %v1341_v4 = vsel %vm1339_vm3, %v1332_v2, %v2627_v61  ;;  %v1388_v63 = vld [vmem:[#allocation2 + $0x58] sm:$0xff] }
 0x190   : > { %1350 = vst [vmem:[#allocation2 + $0xa8] sm:$0xf] %v1341_v4  ;;  %1439 = vmatprep.subr.bf16.mxu0 %v1388_v63 }
 0x191   : > { %v708_v0 = vpop.permute.xlu1 %707  ;;  %1440 = vmatpush1.bf16.msra.mxu0 %v1387_v40  ;;  %v1381_v35 = vld [vmem:[#allocation2 + $0x20] sm:$0xff] }
 0x192   : > { %723 = vst.msk [vmem:[#allocation2 + $0x48] sm:$0xf0] %vm469_vm9, %v708_v0  ;;  %v577_v30 = vpop.permute.xlu0 %576 }
 0x193   : > { %v583_v41 = vsel %vm580_vm12, %v2590_v10, %v577_v30  ;;  %v584_v6 = vsel %vm580_vm12, %v577_v30, %v579_v60  ;;  %v1393_v5 = vld [vmem:[#allocation2 + $0x80] sm:$0xff] }
 0x194   : > { %592 = vst [vmem:[#allocation2 + $0x38] sm:$0xf] %v583_v41  ;;  %593 = vst [vmem:[#allocation2 + $0x40] sm:$0xf] %v584_v6  ;;  %1441 = vmatprep.subr.bf16.mxu0 %v1393_v5 }
 0x195   : > { %v832_v59 = vpop.permute.xlu1 %831  ;;  %1442 = vmatpush1.bf16.msra.mxu0 %v1392_v36 }
 0x196   : > { %847 = vst.msk [vmem:[#allocation2 + $0x70] sm:$0xf] %vm338_vm10, %v832_v59  ;;  %v830_v51 = vpop.permute.xlu0 %829 }
 0x197   : > { %v836_v3 = vsel %vm833_vm13, %v2594_v16, %v830_v51  ;;  %v837_v24 = vsel %vm833_vm13, %v830_v51, %v832_v59  ;;  %v1398_v53 = vld [vmem:[#allocation2 + $0xa8] sm:$0xff] }
 0x198   : > { %845 = vst [vmem:[#allocation2 + $0x60] sm:$0xf] %v836_v3  ;;  %846 = vst [vmem:[#allocation2 + $0x68] sm:$0xf] %v837_v24  ;;  %1443 = vmatprep.subr.bf16.mxu0 %v1398_v53 }
 0x199   : > { %v961_v56 = vpop.permute.xlu1 %960  ;;  %1444 = vmatpush1.bf16.msra.mxu0 %v1397_v17  ;;  %v1386_v45 = vld [vmem:[#allocation2 + $0x48] sm:$0xff] }
 0x19a   : > { %976 = vst.msk [vmem:[#allocation2 + $0x70] sm:$0xf0] %vm469_vm9, %v961_v56  ;;  %v1083_v62 = vpop.permute.xlu0 %1082  ;;  %1445 = vmatprep.subr.bf16.mxu0 %v2088_v54 }
 0x19b   : > { %v1089_v1 = vsel %vm1086_vm14, %v2599_v14, %v1083_v62 }
 0x19c   : > { %1098 = vst [vmem:[#allocation2 + $0x88] sm:$0xf] %v1089_v1 }
 0x19d   : > { %v1085_v55 = vpop.permute.xlu1 %1084  ;;  %1446 = vmatpush1.bf16.msra.mxu0 %v2088_v54 }
 0x19e   : > { %v1090_v8 = vsel %vm1086_vm14, %v1083_v62, %v1085_v55  ;;  %1100 = vst.msk [vmem:[#allocation2 + $0x98] sm:$0xf] %vm338_vm10, %v1085_v55  ;;  %v452_v9 = vpop.permute.xlu0 %451  ;;  %1447 = vmatprep.subr.bf16.mxu0 %v2088_v54 }
 0x19f   : > { %1099 = vst [vmem:[#allocation2 + $0x90] sm:$0xf] %v1090_v8  ;;  %v458_v10 = vsel %vm455_vm15, %v2604_v38, %v452_v9  ;;  %v459_v11 = vsel %vm455_vm15, %v452_v9, %v454_v58  ;;  %v1416_v58 = vld [vmem:[#allocation2 + $0x138] sm:$0xff] }
 0x1a0   : > { %467 = vst [vmem:[#allocation2 + $0x10] sm:$0xf0] %v458_v10  ;;  %468 = vst [vmem:[#allocation2 + $0x18] sm:$0xf0] %v459_v11 }
 0x1a1   : > { %v1214_v13 = vpop.permute.xlu1 %1213  ;;  %1448 = vmatpush1.bf16.msra.mxu0 %v2088_v54  ;;  %v1391_v31 = vld [vmem:[#allocation2 + $0x70] sm:$0xff] }
 0x1a2   : > { %1229 = vst.msk [vmem:[#allocation2 + $0x98] sm:$0xf0] %vm469_vm9, %v1214_v13  ;;  %v706_v16 = vpop.permute.xlu0 %705  ;;  %1449 = vmatprep.subr.bf16.mxu0 %v2088_v54 }
 0x1a3   : > { %v712_v18 = vsel %vm709_vm0, %v2612_v20, %v706_v16  ;;  %v713_v19 = vsel %vm709_vm0, %v706_v16, %v708_v0 }
 0x1a4   : > { %721 = vst [vmem:[#allocation2 + $0x38] sm:$0xf0] %v712_v18  ;;  %722 = vst [vmem:[#allocation2 + $0x40] sm:$0xf0] %v713_v19 }
 0x1a5   : > { %v1338_v12 = vpop.permute.xlu1 %1337  ;;  %1450 = vmatpush1.bf16.msra.mxu0 %v2088_v54 }
 0x1a6   : > { %1353 = vst.msk [vmem:[#allocation2 + $0xc0] sm:$0xf] %vm338_vm10, %v1338_v12  ;;  %v959_v14 = vpop.permute.xlu0 %958  ;;  %1810 = vmatprep.subr.bf16.mxu0 %v2090_v25 }
 0x1a7   : > { %v965_v26 = vsel %vm962_vm1, %v2617_v52, %v959_v14  ;;  %v966_v28 = vsel %vm962_vm1, %v959_v14, %v961_v56  ;;  %v1380_v32 = vld [vmem:[#allocation2 + $0x18] sm:$0xff]  ;;  %v1379_v33 = vld [vmem:[#allocation2 + $0x10] sm:$0xff]  ;;  %v1406_v52 = vld [vmem:[#allocation2 + $0xe8] sm:$0xff] }
 0x1a8   : > { %974 = vst [vmem:[#allocation2 + $0x60] sm:$0xf0] %v965_v26  ;;  %975 = vst [vmem:[#allocation2 + $0x68] sm:$0xf0] %v966_v28  ;;  %1468 = vmatmul.mubr.bf16.vlgmr.msra.gmra.mrb[0].mxu0 %v2656_v23  ;;  %1478 = vmatprep.subr.bf16.mxu1 %v1380_v32 }
 0x1a9   : > { %1479 = vmatpush1.bf16.msra.mxu1 %v1379_v33  ;;  %1811 = vmatpush3.bf16.msra.mxu0 %v1381_v35  ;;  %v1396_v20 = vld [vmem:[#allocation2 + $0x98] sm:$0xff] }
 0x1aa   : > { %v1212_v38 = vpop.permute.xlu0 %1211  ;;  %1812 = vmatprep.subr.bf16.mxu0 %v2090_v25  ;;  %1826 = vmatprep.mubr.msk.bf16.mxu0 %vm2091_vm4, %v2090_v25 }
 0x1ab   : > { %v1218_v39 = vsel %vm1215_vm2, %v2622_v15, %v1212_v38  ;;  %v1219_v42 = vsel %vm1215_vm2, %v1212_v38, %v1214_v13  ;;  %v1385_v29 = vld [vmem:[#allocation2 + $0x40] sm:$0xff]  ;;  %v1384_v27 = vld [vmem:[#allocation2 + $0x38] sm:$0xff] }
 0x1ac   : > { %1227 = vst [vmem:[#allocation2 + $0x88] sm:$0xf0] %v1218_v39  ;;  %1228 = vst [vmem:[#allocation2 + $0x90] sm:$0xf0] %v1219_v42  ;;  %1480 = vmatprep.subr.bf16.mxu1 %v1385_v29 }
 0x1ad   : > { %1481 = vmatpush1.bf16.msra.mxu1 %v1384_v27  ;;  %1813 = vmatpush3.bf16.msra.mxu0 %v1386_v45  ;;  %v1401_v37 = vld [vmem:[#allocation2 + $0xc0] sm:$0xff] }
 0x1ae   : > { %v1336_v50 = vpop.permute.xlu0 %1335  ;;  %1814 = vmatprep.subr.bf16.mxu0 %v2090_v25 }
 0x1af   : > { %v1342_v46 = vsel %vm1339_vm3, %v2627_v61, %v1336_v50  ;;  %v1343_v47 = vsel %vm1339_vm3, %v1336_v50, %v1338_v12  ;;  %v1390_v48 = vld [vmem:[#allocation2 + $0x68] sm:$0xff]  ;;  %v1389_v49 = vld [vmem:[#allocation2 + $0x60] sm:$0xff] }
 0x1b0   : > { %1351 = vst [vmem:[#allocation2 + $0xb0] sm:$0xf] %v1342_v46  ;;  %1352 = vst [vmem:[#allocation2 + $0xb8] sm:$0xf] %v1343_v47  ;;  %1482 = vmatprep.subr.bf16.mxu1 %v1390_v48 }
 0x1b1   : > { %1483 = vmatpush1.bf16.msra.mxu1 %v1389_v49  ;;  %1815 = vmatpush3.bf16.msra.mxu0 %v1391_v31 }
 0x1b2   : > { %1816 = vmatprep.subr.bf16.mxu0 %v2090_v25 }
 0x1b3   : > { %v1395_v44 = vld [vmem:[#allocation2 + $0x90] sm:$0xff]  ;;  %v1394_v2 = vld [vmem:[#allocation2 + $0x88] sm:$0xff] }
 0x1b4   : > { %1484 = vmatprep.subr.bf16.mxu1 %v1395_v44 }
 0x1b5   : > { %1485 = vmatpush1.bf16.msra.mxu1 %v1394_v2  ;;  %1817 = vmatpush3.bf16.msra.mxu0 %v1396_v20 }
 0x1b6   : > { %1818 = vmatprep.subr.bf16.mxu0 %v2090_v25  ;;  %v1427_v21 = vpop.permute.xlu1 %1426 }
 0x1b7   : > { %v1400_v22 = vld [vmem:[#allocation2 + $0xb8] sm:$0xff]  ;;  %v1399_v7 = vld [vmem:[#allocation2 + $0xb0] sm:$0xff] }
 0x1b8   : > { %1486 = vmatprep.subr.bf16.mxu1 %v1400_v22 }
 0x1b9   : > { %1487 = vmatpush1.bf16.msra.mxu1 %v1399_v7  ;;  %1819 = vmatpush3.bf16.msra.mxu0 %v1401_v37 }
 0x1ba   : > { %1488 = vmatprep.subr.bf16.mxu1 %v2088_v54  ;;  %1820 = vmatprep.subr.bf16.mxu0 %v2090_v25 }
 0x1bd   : > { %1489 = vmatpush1.bf16.msra.mxu1 %v2088_v54  ;;  %1821 = vmatpush3.bf16.msra.mxu0 %v1406_v52 }
 0x1be   : > { %1490 = vmatprep.subr.bf16.mxu1 %v2088_v54  ;;  %1822 = vmatprep.subr.bf16.mxu0 %v2090_v25 }
 0x1bf   : > { %v1422_v15 = vpop.permute.xlu0 %1421 }
 0x1c1   : > { %1491 = vmatpush1.bf16.msra.mxu1 %v2088_v54  ;;  %1823 = vmatpush3.bf16.msra.mxu0 %v1411_v57 }
 0x1c2   : > { %1492 = vmatprep.subr.bf16.mxu1 %v2088_v54  ;;  %1824 = vmatprep.subr.bf16.mxu0 %v2090_v25 }
 0x1c5   : > { %1493 = vmatpush1.bf16.msra.mxu1 %v2088_v54  ;;  %1825 = vmatpush3.bf16.msra.mxu0 %v1416_v58 }
 0x1c8   : > { %1511 = vmatmul.mubr.bf16.vlgmr.msra.gmra.mrb[0].mxu1 %v2656_v23  ;;  %1827 = vmatmul.mubr.bf16.vlgmr.msra.gmra.mrb[4].mxu0 %v2656_v23 }
 0x27b   : > { %v1469_v34 = vpop.f32.mrb[0].mxu0 }
 0x27c   : > { %v1471_v43 = vpop.f32.mrb[1].mxu0  ;;  %v1470_v60 = vadd.f32 %v1469_v34, %v1422_v15 }
 0x27d   : > { %v1472_v61 = vadd.f32 %v1471_v43, %v1422_v15  ;;  %v1473_v4 = vpop.f32.mrb[2].mxu0 }
 0x27e   : > { %1944 = vtanh.f32 %v1470_v60  ;;  %v1474_v63 = vadd.f32 %v1473_v4, %v1427_v21  ;;  %v1475_v40 = vpop.f32.mrb[3].mxu0 }
 0x27f   : > { %1946 = vtanh.f32 %v1472_v61  ;;  %v1476_v0 = vadd.f32 %v1475_v40, %v1427_v21 }
 0x280   : > { %1948 = vtanh.f32 %v1474_v63 }
 0x281   : > { %1950 = vtanh.f32 %v1476_v0 }
 0x288   : > { %v1945_v54 = vpop.eup %1944 }
 0x289   : > { %v1947_v30 = vpop.eup %1946  ;;  %1572 = vst [vmem:[%s2691_s16] sm:$0xff] %v1945_v54 }
 0x28a   : > { %v1949_v41 = vpop.eup %1948  ;;  %1573 = vst [vmem:[%s2691_s16 + $0x8] sm:$0xff] %v1947_v30 }
 0x28b   : > { %v1951_v6 = vpop.eup %1950  ;;  %1577 = vst [vmem:[%s2691_s16 + $0x28] sm:$0xf] %v1949_v41 }
 0x28c   : > { %1578 = vst [vmem:[%s2691_s16 + $0x30] sm:$0xf] %v1951_v6 }
 0x29b   : > { %v1512_v5 = vpop.f32.mrb[0].mxu1  ;;  %v1555_v36 = vpop.f32.mrb[4].mxu0 }
 0x29c   : > { %v1513_v59 = vadd.f32 %v1512_v5, %v1422_v15  ;;  %v1556_v51 = vadd.f32 %v1555_v36, %v1422_v15  ;;  %v1514_v3 = vpop.f32.mrb[1].mxu1  ;;  %v1828_v24 = vpop.f32.mrb[5].mxu0 }
 0x29d   : > { %v1515_v53 = vadd.f32 %v1514_v3, %v1422_v15  ;;  %v1516_v17 = vpop.f32.mrb[2].mxu1  ;;  %v1558_v56 = vpop.f32.mrb[6].mxu0 }
 0x29e   : > { %1952 = vtanh.f32 %v1513_v59  ;;  %v1517_v62 = vadd.f32 %v1516_v17, %v1427_v21  ;;  %v1559_v1 = vadd.f32 %v1558_v56, %v1427_v21  ;;  %v1518_v55 = vpop.f32.mrb[3].mxu1  ;;  %v1829_v8 = vpop.f32.mrb[7].mxu0 }
 0x29f   : > { %1954 = vtanh.f32 %v1556_v51  ;;  %v1519_v9 = vadd.f32 %v1518_v55, %v1427_v21 }
 0x2a0   : > { %1956 = vtanh.f32 %v1515_v53 }
 0x2a1   : > { %1958 = vtanh.f32 %v1517_v62 }
 0x2a2   : > { %1960 = vtanh.f32 %v1559_v1 }
 0x2a3   : > { %1962 = vtanh.f32 %v1519_v9 }
 0x2a8   : > { %v1953_v10 = vpop.eup %1952 }
 0x2a9   : > { %v1955_v11 = vpop.eup %1954  ;;  %1574 = vst [vmem:[%s2691_s16 + $0x10] sm:$0xff] %v1953_v10 }
 0x2aa   : > { %v1957_v13 = vpop.eup %1956  ;;  %1576 = vst.msk [vmem:[%s2691_s16 + $0x20] sm:$0xff] %vm1363_vm11, %v1955_v11 }
 0x2ab   : > { %v1959_v16 = vpop.eup %1958  ;;  %1575 = vst [vmem:[%s2691_s16 + $0x18] sm:$0xff] %v1957_v13 }
 0x2ac   : > { %v1961_v18 = vpop.eup %1960  ;;  %1579 = vst [vmem:[%s2691_s16 + $0x38] sm:$0xf] %v1959_v16 }
 0x2ad   : > { %v1963_v19 = vpop.eup %1962  ;;  %1581 = vst.msk [vmem:[%s2691_s16 + $0x48] sm:$0xf] %vm338_vm10, %v1961_v18 }
 0x2ae   : > { %1580 = vst [vmem:[%s2691_s16 + $0x40] sm:$0xf] %v1963_v19 }
 0x2af PF: > { %s16_s15 = sadd.s32 1, %s2062_s15  }
 0x2b0   : > { %p13_p13 = scmp.ge.s32.totalorder %s16_s15, 4  }
 0x2b2   :  { %15 = sbr.rel (!%p13_p13) target bundleno = 2 (0x2), region = 79 }
 0x2b9   :  { %1603 = vsyncpa [#allocation4], 1 }
 0x2ba   :  { %1605 = vsyncpa [#allocation4 + $0x1], 1 }
 0x2bb   :  { %1606 = vsyncpa [#allocation6], 1 }

</bundles_post_ra>
